<compile_context>
chip_gen: v7x
topology: tpu7x:2x2x1
jax: 0.10.0
libtpu: 0.0.40
codegen_flags: <defaults>
</compile_context>

<pallas_src>
import functools
import math

import jax
import jax.numpy as jnp
from jax.experimental import pallas as pl
from jax.experimental.pallas import tpu as pltpu

# ----------------------- config -----------------------
BATCH = 2
IMG_SIZE = 16
PATCH = 8
VIS_WIDTH = 64
VIS_HEADS = 4
VIS_LAYERS = 2
S_VIS_PAD = 8           # padded vision sequence length (sublane aligned)
TXT_WIDTH = 64          # == ctx_dim
TXT_HEADS = 4
TXT_LAYERS = 2
CTX_LEN = 8             # text context length (already sublane aligned)
EMBED_DIM = 32          # shared image/text embedding dim
N_CLS = 4
N_CTX = 4
NAME_LEN = 1
EOT_TOKEN = 49407
DTYPE = jnp.float32
NEG_INF = -1e30

# per-layer stacked parameter arrays, in the order they are passed to kernels
LAYER_KEYS = ("ln1_g", "ln1_b", "qkv_w", "qkv_b", "out_w", "out_b",
              "ln2_g", "ln2_b", "fc_w", "fc_b", "pj_w", "pj_b")


# ----------------------- in-kernel helpers -----------------------
def _ln(x, g, b):
    # x: (M, D) f32 value; g/b: (1, D) f32
    mean = jnp.mean(x, axis=-1, keepdims=True)
    xc = x - mean
    var = jnp.mean(xc * xc, axis=-1, keepdims=True)
    return xc * jax.lax.rsqrt(var + 1e-5) * g + b


def _transformer_block(x2, layer_refs, l, B, S, n_heads, mask_b):
    """One CLIP ResidualAttentionBlock.

    x2: (B*S, D) f32 value.  layer_refs: 12 stacked-weight refs (matmul slabs
    in bf16, LN params / biases in f32).  mask_b: (B, S, S) additive mask.
    """
    (ln1_g, ln1_b, qkv_w, qkv_b, out_w, out_b,
     ln2_g, ln2_b, fc_w, fc_b, pj_w, pj_b) = layer_refs
    D = x2.shape[-1]
    Dh = D // n_heads

    # ---- attention: ONE fused QKV matmul (1/sqrt(Dh) pre-folded into Q) ----
    h = _ln(x2, ln1_g[l], ln1_b[l])
    qkv = jnp.dot(h.astype(jnp.bfloat16), qkv_w[l],
                  preferred_element_type=jnp.float32) + qkv_b[l]   # (B*S, 3D) f32
    qkv = qkv.reshape(B, S, 3 * D)                                 # aligned -> free view

    heads = []
    for hd in range(n_heads):                                      # unrolled, Dh lane slices
        q = qkv[:, :, hd * Dh:(hd + 1) * Dh]
        k = qkv[:, :, D + hd * Dh:D + (hd + 1) * Dh]
        v = qkv[:, :, 2 * D + hd * Dh:2 * D + (hd + 1) * Dh]
        s = jnp.einsum("bqd,bkd->bqk", q.astype(jnp.bfloat16),
                       k.astype(jnp.bfloat16),
                       preferred_element_type=jnp.float32)         # (B, S, S)
        s = s + mask_b                                             # additive, hoisted mask
        m = jnp.max(s, axis=-1, keepdims=True)
        p = jnp.exp(s - m)
        p = p * pl.reciprocal(jnp.sum(p, axis=-1, keepdims=True), approx=True)
        heads.append(jnp.einsum("bqk,bkd->bqd", p.astype(jnp.bfloat16),
                                v.astype(jnp.bfloat16),
                                preferred_element_type=jnp.float32))
    attn = jnp.concatenate(heads, axis=-1).reshape(B * S, D)       # (B*S, D)
    # ONE fused output projection
    x2 = x2 + jnp.dot(attn.astype(jnp.bfloat16), out_w[l],
                      preferred_element_type=jnp.float32) + out_b[l]

    # ---- MLP (QuickGELU) ----
    h = _ln(x2, ln2_g[l], ln2_b[l])
    h = jnp.dot(h.astype(jnp.bfloat16), fc_w[l],
                preferred_element_type=jnp.float32) + fc_b[l]
    h = h * jax.nn.sigmoid(1.702 * h)
    h = jnp.dot(h.astype(jnp.bfloat16), pj_w[l],
                preferred_element_type=jnp.float32) + pj_b[l]
    return x2 + h


# ----------------------- single fused CustomCLIP kernel -----------------------
def _clip_kernel(*args, B, S_v, s_real_v, n_heads_v, n_layers_v,
                 N, L, n_heads_t, n_layers_t):
    nl = len(LAYER_KEYS)
    (patches_ref, base_ref, conv_w_ref, lnpre_g, lnpre_b,
     lnpost_g, lnpost_b, vproj_ref) = args[:8]
    vis_layers = args[8:8 + nl]
    (prompts_ref, lnf_g, lnf_b, tproj_ref, eot_ref, scale_ref) = args[8 + nl:14 + nl]
    txt_layers = args[14 + nl:14 + 2 * nl]
    o_ref = args[14 + 2 * nl]

    Dv = conv_w_ref.shape[1]

    # ---------------- image encoder ----------------
    # patch embedding; CLS token + positional embedding pre-folded into `base`
    x = jnp.dot(patches_ref[...].astype(jnp.bfloat16), conv_w_ref[...],
                preferred_element_type=jnp.float32)                # (B*S_v, Dv)
    x = (x.reshape(B, S_v, Dv) + base_ref[...]).reshape(B * S_v, Dv)
    x = _ln(x, lnpre_g[...], lnpre_b[...])

    # additive key-padding mask for the padded vision sequence (built once)
    colv = jax.lax.broadcasted_iota(jnp.int32, (B, S_v, S_v), 2)
    vmask = jnp.where(colv < s_real_v, 0.0, NEG_INF).astype(jnp.float32)

    for l in range(n_layers_v):
        x = _transformer_block(x, vis_layers, l, B, S_v, n_heads_v, vmask)

    cls = x.reshape(B, S_v, Dv)[:, 0:1, :].reshape(B, Dv)          # CLS token
    cls = _ln(cls, lnpost_g[...], lnpost_b[...])
    img = jnp.dot(cls.astype(jnp.bfloat16), vproj_ref[...],
                  preferred_element_type=jnp.float32)              # (B, E)

    # ---------------- text encoder ----------------
    Dt = prompts_ref.shape[-1]
    t = prompts_ref[...].reshape(N * L, Dt)                        # prompts + pos (wrapper)

    # additive causal mask (built once, reused across layers/heads)
    rowt = jax.lax.broadcasted_iota(jnp.int32, (N, L, L), 1)
    colt = jax.lax.broadcasted_iota(jnp.int32, (N, L, L), 2)
    tmask = jnp.where(colt <= rowt, 0.0, NEG_INF).astype(jnp.float32)

    for l in range(n_layers_t):
        t = _transformer_block(t, txt_layers, l, N, L, n_heads_t, tmask)

    t = _ln(t, lnf_g[...], lnf_b[...])                             # (N*L, Dt)
    # EOT-token gather as a selection matmul (rows picked by argmax position)
    t_eot = jnp.dot(eot_ref[...], t, preferred_element_type=jnp.float32)   # (N, Dt)
    txt = jnp.dot(t_eot.astype(jnp.bfloat16), tproj_ref[...],
                  preferred_element_type=jnp.float32)              # (N, E)

    # ---------------- normalize + logits ----------------
    img = img * jax.lax.rsqrt(jnp.sum(img * img, axis=-1, keepdims=True) + 1e-12)
    txt = txt * jax.lax.rsqrt(jnp.sum(txt * txt, axis=-1, keepdims=True) + 1e-12)
    logits = jnp.dot(img, txt.T, preferred_element_type=jnp.float32)
    o_ref[...] = (logits * scale_ref[...]).astype(o_ref.dtype)     # (B, N)


def custom_clip_forward(params, image):
    vp, tp, pp = params["visual"], params["text"], params["prompt"]
    B = image.shape[0]
    Hp = Wp = IMG_SIZE // PATCH
    Np = Hp * Wp
    cpp = 3 * PATCH * PATCH

    # patch extraction (== Conv2d(k=p, s=p) with weight flattened as C,kh,kw);
    # padded to S_VIS_PAD rows: row 0 is the CLS slot (filled by `base`),
    # rows Np+1.. are zero padding masked out of attention.
    img = image.astype(DTYPE)
    patches = img.reshape(B, 3, Hp, PATCH, Wp, PATCH)
    patches = patches.transpose(0, 2, 4, 1, 3, 5).reshape(B, Np, cpp)
    patches = jnp.pad(patches, ((0, 0), (1, S_VIS_PAD - 1 - Np), (0, 0)))
    patches = patches.reshape(B * S_VIS_PAD, cpp)

    # prompt assembly (class_token_position == 'end') outside the kernel
    ctx = jnp.broadcast_to(pp["ctx"][None], (N_CLS, N_CTX, TXT_WIDTH))
    prompts = jnp.concatenate([pp["token_prefix"], ctx, pp["token_suffix"]], axis=1)
    prompts = prompts + tp["pos_emb"][None]                        # (N, L, D)

    inputs = [patches, vp["base"], vp["conv_w"],
              vp["ln_pre_g"], vp["ln_pre_b"], vp["ln_post_g"], vp["ln_post_b"],
              vp["proj"]]
    inputs += [vp["layers"][k] for k in LAYER_KEYS]
    inputs += [prompts, tp["ln_final_g"], tp["ln_final_b"], tp["text_projection"],
               params["eot_sel"], params["logit_scale_exp"]]
    inputs += [tp["layers"][k] for k in LAYER_KEYS]

    kernel = functools.partial(
        _clip_kernel, B=B, S_v=S_VIS_PAD, s_real_v=Np + 1,
        n_heads_v=VIS_HEADS, n_layers_v=VIS_LAYERS,
        N=N_CLS, L=CTX_LEN, n_heads_t=TXT_HEADS, n_layers_t=TXT_LAYERS)

    return pl.pallas_call(
        kernel,
        out_shape=jax.ShapeDtypeStruct((B, N_CLS), DTYPE),
    )(*inputs)


# ----------------------- deterministic parameter init -----------------------
def _init_block(key, d, mlp_ratio=4):
    ks = jax.random.split(key, 4)
    dh = d * mlp_ratio
    n = lambda k, s: 0.02 * jax.random.normal(k, s, DTYPE)
    return dict(
        ln1_g=jnp.ones((1, d), DTYPE), ln1_b=jnp.zeros((1, d), DTYPE),
        in_w=n(ks[0], (d, 3 * d)), in_b=jnp.zeros((1, 3 * d), DTYPE),
        out_w=n(ks[1], (d, d)), out_b=jnp.zeros((1, d), DTYPE),
        ln2_g=jnp.ones((1, d), DTYPE), ln2_b=jnp.zeros((1, d), DTYPE),
        fc_w=n(ks[2], (d, dh)), fc_b=jnp.zeros((1, dh), DTYPE),
        pj_w=n(ks[3], (dh, d)), pj_b=jnp.zeros((1, d), DTYPE),
    )


def _pack_block(p, n_heads):
    # Fused QKV slab (D, 3D) with the 1/sqrt(Dh) attention scale folded into
    # the Q columns; matmul weights stored in bf16, biases / LN params in f32.
    d = p["out_w"].shape[0]
    dh = d // n_heads
    scale = 1.0 / math.sqrt(dh)
    in_w = p["in_w"].at[:, :d].multiply(scale)
    in_b = p["in_b"].at[:, :d].multiply(scale)
    return dict(
        ln1_g=p["ln1_g"], ln1_b=p["ln1_b"],
        qkv_w=in_w.astype(jnp.bfloat16), qkv_b=in_b,
        out_w=p["out_w"].astype(jnp.bfloat16), out_b=p["out_b"],
        ln2_g=p["ln2_g"], ln2_b=p["ln2_b"],
        fc_w=p["fc_w"].astype(jnp.bfloat16), fc_b=p["fc_b"],
        pj_w=p["pj_w"].astype(jnp.bfloat16), pj_b=p["pj_b"],
    )


def _stack_layers(blocks, n_heads):
    packed = [_pack_block(b, n_heads) for b in blocks]
    return {k: jnp.stack([p[k] for p in packed], axis=0) for k in LAYER_KEYS}


def init_params(key):
    keys = jax.random.split(key, 16)
    n = lambda k, s: 0.02 * jax.random.normal(k, s, DTYPE)
    Np = (IMG_SIZE // PATCH) ** 2
    s_real = Np + 1

    # vision: class token + positional embedding folded into a padded base slab
    class_emb = n(keys[1], (1, VIS_WIDTH))
    pos_emb_v = n(keys[2], (s_real, VIS_WIDTH))
    base = jnp.zeros((S_VIS_PAD, VIS_WIDTH), DTYPE)
    base = base.at[0].set(class_emb[0] + pos_emb_v[0])
    base = base.at[1:s_real].set(pos_emb_v[1:])

    visual = dict(
        conv_w=n(keys[0], (3 * PATCH * PATCH, VIS_WIDTH)).astype(jnp.bfloat16),
        base=base,
        ln_pre_g=jnp.ones((1, VIS_WIDTH), DTYPE), ln_pre_b=jnp.zeros((1, VIS_WIDTH), DTYPE),
        ln_post_g=jnp.ones((1, VIS_WIDTH), DTYPE), ln_post_b=jnp.zeros((1, VIS_WIDTH), DTYPE),
        proj=n(keys[3], (VIS_WIDTH, EMBED_DIM)).astype(jnp.bfloat16),
        layers=_stack_layers(
            [_init_block(k, VIS_WIDTH) for k in jax.random.split(keys[4], VIS_LAYERS)],
            VIS_HEADS),
    )

    text = dict(
        pos_emb=n(keys[5], (CTX_LEN, TXT_WIDTH)),
        ln_final_g=jnp.ones((1, TXT_WIDTH), DTYPE), ln_final_b=jnp.zeros((1, TXT_WIDTH), DTYPE),
        text_projection=n(keys[6], (TXT_WIDTH, EMBED_DIM)).astype(jnp.bfloat16),
        layers=_stack_layers(
            [_init_block(k, TXT_WIDTH) for k in jax.random.split(keys[7], TXT_LAYERS)],
            TXT_HEADS),
    )

    # PromptLearner buffers: prefix = SOS embedding, suffix = class-name/"."/EOT/pad
    suffix_len = CTX_LEN - 1 - N_CTX
    prompt = dict(
        ctx=n(keys[8], (N_CTX, TXT_WIDTH)),                    # generic context, std=0.02
        token_prefix=n(keys[9], (N_CLS, 1, TXT_WIDTH)),
        token_suffix=n(keys[10], (N_CLS, suffix_len, TXT_WIDTH)),
    )

    # synthetic tokenized prompts: [SOS, ctx*4, name, EOT, pad]; argmax -> EOT position
    tok = jnp.zeros((N_CLS, CTX_LEN), jnp.int32)
    tok = tok.at[:, 0].set(49406)
    tok = tok.at[:, 1:1 + N_CTX].set(343)
    tok = tok.at[:, 1 + N_CTX].set(jnp.arange(N_CLS, dtype=jnp.int32) + 1000)
    tok = tok.at[:, 1 + N_CTX + NAME_LEN].set(EOT_TOKEN)
    eot = jnp.argmax(tok, axis=-1)
    eot_sel = jax.nn.one_hot(jnp.arange(N_CLS) * CTX_LEN + eot, N_CLS * CTX_LEN, dtype=DTYPE)

    return dict(
        visual=visual, text=text, prompt=prompt,
        tokenized_prompts=tok, eot_sel=eot_sel,
        logit_scale_exp=jnp.full((1, 1), math.exp(math.log(1.0 / 0.07)), DTYPE),
    )


# ----------------------- main -----------------------
if __name__ == "__main__":
    key = jax.random.PRNGKey(0)
    pkey, xkey = jax.random.split(key)
    params = init_params(pkey)
    image = jax.random.normal(xkey, (BATCH, 3, IMG_SIZE, IMG_SIZE), DTYPE)  # NCHW

    logits = jax.jit(custom_clip_forward)(params, image)
    logits = jax.block_until_ready(logits)

    assert logits.shape == (BATCH, N_CLS), logits.shape
    assert bool(jnp.all(jnp.isfinite(logits)))
    print("KERNEL_OK")
</pallas_src>

<mosaic_0001>
module attributes {stable_mosaic.version = 11 : i64} {
  func.func @_clip_kernel(%arg0: memref<16x192xf32, #tpu.memory_space<vmem>>, %arg1: memref<8x64xf32, #tpu.memory_space<vmem>>, %arg2: memref<192x64xbf16, #tpu.memory_space<vmem>>, %arg3: memref<1x64xf32, #tpu.memory_space<vmem>>, %arg4: memref<1x64xf32, #tpu.memory_space<vmem>>, %arg5: memref<1x64xf32, #tpu.memory_space<vmem>>, %arg6: memref<1x64xf32, #tpu.memory_space<vmem>>, %arg7: memref<64x32xbf16, #tpu.memory_space<vmem>>, %arg8: memref<2x1x64xf32, #tpu.memory_space<vmem>>, %arg9: memref<2x1x64xf32, #tpu.memory_space<vmem>>, %arg10: memref<2x64x192xbf16, #tpu.memory_space<vmem>>, %arg11: memref<2x1x192xf32, #tpu.memory_space<vmem>>, %arg12: memref<2x64x64xbf16, #tpu.memory_space<vmem>>, %arg13: memref<2x1x64xf32, #tpu.memory_space<vmem>>, %arg14: memref<2x1x64xf32, #tpu.memory_space<vmem>>, %arg15: memref<2x1x64xf32, #tpu.memory_space<vmem>>, %arg16: memref<2x64x256xbf16, #tpu.memory_space<vmem>>, %arg17: memref<2x1x256xf32, #tpu.memory_space<vmem>>, %arg18: memref<2x256x64xbf16, #tpu.memory_space<vmem>>, %arg19: memref<2x1x64xf32, #tpu.memory_space<vmem>>, %arg20: memref<4x8x64xf32, #tpu.memory_space<vmem>>, %arg21: memref<1x64xf32, #tpu.memory_space<vmem>>, %arg22: memref<1x64xf32, #tpu.memory_space<vmem>>, %arg23: memref<64x32xbf16, #tpu.memory_space<vmem>>, %arg24: memref<4x32xf32, #tpu.memory_space<vmem>>, %arg25: memref<1x1xf32, #tpu.memory_space<vmem>>, %arg26: memref<2x1x64xf32, #tpu.memory_space<vmem>>, %arg27: memref<2x1x64xf32, #tpu.memory_space<vmem>>, %arg28: memref<2x64x192xbf16, #tpu.memory_space<vmem>>, %arg29: memref<2x1x192xf32, #tpu.memory_space<vmem>>, %arg30: memref<2x64x64xbf16, #tpu.memory_space<vmem>>, %arg31: memref<2x1x64xf32, #tpu.memory_space<vmem>>, %arg32: memref<2x1x64xf32, #tpu.memory_space<vmem>>, %arg33: memref<2x1x64xf32, #tpu.memory_space<vmem>>, %arg34: memref<2x64x256xbf16, #tpu.memory_space<vmem>>, %arg35: memref<2x1x256xf32, #tpu.memory_space<vmem>>, %arg36: memref<2x256x64xbf16, #tpu.memory_space<vmem>>, %arg37: memref<2x1x64xf32, #tpu.memory_space<vmem>>, %arg38: memref<2x4xf32, #tpu.memory_space<vmem>>) attributes {dimension_semantics = [], scalar_prefetch = 0 : i64, scratch_operands = 0 : i64, tpu.core_type = #tpu.core_type<tc>} {
    %c0 = arith.constant 0 : index
    %c0_0 = arith.constant 0 : index
    %0 = vector.load %arg0[%c0, %c0_0] : memref<16x192xf32, #tpu.memory_space<vmem>>, vector<16x192xf32>
    %1 = arith.truncf %0 : vector<16x192xf32> to vector<16x192xbf16>
    %c0_1 = arith.constant 0 : index
    %c0_2 = arith.constant 0 : index
    %2 = vector.load %arg2[%c0_1, %c0_2] : memref<192x64xbf16, #tpu.memory_space<vmem>>, vector<192x64xbf16>
    %cst = arith.constant dense<0.000000e+00> : vector<16x64xf32>
    %3 = tpu.matmul %1, %2, %cst {dimension_numbers = #tpu.dot_dimension_numbers<[1], [0], [0], [1], [0, 0, 1, 1], [], []>} : vector<16x192xbf16>, vector<192x64xbf16>, vector<16x64xf32> -> vector<16x64xf32>
    %4 = vector.shape_cast %3 : vector<16x64xf32> to vector<2x8x64xf32>
    %c0_3 = arith.constant 0 : index
    %c0_4 = arith.constant 0 : index
    %5 = vector.load %arg1[%c0_3, %c0_4] : memref<8x64xf32, #tpu.memory_space<vmem>>, vector<8x64xf32>
    %6 = vector.shape_cast %5 : vector<8x64xf32> to vector<1x8x64xf32>
    %7 = vector.broadcast %6 : vector<1x8x64xf32> to vector<2x8x64xf32>
    %8 = arith.addf %4, %7 : vector<2x8x64xf32>
    %9 = vector.shape_cast %8 : vector<2x8x64xf32> to vector<16x64xf32>
    %c0_5 = arith.constant 0 : index
    %c0_6 = arith.constant 0 : index
    %10 = vector.load %arg3[%c0_5, %c0_6] : memref<1x64xf32, #tpu.memory_space<vmem>>, vector<1x64xf32>
    %c0_7 = arith.constant 0 : index
    %c0_8 = arith.constant 0 : index
    %11 = vector.load %arg4[%c0_7, %c0_8] : memref<1x64xf32, #tpu.memory_space<vmem>>, vector<1x64xf32>
    %cst_9 = arith.constant dense<0.000000e+00> : vector<16xf32>
    %12 = vector.multi_reduction <add>, %9, %cst_9 [1] : vector<16x64xf32> to vector<16xf32>
    %13 = vector.shape_cast %12 : vector<16xf32> to vector<16x1xf32>
    %cst_10 = arith.constant 6.400000e+01 : f32
    %14 = vector.broadcast %cst_10 : f32 to vector<16x1xf32>
    %15 = arith.divf %13, %14 : vector<16x1xf32>
    %16 = vector.broadcast %15 : vector<16x1xf32> to vector<16x64xf32>
    %17 = arith.subf %9, %16 : vector<16x64xf32>
    %18 = arith.mulf %17, %17 : vector<16x64xf32>
    %cst_11 = arith.constant dense<0.000000e+00> : vector<16xf32>
    %19 = vector.multi_reduction <add>, %18, %cst_11 [1] : vector<16x64xf32> to vector<16xf32>
    %20 = vector.shape_cast %19 : vector<16xf32> to vector<16x1xf32>
    %cst_12 = arith.constant 6.400000e+01 : f32
    %21 = vector.broadcast %cst_12 : f32 to vector<16x1xf32>
    %22 = arith.divf %20, %21 : vector<16x1xf32>
    %cst_13 = arith.constant 9.99999974E-6 : f32
    %23 = vector.broadcast %cst_13 : f32 to vector<16x1xf32>
    %24 = arith.addf %22, %23 : vector<16x1xf32>
    %25 = math.rsqrt %24 : vector<16x1xf32>
    %26 = vector.broadcast %25 : vector<16x1xf32> to vector<16x64xf32>
    %27 = arith.mulf %17, %26 : vector<16x64xf32>
    %28 = vector.broadcast %10 : vector<1x64xf32> to vector<16x64xf32>
    %29 = arith.mulf %27, %28 : vector<16x64xf32>
    %30 = vector.broadcast %11 : vector<1x64xf32> to vector<16x64xf32>
    %31 = arith.addf %29, %30 : vector<16x64xf32>
    %32 = tpu.iota {dimensions = array<i32: 2>} : vector<2x8x8xi32>
    %c5_i32 = arith.constant 5 : i32
    %33 = vector.broadcast %c5_i32 : i32 to vector<2x8x8xi32>
    %34 = arith.cmpi slt, %32, %33 : vector<2x8x8xi32>
    %cst_14 = arith.constant 0.000000e+00 : f32
    %cst_15 = arith.constant -1.000000e+30 : f32
    %35 = vector.broadcast %cst_14 : f32 to vector<2x8x8xf32>
    %36 = vector.broadcast %cst_15 : f32 to vector<2x8x8xf32>
    %37 = arith.select %34, %35, %36 : vector<2x8x8xi1>, vector<2x8x8xf32>
    %c0_16 = arith.constant 0 : index
    %c0_17 = arith.constant 0 : index
    %c0_18 = arith.constant 0 : index
    %38 = vector.load %arg8[%c0_16, %c0_17, %c0_18] : memref<2x1x64xf32, #tpu.memory_space<vmem>>, vector<1x1x64xf32>
    %39 = vector.shape_cast %38 : vector<1x1x64xf32> to vector<1x64xf32>
    %c0_19 = arith.constant 0 : index
    %c0_20 = arith.constant 0 : index
    %c0_21 = arith.constant 0 : index
    %40 = vector.load %arg9[%c0_19, %c0_20, %c0_21] : memref<2x1x64xf32, #tpu.memory_space<vmem>>, vector<1x1x64xf32>
    %41 = vector.shape_cast %40 : vector<1x1x64xf32> to vector<1x64xf32>
    %cst_22 = arith.constant dense<0.000000e+00> : vector<16xf32>
    %42 = vector.multi_reduction <add>, %31, %cst_22 [1] : vector<16x64xf32> to vector<16xf32>
    %43 = vector.shape_cast %42 : vector<16xf32> to vector<16x1xf32>
    %cst_23 = arith.constant 6.400000e+01 : f32
    %44 = vector.broadcast %cst_23 : f32 to vector<16x1xf32>
    %45 = arith.divf %43, %44 : vector<16x1xf32>
    %46 = vector.broadcast %45 : vector<16x1xf32> to vector<16x64xf32>
    %47 = arith.subf %31, %46 : vector<16x64xf32>
    %48 = arith.mulf %47, %47 : vector<16x64xf32>
    %cst_24 = arith.constant dense<0.000000e+00> : vector<16xf32>
    %49 = vector.multi_reduction <add>, %48, %cst_24 [1] : vector<16x64xf32> to vector<16xf32>
    %50 = vector.shape_cast %49 : vector<16xf32> to vector<16x1xf32>
    %cst_25 = arith.constant 6.400000e+01 : f32
    %51 = vector.broadcast %cst_25 : f32 to vector<16x1xf32>
    %52 = arith.divf %50, %51 : vector<16x1xf32>
    %cst_26 = arith.constant 9.99999974E-6 : f32
    %53 = vector.broadcast %cst_26 : f32 to vector<16x1xf32>
    %54 = arith.addf %52, %53 : vector<16x1xf32>
    %55 = math.rsqrt %54 : vector<16x1xf32>
    %56 = vector.broadcast %55 : vector<16x1xf32> to vector<16x64xf32>
    %57 = arith.mulf %47, %56 : vector<16x64xf32>
    %58 = vector.broadcast %39 : vector<1x64xf32> to vector<16x64xf32>
    %59 = arith.mulf %57, %58 : vector<16x64xf32>
    %60 = vector.broadcast %41 : vector<1x64xf32> to vector<16x64xf32>
    %61 = arith.addf %59, %60 : vector<16x64xf32>
    %62 = arith.truncf %61 : vector<16x64xf32> to vector<16x64xbf16>
    %c0_27 = arith.constant 0 : index
    %c0_28 = arith.constant 0 : index
    %c0_29 = arith.constant 0 : index
    %63 = vector.load %arg10[%c0_27, %c0_28, %c0_29] : memref<2x64x192xbf16, #tpu.memory_space<vmem>>, vector<1x64x192xbf16>
    %64 = vector.shape_cast %63 : vector<1x64x192xbf16> to vector<64x192xbf16>
    %cst_30 = arith.constant dense<0.000000e+00> : vector<16x192xf32>
    %65 = tpu.matmul %62, %64, %cst_30 {dimension_numbers = #tpu.dot_dimension_numbers<[1], [0], [0], [1], [0, 0, 1, 1], [], []>} : vector<16x64xbf16>, vector<64x192xbf16>, vector<16x192xf32> -> vector<16x192xf32>
    %c0_31 = arith.constant 0 : index
    %c0_32 = arith.constant 0 : index
    %c0_33 = arith.constant 0 : index
    %66 = vector.load %arg11[%c0_31, %c0_32, %c0_33] : memref<2x1x192xf32, #tpu.memory_space<vmem>>, vector<1x1x192xf32>
    %67 = vector.shape_cast %66 : vector<1x1x192xf32> to vector<1x192xf32>
    %68 = vector.broadcast %67 : vector<1x192xf32> to vector<16x192xf32>
    %69 = arith.addf %65, %68 : vector<16x192xf32>
    %70 = vector.shape_cast %69 : vector<16x192xf32> to vector<2x8x192xf32>
    %71 = vector.extract_strided_slice %70 {offsets = [0, 0, 0], sizes = [2, 8, 16], strides = [1, 1, 1]} : vector<2x8x192xf32> to vector<2x8x16xf32>
    %72 = vector.extract_strided_slice %70 {offsets = [0, 0, 64], sizes = [2, 8, 16], strides = [1, 1, 1]} : vector<2x8x192xf32> to vector<2x8x16xf32>
    %73 = vector.extract_strided_slice %70 {offsets = [0, 0, 128], sizes = [2, 8, 16], strides = [1, 1, 1]} : vector<2x8x192xf32> to vector<2x8x16xf32>
    %74 = arith.truncf %71 : vector<2x8x16xf32> to vector<2x8x16xbf16>
    %75 = arith.truncf %72 : vector<2x8x16xf32> to vector<2x8x16xbf16>
    "tpu.trace_start"() <{level = 10 : i32, message = "bqd,bkd->bqk"}> : () -> ()
    %cst_34 = arith.constant dense<0.000000e+00> : vector<2x8x8xf32>
    %76 = tpu.matmul %74, %75, %cst_34 {dimension_numbers = #tpu.dot_dimension_numbers<[2], [2], [1], [1], [0, 0, 0, 1, 1, 1], [0], [0]>} : vector<2x8x16xbf16>, vector<2x8x16xbf16>, vector<2x8x8xf32> -> vector<2x8x8xf32>
    "tpu.trace_stop"() : () -> ()
    %77 = arith.addf %76, %37 : vector<2x8x8xf32>
    %cst_35 = arith.constant dense<0xFF800000> : vector<2x8xf32>
    %78 = vector.multi_reduction <maximumf>, %77, %cst_35 [2] : vector<2x8x8xf32> to vector<2x8xf32>
    %79 = vector.shape_cast %78 : vector<2x8xf32> to vector<2x8x1xf32>
    %80 = vector.broadcast %79 : vector<2x8x1xf32> to vector<2x8x8xf32>
    %81 = arith.subf %77, %80 : vector<2x8x8xf32>
    %82 = math.exp %81 : vector<2x8x8xf32>
    %cst_36 = arith.constant dense<0.000000e+00> : vector<2x8xf32>
    %83 = vector.multi_reduction <add>, %82, %cst_36 [2] : vector<2x8x8xf32> to vector<2x8xf32>
    %84 = vector.shape_cast %83 : vector<2x8xf32> to vector<2x8x1xf32>
    %85 = tpu.reciprocal %84 {approx = true} : vector<2x8x1xf32> -> vector<2x8x1xf32>
    %86 = vector.broadcast %85 : vector<2x8x1xf32> to vector<2x8x8xf32>
    %87 = arith.mulf %82, %86 : vector<2x8x8xf32>
    %88 = arith.truncf %87 : vector<2x8x8xf32> to vector<2x8x8xbf16>
    %89 = arith.truncf %73 : vector<2x8x16xf32> to vector<2x8x16xbf16>
    "tpu.trace_start"() <{level = 10 : i32, message = "bqk,bkd->bqd"}> : () -> ()
    %cst_37 = arith.constant dense<0.000000e+00> : vector<2x8x16xf32>
    %90 = tpu.matmul %88, %89, %cst_37 {dimension_numbers = #tpu.dot_dimension_numbers<[2], [1], [1], [2], [0, 0, 0, 1, 1, 2], [0], [0]>} : vector<2x8x8xbf16>, vector<2x8x16xbf16>, vector<2x8x16xf32> -> vector<2x8x16xf32>
    "tpu.trace_stop"() : () -> ()
    %91 = vector.extract_strided_slice %70 {offsets = [0, 0, 16], sizes = [2, 8, 16], strides = [1, 1, 1]} : vector<2x8x192xf32> to vector<2x8x16xf32>
    %92 = vector.extract_strided_slice %70 {offsets = [0, 0, 80], sizes = [2, 8, 16], strides = [1, 1, 1]} : vector<2x8x192xf32> to vector<2x8x16xf32>
    %93 = vector.extract_strided_slice %70 {offsets = [0, 0, 144], sizes = [2, 8, 16], strides = [1, 1, 1]} : vector<2x8x192xf32> to vector<2x8x16xf32>
    %94 = arith.truncf %91 : vector<2x8x16xf32> to vector<2x8x16xbf16>
    %95 = arith.truncf %92 : vector<2x8x16xf32> to vector<2x8x16xbf16>
    "tpu.trace_start"() <{level = 10 : i32, message = "bqd,bkd->bqk"}> : () -> ()
    %cst_38 = arith.constant dense<0.000000e+00> : vector<2x8x8xf32>
    %96 = tpu.matmul %94, %95, %cst_38 {dimension_numbers = #tpu.dot_dimension_numbers<[2], [2], [1], [1], [0, 0, 0, 1, 1, 1], [0], [0]>} : vector<2x8x16xbf16>, vector<2x8x16xbf16>, vector<2x8x8xf32> -> vector<2x8x8xf32>
    "tpu.trace_stop"() : () -> ()
    %97 = arith.addf %96, %37 : vector<2x8x8xf32>
    %cst_39 = arith.constant dense<0xFF800000> : vector<2x8xf32>
    %98 = vector.multi_reduction <maximumf>, %97, %cst_39 [2] : vector<2x8x8xf32> to vector<2x8xf32>
    %99 = vector.shape_cast %98 : vector<2x8xf32> to vector<2x8x1xf32>
    %100 = vector.broadcast %99 : vector<2x8x1xf32> to vector<2x8x8xf32>
    %101 = arith.subf %97, %100 : vector<2x8x8xf32>
    %102 = math.exp %101 : vector<2x8x8xf32>
    %cst_40 = arith.constant dense<0.000000e+00> : vector<2x8xf32>
    %103 = vector.multi_reduction <add>, %102, %cst_40 [2] : vector<2x8x8xf32> to vector<2x8xf32>
    %104 = vector.shape_cast %103 : vector<2x8xf32> to vector<2x8x1xf32>
    %105 = tpu.reciprocal %104 {approx = true} : vector<2x8x1xf32> -> vector<2x8x1xf32>
    %106 = vector.broadcast %105 : vector<2x8x1xf32> to vector<2x8x8xf32>
    %107 = arith.mulf %102, %106 : vector<2x8x8xf32>
    %108 = arith.truncf %107 : vector<2x8x8xf32> to vector<2x8x8xbf16>
    %109 = arith.truncf %93 : vector<2x8x16xf32> to vector<2x8x16xbf16>
    "tpu.trace_start"() <{level = 10 : i32, message = "bqk,bkd->bqd"}> : () -> ()
    %cst_41 = arith.constant dense<0.000000e+00> : vector<2x8x16xf32>
    %110 = tpu.matmul %108, %109, %cst_41 {dimension_numbers = #tpu.dot_dimension_numbers<[2], [1], [1], [2], [0, 0, 0, 1, 1, 2], [0], [0]>} : vector<2x8x8xbf16>, vector<2x8x16xbf16>, vector<2x8x16xf32> -> vector<2x8x16xf32>
    "tpu.trace_stop"() : () -> ()
    %111 = vector.extract_strided_slice %70 {offsets = [0, 0, 32], sizes = [2, 8, 16], strides = [1, 1, 1]} : vector<2x8x192xf32> to vector<2x8x16xf32>
    %112 = vector.extract_strided_slice %70 {offsets = [0, 0, 96], sizes = [2, 8, 16], strides = [1, 1, 1]} : vector<2x8x192xf32> to vector<2x8x16xf32>
    %113 = vector.extract_strided_slice %70 {offsets = [0, 0, 160], sizes = [2, 8, 16], strides = [1, 1, 1]} : vector<2x8x192xf32> to vector<2x8x16xf32>
    %114 = arith.truncf %111 : vector<2x8x16xf32> to vector<2x8x16xbf16>
    %115 = arith.truncf %112 : vector<2x8x16xf32> to vector<2x8x16xbf16>
    "tpu.trace_start"() <{level = 10 : i32, message = "bqd,bkd->bqk"}> : () -> ()
    %cst_42 = arith.constant dense<0.000000e+00> : vector<2x8x8xf32>
    %116 = tpu.matmul %114, %115, %cst_42 {dimension_numbers = #tpu.dot_dimension_numbers<[2], [2], [1], [1], [0, 0, 0, 1, 1, 1], [0], [0]>} : vector<2x8x16xbf16>, vector<2x8x16xbf16>, vector<2x8x8xf32> -> vector<2x8x8xf32>
    "tpu.trace_stop"() : () -> ()
    %117 = arith.addf %116, %37 : vector<2x8x8xf32>
    %cst_43 = arith.constant dense<0xFF800000> : vector<2x8xf32>
    %118 = vector.multi_reduction <maximumf>, %117, %cst_43 [2] : vector<2x8x8xf32> to vector<2x8xf32>
    %119 = vector.shape_cast %118 : vector<2x8xf32> to vector<2x8x1xf32>
    %120 = vector.broadcast %119 : vector<2x8x1xf32> to vector<2x8x8xf32>
    %121 = arith.subf %117, %120 : vector<2x8x8xf32>
    %122 = math.exp %121 : vector<2x8x8xf32>
    %cst_44 = arith.constant dense<0.000000e+00> : vector<2x8xf32>
    %123 = vector.multi_reduction <add>, %122, %cst_44 [2] : vector<2x8x8xf32> to vector<2x8xf32>
    %124 = vector.shape_cast %123 : vector<2x8xf32> to vector<2x8x1xf32>
    %125 = tpu.reciprocal %124 {approx = true} : vector<2x8x1xf32> -> vector<2x8x1xf32>
    %126 = vector.broadcast %125 : vector<2x8x1xf32> to vector<2x8x8xf32>
    %127 = arith.mulf %122, %126 : vector<2x8x8xf32>
    %128 = arith.truncf %127 : vector<2x8x8xf32> to vector<2x8x8xbf16>
    %129 = arith.truncf %113 : vector<2x8x16xf32> to vector<2x8x16xbf16>
    "tpu.trace_start"() <{level = 10 : i32, message = "bqk,bkd->bqd"}> : () -> ()
    %cst_45 = arith.constant dense<0.000000e+00> : vector<2x8x16xf32>
    %130 = tpu.matmul %128, %129, %cst_45 {dimension_numbers = #tpu.dot_dimension_numbers<[2], [1], [1], [2], [0, 0, 0, 1, 1, 2], [0], [0]>} : vector<2x8x8xbf16>, vector<2x8x16xbf16>, vector<2x8x16xf32> -> vector<2x8x16xf32>
    "tpu.trace_stop"() : () -> ()
    %131 = vector.extract_strided_slice %70 {offsets = [0, 0, 48], sizes = [2, 8, 16], strides = [1, 1, 1]} : vector<2x8x192xf32> to vector<2x8x16xf32>
    %132 = vector.extract_strided_slice %70 {offsets = [0, 0, 112], sizes = [2, 8, 16], strides = [1, 1, 1]} : vector<2x8x192xf32> to vector<2x8x16xf32>
    %133 = vector.extract_strided_slice %70 {offsets = [0, 0, 176], sizes = [2, 8, 16], strides = [1, 1, 1]} : vector<2x8x192xf32> to vector<2x8x16xf32>
    %134 = arith.truncf %131 : vector<2x8x16xf32> to vector<2x8x16xbf16>
    %135 = arith.truncf %132 : vector<2x8x16xf32> to vector<2x8x16xbf16>
    "tpu.trace_start"() <{level = 10 : i32, message = "bqd,bkd->bqk"}> : () -> ()
    %cst_46 = arith.constant dense<0.000000e+00> : vector<2x8x8xf32>
    %136 = tpu.matmul %134, %135, %cst_46 {dimension_numbers = #tpu.dot_dimension_numbers<[2], [2], [1], [1], [0, 0, 0, 1, 1, 1], [0], [0]>} : vector<2x8x16xbf16>, vector<2x8x16xbf16>, vector<2x8x8xf32> -> vector<2x8x8xf32>
    "tpu.trace_stop"() : () -> ()
    %137 = arith.addf %136, %37 : vector<2x8x8xf32>
    %cst_47 = arith.constant dense<0xFF800000> : vector<2x8xf32>
    %138 = vector.multi_reduction <maximumf>, %137, %cst_47 [2] : vector<2x8x8xf32> to vector<2x8xf32>
    %139 = vector.shape_cast %138 : vector<2x8xf32> to vector<2x8x1xf32>
    %140 = vector.broadcast %139 : vector<2x8x1xf32> to vector<2x8x8xf32>
    %141 = arith.subf %137, %140 : vector<2x8x8xf32>
    %142 = math.exp %141 : vector<2x8x8xf32>
    %cst_48 = arith.constant dense<0.000000e+00> : vector<2x8xf32>
    %143 = vector.multi_reduction <add>, %142, %cst_48 [2] : vector<2x8x8xf32> to vector<2x8xf32>
    %144 = vector.shape_cast %143 : vector<2x8xf32> to vector<2x8x1xf32>
    %145 = tpu.reciprocal %144 {approx = true} : vector<2x8x1xf32> -> vector<2x8x1xf32>
    %146 = vector.broadcast %145 : vector<2x8x1xf32> to vector<2x8x8xf32>
    %147 = arith.mulf %142, %146 : vector<2x8x8xf32>
    %148 = arith.truncf %147 : vector<2x8x8xf32> to vector<2x8x8xbf16>
    %149 = arith.truncf %133 : vector<2x8x16xf32> to vector<2x8x16xbf16>
    "tpu.trace_start"() <{level = 10 : i32, message = "bqk,bkd->bqd"}> : () -> ()
    %cst_49 = arith.constant dense<0.000000e+00> : vector<2x8x16xf32>
    %150 = tpu.matmul %148, %149, %cst_49 {dimension_numbers = #tpu.dot_dimension_numbers<[2], [1], [1], [2], [0, 0, 0, 1, 1, 2], [0], [0]>} : vector<2x8x8xbf16>, vector<2x8x16xbf16>, vector<2x8x16xf32> -> vector<2x8x16xf32>
    "tpu.trace_stop"() : () -> ()
    %151 = tpu.concatenate %90, %110, %130, %150 in 2 : vector<2x8x16xf32>, vector<2x8x16xf32>, vector<2x8x16xf32>, vector<2x8x16xf32> -> vector<2x8x64xf32>
    %152 = vector.shape_cast %151 : vector<2x8x64xf32> to vector<16x64xf32>
    %153 = arith.truncf %152 : vector<16x64xf32> to vector<16x64xbf16>
    %c0_50 = arith.constant 0 : index
    %c0_51 = arith.constant 0 : index
    %c0_52 = arith.constant 0 : index
    %154 = vector.load %arg12[%c0_50, %c0_51, %c0_52] : memref<2x64x64xbf16, #tpu.memory_space<vmem>>, vector<1x64x64xbf16>
    %155 = vector.shape_cast %154 : vector<1x64x64xbf16> to vector<64x64xbf16>
    %cst_53 = arith.constant dense<0.000000e+00> : vector<16x64xf32>
    %156 = tpu.matmul %153, %155, %cst_53 {dimension_numbers = #tpu.dot_dimension_numbers<[1], [0], [0], [1], [0, 0, 1, 1], [], []>} : vector<16x64xbf16>, vector<64x64xbf16>, vector<16x64xf32> -> vector<16x64xf32>
    %157 = arith.addf %31, %156 : vector<16x64xf32>
    %c0_54 = arith.constant 0 : index
    %c0_55 = arith.constant 0 : index
    %c0_56 = arith.constant 0 : index
    %158 = vector.load %arg13[%c0_54, %c0_55, %c0_56] : memref<2x1x64xf32, #tpu.memory_space<vmem>>, vector<1x1x64xf32>
    %159 = vector.shape_cast %158 : vector<1x1x64xf32> to vector<1x64xf32>
    %160 = vector.broadcast %159 : vector<1x64xf32> to vector<16x64xf32>
    %161 = arith.addf %157, %160 : vector<16x64xf32>
    %c0_57 = arith.constant 0 : index
    %c0_58 = arith.constant 0 : index
    %c0_59 = arith.constant 0 : index
    %162 = vector.load %arg14[%c0_57, %c0_58, %c0_59] : memref<2x1x64xf32, #tpu.memory_space<vmem>>, vector<1x1x64xf32>
    %163 = vector.shape_cast %162 : vector<1x1x64xf32> to vector<1x64xf32>
    %c0_60 = arith.constant 0 : index
    %c0_61 = arith.constant 0 : index
    %c0_62 = arith.constant 0 : index
    %164 = vector.load %arg15[%c0_60, %c0_61, %c0_62] : memref<2x1x64xf32, #tpu.memory_space<vmem>>, vector<1x1x64xf32>
    %165 = vector.shape_cast %164 : vector<1x1x64xf32> to vector<1x64xf32>
    %cst_63 = arith.constant dense<0.000000e+00> : vector<16xf32>
    %166 = vector.multi_reduction <add>, %161, %cst_63 [1] : vector<16x64xf32> to vector<16xf32>
    %167 = vector.shape_cast %166 : vector<16xf32> to vector<16x1xf32>
    %cst_64 = arith.constant 6.400000e+01 : f32
    %168 = vector.broadcast %cst_64 : f32 to vector<16x1xf32>
    %169 = arith.divf %167, %168 : vector<16x1xf32>
    %170 = vector.broadcast %169 : vector<16x1xf32> to vector<16x64xf32>
    %171 = arith.subf %161, %170 : vector<16x64xf32>
    %172 = arith.mulf %171, %171 : vector<16x64xf32>
    %cst_65 = arith.constant dense<0.000000e+00> : vector<16xf32>
    %173 = vector.multi_reduction <add>, %172, %cst_65 [1] : vector<16x64xf32> to vector<16xf32>
    %174 = vector.shape_cast %173 : vector<16xf32> to vector<16x1xf32>
    %cst_66 = arith.constant 6.400000e+01 : f32
    %175 = vector.broadcast %cst_66 : f32 to vector<16x1xf32>
    %176 = arith.divf %174, %175 : vector<16x1xf32>
    %cst_67 = arith.constant 9.99999974E-6 : f32
    %177 = vector.broadcast %cst_67 : f32 to vector<16x1xf32>
    %178 = arith.addf %176, %177 : vector<16x1xf32>
    %179 = math.rsqrt %178 : vector<16x1xf32>
    %180 = vector.broadcast %179 : vector<16x1xf32> to vector<16x64xf32>
    %181 = arith.mulf %171, %180 : vector<16x64xf32>
    %182 = vector.broadcast %163 : vector<1x64xf32> to vector<16x64xf32>
    %183 = arith.mulf %181, %182 : vector<16x64xf32>
    %184 = vector.broadcast %165 : vector<1x64xf32> to vector<16x64xf32>
    %185 = arith.addf %183, %184 : vector<16x64xf32>
    %186 = arith.truncf %185 : vector<16x64xf32> to vector<16x64xbf16>
    %c0_68 = arith.constant 0 : index
    %c0_69 = arith.constant 0 : index
    %c0_70 = arith.constant 0 : index
    %187 = vector.load %arg16[%c0_68, %c0_69, %c0_70] : memref<2x64x256xbf16, #tpu.memory_space<vmem>>, vector<1x64x256xbf16>
    %188 = vector.shape_cast %187 : vector<1x64x256xbf16> to vector<64x256xbf16>
    %cst_71 = arith.constant dense<0.000000e+00> : vector<16x256xf32>
    %189 = tpu.matmul %186, %188, %cst_71 {dimension_numbers = #tpu.dot_dimension_numbers<[1], [0], [0], [1], [0, 0, 1, 1], [], []>} : vector<16x64xbf16>, vector<64x256xbf16>, vector<16x256xf32> -> vector<16x256xf32>
    %c0_72 = arith.constant 0 : index
    %c0_73 = arith.constant 0 : index
    %c0_74 = arith.constant 0 : index
    %190 = vector.load %arg17[%c0_72, %c0_73, %c0_74] : memref<2x1x256xf32, #tpu.memory_space<vmem>>, vector<1x1x256xf32>
    %191 = vector.shape_cast %190 : vector<1x1x256xf32> to vector<1x256xf32>
    %192 = vector.broadcast %191 : vector<1x256xf32> to vector<16x256xf32>
    %193 = arith.addf %189, %192 : vector<16x256xf32>
    %cst_75 = arith.constant 1.702000e+00 : f32
    %194 = vector.broadcast %cst_75 : f32 to vector<16x256xf32>
    %195 = arith.mulf %194, %193 : vector<16x256xf32>
    %196 = arith.negf %195 : vector<16x256xf32>
    %197 = math.exp %196 : vector<16x256xf32>
    %cst_76 = arith.constant 1.000000e+00 : f32
    %198 = vector.broadcast %cst_76 : f32 to vector<16x256xf32>
    %199 = arith.addf %198, %197 : vector<16x256xf32>
    %200 = arith.divf %198, %199 : vector<16x256xf32>
    %201 = arith.mulf %193, %200 : vector<16x256xf32>
    %202 = arith.truncf %201 : vector<16x256xf32> to vector<16x256xbf16>
    %c0_77 = arith.constant 0 : index
    %c0_78 = arith.constant 0 : index
    %c0_79 = arith.constant 0 : index
    %203 = vector.load %arg18[%c0_77, %c0_78, %c0_79] : memref<2x256x64xbf16, #tpu.memory_space<vmem>>, vector<1x256x64xbf16>
    %204 = vector.shape_cast %203 : vector<1x256x64xbf16> to vector<256x64xbf16>
    %cst_80 = arith.constant dense<0.000000e+00> : vector<16x64xf32>
    %205 = tpu.matmul %202, %204, %cst_80 {dimension_numbers = #tpu.dot_dimension_numbers<[1], [0], [0], [1], [0, 0, 1, 1], [], []>} : vector<16x256xbf16>, vector<256x64xbf16>, vector<16x64xf32> -> vector<16x64xf32>
    %c0_81 = arith.constant 0 : index
    %c0_82 = arith.constant 0 : index
    %c0_83 = arith.constant 0 : index
    %206 = vector.load %arg19[%c0_81, %c0_82, %c0_83] : memref<2x1x64xf32, #tpu.memory_space<vmem>>, vector<1x1x64xf32>
    %207 = vector.shape_cast %206 : vector<1x1x64xf32> to vector<1x64xf32>
    %208 = vector.broadcast %207 : vector<1x64xf32> to vector<16x64xf32>
    %209 = arith.addf %205, %208 : vector<16x64xf32>
    %210 = arith.addf %161, %209 : vector<16x64xf32>
    %c1 = arith.constant 1 : index
    %c0_84 = arith.constant 0 : index
    %c0_85 = arith.constant 0 : index
    %211 = vector.load %arg8[%c1, %c0_84, %c0_85] : memref<2x1x64xf32, #tpu.memory_space<vmem>>, vector<1x1x64xf32>
    %212 = vector.shape_cast %211 : vector<1x1x64xf32> to vector<1x64xf32>
    %c1_86 = arith.constant 1 : index
    %c0_87 = arith.constant 0 : index
    %c0_88 = arith.constant 0 : index
    %213 = vector.load %arg9[%c1_86, %c0_87, %c0_88] : memref<2x1x64xf32, #tpu.memory_space<vmem>>, vector<1x1x64xf32>
    %214 = vector.shape_cast %213 : vector<1x1x64xf32> to vector<1x64xf32>
    %cst_89 = arith.constant dense<0.000000e+00> : vector<16xf32>
    %215 = vector.multi_reduction <add>, %210, %cst_89 [1] : vector<16x64xf32> to vector<16xf32>
    %216 = vector.shape_cast %215 : vector<16xf32> to vector<16x1xf32>
    %cst_90 = arith.constant 6.400000e+01 : f32
    %217 = vector.broadcast %cst_90 : f32 to vector<16x1xf32>
    %218 = arith.divf %216, %217 : vector<16x1xf32>
    %219 = vector.broadcast %218 : vector<16x1xf32> to vector<16x64xf32>
    %220 = arith.subf %210, %219 : vector<16x64xf32>
    %221 = arith.mulf %220, %220 : vector<16x64xf32>
    %cst_91 = arith.constant dense<0.000000e+00> : vector<16xf32>
    %222 = vector.multi_reduction <add>, %221, %cst_91 [1] : vector<16x64xf32> to vector<16xf32>
    %223 = vector.shape_cast %222 : vector<16xf32> to vector<16x1xf32>
    %cst_92 = arith.constant 6.400000e+01 : f32
    %224 = vector.broadcast %cst_92 : f32 to vector<16x1xf32>
    %225 = arith.divf %223, %224 : vector<16x1xf32>
    %cst_93 = arith.constant 9.99999974E-6 : f32
    %226 = vector.broadcast %cst_93 : f32 to vector<16x1xf32>
    %227 = arith.addf %225, %226 : vector<16x1xf32>
    %228 = math.rsqrt %227 : vector<16x1xf32>
    %229 = vector.broadcast %228 : vector<16x1xf32> to vector<16x64xf32>
    %230 = arith.mulf %220, %229 : vector<16x64xf32>
    %231 = vector.broadcast %212 : vector<1x64xf32> to vector<16x64xf32>
    %232 = arith.mulf %230, %231 : vector<16x64xf32>
    %233 = vector.broadcast %214 : vector<1x64xf32> to vector<16x64xf32>
    %234 = arith.addf %232, %233 : vector<16x64xf32>
    %235 = arith.truncf %234 : vector<16x64xf32> to vector<16x64xbf16>
    %c1_94 = arith.constant 1 : index
    %c0_95 = arith.constant 0 : index
    %c0_96 = arith.constant 0 : index
    %236 = vector.load %arg10[%c1_94, %c0_95, %c0_96] : memref<2x64x192xbf16, #tpu.memory_space<vmem>>, vector<1x64x192xbf16>
    %237 = vector.shape_cast %236 : vector<1x64x192xbf16> to vector<64x192xbf16>
    %cst_97 = arith.constant dense<0.000000e+00> : vector<16x192xf32>
    %238 = tpu.matmul %235, %237, %cst_97 {dimension_numbers = #tpu.dot_dimension_numbers<[1], [0], [0], [1], [0, 0, 1, 1], [], []>} : vector<16x64xbf16>, vector<64x192xbf16>, vector<16x192xf32> -> vector<16x192xf32>
    %c1_98 = arith.constant 1 : index
    %c0_99 = arith.constant 0 : index
    %c0_100 = arith.constant 0 : index
    %239 = vector.load %arg11[%c1_98, %c0_99, %c0_100] : memref<2x1x192xf32, #tpu.memory_space<vmem>>, vector<1x1x192xf32>
    %240 = vector.shape_cast %239 : vector<1x1x192xf32> to vector<1x192xf32>
    %241 = vector.broadcast %240 : vector<1x192xf32> to vector<16x192xf32>
    %242 = arith.addf %238, %241 : vector<16x192xf32>
    %243 = vector.shape_cast %242 : vector<16x192xf32> to vector<2x8x192xf32>
    %244 = vector.extract_strided_slice %243 {offsets = [0, 0, 0], sizes = [2, 8, 16], strides = [1, 1, 1]} : vector<2x8x192xf32> to vector<2x8x16xf32>
    %245 = vector.extract_strided_slice %243 {offsets = [0, 0, 64], sizes = [2, 8, 16], strides = [1, 1, 1]} : vector<2x8x192xf32> to vector<2x8x16xf32>
    %246 = vector.extract_strided_slice %243 {offsets = [0, 0, 128], sizes = [2, 8, 16], strides = [1, 1, 1]} : vector<2x8x192xf32> to vector<2x8x16xf32>
    %247 = arith.truncf %244 : vector<2x8x16xf32> to vector<2x8x16xbf16>
    %248 = arith.truncf %245 : vector<2x8x16xf32> to vector<2x8x16xbf16>
    "tpu.trace_start"() <{level = 10 : i32, message = "bqd,bkd->bqk"}> : () -> ()
    %cst_101 = arith.constant dense<0.000000e+00> : vector<2x8x8xf32>
    %249 = tpu.matmul %247, %248, %cst_101 {dimension_numbers = #tpu.dot_dimension_numbers<[2], [2], [1], [1], [0, 0, 0, 1, 1, 1], [0], [0]>} : vector<2x8x16xbf16>, vector<2x8x16xbf16>, vector<2x8x8xf32> -> vector<2x8x8xf32>
    "tpu.trace_stop"() : () -> ()
    %250 = arith.addf %249, %37 : vector<2x8x8xf32>
    %cst_102 = arith.constant dense<0xFF800000> : vector<2x8xf32>
    %251 = vector.multi_reduction <maximumf>, %250, %cst_102 [2] : vector<2x8x8xf32> to vector<2x8xf32>
    %252 = vector.shape_cast %251 : vector<2x8xf32> to vector<2x8x1xf32>
    %253 = vector.broadcast %252 : vector<2x8x1xf32> to vector<2x8x8xf32>
    %254 = arith.subf %250, %253 : vector<2x8x8xf32>
    %255 = math.exp %254 : vector<2x8x8xf32>
    %cst_103 = arith.constant dense<0.000000e+00> : vector<2x8xf32>
    %256 = vector.multi_reduction <add>, %255, %cst_103 [2] : vector<2x8x8xf32> to vector<2x8xf32>
    %257 = vector.shape_cast %256 : vector<2x8xf32> to vector<2x8x1xf32>
    %258 = tpu.reciprocal %257 {approx = true} : vector<2x8x1xf32> -> vector<2x8x1xf32>
    %259 = vector.broadcast %258 : vector<2x8x1xf32> to vector<2x8x8xf32>
    %260 = arith.mulf %255, %259 : vector<2x8x8xf32>
    %261 = arith.truncf %260 : vector<2x8x8xf32> to vector<2x8x8xbf16>
    %262 = arith.truncf %246 : vector<2x8x16xf32> to vector<2x8x16xbf16>
    "tpu.trace_start"() <{level = 10 : i32, message = "bqk,bkd->bqd"}> : () -> ()
    %cst_104 = arith.constant dense<0.000000e+00> : vector<2x8x16xf32>
    %263 = tpu.matmul %261, %262, %cst_104 {dimension_numbers = #tpu.dot_dimension_numbers<[2], [1], [1], [2], [0, 0, 0, 1, 1, 2], [0], [0]>} : vector<2x8x8xbf16>, vector<2x8x16xbf16>, vector<2x8x16xf32> -> vector<2x8x16xf32>
    "tpu.trace_stop"() : () -> ()
    %264 = vector.extract_strided_slice %243 {offsets = [0, 0, 16], sizes = [2, 8, 16], strides = [1, 1, 1]} : vector<2x8x192xf32> to vector<2x8x16xf32>
    %265 = vector.extract_strided_slice %243 {offsets = [0, 0, 80], sizes = [2, 8, 16], strides = [1, 1, 1]} : vector<2x8x192xf32> to vector<2x8x16xf32>
    %266 = vector.extract_strided_slice %243 {offsets = [0, 0, 144], sizes = [2, 8, 16], strides = [1, 1, 1]} : vector<2x8x192xf32> to vector<2x8x16xf32>
    %267 = arith.truncf %264 : vector<2x8x16xf32> to vector<2x8x16xbf16>
    %268 = arith.truncf %265 : vector<2x8x16xf32> to vector<2x8x16xbf16>
    "tpu.trace_start"() <{level = 10 : i32, message = "bqd,bkd->bqk"}> : () -> ()
    %cst_105 = arith.constant dense<0.000000e+00> : vector<2x8x8xf32>
    %269 = tpu.matmul %267, %268, %cst_105 {dimension_numbers = #tpu.dot_dimension_numbers<[2], [2], [1], [1], [0, 0, 0, 1, 1, 1], [0], [0]>} : vector<2x8x16xbf16>, vector<2x8x16xbf16>, vector<2x8x8xf32> -> vector<2x8x8xf32>
    "tpu.trace_stop"() : () -> ()
    %270 = arith.addf %269, %37 : vector<2x8x8xf32>
    %cst_106 = arith.constant dense<0xFF800000> : vector<2x8xf32>
    %271 = vector.multi_reduction <maximumf>, %270, %cst_106 [2] : vector<2x8x8xf32> to vector<2x8xf32>
    %272 = vector.shape_cast %271 : vector<2x8xf32> to vector<2x8x1xf32>
    %273 = vector.broadcast %272 : vector<2x8x1xf32> to vector<2x8x8xf32>
    %274 = arith.subf %270, %273 : vector<2x8x8xf32>
    %275 = math.exp %274 : vector<2x8x8xf32>
    %cst_107 = arith.constant dense<0.000000e+00> : vector<2x8xf32>
    %276 = vector.multi_reduction <add>, %275, %cst_107 [2] : vector<2x8x8xf32> to vector<2x8xf32>
    %277 = vector.shape_cast %276 : vector<2x8xf32> to vector<2x8x1xf32>
    %278 = tpu.reciprocal %277 {approx = true} : vector<2x8x1xf32> -> vector<2x8x1xf32>
    %279 = vector.broadcast %278 : vector<2x8x1xf32> to vector<2x8x8xf32>
    %280 = arith.mulf %275, %279 : vector<2x8x8xf32>
    %281 = arith.truncf %280 : vector<2x8x8xf32> to vector<2x8x8xbf16>
    %282 = arith.truncf %266 : vector<2x8x16xf32> to vector<2x8x16xbf16>
    "tpu.trace_start"() <{level = 10 : i32, message = "bqk,bkd->bqd"}> : () -> ()
    %cst_108 = arith.constant dense<0.000000e+00> : vector<2x8x16xf32>
    %283 = tpu.matmul %281, %282, %cst_108 {dimension_numbers = #tpu.dot_dimension_numbers<[2], [1], [1], [2], [0, 0, 0, 1, 1, 2], [0], [0]>} : vector<2x8x8xbf16>, vector<2x8x16xbf16>, vector<2x8x16xf32> -> vector<2x8x16xf32>
    "tpu.trace_stop"() : () -> ()
    %284 = vector.extract_strided_slice %243 {offsets = [0, 0, 32], sizes = [2, 8, 16], strides = [1, 1, 1]} : vector<2x8x192xf32> to vector<2x8x16xf32>
    %285 = vector.extract_strided_slice %243 {offsets = [0, 0, 96], sizes = [2, 8, 16], strides = [1, 1, 1]} : vector<2x8x192xf32> to vector<2x8x16xf32>
    %286 = vector.extract_strided_slice %243 {offsets = [0, 0, 160], sizes = [2, 8, 16], strides = [1, 1, 1]} : vector<2x8x192xf32> to vector<2x8x16xf32>
    %287 = arith.truncf %284 : vector<2x8x16xf32> to vector<2x8x16xbf16>
    %288 = arith.truncf %285 : vector<2x8x16xf32> to vector<2x8x16xbf16>
    "tpu.trace_start"() <{level = 10 : i32, message = "bqd,bkd->bqk"}> : () -> ()
    %cst_109 = arith.constant dense<0.000000e+00> : vector<2x8x8xf32>
    %289 = tpu.matmul %287, %288, %cst_109 {dimension_numbers = #tpu.dot_dimension_numbers<[2], [2], [1], [1], [0, 0, 0, 1, 1, 1], [0], [0]>} : vector<2x8x16xbf16>, vector<2x8x16xbf16>, vector<2x8x8xf32> -> vector<2x8x8xf32>
    "tpu.trace_stop"() : () -> ()
    %290 = arith.addf %289, %37 : vector<2x8x8xf32>
    %cst_110 = arith.constant dense<0xFF800000> : vector<2x8xf32>
    %291 = vector.multi_reduction <maximumf>, %290, %cst_110 [2] : vector<2x8x8xf32> to vector<2x8xf32>
    %292 = vector.shape_cast %291 : vector<2x8xf32> to vector<2x8x1xf32>
    %293 = vector.broadcast %292 : vector<2x8x1xf32> to vector<2x8x8xf32>
    %294 = arith.subf %290, %293 : vector<2x8x8xf32>
    %295 = math.exp %294 : vector<2x8x8xf32>
    %cst_111 = arith.constant dense<0.000000e+00> : vector<2x8xf32>
    %296 = vector.multi_reduction <add>, %295, %cst_111 [2] : vector<2x8x8xf32> to vector<2x8xf32>
    %297 = vector.shape_cast %296 : vector<2x8xf32> to vector<2x8x1xf32>
    %298 = tpu.reciprocal %297 {approx = true} : vector<2x8x1xf32> -> vector<2x8x1xf32>
    %299 = vector.broadcast %298 : vector<2x8x1xf32> to vector<2x8x8xf32>
    %300 = arith.mulf %295, %299 : vector<2x8x8xf32>
    %301 = arith.truncf %300 : vector<2x8x8xf32> to vector<2x8x8xbf16>
    %302 = arith.truncf %286 : vector<2x8x16xf32> to vector<2x8x16xbf16>
    "tpu.trace_start"() <{level = 10 : i32, message = "bqk,bkd->bqd"}> : () -> ()
    %cst_112 = arith.constant dense<0.000000e+00> : vector<2x8x16xf32>
    %303 = tpu.matmul %301, %302, %cst_112 {dimension_numbers = #tpu.dot_dimension_numbers<[2], [1], [1], [2], [0, 0, 0, 1, 1, 2], [0], [0]>} : vector<2x8x8xbf16>, vector<2x8x16xbf16>, vector<2x8x16xf32> -> vector<2x8x16xf32>
    "tpu.trace_stop"() : () -> ()
    %304 = vector.extract_strided_slice %243 {offsets = [0, 0, 48], sizes = [2, 8, 16], strides = [1, 1, 1]} : vector<2x8x192xf32> to vector<2x8x16xf32>
    %305 = vector.extract_strided_slice %243 {offsets = [0, 0, 112], sizes = [2, 8, 16], strides = [1, 1, 1]} : vector<2x8x192xf32> to vector<2x8x16xf32>
    %306 = vector.extract_strided_slice %243 {offsets = [0, 0, 176], sizes = [2, 8, 16], strides = [1, 1, 1]} : vector<2x8x192xf32> to vector<2x8x16xf32>
    %307 = arith.truncf %304 : vector<2x8x16xf32> to vector<2x8x16xbf16>
    %308 = arith.truncf %305 : vector<2x8x16xf32> to vector<2x8x16xbf16>
    "tpu.trace_start"() <{level = 10 : i32, message = "bqd,bkd->bqk"}> : () -> ()
    %cst_113 = arith.constant dense<0.000000e+00> : vector<2x8x8xf32>
    %309 = tpu.matmul %307, %308, %cst_113 {dimension_numbers = #tpu.dot_dimension_numbers<[2], [2], [1], [1], [0, 0, 0, 1, 1, 1], [0], [0]>} : vector<2x8x16xbf16>, vector<2x8x16xbf16>, vector<2x8x8xf32> -> vector<2x8x8xf32>
    "tpu.trace_stop"() : () -> ()
    %310 = arith.addf %309, %37 : vector<2x8x8xf32>
    %cst_114 = arith.constant dense<0xFF800000> : vector<2x8xf32>
    %311 = vector.multi_reduction <maximumf>, %310, %cst_114 [2] : vector<2x8x8xf32> to vector<2x8xf32>
    %312 = vector.shape_cast %311 : vector<2x8xf32> to vector<2x8x1xf32>
    %313 = vector.broadcast %312 : vector<2x8x1xf32> to vector<2x8x8xf32>
    %314 = arith.subf %310, %313 : vector<2x8x8xf32>
    %315 = math.exp %314 : vector<2x8x8xf32>
    %cst_115 = arith.constant dense<0.000000e+00> : vector<2x8xf32>
    %316 = vector.multi_reduction <add>, %315, %cst_115 [2] : vector<2x8x8xf32> to vector<2x8xf32>
    %317 = vector.shape_cast %316 : vector<2x8xf32> to vector<2x8x1xf32>
    %318 = tpu.reciprocal %317 {approx = true} : vector<2x8x1xf32> -> vector<2x8x1xf32>
    %319 = vector.broadcast %318 : vector<2x8x1xf32> to vector<2x8x8xf32>
    %320 = arith.mulf %315, %319 : vector<2x8x8xf32>
    %321 = arith.truncf %320 : vector<2x8x8xf32> to vector<2x8x8xbf16>
    %322 = arith.truncf %306 : vector<2x8x16xf32> to vector<2x8x16xbf16>
    "tpu.trace_start"() <{level = 10 : i32, message = "bqk,bkd->bqd"}> : () -> ()
    %cst_116 = arith.constant dense<0.000000e+00> : vector<2x8x16xf32>
    %323 = tpu.matmul %321, %322, %cst_116 {dimension_numbers = #tpu.dot_dimension_numbers<[2], [1], [1], [2], [0, 0, 0, 1, 1, 2], [0], [0]>} : vector<2x8x8xbf16>, vector<2x8x16xbf16>, vector<2x8x16xf32> -> vector<2x8x16xf32>
    "tpu.trace_stop"() : () -> ()
    %324 = tpu.concatenate %263, %283, %303, %323 in 2 : vector<2x8x16xf32>, vector<2x8x16xf32>, vector<2x8x16xf32>, vector<2x8x16xf32> -> vector<2x8x64xf32>
    %325 = vector.shape_cast %324 : vector<2x8x64xf32> to vector<16x64xf32>
    %326 = arith.truncf %325 : vector<16x64xf32> to vector<16x64xbf16>
    %c1_117 = arith.constant 1 : index
    %c0_118 = arith.constant 0 : index
    %c0_119 = arith.constant 0 : index
    %327 = vector.load %arg12[%c1_117, %c0_118, %c0_119] : memref<2x64x64xbf16, #tpu.memory_space<vmem>>, vector<1x64x64xbf16>
    %328 = vector.shape_cast %327 : vector<1x64x64xbf16> to vector<64x64xbf16>
    %cst_120 = arith.constant dense<0.000000e+00> : vector<16x64xf32>
    %329 = tpu.matmul %326, %328, %cst_120 {dimension_numbers = #tpu.dot_dimension_numbers<[1], [0], [0], [1], [0, 0, 1, 1], [], []>} : vector<16x64xbf16>, vector<64x64xbf16>, vector<16x64xf32> -> vector<16x64xf32>
    %330 = arith.addf %210, %329 : vector<16x64xf32>
    %c1_121 = arith.constant 1 : index
    %c0_122 = arith.constant 0 : index
    %c0_123 = arith.constant 0 : index
    %331 = vector.load %arg13[%c1_121, %c0_122, %c0_123] : memref<2x1x64xf32, #tpu.memory_space<vmem>>, vector<1x1x64xf32>
    %332 = vector.shape_cast %331 : vector<1x1x64xf32> to vector<1x64xf32>
    %333 = vector.broadcast %332 : vector<1x64xf32> to vector<16x64xf32>
    %334 = arith.addf %330, %333 : vector<16x64xf32>
    %c1_124 = arith.constant 1 : index
    %c0_125 = arith.constant 0 : index
    %c0_126 = arith.constant 0 : index
    %335 = vector.load %arg14[%c1_124, %c0_125, %c0_126] : memref<2x1x64xf32, #tpu.memory_space<vmem>>, vector<1x1x64xf32>
    %336 = vector.shape_cast %335 : vector<1x1x64xf32> to vector<1x64xf32>
    %c1_127 = arith.constant 1 : index
    %c0_128 = arith.constant 0 : index
    %c0_129 = arith.constant 0 : index
    %337 = vector.load %arg15[%c1_127, %c0_128, %c0_129] : memref<2x1x64xf32, #tpu.memory_space<vmem>>, vector<1x1x64xf32>
    %338 = vector.shape_cast %337 : vector<1x1x64xf32> to vector<1x64xf32>
    %cst_130 = arith.constant dense<0.000000e+00> : vector<16xf32>
    %339 = vector.multi_reduction <add>, %334, %cst_130 [1] : vector<16x64xf32> to vector<16xf32>
    %340 = vector.shape_cast %339 : vector<16xf32> to vector<16x1xf32>
    %cst_131 = arith.constant 6.400000e+01 : f32
    %341 = vector.broadcast %cst_131 : f32 to vector<16x1xf32>
    %342 = arith.divf %340, %341 : vector<16x1xf32>
    %343 = vector.broadcast %342 : vector<16x1xf32> to vector<16x64xf32>
    %344 = arith.subf %334, %343 : vector<16x64xf32>
    %345 = arith.mulf %344, %344 : vector<16x64xf32>
    %cst_132 = arith.constant dense<0.000000e+00> : vector<16xf32>
    %346 = vector.multi_reduction <add>, %345, %cst_132 [1] : vector<16x64xf32> to vector<16xf32>
    %347 = vector.shape_cast %346 : vector<16xf32> to vector<16x1xf32>
    %cst_133 = arith.constant 6.400000e+01 : f32
    %348 = vector.broadcast %cst_133 : f32 to vector<16x1xf32>
    %349 = arith.divf %347, %348 : vector<16x1xf32>
    %cst_134 = arith.constant 9.99999974E-6 : f32
    %350 = vector.broadcast %cst_134 : f32 to vector<16x1xf32>
    %351 = arith.addf %349, %350 : vector<16x1xf32>
    %352 = math.rsqrt %351 : vector<16x1xf32>
    %353 = vector.broadcast %352 : vector<16x1xf32> to vector<16x64xf32>
    %354 = arith.mulf %344, %353 : vector<16x64xf32>
    %355 = vector.broadcast %336 : vector<1x64xf32> to vector<16x64xf32>
    %356 = arith.mulf %354, %355 : vector<16x64xf32>
    %357 = vector.broadcast %338 : vector<1x64xf32> to vector<16x64xf32>
    %358 = arith.addf %356, %357 : vector<16x64xf32>
    %359 = arith.truncf %358 : vector<16x64xf32> to vector<16x64xbf16>
    %c1_135 = arith.constant 1 : index
    %c0_136 = arith.constant 0 : index
    %c0_137 = arith.constant 0 : index
    %360 = vector.load %arg16[%c1_135, %c0_136, %c0_137] : memref<2x64x256xbf16, #tpu.memory_space<vmem>>, vector<1x64x256xbf16>
    %361 = vector.shape_cast %360 : vector<1x64x256xbf16> to vector<64x256xbf16>
    %cst_138 = arith.constant dense<0.000000e+00> : vector<16x256xf32>
    %362 = tpu.matmul %359, %361, %cst_138 {dimension_numbers = #tpu.dot_dimension_numbers<[1], [0], [0], [1], [0, 0, 1, 1], [], []>} : vector<16x64xbf16>, vector<64x256xbf16>, vector<16x256xf32> -> vector<16x256xf32>
    %c1_139 = arith.constant 1 : index
    %c0_140 = arith.constant 0 : index
    %c0_141 = arith.constant 0 : index
    %363 = vector.load %arg17[%c1_139, %c0_140, %c0_141] : memref<2x1x256xf32, #tpu.memory_space<vmem>>, vector<1x1x256xf32>
    %364 = vector.shape_cast %363 : vector<1x1x256xf32> to vector<1x256xf32>
    %365 = vector.broadcast %364 : vector<1x256xf32> to vector<16x256xf32>
    %366 = arith.addf %362, %365 : vector<16x256xf32>
    %cst_142 = arith.constant 1.702000e+00 : f32
    %367 = vector.broadcast %cst_142 : f32 to vector<16x256xf32>
    %368 = arith.mulf %367, %366 : vector<16x256xf32>
    %369 = arith.negf %368 : vector<16x256xf32>
    %370 = math.exp %369 : vector<16x256xf32>
    %cst_143 = arith.constant 1.000000e+00 : f32
    %371 = vector.broadcast %cst_143 : f32 to vector<16x256xf32>
    %372 = arith.addf %371, %370 : vector<16x256xf32>
    %373 = arith.divf %371, %372 : vector<16x256xf32>
    %374 = arith.mulf %366, %373 : vector<16x256xf32>
    %375 = arith.truncf %374 : vector<16x256xf32> to vector<16x256xbf16>
    %c1_144 = arith.constant 1 : index
    %c0_145 = arith.constant 0 : index
    %c0_146 = arith.constant 0 : index
    %376 = vector.load %arg18[%c1_144, %c0_145, %c0_146] : memref<2x256x64xbf16, #tpu.memory_space<vmem>>, vector<1x256x64xbf16>
    %377 = vector.shape_cast %376 : vector<1x256x64xbf16> to vector<256x64xbf16>
    %cst_147 = arith.constant dense<0.000000e+00> : vector<16x64xf32>
    %378 = tpu.matmul %375, %377, %cst_147 {dimension_numbers = #tpu.dot_dimension_numbers<[1], [0], [0], [1], [0, 0, 1, 1], [], []>} : vector<16x256xbf16>, vector<256x64xbf16>, vector<16x64xf32> -> vector<16x64xf32>
    %c1_148 = arith.constant 1 : index
    %c0_149 = arith.constant 0 : index
    %c0_150 = arith.constant 0 : index
    %379 = vector.load %arg19[%c1_148, %c0_149, %c0_150] : memref<2x1x64xf32, #tpu.memory_space<vmem>>, vector<1x1x64xf32>
    %380 = vector.shape_cast %379 : vector<1x1x64xf32> to vector<1x64xf32>
    %381 = vector.broadcast %380 : vector<1x64xf32> to vector<16x64xf32>
    %382 = arith.addf %378, %381 : vector<16x64xf32>
    %383 = arith.addf %334, %382 : vector<16x64xf32>
    %384 = vector.shape_cast %383 : vector<16x64xf32> to vector<2x8x64xf32>
    %385 = vector.extract_strided_slice %384 {offsets = [0, 0, 0], sizes = [2, 1, 64], strides = [1, 1, 1]} : vector<2x8x64xf32> to vector<2x1x64xf32>
    %386 = vector.shape_cast %385 : vector<2x1x64xf32> to vector<2x64xf32>
    %c0_151 = arith.constant 0 : index
    %c0_152 = arith.constant 0 : index
    %387 = vector.load %arg5[%c0_151, %c0_152] : memref<1x64xf32, #tpu.memory_space<vmem>>, vector<1x64xf32>
    %c0_153 = arith.constant 0 : index
    %c0_154 = arith.constant 0 : index
    %388 = vector.load %arg6[%c0_153, %c0_154] : memref<1x64xf32, #tpu.memory_space<vmem>>, vector<1x64xf32>
    %cst_155 = arith.constant dense<0.000000e+00> : vector<2xf32>
    %389 = vector.multi_reduction <add>, %386, %cst_155 [1] : vector<2x64xf32> to vector<2xf32>
    %390 = vector.shape_cast %389 : vector<2xf32> to vector<2x1xf32>
    %cst_156 = arith.constant 6.400000e+01 : f32
    %391 = vector.broadcast %cst_156 : f32 to vector<2x1xf32>
    %392 = arith.divf %390, %391 : vector<2x1xf32>
    %393 = vector.broadcast %392 : vector<2x1xf32> to vector<2x64xf32>
    %394 = arith.subf %386, %393 : vector<2x64xf32>
    %395 = arith.mulf %394, %394 : vector<2x64xf32>
    %cst_157 = arith.constant dense<0.000000e+00> : vector<2xf32>
    %396 = vector.multi_reduction <add>, %395, %cst_157 [1] : vector<2x64xf32> to vector<2xf32>
    %397 = vector.shape_cast %396 : vector<2xf32> to vector<2x1xf32>
    %cst_158 = arith.constant 6.400000e+01 : f32
    %398 = vector.broadcast %cst_158 : f32 to vector<2x1xf32>
    %399 = arith.divf %397, %398 : vector<2x1xf32>
    %cst_159 = arith.constant 9.99999974E-6 : f32
    %400 = vector.broadcast %cst_159 : f32 to vector<2x1xf32>
    %401 = arith.addf %399, %400 : vector<2x1xf32>
    %402 = math.rsqrt %401 : vector<2x1xf32>
    %403 = vector.broadcast %402 : vector<2x1xf32> to vector<2x64xf32>
    %404 = arith.mulf %394, %403 : vector<2x64xf32>
    %405 = vector.broadcast %387 : vector<1x64xf32> to vector<2x64xf32>
    %406 = arith.mulf %404, %405 : vector<2x64xf32>
    %407 = vector.broadcast %388 : vector<1x64xf32> to vector<2x64xf32>
    %408 = arith.addf %406, %407 : vector<2x64xf32>
    %409 = arith.truncf %408 : vector<2x64xf32> to vector<2x64xbf16>
    %c0_160 = arith.constant 0 : index
    %c0_161 = arith.constant 0 : index
    %410 = vector.load %arg7[%c0_160, %c0_161] : memref<64x32xbf16, #tpu.memory_space<vmem>>, vector<64x32xbf16>
    %cst_162 = arith.constant dense<0.000000e+00> : vector<2x32xf32>
    %411 = tpu.matmul %409, %410, %cst_162 {dimension_numbers = #tpu.dot_dimension_numbers<[1], [0], [0], [1], [0, 0, 1, 1], [], []>} : vector<2x64xbf16>, vector<64x32xbf16>, vector<2x32xf32> -> vector<2x32xf32>
    %c0_163 = arith.constant 0 : index
    %c0_164 = arith.constant 0 : index
    %c0_165 = arith.constant 0 : index
    %412 = vector.load %arg20[%c0_163, %c0_164, %c0_165] : memref<4x8x64xf32, #tpu.memory_space<vmem>>, vector<4x8x64xf32>
    %413 = vector.shape_cast %412 : vector<4x8x64xf32> to vector<32x64xf32>
    %414 = tpu.iota {dimensions = array<i32: 1>} : vector<4x8x8xi32>
    %415 = tpu.iota {dimensions = array<i32: 2>} : vector<4x8x8xi32>
    %416 = arith.cmpi sle, %415, %414 : vector<4x8x8xi32>
    %cst_166 = arith.constant 0.000000e+00 : f32
    %cst_167 = arith.constant -1.000000e+30 : f32
    %417 = vector.broadcast %cst_166 : f32 to vector<4x8x8xf32>
    %418 = vector.broadcast %cst_167 : f32 to vector<4x8x8xf32>
    %419 = arith.select %416, %417, %418 : vector<4x8x8xi1>, vector<4x8x8xf32>
    %c0_168 = arith.constant 0 : index
    %c0_169 = arith.constant 0 : index
    %c0_170 = arith.constant 0 : index
    %420 = vector.load %arg26[%c0_168, %c0_169, %c0_170] : memref<2x1x64xf32, #tpu.memory_space<vmem>>, vector<1x1x64xf32>
    %421 = vector.shape_cast %420 : vector<1x1x64xf32> to vector<1x64xf32>
    %c0_171 = arith.constant 0 : index
    %c0_172 = arith.constant 0 : index
    %c0_173 = arith.constant 0 : index
    %422 = vector.load %arg27[%c0_171, %c0_172, %c0_173] : memref<2x1x64xf32, #tpu.memory_space<vmem>>, vector<1x1x64xf32>
    %423 = vector.shape_cast %422 : vector<1x1x64xf32> to vector<1x64xf32>
    %cst_174 = arith.constant dense<0.000000e+00> : vector<32xf32>
    %424 = vector.multi_reduction <add>, %413, %cst_174 [1] : vector<32x64xf32> to vector<32xf32>
    %425 = vector.shape_cast %424 : vector<32xf32> to vector<32x1xf32>
    %cst_175 = arith.constant 6.400000e+01 : f32
    %426 = vector.broadcast %cst_175 : f32 to vector<32x1xf32>
    %427 = arith.divf %425, %426 : vector<32x1xf32>
    %428 = vector.broadcast %427 : vector<32x1xf32> to vector<32x64xf32>
    %429 = arith.subf %413, %428 : vector<32x64xf32>
    %430 = arith.mulf %429, %429 : vector<32x64xf32>
    %cst_176 = arith.constant dense<0.000000e+00> : vector<32xf32>
    %431 = vector.multi_reduction <add>, %430, %cst_176 [1] : vector<32x64xf32> to vector<32xf32>
    %432 = vector.shape_cast %431 : vector<32xf32> to vector<32x1xf32>
    %cst_177 = arith.constant 6.400000e+01 : f32
    %433 = vector.broadcast %cst_177 : f32 to vector<32x1xf32>
    %434 = arith.divf %432, %433 : vector<32x1xf32>
    %cst_178 = arith.constant 9.99999974E-6 : f32
    %435 = vector.broadcast %cst_178 : f32 to vector<32x1xf32>
    %436 = arith.addf %434, %435 : vector<32x1xf32>
    %437 = math.rsqrt %436 : vector<32x1xf32>
    %438 = vector.broadcast %437 : vector<32x1xf32> to vector<32x64xf32>
    %439 = arith.mulf %429, %438 : vector<32x64xf32>
    %440 = vector.broadcast %421 : vector<1x64xf32> to vector<32x64xf32>
    %441 = arith.mulf %439, %440 : vector<32x64xf32>
    %442 = vector.broadcast %423 : vector<1x64xf32> to vector<32x64xf32>
    %443 = arith.addf %441, %442 : vector<32x64xf32>
    %444 = arith.truncf %443 : vector<32x64xf32> to vector<32x64xbf16>
    %c0_179 = arith.constant 0 : index
    %c0_180 = arith.constant 0 : index
    %c0_181 = arith.constant 0 : index
    %445 = vector.load %arg28[%c0_179, %c0_180, %c0_181] : memref<2x64x192xbf16, #tpu.memory_space<vmem>>, vector<1x64x192xbf16>
    %446 = vector.shape_cast %445 : vector<1x64x192xbf16> to vector<64x192xbf16>
    %cst_182 = arith.constant dense<0.000000e+00> : vector<32x192xf32>
    %447 = tpu.matmul %444, %446, %cst_182 {dimension_numbers = #tpu.dot_dimension_numbers<[1], [0], [0], [1], [0, 0, 1, 1], [], []>} : vector<32x64xbf16>, vector<64x192xbf16>, vector<32x192xf32> -> vector<32x192xf32>
    %c0_183 = arith.constant 0 : index
    %c0_184 = arith.constant 0 : index
    %c0_185 = arith.constant 0 : index
    %448 = vector.load %arg29[%c0_183, %c0_184, %c0_185] : memref<2x1x192xf32, #tpu.memory_space<vmem>>, vector<1x1x192xf32>
    %449 = vector.shape_cast %448 : vector<1x1x192xf32> to vector<1x192xf32>
    %450 = vector.broadcast %449 : vector<1x192xf32> to vector<32x192xf32>
    %451 = arith.addf %447, %450 : vector<32x192xf32>
    %452 = vector.shape_cast %451 : vector<32x192xf32> to vector<4x8x192xf32>
    %453 = vector.extract_strided_slice %452 {offsets = [0, 0, 0], sizes = [4, 8, 16], strides = [1, 1, 1]} : vector<4x8x192xf32> to vector<4x8x16xf32>
    %454 = vector.extract_strided_slice %452 {offsets = [0, 0, 64], sizes = [4, 8, 16], strides = [1, 1, 1]} : vector<4x8x192xf32> to vector<4x8x16xf32>
    %455 = vector.extract_strided_slice %452 {offsets = [0, 0, 128], sizes = [4, 8, 16], strides = [1, 1, 1]} : vector<4x8x192xf32> to vector<4x8x16xf32>
    %456 = arith.truncf %453 : vector<4x8x16xf32> to vector<4x8x16xbf16>
    %457 = arith.truncf %454 : vector<4x8x16xf32> to vector<4x8x16xbf16>
    "tpu.trace_start"() <{level = 10 : i32, message = "bqd,bkd->bqk"}> : () -> ()
    %cst_186 = arith.constant dense<0.000000e+00> : vector<4x8x8xf32>
    %458 = tpu.matmul %456, %457, %cst_186 {dimension_numbers = #tpu.dot_dimension_numbers<[2], [2], [1], [1], [0, 0, 0, 1, 1, 1], [0], [0]>} : vector<4x8x16xbf16>, vector<4x8x16xbf16>, vector<4x8x8xf32> -> vector<4x8x8xf32>
    "tpu.trace_stop"() : () -> ()
    %459 = arith.addf %458, %419 : vector<4x8x8xf32>
    %cst_187 = arith.constant dense<0xFF800000> : vector<4x8xf32>
    %460 = vector.multi_reduction <maximumf>, %459, %cst_187 [2] : vector<4x8x8xf32> to vector<4x8xf32>
    %461 = vector.shape_cast %460 : vector<4x8xf32> to vector<4x8x1xf32>
    %462 = vector.broadcast %461 : vector<4x8x1xf32> to vector<4x8x8xf32>
    %463 = arith.subf %459, %462 : vector<4x8x8xf32>
    %464 = math.exp %463 : vector<4x8x8xf32>
    %cst_188 = arith.constant dense<0.000000e+00> : vector<4x8xf32>
    %465 = vector.multi_reduction <add>, %464, %cst_188 [2] : vector<4x8x8xf32> to vector<4x8xf32>
    %466 = vector.shape_cast %465 : vector<4x8xf32> to vector<4x8x1xf32>
    %467 = tpu.reciprocal %466 {approx = true} : vector<4x8x1xf32> -> vector<4x8x1xf32>
    %468 = vector.broadcast %467 : vector<4x8x1xf32> to vector<4x8x8xf32>
    %469 = arith.mulf %464, %468 : vector<4x8x8xf32>
    %470 = arith.truncf %469 : vector<4x8x8xf32> to vector<4x8x8xbf16>
    %471 = arith.truncf %455 : vector<4x8x16xf32> to vector<4x8x16xbf16>
    "tpu.trace_start"() <{level = 10 : i32, message = "bqk,bkd->bqd"}> : () -> ()
    %cst_189 = arith.constant dense<0.000000e+00> : vector<4x8x16xf32>
    %472 = tpu.matmul %470, %471, %cst_189 {dimension_numbers = #tpu.dot_dimension_numbers<[2], [1], [1], [2], [0, 0, 0, 1, 1, 2], [0], [0]>} : vector<4x8x8xbf16>, vector<4x8x16xbf16>, vector<4x8x16xf32> -> vector<4x8x16xf32>
    "tpu.trace_stop"() : () -> ()
    %473 = vector.extract_strided_slice %452 {offsets = [0, 0, 16], sizes = [4, 8, 16], strides = [1, 1, 1]} : vector<4x8x192xf32> to vector<4x8x16xf32>
    %474 = vector.extract_strided_slice %452 {offsets = [0, 0, 80], sizes = [4, 8, 16], strides = [1, 1, 1]} : vector<4x8x192xf32> to vector<4x8x16xf32>
    %475 = vector.extract_strided_slice %452 {offsets = [0, 0, 144], sizes = [4, 8, 16], strides = [1, 1, 1]} : vector<4x8x192xf32> to vector<4x8x16xf32>
    %476 = arith.truncf %473 : vector<4x8x16xf32> to vector<4x8x16xbf16>
    %477 = arith.truncf %474 : vector<4x8x16xf32> to vector<4x8x16xbf16>
    "tpu.trace_start"() <{level = 10 : i32, message = "bqd,bkd->bqk"}> : () -> ()
    %cst_190 = arith.constant dense<0.000000e+00> : vector<4x8x8xf32>
    %478 = tpu.matmul %476, %477, %cst_190 {dimension_numbers = #tpu.dot_dimension_numbers<[2], [2], [1], [1], [0, 0, 0, 1, 1, 1], [0], [0]>} : vector<4x8x16xbf16>, vector<4x8x16xbf16>, vector<4x8x8xf32> -> vector<4x8x8xf32>
    "tpu.trace_stop"() : () -> ()
    %479 = arith.addf %478, %419 : vector<4x8x8xf32>
    %cst_191 = arith.constant dense<0xFF800000> : vector<4x8xf32>
    %480 = vector.multi_reduction <maximumf>, %479, %cst_191 [2] : vector<4x8x8xf32> to vector<4x8xf32>
    %481 = vector.shape_cast %480 : vector<4x8xf32> to vector<4x8x1xf32>
    %482 = vector.broadcast %481 : vector<4x8x1xf32> to vector<4x8x8xf32>
    %483 = arith.subf %479, %482 : vector<4x8x8xf32>
    %484 = math.exp %483 : vector<4x8x8xf32>
    %cst_192 = arith.constant dense<0.000000e+00> : vector<4x8xf32>
    %485 = vector.multi_reduction <add>, %484, %cst_192 [2] : vector<4x8x8xf32> to vector<4x8xf32>
    %486 = vector.shape_cast %485 : vector<4x8xf32> to vector<4x8x1xf32>
    %487 = tpu.reciprocal %486 {approx = true} : vector<4x8x1xf32> -> vector<4x8x1xf32>
    %488 = vector.broadcast %487 : vector<4x8x1xf32> to vector<4x8x8xf32>
    %489 = arith.mulf %484, %488 : vector<4x8x8xf32>
    %490 = arith.truncf %489 : vector<4x8x8xf32> to vector<4x8x8xbf16>
    %491 = arith.truncf %475 : vector<4x8x16xf32> to vector<4x8x16xbf16>
    "tpu.trace_start"() <{level = 10 : i32, message = "bqk,bkd->bqd"}> : () -> ()
    %cst_193 = arith.constant dense<0.000000e+00> : vector<4x8x16xf32>
    %492 = tpu.matmul %490, %491, %cst_193 {dimension_numbers = #tpu.dot_dimension_numbers<[2], [1], [1], [2], [0, 0, 0, 1, 1, 2], [0], [0]>} : vector<4x8x8xbf16>, vector<4x8x16xbf16>, vector<4x8x16xf32> -> vector<4x8x16xf32>
    "tpu.trace_stop"() : () -> ()
    %493 = vector.extract_strided_slice %452 {offsets = [0, 0, 32], sizes = [4, 8, 16], strides = [1, 1, 1]} : vector<4x8x192xf32> to vector<4x8x16xf32>
    %494 = vector.extract_strided_slice %452 {offsets = [0, 0, 96], sizes = [4, 8, 16], strides = [1, 1, 1]} : vector<4x8x192xf32> to vector<4x8x16xf32>
    %495 = vector.extract_strided_slice %452 {offsets = [0, 0, 160], sizes = [4, 8, 16], strides = [1, 1, 1]} : vector<4x8x192xf32> to vector<4x8x16xf32>
    %496 = arith.truncf %493 : vector<4x8x16xf32> to vector<4x8x16xbf16>
    %497 = arith.truncf %494 : vector<4x8x16xf32> to vector<4x8x16xbf16>
    "tpu.trace_start"() <{level = 10 : i32, message = "bqd,bkd->bqk"}> : () -> ()
    %cst_194 = arith.constant dense<0.000000e+00> : vector<4x8x8xf32>
    %498 = tpu.matmul %496, %497, %cst_194 {dimension_numbers = #tpu.dot_dimension_numbers<[2], [2], [1], [1], [0, 0, 0, 1, 1, 1], [0], [0]>} : vector<4x8x16xbf16>, vector<4x8x16xbf16>, vector<4x8x8xf32> -> vector<4x8x8xf32>
    "tpu.trace_stop"() : () -> ()
    %499 = arith.addf %498, %419 : vector<4x8x8xf32>
    %cst_195 = arith.constant dense<0xFF800000> : vector<4x8xf32>
    %500 = vector.multi_reduction <maximumf>, %499, %cst_195 [2] : vector<4x8x8xf32> to vector<4x8xf32>
    %501 = vector.shape_cast %500 : vector<4x8xf32> to vector<4x8x1xf32>
    %502 = vector.broadcast %501 : vector<4x8x1xf32> to vector<4x8x8xf32>
    %503 = arith.subf %499, %502 : vector<4x8x8xf32>
    %504 = math.exp %503 : vector<4x8x8xf32>
    %cst_196 = arith.constant dense<0.000000e+00> : vector<4x8xf32>
    %505 = vector.multi_reduction <add>, %504, %cst_196 [2] : vector<4x8x8xf32> to vector<4x8xf32>
    %506 = vector.shape_cast %505 : vector<4x8xf32> to vector<4x8x1xf32>
    %507 = tpu.reciprocal %506 {approx = true} : vector<4x8x1xf32> -> vector<4x8x1xf32>
    %508 = vector.broadcast %507 : vector<4x8x1xf32> to vector<4x8x8xf32>
    %509 = arith.mulf %504, %508 : vector<4x8x8xf32>
    %510 = arith.truncf %509 : vector<4x8x8xf32> to vector<4x8x8xbf16>
    %511 = arith.truncf %495 : vector<4x8x16xf32> to vector<4x8x16xbf16>
    "tpu.trace_start"() <{level = 10 : i32, message = "bqk,bkd->bqd"}> : () -> ()
    %cst_197 = arith.constant dense<0.000000e+00> : vector<4x8x16xf32>
    %512 = tpu.matmul %510, %511, %cst_197 {dimension_numbers = #tpu.dot_dimension_numbers<[2], [1], [1], [2], [0, 0, 0, 1, 1, 2], [0], [0]>} : vector<4x8x8xbf16>, vector<4x8x16xbf16>, vector<4x8x16xf32> -> vector<4x8x16xf32>
    "tpu.trace_stop"() : () -> ()
    %513 = vector.extract_strided_slice %452 {offsets = [0, 0, 48], sizes = [4, 8, 16], strides = [1, 1, 1]} : vector<4x8x192xf32> to vector<4x8x16xf32>
    %514 = vector.extract_strided_slice %452 {offsets = [0, 0, 112], sizes = [4, 8, 16], strides = [1, 1, 1]} : vector<4x8x192xf32> to vector<4x8x16xf32>
    %515 = vector.extract_strided_slice %452 {offsets = [0, 0, 176], sizes = [4, 8, 16], strides = [1, 1, 1]} : vector<4x8x192xf32> to vector<4x8x16xf32>
    %516 = arith.truncf %513 : vector<4x8x16xf32> to vector<4x8x16xbf16>
    %517 = arith.truncf %514 : vector<4x8x16xf32> to vector<4x8x16xbf16>
    "tpu.trace_start"() <{level = 10 : i32, message = "bqd,bkd->bqk"}> : () -> ()
    %cst_198 = arith.constant dense<0.000000e+00> : vector<4x8x8xf32>
    %518 = tpu.matmul %516, %517, %cst_198 {dimension_numbers = #tpu.dot_dimension_numbers<[2], [2], [1], [1], [0, 0, 0, 1, 1, 1], [0], [0]>} : vector<4x8x16xbf16>, vector<4x8x16xbf16>, vector<4x8x8xf32> -> vector<4x8x8xf32>
    "tpu.trace_stop"() : () -> ()
    %519 = arith.addf %518, %419 : vector<4x8x8xf32>
    %cst_199 = arith.constant dense<0xFF800000> : vector<4x8xf32>
    %520 = vector.multi_reduction <maximumf>, %519, %cst_199 [2] : vector<4x8x8xf32> to vector<4x8xf32>
    %521 = vector.shape_cast %520 : vector<4x8xf32> to vector<4x8x1xf32>
    %522 = vector.broadcast %521 : vector<4x8x1xf32> to vector<4x8x8xf32>
    %523 = arith.subf %519, %522 : vector<4x8x8xf32>
    %524 = math.exp %523 : vector<4x8x8xf32>
    %cst_200 = arith.constant dense<0.000000e+00> : vector<4x8xf32>
    %525 = vector.multi_reduction <add>, %524, %cst_200 [2] : vector<4x8x8xf32> to vector<4x8xf32>
    %526 = vector.shape_cast %525 : vector<4x8xf32> to vector<4x8x1xf32>
    %527 = tpu.reciprocal %526 {approx = true} : vector<4x8x1xf32> -> vector<4x8x1xf32>
    %528 = vector.broadcast %527 : vector<4x8x1xf32> to vector<4x8x8xf32>
    %529 = arith.mulf %524, %528 : vector<4x8x8xf32>
    %530 = arith.truncf %529 : vector<4x8x8xf32> to vector<4x8x8xbf16>
    %531 = arith.truncf %515 : vector<4x8x16xf32> to vector<4x8x16xbf16>
    "tpu.trace_start"() <{level = 10 : i32, message = "bqk,bkd->bqd"}> : () -> ()
    %cst_201 = arith.constant dense<0.000000e+00> : vector<4x8x16xf32>
    %532 = tpu.matmul %530, %531, %cst_201 {dimension_numbers = #tpu.dot_dimension_numbers<[2], [1], [1], [2], [0, 0, 0, 1, 1, 2], [0], [0]>} : vector<4x8x8xbf16>, vector<4x8x16xbf16>, vector<4x8x16xf32> -> vector<4x8x16xf32>
    "tpu.trace_stop"() : () -> ()
    %533 = tpu.concatenate %472, %492, %512, %532 in 2 : vector<4x8x16xf32>, vector<4x8x16xf32>, vector<4x8x16xf32>, vector<4x8x16xf32> -> vector<4x8x64xf32>
    %534 = vector.shape_cast %533 : vector<4x8x64xf32> to vector<32x64xf32>
    %535 = arith.truncf %534 : vector<32x64xf32> to vector<32x64xbf16>
    %c0_202 = arith.constant 0 : index
    %c0_203 = arith.constant 0 : index
    %c0_204 = arith.constant 0 : index
    %536 = vector.load %arg30[%c0_202, %c0_203, %c0_204] : memref<2x64x64xbf16, #tpu.memory_space<vmem>>, vector<1x64x64xbf16>
    %537 = vector.shape_cast %536 : vector<1x64x64xbf16> to vector<64x64xbf16>
    %cst_205 = arith.constant dense<0.000000e+00> : vector<32x64xf32>
    %538 = tpu.matmul %535, %537, %cst_205 {dimension_numbers = #tpu.dot_dimension_numbers<[1], [0], [0], [1], [0, 0, 1, 1], [], []>} : vector<32x64xbf16>, vector<64x64xbf16>, vector<32x64xf32> -> vector<32x64xf32>
    %539 = arith.addf %413, %538 : vector<32x64xf32>
    %c0_206 = arith.constant 0 : index
    %c0_207 = arith.constant 0 : index
    %c0_208 = arith.constant 0 : index
    %540 = vector.load %arg31[%c0_206, %c0_207, %c0_208] : memref<2x1x64xf32, #tpu.memory_space<vmem>>, vector<1x1x64xf32>
    %541 = vector.shape_cast %540 : vector<1x1x64xf32> to vector<1x64xf32>
    %542 = vector.broadcast %541 : vector<1x64xf32> to vector<32x64xf32>
    %543 = arith.addf %539, %542 : vector<32x64xf32>
    %c0_209 = arith.constant 0 : index
    %c0_210 = arith.constant 0 : index
    %c0_211 = arith.constant 0 : index
    %544 = vector.load %arg32[%c0_209, %c0_210, %c0_211] : memref<2x1x64xf32, #tpu.memory_space<vmem>>, vector<1x1x64xf32>
    %545 = vector.shape_cast %544 : vector<1x1x64xf32> to vector<1x64xf32>
    %c0_212 = arith.constant 0 : index
    %c0_213 = arith.constant 0 : index
    %c0_214 = arith.constant 0 : index
    %546 = vector.load %arg33[%c0_212, %c0_213, %c0_214] : memref<2x1x64xf32, #tpu.memory_space<vmem>>, vector<1x1x64xf32>
    %547 = vector.shape_cast %546 : vector<1x1x64xf32> to vector<1x64xf32>
    %cst_215 = arith.constant dense<0.000000e+00> : vector<32xf32>
    %548 = vector.multi_reduction <add>, %543, %cst_215 [1] : vector<32x64xf32> to vector<32xf32>
    %549 = vector.shape_cast %548 : vector<32xf32> to vector<32x1xf32>
    %cst_216 = arith.constant 6.400000e+01 : f32
    %550 = vector.broadcast %cst_216 : f32 to vector<32x1xf32>
    %551 = arith.divf %549, %550 : vector<32x1xf32>
    %552 = vector.broadcast %551 : vector<32x1xf32> to vector<32x64xf32>
    %553 = arith.subf %543, %552 : vector<32x64xf32>
    %554 = arith.mulf %553, %553 : vector<32x64xf32>
    %cst_217 = arith.constant dense<0.000000e+00> : vector<32xf32>
    %555 = vector.multi_reduction <add>, %554, %cst_217 [1] : vector<32x64xf32> to vector<32xf32>
    %556 = vector.shape_cast %555 : vector<32xf32> to vector<32x1xf32>
    %cst_218 = arith.constant 6.400000e+01 : f32
    %557 = vector.broadcast %cst_218 : f32 to vector<32x1xf32>
    %558 = arith.divf %556, %557 : vector<32x1xf32>
    %cst_219 = arith.constant 9.99999974E-6 : f32
    %559 = vector.broadcast %cst_219 : f32 to vector<32x1xf32>
    %560 = arith.addf %558, %559 : vector<32x1xf32>
    %561 = math.rsqrt %560 : vector<32x1xf32>
    %562 = vector.broadcast %561 : vector<32x1xf32> to vector<32x64xf32>
    %563 = arith.mulf %553, %562 : vector<32x64xf32>
    %564 = vector.broadcast %545 : vector<1x64xf32> to vector<32x64xf32>
    %565 = arith.mulf %563, %564 : vector<32x64xf32>
    %566 = vector.broadcast %547 : vector<1x64xf32> to vector<32x64xf32>
    %567 = arith.addf %565, %566 : vector<32x64xf32>
    %568 = arith.truncf %567 : vector<32x64xf32> to vector<32x64xbf16>
    %c0_220 = arith.constant 0 : index
    %c0_221 = arith.constant 0 : index
    %c0_222 = arith.constant 0 : index
    %569 = vector.load %arg34[%c0_220, %c0_221, %c0_222] : memref<2x64x256xbf16, #tpu.memory_space<vmem>>, vector<1x64x256xbf16>
    %570 = vector.shape_cast %569 : vector<1x64x256xbf16> to vector<64x256xbf16>
    %cst_223 = arith.constant dense<0.000000e+00> : vector<32x256xf32>
    %571 = tpu.matmul %568, %570, %cst_223 {dimension_numbers = #tpu.dot_dimension_numbers<[1], [0], [0], [1], [0, 0, 1, 1], [], []>} : vector<32x64xbf16>, vector<64x256xbf16>, vector<32x256xf32> -> vector<32x256xf32>
    %c0_224 = arith.constant 0 : index
    %c0_225 = arith.constant 0 : index
    %c0_226 = arith.constant 0 : index
    %572 = vector.load %arg35[%c0_224, %c0_225, %c0_226] : memref<2x1x256xf32, #tpu.memory_space<vmem>>, vector<1x1x256xf32>
    %573 = vector.shape_cast %572 : vector<1x1x256xf32> to vector<1x256xf32>
    %574 = vector.broadcast %573 : vector<1x256xf32> to vector<32x256xf32>
    %575 = arith.addf %571, %574 : vector<32x256xf32>
    %cst_227 = arith.constant 1.702000e+00 : f32
    %576 = vector.broadcast %cst_227 : f32 to vector<32x256xf32>
    %577 = arith.mulf %576, %575 : vector<32x256xf32>
    %578 = arith.negf %577 : vector<32x256xf32>
    %579 = math.exp %578 : vector<32x256xf32>
    %cst_228 = arith.constant 1.000000e+00 : f32
    %580 = vector.broadcast %cst_228 : f32 to vector<32x256xf32>
    %581 = arith.addf %580, %579 : vector<32x256xf32>
    %582 = arith.divf %580, %581 : vector<32x256xf32>
    %583 = arith.mulf %575, %582 : vector<32x256xf32>
    %584 = arith.truncf %583 : vector<32x256xf32> to vector<32x256xbf16>
    %c0_229 = arith.constant 0 : index
    %c0_230 = arith.constant 0 : index
    %c0_231 = arith.constant 0 : index
    %585 = vector.load %arg36[%c0_229, %c0_230, %c0_231] : memref<2x256x64xbf16, #tpu.memory_space<vmem>>, vector<1x256x64xbf16>
    %586 = vector.shape_cast %585 : vector<1x256x64xbf16> to vector<256x64xbf16>
    %cst_232 = arith.constant dense<0.000000e+00> : vector<32x64xf32>
    %587 = tpu.matmul %584, %586, %cst_232 {dimension_numbers = #tpu.dot_dimension_numbers<[1], [0], [0], [1], [0, 0, 1, 1], [], []>} : vector<32x256xbf16>, vector<256x64xbf16>, vector<32x64xf32> -> vector<32x64xf32>
    %c0_233 = arith.constant 0 : index
    %c0_234 = arith.constant 0 : index
    %c0_235 = arith.constant 0 : index
    %588 = vector.load %arg37[%c0_233, %c0_234, %c0_235] : memref<2x1x64xf32, #tpu.memory_space<vmem>>, vector<1x1x64xf32>
    %589 = vector.shape_cast %588 : vector<1x1x64xf32> to vector<1x64xf32>
    %590 = vector.broadcast %589 : vector<1x64xf32> to vector<32x64xf32>
    %591 = arith.addf %587, %590 : vector<32x64xf32>
    %592 = arith.addf %543, %591 : vector<32x64xf32>
    %c1_236 = arith.constant 1 : index
    %c0_237 = arith.constant 0 : index
    %c0_238 = arith.constant 0 : index
    %593 = vector.load %arg26[%c1_236, %c0_237, %c0_238] : memref<2x1x64xf32, #tpu.memory_space<vmem>>, vector<1x1x64xf32>
    %594 = vector.shape_cast %593 : vector<1x1x64xf32> to vector<1x64xf32>
    %c1_239 = arith.constant 1 : index
    %c0_240 = arith.constant 0 : index
    %c0_241 = arith.constant 0 : index
    %595 = vector.load %arg27[%c1_239, %c0_240, %c0_241] : memref<2x1x64xf32, #tpu.memory_space<vmem>>, vector<1x1x64xf32>
    %596 = vector.shape_cast %595 : vector<1x1x64xf32> to vector<1x64xf32>
    %cst_242 = arith.constant dense<0.000000e+00> : vector<32xf32>
    %597 = vector.multi_reduction <add>, %592, %cst_242 [1] : vector<32x64xf32> to vector<32xf32>
    %598 = vector.shape_cast %597 : vector<32xf32> to vector<32x1xf32>
    %cst_243 = arith.constant 6.400000e+01 : f32
    %599 = vector.broadcast %cst_243 : f32 to vector<32x1xf32>
    %600 = arith.divf %598, %599 : vector<32x1xf32>
    %601 = vector.broadcast %600 : vector<32x1xf32> to vector<32x64xf32>
    %602 = arith.subf %592, %601 : vector<32x64xf32>
    %603 = arith.mulf %602, %602 : vector<32x64xf32>
    %cst_244 = arith.constant dense<0.000000e+00> : vector<32xf32>
    %604 = vector.multi_reduction <add>, %603, %cst_244 [1] : vector<32x64xf32> to vector<32xf32>
    %605 = vector.shape_cast %604 : vector<32xf32> to vector<32x1xf32>
    %cst_245 = arith.constant 6.400000e+01 : f32
    %606 = vector.broadcast %cst_245 : f32 to vector<32x1xf32>
    %607 = arith.divf %605, %606 : vector<32x1xf32>
    %cst_246 = arith.constant 9.99999974E-6 : f32
    %608 = vector.broadcast %cst_246 : f32 to vector<32x1xf32>
    %609 = arith.addf %607, %608 : vector<32x1xf32>
    %610 = math.rsqrt %609 : vector<32x1xf32>
    %611 = vector.broadcast %610 : vector<32x1xf32> to vector<32x64xf32>
    %612 = arith.mulf %602, %611 : vector<32x64xf32>
    %613 = vector.broadcast %594 : vector<1x64xf32> to vector<32x64xf32>
    %614 = arith.mulf %612, %613 : vector<32x64xf32>
    %615 = vector.broadcast %596 : vector<1x64xf32> to vector<32x64xf32>
    %616 = arith.addf %614, %615 : vector<32x64xf32>
    %617 = arith.truncf %616 : vector<32x64xf32> to vector<32x64xbf16>
    %c1_247 = arith.constant 1 : index
    %c0_248 = arith.constant 0 : index
    %c0_249 = arith.constant 0 : index
    %618 = vector.load %arg28[%c1_247, %c0_248, %c0_249] : memref<2x64x192xbf16, #tpu.memory_space<vmem>>, vector<1x64x192xbf16>
    %619 = vector.shape_cast %618 : vector<1x64x192xbf16> to vector<64x192xbf16>
    %cst_250 = arith.constant dense<0.000000e+00> : vector<32x192xf32>
    %620 = tpu.matmul %617, %619, %cst_250 {dimension_numbers = #tpu.dot_dimension_numbers<[1], [0], [0], [1], [0, 0, 1, 1], [], []>} : vector<32x64xbf16>, vector<64x192xbf16>, vector<32x192xf32> -> vector<32x192xf32>
    %c1_251 = arith.constant 1 : index
    %c0_252 = arith.constant 0 : index
    %c0_253 = arith.constant 0 : index
    %621 = vector.load %arg29[%c1_251, %c0_252, %c0_253] : memref<2x1x192xf32, #tpu.memory_space<vmem>>, vector<1x1x192xf32>
    %622 = vector.shape_cast %621 : vector<1x1x192xf32> to vector<1x192xf32>
    %623 = vector.broadcast %622 : vector<1x192xf32> to vector<32x192xf32>
    %624 = arith.addf %620, %623 : vector<32x192xf32>
    %625 = vector.shape_cast %624 : vector<32x192xf32> to vector<4x8x192xf32>
    %626 = vector.extract_strided_slice %625 {offsets = [0, 0, 0], sizes = [4, 8, 16], strides = [1, 1, 1]} : vector<4x8x192xf32> to vector<4x8x16xf32>
    %627 = vector.extract_strided_slice %625 {offsets = [0, 0, 64], sizes = [4, 8, 16], strides = [1, 1, 1]} : vector<4x8x192xf32> to vector<4x8x16xf32>
    %628 = vector.extract_strided_slice %625 {offsets = [0, 0, 128], sizes = [4, 8, 16], strides = [1, 1, 1]} : vector<4x8x192xf32> to vector<4x8x16xf32>
    %629 = arith.truncf %626 : vector<4x8x16xf32> to vector<4x8x16xbf16>
    %630 = arith.truncf %627 : vector<4x8x16xf32> to vector<4x8x16xbf16>
    "tpu.trace_start"() <{level = 10 : i32, message = "bqd,bkd->bqk"}> : () -> ()
    %cst_254 = arith.constant dense<0.000000e+00> : vector<4x8x8xf32>
    %631 = tpu.matmul %629, %630, %cst_254 {dimension_numbers = #tpu.dot_dimension_numbers<[2], [2], [1], [1], [0, 0, 0, 1, 1, 1], [0], [0]>} : vector<4x8x16xbf16>, vector<4x8x16xbf16>, vector<4x8x8xf32> -> vector<4x8x8xf32>
    "tpu.trace_stop"() : () -> ()
    %632 = arith.addf %631, %419 : vector<4x8x8xf32>
    %cst_255 = arith.constant dense<0xFF800000> : vector<4x8xf32>
    %633 = vector.multi_reduction <maximumf>, %632, %cst_255 [2] : vector<4x8x8xf32> to vector<4x8xf32>
    %634 = vector.shape_cast %633 : vector<4x8xf32> to vector<4x8x1xf32>
    %635 = vector.broadcast %634 : vector<4x8x1xf32> to vector<4x8x8xf32>
    %636 = arith.subf %632, %635 : vector<4x8x8xf32>
    %637 = math.exp %636 : vector<4x8x8xf32>
    %cst_256 = arith.constant dense<0.000000e+00> : vector<4x8xf32>
    %638 = vector.multi_reduction <add>, %637, %cst_256 [2] : vector<4x8x8xf32> to vector<4x8xf32>
    %639 = vector.shape_cast %638 : vector<4x8xf32> to vector<4x8x1xf32>
    %640 = tpu.reciprocal %639 {approx = true} : vector<4x8x1xf32> -> vector<4x8x1xf32>
    %641 = vector.broadcast %640 : vector<4x8x1xf32> to vector<4x8x8xf32>
    %642 = arith.mulf %637, %641 : vector<4x8x8xf32>
    %643 = arith.truncf %642 : vector<4x8x8xf32> to vector<4x8x8xbf16>
    %644 = arith.truncf %628 : vector<4x8x16xf32> to vector<4x8x16xbf16>
    "tpu.trace_start"() <{level = 10 : i32, message = "bqk,bkd->bqd"}> : () -> ()
    %cst_257 = arith.constant dense<0.000000e+00> : vector<4x8x16xf32>
    %645 = tpu.matmul %643, %644, %cst_257 {dimension_numbers = #tpu.dot_dimension_numbers<[2], [1], [1], [2], [0, 0, 0, 1, 1, 2], [0], [0]>} : vector<4x8x8xbf16>, vector<4x8x16xbf16>, vector<4x8x16xf32> -> vector<4x8x16xf32>
    "tpu.trace_stop"() : () -> ()
    %646 = vector.extract_strided_slice %625 {offsets = [0, 0, 16], sizes = [4, 8, 16], strides = [1, 1, 1]} : vector<4x8x192xf32> to vector<4x8x16xf32>
    %647 = vector.extract_strided_slice %625 {offsets = [0, 0, 80], sizes = [4, 8, 16], strides = [1, 1, 1]} : vector<4x8x192xf32> to vector<4x8x16xf32>
    %648 = vector.extract_strided_slice %625 {offsets = [0, 0, 144], sizes = [4, 8, 16], strides = [1, 1, 1]} : vector<4x8x192xf32> to vector<4x8x16xf32>
    %649 = arith.truncf %646 : vector<4x8x16xf32> to vector<4x8x16xbf16>
    %650 = arith.truncf %647 : vector<4x8x16xf32> to vector<4x8x16xbf16>
    "tpu.trace_start"() <{level = 10 : i32, message = "bqd,bkd->bqk"}> : () -> ()
    %cst_258 = arith.constant dense<0.000000e+00> : vector<4x8x8xf32>
    %651 = tpu.matmul %649, %650, %cst_258 {dimension_numbers = #tpu.dot_dimension_numbers<[2], [2], [1], [1], [0, 0, 0, 1, 1, 1], [0], [0]>} : vector<4x8x16xbf16>, vector<4x8x16xbf16>, vector<4x8x8xf32> -> vector<4x8x8xf32>
    "tpu.trace_stop"() : () -> ()
    %652 = arith.addf %651, %419 : vector<4x8x8xf32>
    %cst_259 = arith.constant dense<0xFF800000> : vector<4x8xf32>
    %653 = vector.multi_reduction <maximumf>, %652, %cst_259 [2] : vector<4x8x8xf32> to vector<4x8xf32>
    %654 = vector.shape_cast %653 : vector<4x8xf32> to vector<4x8x1xf32>
    %655 = vector.broadcast %654 : vector<4x8x1xf32> to vector<4x8x8xf32>
    %656 = arith.subf %652, %655 : vector<4x8x8xf32>
    %657 = math.exp %656 : vector<4x8x8xf32>
    %cst_260 = arith.constant dense<0.000000e+00> : vector<4x8xf32>
    %658 = vector.multi_reduction <add>, %657, %cst_260 [2] : vector<4x8x8xf32> to vector<4x8xf32>
    %659 = vector.shape_cast %658 : vector<4x8xf32> to vector<4x8x1xf32>
    %660 = tpu.reciprocal %659 {approx = true} : vector<4x8x1xf32> -> vector<4x8x1xf32>
    %661 = vector.broadcast %660 : vector<4x8x1xf32> to vector<4x8x8xf32>
    %662 = arith.mulf %657, %661 : vector<4x8x8xf32>
    %663 = arith.truncf %662 : vector<4x8x8xf32> to vector<4x8x8xbf16>
    %664 = arith.truncf %648 : vector<4x8x16xf32> to vector<4x8x16xbf16>
    "tpu.trace_start"() <{level = 10 : i32, message = "bqk,bkd->bqd"}> : () -> ()
    %cst_261 = arith.constant dense<0.000000e+00> : vector<4x8x16xf32>
    %665 = tpu.matmul %663, %664, %cst_261 {dimension_numbers = #tpu.dot_dimension_numbers<[2], [1], [1], [2], [0, 0, 0, 1, 1, 2], [0], [0]>} : vector<4x8x8xbf16>, vector<4x8x16xbf16>, vector<4x8x16xf32> -> vector<4x8x16xf32>
    "tpu.trace_stop"() : () -> ()
    %666 = vector.extract_strided_slice %625 {offsets = [0, 0, 32], sizes = [4, 8, 16], strides = [1, 1, 1]} : vector<4x8x192xf32> to vector<4x8x16xf32>
    %667 = vector.extract_strided_slice %625 {offsets = [0, 0, 96], sizes = [4, 8, 16], strides = [1, 1, 1]} : vector<4x8x192xf32> to vector<4x8x16xf32>
    %668 = vector.extract_strided_slice %625 {offsets = [0, 0, 160], sizes = [4, 8, 16], strides = [1, 1, 1]} : vector<4x8x192xf32> to vector<4x8x16xf32>
    %669 = arith.truncf %666 : vector<4x8x16xf32> to vector<4x8x16xbf16>
    %670 = arith.truncf %667 : vector<4x8x16xf32> to vector<4x8x16xbf16>
    "tpu.trace_start"() <{level = 10 : i32, message = "bqd,bkd->bqk"}> : () -> ()
    %cst_262 = arith.constant dense<0.000000e+00> : vector<4x8x8xf32>
    %671 = tpu.matmul %669, %670, %cst_262 {dimension_numbers = #tpu.dot_dimension_numbers<[2], [2], [1], [1], [0, 0, 0, 1, 1, 1], [0], [0]>} : vector<4x8x16xbf16>, vector<4x8x16xbf16>, vector<4x8x8xf32> -> vector<4x8x8xf32>
    "tpu.trace_stop"() : () -> ()
    %672 = arith.addf %671, %419 : vector<4x8x8xf32>
    %cst_263 = arith.constant dense<0xFF800000> : vector<4x8xf32>
    %673 = vector.multi_reduction <maximumf>, %672, %cst_263 [2] : vector<4x8x8xf32> to vector<4x8xf32>
    %674 = vector.shape_cast %673 : vector<4x8xf32> to vector<4x8x1xf32>
    %675 = vector.broadcast %674 : vector<4x8x1xf32> to vector<4x8x8xf32>
    %676 = arith.subf %672, %675 : vector<4x8x8xf32>
    %677 = math.exp %676 : vector<4x8x8xf32>
    %cst_264 = arith.constant dense<0.000000e+00> : vector<4x8xf32>
    %678 = vector.multi_reduction <add>, %677, %cst_264 [2] : vector<4x8x8xf32> to vector<4x8xf32>
    %679 = vector.shape_cast %678 : vector<4x8xf32> to vector<4x8x1xf32>
    %680 = tpu.reciprocal %679 {approx = true} : vector<4x8x1xf32> -> vector<4x8x1xf32>
    %681 = vector.broadcast %680 : vector<4x8x1xf32> to vector<4x8x8xf32>
    %682 = arith.mulf %677, %681 : vector<4x8x8xf32>
    %683 = arith.truncf %682 : vector<4x8x8xf32> to vector<4x8x8xbf16>
    %684 = arith.truncf %668 : vector<4x8x16xf32> to vector<4x8x16xbf16>
    "tpu.trace_start"() <{level = 10 : i32, message = "bqk,bkd->bqd"}> : () -> ()
    %cst_265 = arith.constant dense<0.000000e+00> : vector<4x8x16xf32>
    %685 = tpu.matmul %683, %684, %cst_265 {dimension_numbers = #tpu.dot_dimension_numbers<[2], [1], [1], [2], [0, 0, 0, 1, 1, 2], [0], [0]>} : vector<4x8x8xbf16>, vector<4x8x16xbf16>, vector<4x8x16xf32> -> vector<4x8x16xf32>
    "tpu.trace_stop"() : () -> ()
    %686 = vector.extract_strided_slice %625 {offsets = [0, 0, 48], sizes = [4, 8, 16], strides = [1, 1, 1]} : vector<4x8x192xf32> to vector<4x8x16xf32>
    %687 = vector.extract_strided_slice %625 {offsets = [0, 0, 112], sizes = [4, 8, 16], strides = [1, 1, 1]} : vector<4x8x192xf32> to vector<4x8x16xf32>
    %688 = vector.extract_strided_slice %625 {offsets = [0, 0, 176], sizes = [4, 8, 16], strides = [1, 1, 1]} : vector<4x8x192xf32> to vector<4x8x16xf32>
    %689 = arith.truncf %686 : vector<4x8x16xf32> to vector<4x8x16xbf16>
    %690 = arith.truncf %687 : vector<4x8x16xf32> to vector<4x8x16xbf16>
    "tpu.trace_start"() <{level = 10 : i32, message = "bqd,bkd->bqk"}> : () -> ()
    %cst_266 = arith.constant dense<0.000000e+00> : vector<4x8x8xf32>
    %691 = tpu.matmul %689, %690, %cst_266 {dimension_numbers = #tpu.dot_dimension_numbers<[2], [2], [1], [1], [0, 0, 0, 1, 1, 1], [0], [0]>} : vector<4x8x16xbf16>, vector<4x8x16xbf16>, vector<4x8x8xf32> -> vector<4x8x8xf32>
    "tpu.trace_stop"() : () -> ()
    %692 = arith.addf %691, %419 : vector<4x8x8xf32>
    %cst_267 = arith.constant dense<0xFF800000> : vector<4x8xf32>
    %693 = vector.multi_reduction <maximumf>, %692, %cst_267 [2] : vector<4x8x8xf32> to vector<4x8xf32>
    %694 = vector.shape_cast %693 : vector<4x8xf32> to vector<4x8x1xf32>
    %695 = vector.broadcast %694 : vector<4x8x1xf32> to vector<4x8x8xf32>
    %696 = arith.subf %692, %695 : vector<4x8x8xf32>
    %697 = math.exp %696 : vector<4x8x8xf32>
    %cst_268 = arith.constant dense<0.000000e+00> : vector<4x8xf32>
    %698 = vector.multi_reduction <add>, %697, %cst_268 [2] : vector<4x8x8xf32> to vector<4x8xf32>
    %699 = vector.shape_cast %698 : vector<4x8xf32> to vector<4x8x1xf32>
    %700 = tpu.reciprocal %699 {approx = true} : vector<4x8x1xf32> -> vector<4x8x1xf32>
    %701 = vector.broadcast %700 : vector<4x8x1xf32> to vector<4x8x8xf32>
    %702 = arith.mulf %697, %701 : vector<4x8x8xf32>
    %703 = arith.truncf %702 : vector<4x8x8xf32> to vector<4x8x8xbf16>
    %704 = arith.truncf %688 : vector<4x8x16xf32> to vector<4x8x16xbf16>
    "tpu.trace_start"() <{level = 10 : i32, message = "bqk,bkd->bqd"}> : () -> ()
    %cst_269 = arith.constant dense<0.000000e+00> : vector<4x8x16xf32>
    %705 = tpu.matmul %703, %704, %cst_269 {dimension_numbers = #tpu.dot_dimension_numbers<[2], [1], [1], [2], [0, 0, 0, 1, 1, 2], [0], [0]>} : vector<4x8x8xbf16>, vector<4x8x16xbf16>, vector<4x8x16xf32> -> vector<4x8x16xf32>
    "tpu.trace_stop"() : () -> ()
    %706 = tpu.concatenate %645, %665, %685, %705 in 2 : vector<4x8x16xf32>, vector<4x8x16xf32>, vector<4x8x16xf32>, vector<4x8x16xf32> -> vector<4x8x64xf32>
    %707 = vector.shape_cast %706 : vector<4x8x64xf32> to vector<32x64xf32>
    %708 = arith.truncf %707 : vector<32x64xf32> to vector<32x64xbf16>
    %c1_270 = arith.constant 1 : index
    %c0_271 = arith.constant 0 : index
    %c0_272 = arith.constant 0 : index
    %709 = vector.load %arg30[%c1_270, %c0_271, %c0_272] : memref<2x64x64xbf16, #tpu.memory_space<vmem>>, vector<1x64x64xbf16>
    %710 = vector.shape_cast %709 : vector<1x64x64xbf16> to vector<64x64xbf16>
    %cst_273 = arith.constant dense<0.000000e+00> : vector<32x64xf32>
    %711 = tpu.matmul %708, %710, %cst_273 {dimension_numbers = #tpu.dot_dimension_numbers<[1], [0], [0], [1], [0, 0, 1, 1], [], []>} : vector<32x64xbf16>, vector<64x64xbf16>, vector<32x64xf32> -> vector<32x64xf32>
    %712 = arith.addf %592, %711 : vector<32x64xf32>
    %c1_274 = arith.constant 1 : index
    %c0_275 = arith.constant 0 : index
    %c0_276 = arith.constant 0 : index
    %713 = vector.load %arg31[%c1_274, %c0_275, %c0_276] : memref<2x1x64xf32, #tpu.memory_space<vmem>>, vector<1x1x64xf32>
    %714 = vector.shape_cast %713 : vector<1x1x64xf32> to vector<1x64xf32>
    %715 = vector.broadcast %714 : vector<1x64xf32> to vector<32x64xf32>
    %716 = arith.addf %712, %715 : vector<32x64xf32>
    %c1_277 = arith.constant 1 : index
    %c0_278 = arith.constant 0 : index
    %c0_279 = arith.constant 0 : index
    %717 = vector.load %arg32[%c1_277, %c0_278, %c0_279] : memref<2x1x64xf32, #tpu.memory_space<vmem>>, vector<1x1x64xf32>
    %718 = vector.shape_cast %717 : vector<1x1x64xf32> to vector<1x64xf32>
    %c1_280 = arith.constant 1 : index
    %c0_281 = arith.constant 0 : index
    %c0_282 = arith.constant 0 : index
    %719 = vector.load %arg33[%c1_280, %c0_281, %c0_282] : memref<2x1x64xf32, #tpu.memory_space<vmem>>, vector<1x1x64xf32>
    %720 = vector.shape_cast %719 : vector<1x1x64xf32> to vector<1x64xf32>
    %cst_283 = arith.constant dense<0.000000e+00> : vector<32xf32>
    %721 = vector.multi_reduction <add>, %716, %cst_283 [1] : vector<32x64xf32> to vector<32xf32>
    %722 = vector.shape_cast %721 : vector<32xf32> to vector<32x1xf32>
    %cst_284 = arith.constant 6.400000e+01 : f32
    %723 = vector.broadcast %cst_284 : f32 to vector<32x1xf32>
    %724 = arith.divf %722, %723 : vector<32x1xf32>
    %725 = vector.broadcast %724 : vector<32x1xf32> to vector<32x64xf32>
    %726 = arith.subf %716, %725 : vector<32x64xf32>
    %727 = arith.mulf %726, %726 : vector<32x64xf32>
    %cst_285 = arith.constant dense<0.000000e+00> : vector<32xf32>
    %728 = vector.multi_reduction <add>, %727, %cst_285 [1] : vector<32x64xf32> to vector<32xf32>
    %729 = vector.shape_cast %728 : vector<32xf32> to vector<32x1xf32>
    %cst_286 = arith.constant 6.400000e+01 : f32
    %730 = vector.broadcast %cst_286 : f32 to vector<32x1xf32>
    %731 = arith.divf %729, %730 : vector<32x1xf32>
    %cst_287 = arith.constant 9.99999974E-6 : f32
    %732 = vector.broadcast %cst_287 : f32 to vector<32x1xf32>
    %733 = arith.addf %731, %732 : vector<32x1xf32>
    %734 = math.rsqrt %733 : vector<32x1xf32>
    %735 = vector.broadcast %734 : vector<32x1xf32> to vector<32x64xf32>
    %736 = arith.mulf %726, %735 : vector<32x64xf32>
    %737 = vector.broadcast %718 : vector<1x64xf32> to vector<32x64xf32>
    %738 = arith.mulf %736, %737 : vector<32x64xf32>
    %739 = vector.broadcast %720 : vector<1x64xf32> to vector<32x64xf32>
    %740 = arith.addf %738, %739 : vector<32x64xf32>
    %741 = arith.truncf %740 : vector<32x64xf32> to vector<32x64xbf16>
    %c1_288 = arith.constant 1 : index
    %c0_289 = arith.constant 0 : index
    %c0_290 = arith.constant 0 : index
    %742 = vector.load %arg34[%c1_288, %c0_289, %c0_290] : memref<2x64x256xbf16, #tpu.memory_space<vmem>>, vector<1x64x256xbf16>
    %743 = vector.shape_cast %742 : vector<1x64x256xbf16> to vector<64x256xbf16>
    %cst_291 = arith.constant dense<0.000000e+00> : vector<32x256xf32>
    %744 = tpu.matmul %741, %743, %cst_291 {dimension_numbers = #tpu.dot_dimension_numbers<[1], [0], [0], [1], [0, 0, 1, 1], [], []>} : vector<32x64xbf16>, vector<64x256xbf16>, vector<32x256xf32> -> vector<32x256xf32>
    %c1_292 = arith.constant 1 : index
    %c0_293 = arith.constant 0 : index
    %c0_294 = arith.constant 0 : index
    %745 = vector.load %arg35[%c1_292, %c0_293, %c0_294] : memref<2x1x256xf32, #tpu.memory_space<vmem>>, vector<1x1x256xf32>
    %746 = vector.shape_cast %745 : vector<1x1x256xf32> to vector<1x256xf32>
    %747 = vector.broadcast %746 : vector<1x256xf32> to vector<32x256xf32>
    %748 = arith.addf %744, %747 : vector<32x256xf32>
    %cst_295 = arith.constant 1.702000e+00 : f32
    %749 = vector.broadcast %cst_295 : f32 to vector<32x256xf32>
    %750 = arith.mulf %749, %748 : vector<32x256xf32>
    %751 = arith.negf %750 : vector<32x256xf32>
    %752 = math.exp %751 : vector<32x256xf32>
    %cst_296 = arith.constant 1.000000e+00 : f32
    %753 = vector.broadcast %cst_296 : f32 to vector<32x256xf32>
    %754 = arith.addf %753, %752 : vector<32x256xf32>
    %755 = arith.divf %753, %754 : vector<32x256xf32>
    %756 = arith.mulf %748, %755 : vector<32x256xf32>
    %757 = arith.truncf %756 : vector<32x256xf32> to vector<32x256xbf16>
    %c1_297 = arith.constant 1 : index
    %c0_298 = arith.constant 0 : index
    %c0_299 = arith.constant 0 : index
    %758 = vector.load %arg36[%c1_297, %c0_298, %c0_299] : memref<2x256x64xbf16, #tpu.memory_space<vmem>>, vector<1x256x64xbf16>
    %759 = vector.shape_cast %758 : vector<1x256x64xbf16> to vector<256x64xbf16>
    %cst_300 = arith.constant dense<0.000000e+00> : vector<32x64xf32>
    %760 = tpu.matmul %757, %759, %cst_300 {dimension_numbers = #tpu.dot_dimension_numbers<[1], [0], [0], [1], [0, 0, 1, 1], [], []>} : vector<32x256xbf16>, vector<256x64xbf16>, vector<32x64xf32> -> vector<32x64xf32>
    %c1_301 = arith.constant 1 : index
    %c0_302 = arith.constant 0 : index
    %c0_303 = arith.constant 0 : index
    %761 = vector.load %arg37[%c1_301, %c0_302, %c0_303] : memref<2x1x64xf32, #tpu.memory_space<vmem>>, vector<1x1x64xf32>
    %762 = vector.shape_cast %761 : vector<1x1x64xf32> to vector<1x64xf32>
    %763 = vector.broadcast %762 : vector<1x64xf32> to vector<32x64xf32>
    %764 = arith.addf %760, %763 : vector<32x64xf32>
    %765 = arith.addf %716, %764 : vector<32x64xf32>
    %c0_304 = arith.constant 0 : index
    %c0_305 = arith.constant 0 : index
    %766 = vector.load %arg21[%c0_304, %c0_305] : memref<1x64xf32, #tpu.memory_space<vmem>>, vector<1x64xf32>
    %c0_306 = arith.constant 0 : index
    %c0_307 = arith.constant 0 : index
    %767 = vector.load %arg22[%c0_306, %c0_307] : memref<1x64xf32, #tpu.memory_space<vmem>>, vector<1x64xf32>
    %cst_308 = arith.constant dense<0.000000e+00> : vector<32xf32>
    %768 = vector.multi_reduction <add>, %765, %cst_308 [1] : vector<32x64xf32> to vector<32xf32>
    %769 = vector.shape_cast %768 : vector<32xf32> to vector<32x1xf32>
    %cst_309 = arith.constant 6.400000e+01 : f32
    %770 = vector.broadcast %cst_309 : f32 to vector<32x1xf32>
    %771 = arith.divf %769, %770 : vector<32x1xf32>
    %772 = vector.broadcast %771 : vector<32x1xf32> to vector<32x64xf32>
    %773 = arith.subf %765, %772 : vector<32x64xf32>
    %774 = arith.mulf %773, %773 : vector<32x64xf32>
    %cst_310 = arith.constant dense<0.000000e+00> : vector<32xf32>
    %775 = vector.multi_reduction <add>, %774, %cst_310 [1] : vector<32x64xf32> to vector<32xf32>
    %776 = vector.shape_cast %775 : vector<32xf32> to vector<32x1xf32>
    %cst_311 = arith.constant 6.400000e+01 : f32
    %777 = vector.broadcast %cst_311 : f32 to vector<32x1xf32>
    %778 = arith.divf %776, %777 : vector<32x1xf32>
    %cst_312 = arith.constant 9.99999974E-6 : f32
    %779 = vector.broadcast %cst_312 : f32 to vector<32x1xf32>
    %780 = arith.addf %778, %779 : vector<32x1xf32>
    %781 = math.rsqrt %780 : vector<32x1xf32>
    %782 = vector.broadcast %781 : vector<32x1xf32> to vector<32x64xf32>
    %783 = arith.mulf %773, %782 : vector<32x64xf32>
    %784 = vector.broadcast %766 : vector<1x64xf32> to vector<32x64xf32>
    %785 = arith.mulf %783, %784 : vector<32x64xf32>
    %786 = vector.broadcast %767 : vector<1x64xf32> to vector<32x64xf32>
    %787 = arith.addf %785, %786 : vector<32x64xf32>
    %c0_313 = arith.constant 0 : index
    %c0_314 = arith.constant 0 : index
    %788 = vector.load %arg24[%c0_313, %c0_314] : memref<4x32xf32, #tpu.memory_space<vmem>>, vector<4x32xf32>
    %cst_315 = arith.constant dense<0.000000e+00> : vector<4x64xf32>
    %789 = tpu.matmul %788, %787, %cst_315 {dimension_numbers = #tpu.dot_dimension_numbers<[1], [0], [0], [1], [0, 0, 1, 1], [], []>} : vector<4x32xf32>, vector<32x64xf32>, vector<4x64xf32> -> vector<4x64xf32>
    %790 = arith.truncf %789 : vector<4x64xf32> to vector<4x64xbf16>
    %c0_316 = arith.constant 0 : index
    %c0_317 = arith.constant 0 : index
    %791 = vector.load %arg23[%c0_316, %c0_317] : memref<64x32xbf16, #tpu.memory_space<vmem>>, vector<64x32xbf16>
    %cst_318 = arith.constant dense<0.000000e+00> : vector<4x32xf32>
    %792 = tpu.matmul %790, %791, %cst_318 {dimension_numbers = #tpu.dot_dimension_numbers<[1], [0], [0], [1], [0, 0, 1, 1], [], []>} : vector<4x64xbf16>, vector<64x32xbf16>, vector<4x32xf32> -> vector<4x32xf32>
    %793 = arith.mulf %411, %411 : vector<2x32xf32>
    %cst_319 = arith.constant dense<0.000000e+00> : vector<2xf32>
    %794 = vector.multi_reduction <add>, %793, %cst_319 [1] : vector<2x32xf32> to vector<2xf32>
    %795 = vector.shape_cast %794 : vector<2xf32> to vector<2x1xf32>
    %cst_320 = arith.constant 9.99999996E-13 : f32
    %796 = vector.broadcast %cst_320 : f32 to vector<2x1xf32>
    %797 = arith.addf %795, %796 : vector<2x1xf32>
    %798 = math.rsqrt %797 : vector<2x1xf32>
    %799 = vector.broadcast %798 : vector<2x1xf32> to vector<2x32xf32>
    %800 = arith.mulf %411, %799 : vector<2x32xf32>
    %801 = arith.mulf %792, %792 : vector<4x32xf32>
    %cst_321 = arith.constant dense<0.000000e+00> : vector<4xf32>
    %802 = vector.multi_reduction <add>, %801, %cst_321 [1] : vector<4x32xf32> to vector<4xf32>
    %803 = vector.shape_cast %802 : vector<4xf32> to vector<4x1xf32>
    %cst_322 = arith.constant 9.99999996E-13 : f32
    %804 = vector.broadcast %cst_322 : f32 to vector<4x1xf32>
    %805 = arith.addf %803, %804 : vector<4x1xf32>
    %806 = math.rsqrt %805 : vector<4x1xf32>
    %807 = vector.broadcast %806 : vector<4x1xf32> to vector<4x32xf32>
    %808 = arith.mulf %792, %807 : vector<4x32xf32>
    %809 = tpu.transpose %808, [1, 0] : vector<4x32xf32> -> vector<32x4xf32>
    %cst_323 = arith.constant dense<0.000000e+00> : vector<2x4xf32>
    %810 = tpu.matmul %800, %809, %cst_323 {dimension_numbers = #tpu.dot_dimension_numbers<[1], [0], [0], [1], [0, 0, 1, 1], [], []>} : vector<2x32xf32>, vector<32x4xf32>, vector<2x4xf32> -> vector<2x4xf32>
    %c0_324 = arith.constant 0 : index
    %c0_325 = arith.constant 0 : index
    %811 = vector.load %arg25[%c0_324, %c0_325] : memref<1x1xf32, #tpu.memory_space<vmem>>, vector<1x1xf32>
    %812 = vector.broadcast %811 : vector<1x1xf32> to vector<2x4xf32>
    %813 = arith.mulf %810, %812 : vector<2x4xf32>
    %c0_326 = arith.constant 0 : index
    %c0_327 = arith.constant 0 : index
    %814 = vector.load %arg38[%c0_326, %c0_327] : memref<2x4xf32, #tpu.memory_space<vmem>>, vector<2x4xf32>
    tpu.vector_store %arg38[%c0_326, %c0_327], %813 {strides = array<i32>} : memref<2x4xf32, #tpu.memory_space<vmem>>, vector<2x4xf32>,
    return
  }
}

</mosaic_0001>

<bundles_post_ra>
// kernel: custom_clip_forward.1
= control target key start
LH: loop header
LB: loop body
LE: loop exit
PB: predicated region body
PF: predicated region fallthrough
CT: control target
= control target key end

     0   :  { %s11269_s6 = smov 1   ;;  %s11270_s10 = smov 2   ;;  %s13179_s0 = inlined_call_operand.smem [shape: u32[39], index: -1, kind: input, shape index: {}] }
   0x1   :  { %s11328_s5 = sld [smem:[%s13179_s0]]   ;;  %s11271_s14 = smov 3  }
   0x2   :  { %s11333_s9 = sld [smem:[%s13179_s0 + %s11269_s6]]   ;;  %s11272_s18 = smov 4  }
   0x3   :  { %s11338_s13 = sld [smem:[%s13179_s0 + %s11270_s10]]   ;;  %s11273_s22 = smov 5  }
   0x4   :  { %s11343_s17 = sld [smem:[%s13179_s0 + %s11271_s14]]   ;;  %s11274_s26 = smov 6  }
   0x5   :  { %s11348_s21 = sld [smem:[%s13179_s0 + %s11272_s18]]   ;;  %s11275_s30 = smov 7  }
   0x6   :  { %s11353_s25 = sld [smem:[%s13179_s0 + %s11273_s22]]   ;;  %s11276_s4 = smov 8  }
   0x7   :  { %s11358_s29 = sld [smem:[%s13179_s0 + %s11274_s26]]   ;;  %s11277_s10 = smov 9  }
   0x8   :  { %s11363_s3 = sld [smem:[%s13179_s0 + %s11275_s30]]   ;;  %s11278_s15 = smov 10  }
   0x9   :  { %s11368_s8 = sld [smem:[%s13179_s0 + %s11276_s4]]   ;;  %s11279_s20 = smov 11  }
   0xa   :  { %s11373_s14 = sld [smem:[%s13179_s0 + %s11277_s10]]   ;;  %s11280_s26 = smov 12  }
   0xb   :  { %s11378_s19 = sld [smem:[%s13179_s0 + %s11278_s15]]   ;;  %s11281_s1 = smov 13  }
   0xc   :  { %13195 = sst [smem:[#allocation6_spill]] %s11353_s25  ;;  %s11282_s7 = smov 14  }
   0xd   :  { %13196 = sst [smem:[#allocation7_spill]] %s11358_s29  ;;  %s11283_s15 = smov 15  }
   0xe   :  { %13197 = sst [smem:[#allocation8_spill]] %s11363_s3  ;;  %s11284_s22 = smov 16  }
   0xf   :  { %s11383_s24 = sld [smem:[%s13179_s0 + %s11279_s20]]   ;;  %s11285_s28 = smov 17  }
  0x10   :  { %s11388_s30 = sld [smem:[%s13179_s0 + %s11280_s26]]   ;;  %s11294_s10 = smov 26  }
  0x11   :  { %s11393_s6 = sld [smem:[%s13179_s0 + %s11281_s1]]   ;;  %s11295_s16 = smov 27  }
  0x12   :  { %s11398_s12 = sld [smem:[%s13179_s0 + %s11282_s7]]   ;;  %s11286_s7 = smov 18  }
  0x13   :  { %s11403_s20 = sld [smem:[%s13179_s0 + %s11283_s15]]   ;;  %s11287_s15 = smov 19  }
  0x14   :  { %s11408_s27 = sld [smem:[%s13179_s0 + %s11284_s22]]   ;;  %s11288_s22 = smov 20  }
  0x15   :  { %s11413_s4 = sld [smem:[%s13179_s0 + %s11285_s28]]   ;;  %s11289_s28 = smov 21  }
  0x16   :  { %s11418_s29 = sld [smem:[%s13179_s0 + %s11286_s7]]   ;;  %s11290_s7 = smov 22  }
  0x17   :  { %s11423_s25 = sld [smem:[%s13179_s0 + %s11287_s15]]   ;;  %s11291_s15 = smov 23  }
  0x18   :  { %s11428_s3 = sld [smem:[%s13179_s0 + %s11288_s22]]   ;;  %s11292_s22 = smov 24  }
  0x19   :  { %13198 = sst [smem:[#allocation9_spill]] %s11403_s20  ;;  %s11296_s23 = smov 28  }
  0x1a   :  { %s11297_s1 = smov 29  }
  0x1b   :  { %13199 = sst [smem:[#allocation10_spill]] %s11413_s4 }
  0x1c   :  { %13200 = sst [smem:[#allocation11_spill]] %s11418_s29 }
  0x1d   :  { %13201 = sst [smem:[#allocation12_spill]] %s11423_s25 }
  0x1e   :  { %13202 = sst [smem:[#allocation13_spill]] %s11428_s3 }
  0x1f   :  { %s11433_s4 = sld [smem:[%s13179_s0 + %s11289_s28]]   ;;  %s11293_s28 = smov 25  }
  0x20   :  { %s11438_s29 = sld [smem:[%s13179_s0 + %s11290_s7]]   ;;  %s11302_s7 = smov 34  }
  0x21   :  { %s11443_s25 = sld [smem:[%s13179_s0 + %s11291_s15]]  }
  0x22   :  { %s11448_s3 = sld [smem:[%s13179_s0 + %s11292_s22]]  }
  0x23   :  { %s11471_s20 = sld [smem:[%s13179_s0 + %s11297_s1]]   ;;  %s11301_s1 = smov 33  }
  0x25   :  { %13203 = sst [smem:[#allocation14_spill]] %s11433_s4 }
  0x26   :  { %13204 = sst [smem:[#allocation15_spill]] %s11438_s29 }
  0x27   :  { %13205 = sst [smem:[#allocation16_spill]] %s11443_s25 }
  0x28   :  { %13206 = sst [smem:[#allocation17_spill]] %s11448_s3 }
  0x29   :  { %s9067_s4 = sld [smem:[%s13179_s0 + %s11293_s28]]  }
  0x2a   :  { %s11456_s29 = sld [smem:[%s13179_s0 + %s11294_s10]]   ;;  %s11298_s10 = smov 30  }
  0x2b   :  { %s11461_s25 = sld [smem:[%s13179_s0 + %s11295_s16]]   ;;  %s11299_s16 = smov 31  }
  0x2c   :  { %s11466_s3 = sld [smem:[%s13179_s0 + %s11296_s23]]   ;;  %s11300_s23 = smov 32  }
  0x2d   :  { %13209 = sst [smem:[#allocation20_spill]] %s11471_s20  ;;  %s11305_s20 = smov 37  }
  0x2e   :  { %s11486_s28 = sld [smem:[%s13179_s0 + %s11300_s23]]   ;;  %s11304_s23 = smov 36  }
  0x2f   :  { %v82_v0 = vstv %s9067_s4  ;;  %s11303_s4 = smov 35  }
  0x30   :  { %13207 = sst [smem:[#allocation18_spill]] %s11456_s29  ;;  %83 = vst [vmem:[#allocation2] sm:$0x1] %v82_v0 }
  0x31   :  { %13208 = sst [smem:[#allocation19_spill]] %s11461_s25 }
  0x32   :  { %s11476_s29 = sld [smem:[%s13179_s0 + %s11298_s10]]  }
  0x33   :  { %s11481_s25 = sld [smem:[%s13179_s0 + %s11299_s16]]  }
  0x34   :  { %13212 = sst [smem:[#allocation23_spill]] %s11486_s28 }
  0x35   :  { %s11491_s10 = sld [smem:[%s13179_s0 + %s11301_s1]]  }
  0x36   :  { %s11496_s16 = sld [smem:[%s13179_s0 + %s11302_s7]]  }
  0x37   :  { %s11501_s22 = sld [smem:[%s13179_s0 + %s11303_s4]]  }
  0x38   :  { %13210 = sst [smem:[#allocation21_spill]] %s11476_s29  ;;  %s11306_s29 = smov 38  }
  0x39   :  { %13211 = sst [smem:[#allocation22_spill]] %s11481_s25 }
  0x3a   :  { %s11506_s25 = sld [smem:[%s13179_s0 + %s11304_s23]]  }
  0x3b   :  { %13213 = sst [smem:[#allocation24_spill]] %s11491_s10 }
  0x3c   :  { %13214 = sst [smem:[#allocation25_spill]] %s11496_s16 }
  0x3d   :  { %s11511_s10 = sld [smem:[%s13179_s0 + %s11305_s20]]  }
  0x3e   :  { %s11516_s16 = sld [smem:[%s13179_s0 + %s11306_s29]]  }
  0x3f   :  { %v10691_v1 = vld [vmem:[%s11338_s13] sm:$0xff]   ;;  %v11307_v2 = vmov 0   ;;  %v10692_v3 = vld [vmem:[%s11338_s13 + $0x8] sm:$0xff]   ;;  %v10693_v4 = vld [vmem:[%s11338_s13 + $0x10] sm:$0xff]   ;;  %vm264_vm0 = vcmask 523264  }
  0x40   :  { %268 = vmatprep.subr.bf16.mxu0 %v11307_v2  ;;  %501 = vmatprep.mubr.bf16.mxu1 %v11307_v2  ;;  %v10694_v5 = vld [vmem:[%s11338_s13 + $0x18] sm:$0xff]   ;;  %v163_v6 = vld [vmem:[%s11328_s5 + $0x8] sm:$0xff]  ;;  %v10695_v8 = vld [vmem:[%s11338_s13 + $0x20] sm:$0xff]  }
  0x41   :  { %269 = vmatpush1.bf16.msra.mxu0 %v10691_v1  ;;  %10690 = vset.pattern.permute.xlu0 %v11307_v2  ;;  %v165_v7 = vld [vmem:[%s11328_s5 + $0x18] sm:$0xff]  ;;  %v10696_v10 = vld [vmem:[%s11338_s13 + $0x28] sm:$0xff]   ;;  %v10697_v11 = vld [vmem:[%s11338_s13 + $0x30] sm:$0xff]  }
  0x42   :  { %270 = vmatprep.subr.bf16.mxu0 %v11307_v2  ;;  %v167_v9 = vpack.c.bf16 %v165_v7, %v163_v6  ;;  %v10698_v12 = vld [vmem:[%s11338_s13 + $0x38] sm:$0xff]   ;;  %v10699_v13 = vld [vmem:[%s11338_s13 + $0x40] sm:$0xff]   ;;  %v10700_v14 = vld [vmem:[%s11338_s13 + $0x48] sm:$0xff]  }
  0x43   :  { %v10701_v15 = vld [vmem:[%s11338_s13 + $0x50] sm:$0xff]   ;;  %v10702_v16 = vld [vmem:[%s11338_s13 + $0x58] sm:$0xff]   ;;  %v162_v17 = vld [vmem:[%s11328_s5] sm:$0xff] }
  0x44   :  { %9093 = vmatprep.mubr.msk.bf16.mxu0 %vm264_vm0, %v167_v9  ;;  %v164_v18 = vld [vmem:[%s11328_s5 + $0x10] sm:$0xff] }
  0x45   :  { %271 = vmatpush1.bf16.msra.mxu0 %v10692_v3  ;;  %v166_v19 = vpack.c.bf16 %v164_v18, %v162_v17 }
  0x46   :  { %272 = vmatprep.subr.bf16.mxu0 %v11307_v2 }
  0x49   :  { %273 = vmatpush1.bf16.msra.mxu0 %v10693_v4 }
  0x4a   :  { %274 = vmatprep.subr.bf16.mxu0 %v11307_v2 }
  0x4d   :  { %275 = vmatpush1.bf16.msra.mxu0 %v10694_v5 }
  0x4e   :  { %276 = vmatprep.subr.bf16.mxu0 %v11307_v2 }
  0x51   :  { %277 = vmatpush1.bf16.msra.mxu0 %v10695_v8 }
  0x52   :  { %278 = vmatprep.subr.bf16.mxu0 %v11307_v2 }
  0x55   :  { %279 = vmatpush1.bf16.msra.mxu0 %v10696_v10 }
  0x56   :  { %280 = vmatprep.subr.bf16.mxu0 %v11307_v2 }
  0x59   :  { %281 = vmatpush1.bf16.msra.mxu0 %v10697_v11 }
  0x5a   :  { %282 = vmatprep.subr.bf16.mxu0 %v11307_v2 }
  0x5d   :  { %283 = vmatpush1.bf16.msra.mxu0 %v10698_v12 }
  0x5e   :  { %284 = vmatprep.subr.bf16.mxu0 %v11307_v2 }
  0x61   :  { %285 = vmatpush1.bf16.msra.mxu0 %v10699_v13 }
  0x62   :  { %286 = vmatprep.subr.bf16.mxu0 %v11307_v2 }
  0x65   :  { %287 = vmatpush1.bf16.msra.mxu0 %v10700_v14 }
  0x66   :  { %288 = vmatprep.subr.bf16.mxu0 %v11307_v2 }
  0x69   :  { %289 = vmatpush1.bf16.msra.mxu0 %v10701_v15 }
  0x6a   :  { %290 = vmatprep.subr.bf16.mxu0 %v11307_v2 }
  0x6d   :  { %291 = vmatpush1.bf16.msra.mxu0 %v10702_v16 }
  0x70   :  { %301 = vmatmul.mubr.bf16.vlgmr.msra.gmra.mrb[0].mxu0 %v166_v19 }
  0x71   :  { %84 = vsyncpa [#allocation4], 0  ;;  %v309_v20 = vld [vmem:[%s11333_s9] sm:$0xff]  ;;  %v10706_v6 = vld [vmem:[%s11378_s19 + $0x14] ss:$8 sps:$4 sm:$0xff]   ;;  %vm11309_vm1 = vmmov 0  }
  0x72   :  { %v9094_v46 = vld [vmem:[%s11343_s17] ss:$0 sm:$0xff]  ;;  %v10703_v4 = vld [vmem:[%s11378_s19 + $0x4] ss:$8 sps:$4 sm:$0xff]   ;;  %v10708_v7 = vld [vmem:[%s11378_s19 + $0x10] ss:$8 sps:$4 sm:$0xff]  }
  0x73   :  { %v9095_v48 = vld [vmem:[%s11348_s21] ss:$0 sm:$0xff]  ;;  %469 = vmatprep.subr.bf16.mxu1 %v10703_v4  ;;  %v10709_v8 = vld [vmem:[%s11378_s19 + $0x24] ss:$8 sps:$4 sm:$0xff]   ;;  %v10712_v10 = vld [vmem:[%s11378_s19 + $0x34] ss:$8 sps:$4 sm:$0xff]  }
  0x74   :  { %v10705_v5 = vld [vmem:[%s11378_s19] ss:$8 sps:$4 sm:$0xff]   ;;  %v10714_v11 = vld [vmem:[%s11378_s19 + $0x30] ss:$8 sps:$4 sm:$0xff]   ;;  %s11310_s0 = smov 64   ;;  %vm517_vm2 = vcmask 130048  }
  0x75   :  { %470 = vmatpush1.bf16.msra.mxu1 %v10705_v5  ;;  %v10711_v9 = vld [vmem:[%s11378_s19 + $0x20] ss:$8 sps:$4 sm:$0xff]   ;;  %vm643_vm3 = vcmask 1043456   ;;  %vm613_vm5 = vcmask 64512   ;;  %s11312_s5 = smov 48   ;;  %s11313_s9 = smov 112  }
  0x76   :  { %471 = vmatprep.subr.bf16.mxu1 %v10706_v6  ;;  %s11314_s13 = smov 32   ;;  %s11315_s17 = smov 96   ;;  %vm1421_vm6 = vcmask 261120   ;;  %vm1424_vm7 = vcmask 392192   ;;  %vm3407_vm8 = vcmask 1041409   ;;  %vm3410_vm9 = vcmask 517120  }
  0x77   :  { %s11316_s21 = smov 16   ;;  %s11317_s28 = smov 80   ;;  %vm8925_vm11 = vcmask 254976   ;;  %vm8933_vm12 = vcmask 257024   ;;  %vm9027_vm13 = vcmask 25600  }
  0x78   :  { %s13215_s4 = sld [smem:[#allocation9_spill]]  ;;  %s13216_s15 = sld [smem:[#allocation11_spill]] }
  0x79   :  { %472 = vmatpush1.bf16.msra.mxu1 %v10708_v7  ;;  %s13217_s18 = sld [smem:[#allocation10_spill]]  ;;  %s13218_s23 = sld [smem:[#allocation12_spill]] }
  0x7a   :  { %473 = vmatprep.subr.bf16.mxu1 %v10709_v8  ;;  %s13227_s26 = sld [smem:[#allocation22_spill]]  ;;  %s13228_s20 = sld [smem:[#allocation25_spill]] }
  0x7b   :  { %s13229_s1 = sld [smem:[#allocation23_spill]]  ;;  %s13230_s2 = sld [smem:[#allocation24_spill]] }
  0x7c   :  { %s11319_s29 = smov [#allocation3]  }
  0x7d   :  { %474 = vmatpush1.bf16.msra.mxu1 %v10711_v9  ;;  %s9035_s7 = sshll.u32 %s11319_s29, 4  ;;  %s9036_s7 = int_to_ptr.vmem [resolvable:$true] %s9035_s7 }
  0x7e   :  { %475 = vmatprep.subr.bf16.mxu1 %v10712_v10  ;;  %s11245_s11 = scalar_lea.vmem %s9036_s7, 32  ;;  %p11250_p1 = scmp.lt.s32.totalorder %s9036_s7, %s9036_s7 }
  0x7f   :  { %p11246_p0 = scmp.ne.s32.totalorder %s9036_s7, %s11245_s11  ;;  %p11251_p2 = scmp.lt.s32.totalorder %s11245_s11, %s11245_s11 }
  0x81   :  { %476 = vmatpush1.bf16.msra.mxu1 %v10714_v11  ;;  %p11252_p3 = por %p11251_p2, %p11250_p1 }
  0x83   :  { %p11253_p4 = pnand %p11252_p3, %p11246_p0 }
 0x143   :  { %v302_v21 = vpop.f32.mrb[0].mxu0 }
 0x144   :  { %v310_v22 = vadd.f32 %v309_v20, %v302_v21  ;;  %v304_v23 = vpop.f32.mrb[1].mxu0 }
 0x145   :  { %v305_v24 = vpop.f32.mrb[2].mxu0 }
 0x146   :  { %v311_v25 = vadd.f32 %v309_v20, %v305_v24  ;;  %v307_v26 = vpop.f32.mrb[3].mxu0  ;;  %v314_v27 = vsel %vm264_vm0, %v310_v22, 0.0  ;;  %v9096_v20 = vld [vmem:[%s11368_s8] ss:$0 sm:$0xff] }
 0x147   :  { %315 = vadd.xlane.f32.xlu0 %v314_v27  ;;  %v9097_v24 = vld [vmem:[%s11373_s14] ss:$0 sm:$0xff] }
 0x148   :  { %v317_v28 = vsel %vm264_vm0, %v311_v25, 0.0 }
 0x14b   :  { %318 = vadd.xlane.f32.xlu0 %v317_v28 }
 0x1d4   :  { %v316_v29 = vpop.xlane.xlu0 %315 }
 0x1d5   :  { %v321_v30 = vmul.f32 0.015625, %v316_v29  ;;  %v357_v29 = vlaneseq }
 0x1d7   :  { %v323_v31 = vsub.f32 %v310_v22, %v321_v30  ;;  %v11579_v30 = vshrl.u32 %v357_v29, 7 }
 0x1d8   :  { %v319_v32 = vpop.xlane.xlu0 %318 }
 0x1d9   :  { %v322_v33 = vmul.f32 0.015625, %v319_v32  ;;  %v325_v34 = vmul.f32 %v323_v31, %v323_v31  ;;  %v11584_v32 = vsub.s32 0, %v11579_v30 }
 0x1db   :  { %v324_v35 = vsub.f32 %v311_v25, %v322_v33  ;;  %v327_v36 = vsel %vm264_vm0, %v325_v34, 0.0  ;;  %v414_v33 = vld [vmem:[%s11383_s24] sm:$0x3] }
 0x1dc   :  { %328 = vadd.xlane.f32.xlu1 %v327_v36  ;;  %v419_v34 = vrot.slane %v414_v33, %v11584_v32 }
 0x1dd   :  { %v326_v37 = vmul.f32 %v324_v35, %v324_v35 }
 0x1df   :  { %v330_v38 = vsel %vm264_vm0, %v326_v37, 0.0 }
 0x1e0   :  { %331 = vadd.xlane.f32.xlu1 %v330_v38 }
 0x269   :  { %v329_v39 = vpop.xlane.xlu1 %328 }
 0x26a   :  { %v333_v40 = vmul.f32 0.015625, %v329_v39 }
 0x26c   :  { %v335_v41 = vadd.f32 1e-05, %v333_v40 }
 0x26d   :  { %v332_v42 = vpop.xlane.xlu1 %331 }
 0x26e   :  { %10887 = vrsqrt.f32 %v335_v41  ;;  %v334_v43 = vmul.f32 0.015625, %v332_v42 }
 0x270   :  { %v336_v44 = vadd.f32 1e-05, %v334_v43 }
 0x272   :  { %10889 = vrsqrt.f32 %v336_v44 }
 0x278   :  { %v10888_v45 = vpop.eup %10887 }
 0x279   :  { %v339_v47 = vmul.f32 %v10888_v45, %v323_v31  ;;  %v11308_v31 = vmov 0.0  }
 0x27a   :  { %9879 = vmatprep.subr.bf16.mxu1 %v11308_v31  ;;  %9903 = vmatprep.subr.bf16.mxu0 %v11308_v31 }
 0x27b   :  { %v347_v49 = vmul.f32 %v9094_v46, %v339_v47  ;;  %9905 = vmatprep.mubr.msk.bf16.mxu0 %vm11309_vm1, %v11308_v31 }
 0x27c   :  { %v10890_v50 = vpop.eup %10889 }
 0x27d   :  { %v11556_v51 = vadd.f32 %v9095_v48, %v347_v49  ;;  %v340_v52 = vmul.f32 %v10890_v50, %v324_v35  ;;  %v11593_v35 = vsub.s32 1, %v11579_v30 }
 0x27f   :  { %v363_v53 = vsel %vm264_vm0, %v11556_v51, 0.0  ;;  %v348_v54 = vmul.f32 %v9094_v46, %v340_v52  ;;  %v423_v39 = vrot.slane %v414_v33, %v11593_v35 }
 0x280   :  { %364 = vadd.xlane.f32.xlu0 %v363_v53 }
 0x281   :  { %v11560_v55 = vadd.f32 %v9095_v48, %v348_v54  ;;  %v11623_v54 = vand.u32 127, %v357_v29 }
 0x283   :  { %v366_v56 = vsel %vm264_vm0, %v11560_v55, 0.0  ;;  %vm359_vm4 = vcmp.lt.s32.totalorder %v11623_v54, 5  ;;  %vm3546_vm10 = vcmp.le.s32.totalorder %v11623_v54, %v11579_v30 }
 0x284   :  { %367 = vadd.xlane.f32.xlu1 %v366_v56  ;;  %v11311_v56 = vmov -1e+30  }
 0x30d   :  { %v365_v57 = vpop.xlane.xlu0 %364 }
 0x30e   :  { %v369_v58 = vmul.f32 0.015625, %v365_v57  ;;  %v11627_v57 = vsel %vm359_vm4, 0.0, %v11311_v56 }
 0x310   :  { %v371_v59 = vsub.f32 %v11556_v51, %v369_v58 }
 0x311   :  { %v368_v60 = vpop.xlane.xlu1 %367 }
 0x312   :  { %v370_v61 = vmul.f32 0.015625, %v368_v60  ;;  %v373_v62 = vmul.f32 %v371_v59, %v371_v59 }
 0x314   :  { %v372_v63 = vsub.f32 %v11560_v55, %v370_v61  ;;  %v375_v0 = vsel %vm264_vm0, %v373_v62, 0.0 }
 0x315   :  { %376 = vadd.xlane.f32.xlu0 %v375_v0 }
 0x316   :  { %v374_v1 = vmul.f32 %v372_v63, %v372_v63 }
 0x318   :  { %v378_v3 = vsel %vm264_vm0, %v374_v1, 0.0 }
 0x319   :  { %379 = vadd.xlane.f32.xlu1 %v378_v3 }
 0x3a2   :  { %v377_v12 = vpop.xlane.xlu0 %376 }
 0x3a3   :  { %v381_v13 = vmul.f32 0.015625, %v377_v12 }
 0x3a5   :  { %v383_v14 = vadd.f32 1e-05, %v381_v13 }
 0x3a6   :  { %v380_v15 = vpop.xlane.xlu1 %379 }
 0x3a7   :  { %10891 = vrsqrt.f32 %v383_v14  ;;  %v382_v16 = vmul.f32 0.015625, %v380_v15 }
 0x3a9   :  { %v384_v17 = vadd.f32 1e-05, %v382_v16 }
 0x3ab   :  { %10893 = vrsqrt.f32 %v384_v17 }
 0x3b1   :  { %v10892_v18 = vpop.eup %10891 }
 0x3b2   :  { %v387_v19 = vmul.f32 %v10892_v18, %v371_v59 }
 0x3b4   :  { %v395_v23 = vmul.f32 %v9096_v20, %v387_v19 }
 0x3b5   :  { %v10894_v21 = vpop.eup %10893 }
 0x3b6   :  { %v388_v22 = vmul.f32 %v10894_v21, %v372_v63  ;;  %v403_v26 = vadd.f32 %v9097_v24, %v395_v23 }
 0x3b8   :  { %v396_v25 = vmul.f32 %v9096_v20, %v388_v22 }
 0x3ba   :  { %v404_v27 = vadd.f32 %v9097_v24, %v396_v25 }
 0x3bc   :  { %v405_v28 = vpack.c.bf16 %v404_v27, %v403_v26 }
 0x3be   :  { %9106 = vmatmul.mubr.msk.bf16.vlgmr.msra.gmra.mrb[0].mxu1 %vm264_vm0, %v405_v28 }
 0x3bf   :  { %9881 = vmatprep.mubr.msk.bf16.mxu1 %vm11309_vm1, %v11308_v31 }
 0x491   :  { %v503_v36 = vpop.f32.mrb[0].mxu1 }
 0x492   :  { %v504_v37 = vadd.f32 %v503_v36, %v419_v34  ;;  %v505_v38 = vpop.f32.mrb[1].mxu1 }
 0x493   :  { %v507_v40 = vpop.f32.mrb[2].mxu1  ;;  %v506_v49 = vadd.f32 %v505_v38, %v423_v39 }
 0x494   :  { %v11596_v41 = vpack.c.bf16 %v504_v37, %v504_v37  ;;  %v508_v42 = vadd.f32 %v507_v40, %v419_v34  ;;  %v509_v43 = vpop.f32.mrb[3].mxu1 }
 0x495   :  { %v11598_v44 = vadd.f32 %v509_v43, %v423_v39  ;;  %v11614_v52 = vpack.c.bf16 %v506_v49, %v506_v49 }
 0x496   :  { %v11600_v45 = vpack.c.bf16 %v508_v42, %v508_v42  ;;  %515 = vrot.lane.b32.xlu0 %v11596_v41, %s11310_s0 }
 0x497   :  { %v645_v53 = vsel %vm643_vm3, %v11614_v52, 0  ;;  %v11647_v23 = vpack.c.bf16 %v11598_v44, %v11598_v44 }
 0x498   :  { %565 = vrot.lane.b32.xlu1 %v11600_v45, %s11310_s0 }
 0x499   :  { %v691_v27 = vsel %vm643_vm3, %v11647_v23, 0 }
 0x508   :  { %v516_v46 = vpop.permute.xlu0 %515 }
 0x509   :  { %v522_v47 = vsel %vm517_vm2, %v516_v46, 0 }
 0x50a   :  { %9880 = vmatpush3.bf16.xpose.msra.mxu1 %v522_v47  ;;  %v566_v48 = vpop.permute.xlu1 %565 }
 0x50b   :  { %9885 = vmatprep.subr.bf16.mxu1 %v11308_v31  ;;  %v571_v50 = vsel %vm517_vm2, %v566_v48, 0 }
 0x511   :  { %9882 = vmatmul.mubr.msk.bf16.vlgmr.msra.gmra.mrb[4].mxu1 %vm517_vm2, %v11596_v41 }
 0x512   :  { %9886 = vmatpush3.bf16.xpose.msra.mxu1 %v571_v50  ;;  %9887 = vmatprep.mubr.msk.bf16.mxu1 %vm11309_vm1, %v11308_v31 }
 0x513   :  { %9891 = vmatprep.subr.bf16.mxu1 %v11308_v31 }
 0x519   :  { %9888 = vmatmul.mubr.msk.bf16.vlgmr.msra.gmra.mrb[8].mxu1 %vm517_vm2, %v11600_v45 }
 0x51a   :  { %9892 = vmatpush3.bf16.msra.mxu1 %v645_v53  ;;  %9893 = vmatprep.mubr.msk.bf16.mxu1 %vm11309_vm1, %v11308_v31 }
 0x51b   :  { %9897 = vmatprep.subr.bf16.mxu1 %v11308_v31 }
 0x5e4   :  { %v558_v58 = vpop.f32.mrb[4].mxu1 }
 0x5e5   :  { %v559_v59 = vadd.f32 %v558_v58, %v11627_v57  ;;  %v9883_v60 = vpop.f32.mrb[5].mxu1 }
 0x5e6   :  { %v561_v61 = vpop.f32.mrb[6].mxu1 }
 0x5e7   :  { %v9884_v62 = vpop.f32.mrb[7].mxu1  ;;  %v614_v63 = vsel %vm613_vm5, %v559_v59, -inf }
 0x5e8   :  { %615 = vmax.xlane.f32.xlu1 %v614_v63 }
 0x5ec   :  { %v607_v0 = vpop.f32.mrb[8].mxu1 }
 0x5ed   :  { %v608_v1 = vadd.f32 %v607_v0, %v11627_v57  ;;  %v9889_v3 = vpop.f32.mrb[9].mxu1 }
 0x5ee   :  { %v610_v4 = vpop.f32.mrb[10].mxu1 }
 0x5ef   :  { %v9890_v5 = vpop.f32.mrb[11].mxu1  ;;  %v617_v6 = vsel %vm613_vm5, %v608_v1, -inf }
 0x5f0   :  { %618 = vmax.xlane.f32.xlu0 %v617_v6 }
 0x5f9   :  { %785 = vrot.lane.b32.xlu1 %v11600_v45, %s11312_s5 }
 0x675   :  { %v616_v7 = vpop.xlane.xlu1 %615 }
 0x676   :  { %v620_v8 = vsub.f32 %v559_v59, %v616_v7 }
 0x678   :  { %v622_v9 = vmul.f32 1.442695, %v620_v8 }
 0x679   :  { %v786_v18 = vpop.permute.xlu1 %785 }
 0x67a   :  { %10895 = vpow2.f32 %v622_v9  ;;  %v791_v34 = vsel %vm517_vm2, %v786_v18, 0 }
 0x67d   :  { %v619_v10 = vpop.xlane.xlu0 %618 }
 0x67e   :  { %v621_v11 = vsub.f32 %v608_v1, %v619_v10 }
 0x680   :  { %v624_v12 = vmul.f32 1.442695, %v621_v11 }
 0x682   :  { %10897 = vpow2.f32 %v624_v12 }
 0x684   :  { %v10896_v13 = vpop.eup %10895 }
 0x685   :  { %v626_v14 = vsel %vm613_vm5, %v10896_v13, 0.0 }
 0x686   :  { %627 = vadd.xlane.f32.xlu0 %v626_v14 }
 0x68c   :  { %v10898_v15 = vpop.eup %10897 }
 0x68d   :  { %v629_v16 = vsel %vm613_vm5, %v10898_v15, 0.0 }
 0x68e   :  { %630 = vadd.xlane.f32.xlu1 %v629_v16 }
 0x69c   :  { %735 = vrot.lane.b32.xlu0 %v11596_v41, %s11312_s5 }
 0x69f   :  { %733 = vrot.lane.b32.xlu1 %v11596_v41, %s11313_s9 }
 0x6a3   :  { %783 = vrot.lane.b32.xlu1 %v11600_v45, %s11313_s9 }
 0x713   :  { %v628_v17 = vpop.xlane.xlu0 %627 }
 0x714   :  { %10899 = vrcp.f32 %v628_v17 }
 0x717   :  { %v736_v19 = vpop.permute.xlu0 %735 }
 0x718   :  { %v741_v20 = vsel %vm517_vm2, %v736_v19, 0 }
 0x719   :  { %9904 = vmatpush3.bf16.xpose.msra.mxu0 %v741_v20 }
 0x71a   :  { %9915 = vmatprep.subr.bf16.mxu0 %v11308_v31 }
 0x71b   :  { %v631_v21 = vpop.xlane.xlu1 %630 }
 0x71c   :  { %10901 = vrcp.f32 %v631_v21 }
 0x71e   :  { %v10900_v22 = vpop.eup %10899 }
 0x71f   :  { %v734_v24 = vpop.permute.xlu1 %733  ;;  %v634_v25 = vmul.f32 %v10900_v22, %v10896_v13 }
 0x720   :  { %9906 = vmatmul.mubr.msk.bf16.vlgmr.msra.gmra.mrb[4].mxu0 %vm517_vm2, %v734_v24 }
 0x721   :  { %v636_v26 = vpack.c.bf16 %v634_v25, %v634_v25  ;;  %9917 = vmatprep.mubr.msk.bf16.mxu0 %vm11309_vm1, %v11308_v31 }
 0x723   :  { %9894 = vmatmul.mubr.msk.bf16.vlgmr.msra.gmra.mrb[12].mxu1 %vm613_vm5, %v636_v26  ;;  %v784_v36 = vpop.permute.xlu1 %783 }
 0x724   :  { %9898 = vmatpush3.bf16.msra.mxu1 %v691_v27  ;;  %9899 = vmatprep.mubr.msk.bf16.mxu1 %vm11309_vm1, %v11308_v31 }
 0x725   :  { %9909 = vmatprep.subr.bf16.mxu1 %v11308_v31 }
 0x726   :  { %v10902_v28 = vpop.eup %10901 }
 0x727   :  { %v635_v29 = vmul.f32 %v10902_v28, %v10898_v15 }
 0x729   :  { %v637_v33 = vpack.c.bf16 %v635_v29, %v635_v29 }
 0x72b   :  { %9900 = vmatmul.mubr.msk.bf16.vlgmr.msra.gmra.mrb[16].mxu1 %vm613_vm5, %v637_v33 }
 0x72c   :  { %9911 = vmatprep.mubr.msk.bf16.mxu1 %vm11309_vm1, %v11308_v31 }
 0x72d   :  { %9910 = vmatpush3.bf16.xpose.msra.mxu1 %v791_v34 }
 0x72e   :  { %9921 = vmatprep.subr.bf16.mxu1 %v11308_v31 }
 0x734   :  { %9912 = vmatmul.mubr.msk.bf16.vlgmr.msra.gmra.mrb[20].mxu1 %vm517_vm2, %v784_v36 }
 0x735   :  { %9923 = vmatprep.mubr.msk.bf16.mxu1 %vm11309_vm1, %v11308_v31 }
 0x7f3   :  { %v777_v37 = vpop.f32.mrb[4].mxu0 }
 0x7f4   :  { %v778_v38 = vadd.f32 %v777_v37, %v11627_v57  ;;  %v9907_v39 = vpop.f32.mrb[5].mxu0 }
 0x7f5   :  { %v780_v40 = vpop.f32.mrb[6].mxu0 }
 0x7f6   :  { %v11667_v42 = vpop.f32.mrb[12].mxu1  ;;  %v9908_v43 = vpop.f32.mrb[7].mxu0  ;;  %v833_v44 = vsel %vm613_vm5, %v778_v38, -inf }
 0x7f7   :  { %v9895_v46 = vpop.f32.mrb[13].mxu1  ;;  %834 = vmax.xlane.f32.xlu0 %v833_v44 }
 0x7f8   :  { %v684_v47 = vpop.f32.mrb[14].mxu1 }
 0x7f9   :  { %v9896_v48 = vpop.f32.mrb[15].mxu1 }
 0x7fe   :  { %v11670_v49 = vpop.f32.mrb[16].mxu1 }
 0x7ff   :  { %v9901_v50 = vpop.f32.mrb[17].mxu1 }
 0x800   :  { %v730_v53 = vpop.f32.mrb[18].mxu1 }
 0x801   :  { %v9902_v58 = vpop.f32.mrb[19].mxu1 }
 0x807   :  { %v827_v59 = vpop.f32.mrb[20].mxu1 }
 0x808   :  { %v828_v60 = vadd.f32 %v827_v59, %v11627_v57  ;;  %v9913_v61 = vpop.f32.mrb[21].mxu1 }
 0x809   :  { %v830_v62 = vpop.f32.mrb[22].mxu1 }
 0x80a   :  { %v9914_v63 = vpop.f32.mrb[23].mxu1  ;;  %v836_v0 = vsel %vm613_vm5, %v828_v60, -inf }
 0x80b   :  { %837 = vmax.xlane.f32.xlu1 %v836_v0 }
 0x81c   :  { %907 = vrot.lane.b32.xlu1 %v11647_v23, %s11313_s9 }
 0x820   :  { %957 = vrot.lane.b32.xlu1 %v11596_v41, %s11314_s13 }
 0x824   :  { %1007 = vrot.lane.b32.xlu1 %v11600_v45, %s11314_s13 }
 0x828   :  { %1005 = vrot.lane.b32.xlu1 %v11600_v45, %s11315_s17 }
 0x884   :  { %v835_v1 = vpop.xlane.xlu0 %834 }
 0x885   :  { %v839_v3 = vsub.f32 %v778_v38, %v835_v1 }
 0x887   :  { %v841_v4 = vmul.f32 1.442695, %v839_v3 }
 0x889   :  { %10903 = vpow2.f32 %v841_v4 }
 0x893   :  { %v10904_v5 = vpop.eup %10903 }
 0x894   :  { %v845_v6 = vsel %vm613_vm5, %v10904_v5, 0.0 }
 0x895   :  { %846 = vadd.xlane.f32.xlu0 %v845_v6 }
 0x898   :  { %v838_v7 = vpop.xlane.xlu1 %837 }
 0x899   :  { %v840_v8 = vsub.f32 %v828_v60, %v838_v7 }
 0x89b   :  { %v843_v9 = vmul.f32 1.442695, %v840_v8 }
 0x89c   :  { %v908_v10 = vpop.permute.xlu1 %907 }
 0x89d   :  { %10905 = vpow2.f32 %v843_v9  ;;  %v913_v11 = vsel %vm643_vm3, %v908_v10, 0 }
 0x89e   :  { %9922 = vmatpush3.bf16.msra.mxu1 %v913_v11 }
 0x89f   :  { %9933 = vmatprep.subr.bf16.mxu1 %v11308_v31 }
 0x8a0   :  { %v958_v20 = vpop.permute.xlu1 %957 }
 0x8a1   :  { %v963_v26 = vsel %vm517_vm2, %v958_v20, 0 }
 0x8a4   :  { %v1008_v25 = vpop.permute.xlu1 %1007 }
 0x8a5   :  { %v1013_v28 = vsel %vm517_vm2, %v1008_v25, 0 }
 0x8a7   :  { %v10906_v12 = vpop.eup %10905 }
 0x8a8   :  { %v848_v13 = vsel %vm613_vm5, %v10906_v12, 0.0  ;;  %v1006_v33 = vpop.permute.xlu1 %1005 }
 0x8a9   :  { %849 = vadd.xlane.f32.xlu0 %v848_v13 }
 0x8bf   :  { %858 = vrot.lane.b32.xlu0 %v11614_v52, %s11313_s9 }
 0x8c3   :  { %955 = vrot.lane.b32.xlu0 %v11596_v41, %s11315_s17 }
 0x922   :  { %v847_v14 = vpop.xlane.xlu0 %846 }
 0x923   :  { %10907 = vrcp.f32 %v847_v14 }
 0x92d   :  { %v10908_v15 = vpop.eup %10907 }
 0x92e   :  { %v853_v17 = vmul.f32 %v10908_v15, %v10904_v5 }
 0x930   :  { %v855_v21 = vpack.c.bf16 %v853_v17, %v853_v17 }
 0x936   :  { %v850_v16 = vpop.xlane.xlu0 %849 }
 0x937   :  { %10909 = vrcp.f32 %v850_v16 }
 0x93a   :  { %v859_v18 = vpop.permute.xlu0 %858 }
 0x93b   :  { %v864_v19 = vsel %vm643_vm3, %v859_v18, 0 }
 0x93c   :  { %9916 = vmatpush3.bf16.msra.mxu0 %v864_v19 }
 0x93d   :  { %9927 = vmatprep.subr.bf16.mxu0 %v11308_v31 }
 0x93e   :  { %v956_v29 = vpop.permute.xlu0 %955 }
 0x93f   :  { %9918 = vmatmul.mubr.msk.bf16.vlgmr.msra.gmra.mrb[8].mxu0 %vm613_vm5, %v855_v21 }
 0x940   :  { %9929 = vmatprep.mubr.msk.bf16.mxu0 %vm11309_vm1, %v11308_v31 }
 0x941   :  { %v10910_v22 = vpop.eup %10909 }
 0x942   :  { %v854_v24 = vmul.f32 %v10910_v22, %v10906_v12 }
 0x944   :  { %v856_v27 = vpack.c.bf16 %v854_v24, %v854_v24 }
 0x945   :  { %9928 = vmatpush3.bf16.xpose.msra.mxu0 %v963_v26 }
 0x946   :  { %9924 = vmatmul.mubr.msk.bf16.vlgmr.msra.gmra.mrb[24].mxu1 %vm613_vm5, %v856_v27  ;;  %9939 = vmatprep.subr.bf16.mxu0 %v11308_v31 }
 0x947   :  { %9934 = vmatpush3.bf16.xpose.msra.mxu1 %v1013_v28  ;;  %9935 = vmatprep.mubr.msk.bf16.mxu1 %vm11309_vm1, %v11308_v31 }
 0x948   :  { %9945 = vmatprep.subr.bf16.mxu1 %v11308_v31 }
 0x94c   :  { %9930 = vmatmul.mubr.msk.bf16.vlgmr.msra.gmra.mrb[12].mxu0 %vm517_vm2, %v956_v29 }
 0x94d   :  { %9941 = vmatprep.mubr.msk.bf16.mxu0 %vm11309_vm1, %v11308_v31 }
 0x94e   :  { %9936 = vmatmul.mubr.msk.bf16.vlgmr.msra.gmra.mrb[28].mxu1 %vm517_vm2, %v1006_v33 }
 0x94f   :  { %9947 = vmatprep.mubr.msk.bf16.mxu1 %vm11309_vm1, %v11308_v31 }
 0xa12   :  { %v11708_v34 = vpop.f32.mrb[8].mxu0 }
 0xa13   :  { %v9919_v36 = vpop.f32.mrb[9].mxu0 }
 0xa14   :  { %v903_v37 = vpop.f32.mrb[10].mxu0 }
 0xa15   :  { %v9920_v38 = vpop.f32.mrb[11].mxu0 }
 0xa19   :  { %v11710_v39 = vpop.f32.mrb[24].mxu1 }
 0xa1a   :  { %v10600_v40 = vpack.i.bf16 %v11710_v39, %v11708_v34  ;;  %v9925_v43 = vpop.f32.mrb[25].mxu1 }
 0xa1b   :  { %v952_v44 = vpop.f32.mrb[26].mxu1 }
 0xa1c   :  { %v9926_v46 = vpop.f32.mrb[27].mxu1 }
 0xa1f   :  { %v999_v47 = vpop.f32.mrb[12].mxu0 }
 0xa20   :  { %v1000_v48 = vadd.f32 %v999_v47, %v11627_v57  ;;  %v9931_v50 = vpop.f32.mrb[13].mxu0 }
 0xa21   :  { %v1002_v53 = vpop.f32.mrb[14].mxu0  ;;  %v1049_v58 = vpop.f32.mrb[28].mxu1 }
 0xa22   :  { %v1050_v59 = vadd.f32 %v1049_v58, %v11627_v57  ;;  %v9932_v60 = vpop.f32.mrb[15].mxu0  ;;  %v9937_v61 = vpop.f32.mrb[29].mxu1  ;;  %v1055_v62 = vsel %vm613_vm5, %v1000_v48, -inf }
 0xa23   :  { %v1052_v63 = vpop.f32.mrb[30].mxu1  ;;  %1056 = vmax.xlane.f32.xlu0 %v1055_v62 }
 0xa24   :  { %v9938_v0 = vpop.f32.mrb[31].mxu1  ;;  %v1058_v1 = vsel %vm613_vm5, %v1050_v59, -inf }
 0xa25   :  { %1059 = vmax.xlane.f32.xlu1 %v1058_v1 }
 0xa36   :  { %1127 = vrot.lane.b32.xlu1 %v11647_v23, %s11315_s17 }
 0xa3a   :  { %1177 = vrot.lane.b32.xlu1 %v11596_v41, %s11316_s21 }
 0xa3e   :  { %1227 = vrot.lane.b32.xlu1 %v11600_v45, %s11316_s21 }
 0xa42   :  { %1225 = vrot.lane.b32.xlu1 %v11600_v45, %s11317_s28 }
 0xab0   :  { %v1057_v3 = vpop.xlane.xlu0 %1056 }
 0xab1   :  { %v1061_v4 = vsub.f32 %v1000_v48, %v1057_v3 }
 0xab2   :  { %v1060_v5 = vpop.xlane.xlu1 %1059 }
 0xab3   :  { %v1063_v6 = vmul.f32 1.442695, %v1061_v4  ;;  %v1062_v7 = vsub.f32 %v1050_v59, %v1060_v5 }
 0xab5   :  { %10911 = vpow2.f32 %v1063_v6  ;;  %v1065_v8 = vmul.f32 1.442695, %v1062_v7 }
 0xab6   :  { %v1128_v9 = vpop.permute.xlu1 %1127 }
 0xab7   :  { %10913 = vpow2.f32 %v1065_v8  ;;  %v1133_v10 = vsel %vm643_vm3, %v1128_v9, 0 }
 0xab8   :  { %9946 = vmatpush3.bf16.msra.mxu1 %v1133_v10 }
 0xab9   :  { %9957 = vmatprep.subr.bf16.mxu1 %v11308_v31 }
 0xaba   :  { %v1178_v19 = vpop.permute.xlu1 %1177 }
 0xabe   :  { %v1228_v25 = vpop.permute.xlu1 %1227 }
 0xabf   :  { %v10912_v11 = vpop.eup %10911  ;;  %v1233_v27 = vsel %vm517_vm2, %v1228_v25, 0  ;;  %v10718_v25 = vld [vmem:[%s11388_s30 + $0x18] sm:$0xff]  }
 0xac0   :  { %v1067_v12 = vsel %vm613_vm5, %v10912_v11, 0.0 }
 0xac1   :  { %v10914_v13 = vpop.eup %10913  ;;  %1068 = vadd.xlane.f32.xlu0 %v1067_v12 }
 0xac2   :  { %v1070_v45 = vsel %vm613_vm5, %v10914_v13, 0.0  ;;  %v1226_v29 = vpop.permute.xlu1 %1225 }
 0xac5   :  { %1071 = vadd.xlane.f32.xlu0 %v1070_v45 }
 0xadb   :  { %1079 = vrot.lane.b32.xlu0 %v11614_v52, %s11315_s17 }
 0xadf   :  { %1175 = vrot.lane.b32.xlu0 %v11596_v41, %s11317_s28  ;;  %v1183_v41 = vsel %vm517_vm2, %v1178_v19, 0 }
 0xb4e   :  { %v1069_v14 = vpop.xlane.xlu0 %1068 }
 0xb4f   :  { %10915 = vrcp.f32 %v1069_v14 }
 0xb52   :  { %v1072_v15 = vpop.xlane.xlu0 %1071 }
 0xb53   :  { %10917 = vrcp.f32 %v1072_v15 }
 0xb56   :  { %v1080_v16 = vpop.permute.xlu0 %1079 }
 0xb57   :  { %v1085_v17 = vsel %vm643_vm3, %v1080_v16, 0 }
 0xb58   :  { %9940 = vmatpush3.bf16.msra.mxu0 %v1085_v17 }
 0xb59   :  { %v10916_v18 = vpop.eup %10915  ;;  %9951 = vmatprep.subr.bf16.mxu0 %v11308_v31 }
 0xb5a   :  { %v1075_v20 = vmul.f32 %v10916_v18, %v10912_v11  ;;  %v1176_v28 = vpop.permute.xlu0 %1175 }
 0xb5c   :  { %v1077_v21 = vpack.c.bf16 %v1075_v20, %v1075_v20 }
 0xb5d   :  { %v10918_v22 = vpop.eup %10917 }
 0xb5e   :  { %9942 = vmatmul.mubr.msk.bf16.vlgmr.msra.gmra.mrb[16].mxu0 %vm613_vm5, %v1077_v21  ;;  %v1076_v24 = vmul.f32 %v10918_v22, %v10914_v13  ;;  %v10715_v21 = vld [vmem:[%s11388_s30] sm:$0xff]   ;;  %v10716_v22 = vld [vmem:[%s11388_s30 + $0x8] sm:$0xff]  }
 0xb5f   :  { %9953 = vmatprep.mubr.msk.bf16.mxu0 %vm11309_vm1, %v11308_v31 }
 0xb60   :  { %v1078_v26 = vpack.c.bf16 %v1076_v24, %v1076_v24  ;;  %v10717_v24 = vld [vmem:[%s11388_s30 + $0x10] sm:$0xff]  }
 0xb61   :  { %9952 = vmatpush3.bf16.xpose.msra.mxu0 %v1183_v41 }
 0xb62   :  { %9948 = vmatmul.mubr.msk.bf16.vlgmr.msra.gmra.mrb[32].mxu1 %vm613_vm5, %v1078_v26  ;;  %9963 = vmatprep.subr.bf16.mxu0 %v11308_v31 }
 0xb63   :  { %9958 = vmatpush3.bf16.xpose.msra.mxu1 %v1233_v27  ;;  %9959 = vmatprep.mubr.msk.bf16.mxu1 %vm11309_vm1, %v11308_v31 }
 0xb64   :  { %9969 = vmatprep.subr.bf16.mxu1 %v11308_v31 }
 0xb68   :  { %9954 = vmatmul.mubr.msk.bf16.vlgmr.msra.gmra.mrb[20].mxu0 %vm517_vm2, %v1176_v28 }
 0xb69   :  { %9965 = vmatprep.mubr.msk.bf16.mxu0 %vm11309_vm1, %v11308_v31 }
 0xb6a   :  { %9960 = vmatmul.mubr.msk.bf16.vlgmr.msra.gmra.mrb[36].mxu1 %vm517_vm2, %v1226_v29 }
 0xb6b   :  { %9971 = vmatprep.mubr.msk.bf16.mxu1 %vm11309_vm1, %v11308_v31 }
 0xc31   :  { %v1121_v33 = vpop.f32.mrb[16].mxu0 }
 0xc32   :  { %v9943_v36 = vpop.f32.mrb[17].mxu0 }
 0xc33   :  { %v1124_v37 = vpop.f32.mrb[18].mxu0 }
 0xc34   :  { %v9944_v38 = vpop.f32.mrb[19].mxu0 }
 0xc35   :  { %v1169_v43 = vpop.f32.mrb[32].mxu1 }
 0xc36   :  { %v10605_v44 = vpack.i.bf16 %v1169_v43, %v1121_v33  ;;  %v9949_v46 = vpop.f32.mrb[33].mxu1 }
 0xc37   :  { %v1172_v47 = vpop.f32.mrb[34].mxu1 }
 0xc38   :  { %v9950_v48 = vpop.f32.mrb[35].mxu1 }
 0xc3b   :  { %v1219_v50 = vpop.f32.mrb[20].mxu0 }
 0xc3c   :  { %v1220_v53 = vadd.f32 %v1219_v50, %v11627_v57  ;;  %v9955_v58 = vpop.f32.mrb[21].mxu0 }
 0xc3d   :  { %v1222_v59 = vpop.f32.mrb[22].mxu0  ;;  %v1269_v60 = vpop.f32.mrb[36].mxu1 }
 0xc3e   :  { %v1270_v61 = vadd.f32 %v1269_v60, %v11627_v57  ;;  %v9956_v62 = vpop.f32.mrb[23].mxu0  ;;  %v9961_v63 = vpop.f32.mrb[37].mxu1  ;;  %v1275_v0 = vsel %vm613_vm5, %v1220_v53, -inf }
 0xc3f   :  { %v1272_v1 = vpop.f32.mrb[38].mxu1  ;;  %1276 = vmax.xlane.f32.xlu0 %v1275_v0 }
 0xc40   :  { %v9962_v3 = vpop.f32.mrb[39].mxu1  ;;  %v1278_v4 = vsel %vm613_vm5, %v1270_v61, -inf }
 0xc41   :  { %1279 = vmax.xlane.f32.xlu1 %v1278_v4 }
 0xc52   :  { %1347 = vrot.lane.b32.xlu1 %v11647_v23, %s11317_s28 }
 0xc56   :  { %10601 = vrot.lane.b32.xlu1 %v10600_v40, %s11316_s21 }
 0xc5a   :  { %10606 = vrot.lane.b32.xlu1 %v10605_v44, %s11314_s13 }
 0xccc   :  { %v1277_v5 = vpop.xlane.xlu0 %1276 }
 0xccd   :  { %v1281_v6 = vsub.f32 %v1220_v53, %v1277_v5  ;;  %v9128_v5 = vld [vmem:[%s11393_s6] ss:$0 sm:$0xff] }
 0xcce   :  { %v1280_v7 = vpop.xlane.xlu1 %1279 }
 0xccf   :  { %v1283_v8 = vmul.f32 1.442695, %v1281_v6  ;;  %v1282_v9 = vsub.f32 %v1270_v61, %v1280_v7 }
 0xcd1   :  { %10919 = vpow2.f32 %v1283_v8  ;;  %v1285_v10 = vmul.f32 1.442695, %v1282_v9 }
 0xcd2   :  { %v1348_v11 = vpop.permute.xlu1 %1347 }
 0xcd3   :  { %10921 = vpow2.f32 %v1285_v10  ;;  %v1353_v12 = vsel %vm643_vm3, %v1348_v11, 0 }
 0xcd4   :  { %9970 = vmatpush3.bf16.msra.mxu1 %v1353_v12 }
 0xcd6   :  { %v10602_v43 = vpop.permute.xlu1 %10601 }
 0xcd7   :  { %v10604_v46 = vunpack.i.h.bf16 %v10602_v43  ;;  %v10603_v47 = vunpack.i.l.bf16 %v10602_v43 }
 0xcd9   :  { %v1420_v58 = vsel %vm517_vm2, %v11670_v49, %v10604_v46  ;;  %v1419_v59 = vsel %vm517_vm2, %v11667_v42, %v10603_v47 }
 0xcda   :  { %v10607_v44 = vpop.permute.xlu1 %10606 }
 0xcdb   :  { %v10920_v23 = vpop.eup %10919  ;;  %v10609_v48 = vunpack.i.h.bf16 %v10607_v44  ;;  %v10608_v50 = vunpack.i.l.bf16 %v10607_v44  ;;  %v9130_v44 = vld [vmem:[%s13215_s4] ss:$0 sm:$0xff] }
 0xcdc   :  { %v1287_v13 = vsel %vm613_vm5, %v10920_v23, 0.0 }
 0xcdd   :  { %v10922_v45 = vpop.eup %10921  ;;  %1288 = vadd.xlane.f32.xlu0 %v1287_v13  ;;  %v1423_v62 = vsel %vm1421_vm6, %v1420_v58, %v10609_v48  ;;  %v1422_v63 = vsel %vm1421_vm6, %v1419_v59, %v10608_v50  ;;  %v10732_v58 = vld [vmem:[%s13216_s15] sm:$0xff]   ;;  %v10733_v59 = vld [vmem:[%s13216_s15 + $0x48] sm:$0xff]  }
 0xcde   :  { %v1290_v34 = vsel %vm613_vm5, %v10922_v45, 0.0 }
 0xce1   :  { %1291 = vadd.xlane.f32.xlu0 %v1290_v34 }
 0xcf7   :  { %1299 = vrot.lane.b32.xlu0 %v11614_v52, %s11317_s28 }
 0xd6a   :  { %v1289_v39 = vpop.xlane.xlu0 %1288 }
 0xd6b   :  { %10923 = vrcp.f32 %v1289_v39 }
 0xd6e   :  { %v1292_v40 = vpop.xlane.xlu0 %1291 }
 0xd6f   :  { %10925 = vrcp.f32 %v1292_v40 }
 0xd72   :  { %v1300_v14 = vpop.permute.xlu0 %1299 }
 0xd73   :  { %v1305_v15 = vsel %vm643_vm3, %v1300_v14, 0 }
 0xd74   :  { %9964 = vmatpush3.bf16.msra.mxu0 %v1305_v15 }
 0xd75   :  { %v10924_v16 = vpop.eup %10923  ;;  %9975 = vmatprep.subr.bf16.mxu0 %v11308_v31 }
 0xd76   :  { %v1295_v17 = vmul.f32 %v10924_v16, %v10920_v23  ;;  %v10721_v16 = vld [vmem:[%s11408_s27 + $0x4] ss:$8 sps:$4 sm:$0xff]  }
 0xd77   :  { %1623 = vmatprep.subr.bf16.mxu1 %v10721_v16 }
 0xd78   :  { %v1297_v18 = vpack.c.bf16 %v1295_v17, %v1295_v17  ;;  %v10719_v17 = vld [vmem:[%s11408_s27] ss:$8 sps:$4 sm:$0xff]  }
 0xd79   :  { %v10926_v19 = vpop.eup %10925 }
 0xd7a   :  { %9966 = vmatmul.mubr.msk.bf16.vlgmr.msra.gmra.mrb[24].mxu0 %vm613_vm5, %v1297_v18  ;;  %v1296_v52 = vmul.f32 %v10926_v19, %v10922_v45  ;;  %v10724_v18 = vld [vmem:[%s11408_s27 + $0x14] ss:$8 sps:$4 sm:$0xff]   ;;  %v10722_v19 = vld [vmem:[%s11408_s27 + $0x10] ss:$8 sps:$4 sm:$0xff]  }
 0xd7b   :  { %9983 = vmatprep.mubr.msk.bf16.mxu0 %vm11309_vm1, %v11308_v31  ;;  %9976 = vmatpush3.bf16.msra.mxu0 %v10715_v21  ;;  %v10728_v21 = vld [vmem:[%s11408_s27 + $0x30] ss:$8 sps:$4 sm:$0xff]  }
 0xd7c   :  { %v1298_v20 = vpack.c.bf16 %v1296_v52, %v1296_v52  ;;  %9977 = vmatprep.subr.bf16.mxu0 %v11308_v31  ;;  %v10727_v52 = vld [vmem:[%s11408_s27 + $0x24] ss:$8 sps:$4 sm:$0xff]  }
 0xd7e   :  { %9972 = vmatmul.mubr.msk.bf16.vlgmr.msra.gmra.mrb[40].mxu1 %vm613_vm5, %v1298_v20  ;;  %v10725_v20 = vld [vmem:[%s11408_s27 + $0x20] ss:$8 sps:$4 sm:$0xff]  }
 0xd7f   :  { %1655 = vmatprep.mubr.bf16.mxu1 %v11307_v2  ;;  %9978 = vmatpush3.bf16.msra.mxu0 %v10716_v22  ;;  %v10730_v22 = vld [vmem:[%s11408_s27 + $0x34] ss:$8 sps:$4 sm:$0xff]  }
 0xd80   :  { %9979 = vmatprep.subr.bf16.mxu0 %v11308_v31  ;;  %1624 = vmatpush1.bf16.msra.mxu1 %v10719_v17 }
 0xd81   :  { %1625 = vmatprep.subr.bf16.mxu1 %v10724_v18 }
 0xd83   :  { %9980 = vmatpush3.bf16.msra.mxu0 %v10717_v24 }
 0xd84   :  { %9981 = vmatprep.subr.bf16.mxu0 %v11308_v31  ;;  %1626 = vmatpush1.bf16.msra.mxu1 %v10722_v19 }
 0xd85   :  { %1627 = vmatprep.subr.bf16.mxu1 %v10727_v52 }
 0xd87   :  { %9982 = vmatpush3.bf16.msra.mxu0 %v10718_v25 }
 0xd88   :  { %1628 = vmatpush1.bf16.msra.mxu1 %v10725_v20 }
 0xd89   :  { %1629 = vmatprep.subr.bf16.mxu1 %v10730_v22 }
 0xd8c   :  { %1630 = vmatpush1.bf16.msra.mxu1 %v10728_v21 }
 0xe4d   :  { %v1341_v41 = vpop.f32.mrb[24].mxu0 }
 0xe4e   :  { %v9967_v26 = vpop.f32.mrb[25].mxu0 }
 0xe4f   :  { %v1344_v27 = vpop.f32.mrb[26].mxu0 }
 0xe50   :  { %v9968_v28 = vpop.f32.mrb[27].mxu0 }
 0xe51   :  { %v1389_v29 = vpop.f32.mrb[40].mxu1 }
 0xe52   :  { %v10610_v33 = vpack.i.bf16 %v1389_v29, %v1341_v41  ;;  %v9973_v36 = vpop.f32.mrb[41].mxu1 }
 0xe53   :  { %v1392_v37 = vpop.f32.mrb[42].mxu1  ;;  %v9129_v36 = vld [vmem:[%s11398_s12] ss:$0 sm:$0xff] }
 0xe54   :  { %v9974_v38 = vpop.f32.mrb[43].mxu1  ;;  %10611 = vrot.lane.b32.xlu0 %v10610_v33, %s11312_s5 }
 0xec6   :  { %v10612_v53 = vpop.permute.xlu0 %10611 }
 0xec7   :  { %v10614_v60 = vunpack.i.h.bf16 %v10612_v53  ;;  %v10613_v61 = vunpack.i.l.bf16 %v10612_v53  ;;  %v10731_v53 = vld [vmem:[%s13216_s15 + $0x40] sm:$0xff]  }
 0xec8   :  { %9585 = vmatprep.subr.bf16.mxu0 %v10731_v53  ;;  %v9144_v53 = vld [vmem:[%s13218_s23] ss:$0 sm:$0xff] }
 0xec9   :  { %v1426_v0 = vsel %vm1424_vm7, %v1423_v62, %v10614_v60  ;;  %v1425_v1 = vsel %vm1424_vm7, %v1422_v63, %v10613_v61  ;;  %v10734_v60 = vld [vmem:[%s13216_s15 + $0x8] sm:$0xff]   ;;  %v10735_v61 = vld [vmem:[%s13216_s15 + $0x50] sm:$0xff]   ;;  %v10737_v63 = vld [vmem:[%s13216_s15 + $0x58] sm:$0xff]  }
 0xeca   :  { %v1427_v3 = vpack.c.bf16 %v1426_v0, %v1425_v1  ;;  %v10736_v62 = vld [vmem:[%s13216_s15 + $0x10] sm:$0xff]   ;;  %v10738_v0 = vld [vmem:[%s13216_s15 + $0x18] sm:$0xff]   ;;  %v10739_v1 = vld [vmem:[%s13216_s15 + $0x60] sm:$0xff]  }
 0xecc   :  { %9984 = vmatmul.mubr.msk.bf16.vlgmr.msra.gmra.mrb[28].mxu0 %vm264_vm0, %v1427_v3  ;;  %v10740_v3 = vld [vmem:[%s13216_s15 + $0x20] sm:$0xff]  }
 0xecd   :  { %9586 = vmatpush3.bf16.msra.mxu0 %v10732_v58 }
 0xece   :  { %9587 = vmatprep.subr.bf16.mxu0 %v10733_v59 }
 0xed1   :  { %9588 = vmatpush3.bf16.msra.mxu0 %v10734_v60 }
 0xed2   :  { %9589 = vmatprep.subr.bf16.mxu0 %v10735_v61 }
 0xed5   :  { %9590 = vmatpush3.bf16.msra.mxu0 %v10736_v62 }
 0xed6   :  { %9591 = vmatprep.subr.bf16.mxu0 %v10737_v63 }
 0xed9   :  { %9592 = vmatpush3.bf16.msra.mxu0 %v10738_v0 }
 0xeda   :  { %9593 = vmatprep.subr.bf16.mxu0 %v10739_v1 }
 0xedd   :  { %9594 = vmatpush3.bf16.msra.mxu0 %v10740_v3 }
 0xf9f   :  { %v1497_v4 = vpop.f32.mrb[28].mxu0 }
 0xfa0   :  { %v1504_v49 = vadd.f32 %v1497_v4, %v11556_v51  ;;  %v9985_v6 = vpop.f32.mrb[29].mxu0  ;;  %v10741_v4 = vld [vmem:[%s13216_s15 + $0x68] sm:$0xff]  }
 0xfa1   :  { %v1500_v7 = vpop.f32.mrb[30].mxu0  ;;  %9595 = vmatprep.subr.bf16.mxu0 %v10741_v4  ;;  %v10744_v6 = vld [vmem:[%s13216_s15 + $0x30] sm:$0xff]  }
 0xfa2   :  { %v11794_v42 = vadd.f32 %v9128_v5, %v1504_v49  ;;  %v1505_v8 = vadd.f32 %v1500_v7, %v11560_v55  ;;  %v9986_v9 = vpop.f32.mrb[31].mxu0  ;;  %v10743_v49 = vld [vmem:[%s13216_s15 + $0x70] sm:$0xff]   ;;  %v10745_v7 = vld [vmem:[%s13216_s15 + $0x78] sm:$0xff]  }
 0xfa3   :  { %v1568_v9 = vld [vmem:[%s13217_s18] sm:$0x3] }
 0xfa4   :  { %v11797_v10 = vadd.f32 %v9128_v5, %v1505_v8  ;;  %v1517_v11 = vsel %vm264_vm0, %v11794_v42, 0.0  ;;  %v10742_v5 = vld [vmem:[%s13216_s15 + $0x28] sm:$0xff]   ;;  %v10746_v8 = vld [vmem:[%s13216_s15 + $0x38] sm:$0xff]  }
 0xfa5   :  { %1518 = vadd.xlane.f32.xlu1 %v1517_v11  ;;  %9596 = vmatpush3.bf16.msra.mxu0 %v10742_v5  ;;  %v1573_v11 = vrot.slane %v1568_v9, %v11584_v32 }
 0xfa6   :  { %v1520_v12 = vsel %vm264_vm0, %v11797_v10, 0.0  ;;  %9597 = vmatprep.subr.bf16.mxu0 %v10743_v49 }
 0xfa7   :  { %1521 = vadd.xlane.f32.xlu0 %v1520_v12  ;;  %v1577_v12 = vrot.slane %v1568_v9, %v11593_v35 }
 0xfa9   :  { %9598 = vmatpush3.bf16.msra.mxu0 %v10744_v6 }
 0xfaa   :  { %9599 = vmatprep.subr.bf16.mxu0 %v10745_v7 }
 0xfad   :  { %9600 = vmatpush3.bf16.msra.mxu0 %v10746_v8 }
 0xfae   :  { %9999 = vmatprep.subr.bf16.mxu0 %v11308_v31 }
0x1032   :  { %v1519_v51 = vpop.xlane.xlu1 %1518 }
0x1033   :  { %v1523_v23 = vmul.f32 0.015625, %v1519_v51 }
0x1034   :  { %v1522_v13 = vpop.xlane.xlu0 %1521 }
0x1035   :  { %v1525_v55 = vsub.f32 %v11794_v42, %v1523_v23  ;;  %v1524_v45 = vmul.f32 0.015625, %v1522_v13 }
0x1037   :  { %v1526_v34 = vsub.f32 %v11797_v10, %v1524_v45  ;;  %v1527_v39 = vmul.f32 %v1525_v55, %v1525_v55 }
0x1039   :  { %v1529_v40 = vsel %vm264_vm0, %v1527_v39, 0.0  ;;  %v1528_v14 = vmul.f32 %v1526_v34, %v1526_v34 }
0x103a   :  { %1530 = vadd.xlane.f32.xlu0 %v1529_v40 }
0x103b   :  { %v1532_v15 = vsel %vm264_vm0, %v1528_v14, 0.0 }
0x103e   :  { %1533 = vadd.xlane.f32.xlu0 %v1532_v15 }
0x10c7   :  { %v1531_v24 = vpop.xlane.xlu0 %1530 }
0x10c8   :  { %v1535_v25 = vmul.f32 0.015625, %v1531_v24 }
0x10ca   :  { %v1537_v41 = vadd.f32 1e-05, %v1535_v25 }
0x10cb   :  { %v1534_v26 = vpop.xlane.xlu0 %1533 }
0x10cc   :  { %10927 = vrsqrt.f32 %v1537_v41  ;;  %v1536_v27 = vmul.f32 0.015625, %v1534_v26 }
0x10ce   :  { %v1538_v28 = vadd.f32 1e-05, %v1536_v27 }
0x10d0   :  { %10929 = vrsqrt.f32 %v1538_v28 }
0x10d6   :  { %v10928_v29 = vpop.eup %10927 }
0x10d7   :  { %v1541_v33 = vmul.f32 %v10928_v29, %v1525_v55 }
0x10d9   :  { %v1549_v38 = vmul.f32 %v9129_v36, %v1541_v33 }
0x10da   :  { %v10930_v37 = vpop.eup %10929 }
0x10db   :  { %v1542_v43 = vmul.f32 %v10930_v37, %v1526_v34  ;;  %v1557_v47 = vadd.f32 %v9130_v44, %v1549_v38 }
0x10dd   :  { %v1550_v46 = vmul.f32 %v9129_v36, %v1542_v43 }
0x10df   :  { %v1558_v48 = vadd.f32 %v9130_v44, %v1550_v46 }
0x10e1   :  { %v1559_v50 = vpack.c.bf16 %v1558_v48, %v1557_v47 }
0x10e3   :  { %9139 = vmatmul.mubr.msk.bf16.vlgmr.msra.gmra.mrb[44].mxu1 %vm264_vm0, %v1559_v50 }
0x10e4   :  { %2022 = vmatprep.mubr.bf16.mxu1 %v11307_v2 }
0x11b6   :  { %v1657_v51 = vpop.f32.mrb[44].mxu1 }
0x11b7   :  { %v1658_v23 = vadd.f32 %v1657_v51, %v1573_v11  ;;  %v1659_v13 = vpop.f32.mrb[45].mxu1 }
0x11b8   :  { %v1660_v55 = vadd.f32 %v1659_v13, %v1577_v12  ;;  %v1661_v45 = vpop.f32.mrb[46].mxu1  ;;  %v10747_v13 = vld [vmem:[%s11378_s19 + $0x40] ss:$8 sps:$4 sm:$0xff]  }
0x11b9   :  { %v9140_v34 = vmul.f32 -1.702, %v1658_v23  ;;  %v1662_v39 = vadd.f32 %v1661_v45, %v1573_v11  ;;  %v1663_v40 = vpop.f32.mrb[47].mxu1  ;;  %v10750_v45 = vld [vmem:[%s11378_s19 + $0x50] ss:$8 sps:$4 sm:$0xff]  }
0x11ba   :  { %v9141_v14 = vmul.f32 -1.702, %v1660_v55  ;;  %v1664_v15 = vadd.f32 %v1663_v40, %v1577_v12  ;;  %v10756_v40 = vld [vmem:[%s11378_s19 + $0x70] ss:$8 sps:$4 sm:$0xff]  }
0x11bb   :  { %v1674_v16 = vmul.f32 1.442695, %v9140_v34  ;;  %v9142_v17 = vmul.f32 -1.702, %v1662_v39  ;;  %v10755_v34 = vld [vmem:[%s11378_s19 + $0x64] ss:$8 sps:$4 sm:$0xff]  }
0x11bc   :  { %v1676_v18 = vmul.f32 1.442695, %v9141_v14  ;;  %v9143_v19 = vmul.f32 -1.702, %v1664_v15  ;;  %v10758_v14 = vld [vmem:[%s11378_s19 + $0x74] ss:$8 sps:$4 sm:$0xff]  }
0x11bd   :  { %10931 = vpow2.f32 %v1674_v16  ;;  %v1678_v52 = vmul.f32 1.442695, %v9142_v17 }
0x11be   :  { %10933 = vpow2.f32 %v1676_v18  ;;  %v1680_v20 = vmul.f32 1.442695, %v9143_v19 }
0x11bf   :  { %10935 = vpow2.f32 %v1678_v52 }
0x11c0   :  { %10937 = vpow2.f32 %v1680_v20 }
0x11c7   :  { %v10932_v21 = vpop.eup %10931 }
0x11c8   :  { %v10934_v22 = vpop.eup %10933  ;;  %v1682_v24 = vadd.f32 1.0, %v10932_v21  ;;  %v9163_v21 = vld [vmem:[%s11368_s8 + $0x1] ss:$0 sm:$0xff]  ;;  %s13219_s8 = sld [smem:[#allocation13_spill]] }
0x11c9   :  { %v10936_v25 = vpop.eup %10935  ;;  %v1683_v41 = vadd.f32 1.0, %v10934_v22 }
0x11ca   :  { %v10938_v26 = vpop.eup %10937  ;;  %10939 = vrcp.f32 %v1682_v24  ;;  %v1684_v27 = vadd.f32 1.0, %v10936_v25 }
0x11cb   :  { %10941 = vrcp.f32 %v1683_v41  ;;  %v1685_v28 = vadd.f32 1.0, %v10938_v26  ;;  %v9164_v26 = vld [vmem:[%s11373_s14 + $0x1] ss:$0 sm:$0xff]  ;;  %s13220_s14 = sld [smem:[#allocation8_spill]] }
0x11cc   :  { %10943 = vrcp.f32 %v1684_v27 }
0x11cd   :  { %10945 = vrcp.f32 %v1685_v28 }
0x11d4   :  { %v10940_v29 = vpop.eup %10939 }
0x11d5   :  { %v10942_v33 = vpop.eup %10941  ;;  %v1694_v38 = vmul.f32 %v10940_v29, %v1658_v23  ;;  %v10749_v23 = vld [vmem:[%s11378_s19 + $0x44] ss:$8 sps:$4 sm:$0xff]  }
0x11d6   :  { %v10944_v36 = vpop.eup %10943  ;;  %v1695_v44 = vmul.f32 %v10942_v33, %v1660_v55  ;;  %1990 = vmatprep.subr.bf16.mxu1 %v10749_v23  ;;  %v10752_v55 = vld [vmem:[%s11378_s19 + $0x54] ss:$8 sps:$4 sm:$0xff]  }
0x11d7   :  { %v10946_v37 = vpop.eup %10945  ;;  %v1696_v43 = vmul.f32 %v10944_v36, %v1662_v39  ;;  %1991 = vmatpush1.bf16.msra.mxu1 %v10747_v13  ;;  %v10753_v39 = vld [vmem:[%s11378_s19 + $0x60] ss:$8 sps:$4 sm:$0xff]   ;;  %s13221_s19 = sld [smem:[#allocation6_spill]] }
0x11d8   :  { %v1697_v46 = vmul.f32 %v10946_v37, %v1664_v15  ;;  %1992 = vmatprep.subr.bf16.mxu1 %v10752_v55  ;;  %v9173_v36 = vld [vmem:[%s11383_s24 + $0x2] sm:$0x3]  ;;  %s13222_s24 = sld [smem:[#allocation7_spill]] }
0x11d9   :  { %v1698_v47 = vpack.c.bf16 %v1696_v43, %v1694_v38  ;;  %v1940_v37 = vrot.slane %v9173_v36, %v11584_v32  ;;  %v1944_v38 = vrot.slane %v9173_v36, %v11593_v35 }
0x11da   :  { %v1699_v48 = vpack.c.bf16 %v1697_v46, %v1695_v44 }
0x11db   :  { %1993 = vmatpush1.bf16.msra.mxu1 %v10750_v45 }
0x11dc   :  { %1867 = vmatprep.mubr.bf16.mxu0 %v1699_v48  ;;  %1994 = vmatprep.subr.bf16.mxu1 %v10755_v34 }
0x11dd   :  { %1868 = vmatmul.mubr.bf16.vlgmr.msra.gmra.mrb[32].mxu0 %v1698_v47 }
0x11de   :  { %10001 = vmatprep.mubr.msk.bf16.mxu0 %vm11309_vm1, %v11308_v31 }
0x11df   :  { %1995 = vmatpush1.bf16.msra.mxu1 %v10753_v39 }
0x11e0   :  { %1996 = vmatprep.subr.bf16.mxu1 %v10758_v14 }
0x11e3   :  { %1997 = vmatpush1.bf16.msra.mxu1 %v10756_v40 }
0x11e4   :  { %9987 = vmatprep.subr.bf16.mxu1 %v11308_v31 }
0x12b0   :  { %v9601_v50 = vpop.f32.mrb[32].mxu0 }
0x12b1   :  { %v9602_v58 = vpop.f32.mrb[33].mxu0 }
0x12b2   :  { %v9603_v59 = vadd.f32 %v9602_v58, %v9601_v50  ;;  %v9604_v60 = vpop.f32.mrb[34].mxu0 }
0x12b3   :  { %v9605_v61 = vpop.f32.mrb[35].mxu0 }
0x12b4   :  { %v1870_v62 = vadd.f32 %v9603_v59, %v9144_v53  ;;  %v9606_v63 = vadd.f32 %v9605_v61, %v9604_v60 }
0x12b6   :  { %v11843_v0 = vadd.f32 %v1870_v62, %v11794_v42  ;;  %v1873_v1 = vadd.f32 %v9606_v63, %v9144_v53 }
0x12b8   :  { %v11846_v3 = vadd.f32 %v1873_v1, %v11797_v10  ;;  %v1882_v4 = vsel %vm264_vm0, %v11843_v0, 0.0 }
0x12b9   :  { %1883 = vadd.xlane.f32.xlu1 %v1882_v4 }
0x12ba   :  { %v1885_v5 = vsel %vm264_vm0, %v11846_v3, 0.0 }
0x12bb   :  { %1886 = vadd.xlane.f32.xlu0 %v1885_v5 }
0x1346   :  { %v1884_v49 = vpop.xlane.xlu1 %1883 }
0x1347   :  { %v1888_v6 = vmul.f32 0.015625, %v1884_v49 }
0x1348   :  { %v1887_v42 = vpop.xlane.xlu0 %1886 }
0x1349   :  { %v1890_v7 = vsub.f32 %v11843_v0, %v1888_v6  ;;  %v1889_v8 = vmul.f32 0.015625, %v1887_v42 }
0x134b   :  { %v1891_v10 = vsub.f32 %v11846_v3, %v1889_v8  ;;  %v1892_v9 = vmul.f32 %v1890_v7, %v1890_v7 }
0x134d   :  { %v1894_v11 = vsel %vm264_vm0, %v1892_v9, 0.0  ;;  %v1893_v12 = vmul.f32 %v1891_v10, %v1891_v10 }
0x134e   :  { %1895 = vadd.xlane.f32.xlu1 %v1894_v11 }
0x134f   :  { %v1897_v51 = vsel %vm264_vm0, %v1893_v12, 0.0 }
0x1350   :  { %1898 = vadd.xlane.f32.xlu0 %v1897_v51 }
0x13db   :  { %v1896_v15 = vpop.xlane.xlu1 %1895 }
0x13dc   :  { %v1900_v16 = vmul.f32 0.015625, %v1896_v15 }
0x13dd   :  { %v1899_v17 = vpop.xlane.xlu0 %1898 }
0x13de   :  { %v1902_v18 = vadd.f32 1e-05, %v1900_v16  ;;  %v1901_v19 = vmul.f32 0.015625, %v1899_v17 }
0x13e0   :  { %10947 = vrsqrt.f32 %v1902_v18  ;;  %v1903_v52 = vadd.f32 1e-05, %v1901_v19 }
0x13e2   :  { %10949 = vrsqrt.f32 %v1903_v52 }
0x13ea   :  { %v10948_v20 = vpop.eup %10947 }
0x13eb   :  { %v1906_v22 = vmul.f32 %v10948_v20, %v1890_v7 }
0x13ec   :  { %v10950_v24 = vpop.eup %10949 }
0x13ed   :  { %v1914_v25 = vmul.f32 %v9163_v21, %v1906_v22  ;;  %v1907_v41 = vmul.f32 %v10950_v24, %v1891_v10 }
0x13ef   :  { %v1915_v27 = vmul.f32 %v9163_v21, %v1907_v41  ;;  %v1922_v28 = vadd.f32 %v9164_v26, %v1914_v25 }
0x13f1   :  { %v1923_v29 = vadd.f32 %v9164_v26, %v1915_v27 }
0x13f3   :  { %v1924_v33 = vpack.c.bf16 %v1923_v29, %v1922_v28 }
0x13f5   :  { %9182 = vmatmul.mubr.msk.bf16.vlgmr.msra.gmra.mrb[48].mxu1 %vm264_vm0, %v1924_v33 }
0x13f6   :  { %9989 = vmatprep.mubr.msk.bf16.mxu1 %vm11309_vm1, %v11308_v31 }
0x14c8   :  { %v2024_v43 = vpop.f32.mrb[48].mxu1 }
0x14c9   :  { %v2025_v44 = vadd.f32 %v2024_v43, %v1940_v37  ;;  %v2026_v46 = vpop.f32.mrb[49].mxu1 }
0x14ca   :  { %v2027_v47 = vadd.f32 %v2026_v46, %v1944_v38  ;;  %v2028_v48 = vpop.f32.mrb[50].mxu1 }
0x14cb   :  { %v11873_v50 = vpack.c.bf16 %v2025_v44, %v2025_v44  ;;  %v2029_v53 = vadd.f32 %v2028_v48, %v1940_v37  ;;  %v2030_v58 = vpop.f32.mrb[51].mxu1 }
0x14cc   :  { %v11875_v59 = vpack.c.bf16 %v2027_v47, %v2027_v47  ;;  %v2031_v60 = vadd.f32 %v2030_v58, %v1944_v38 }
0x14cd   :  { %v11877_v61 = vpack.c.bf16 %v2029_v53, %v2029_v53  ;;  %2036 = vrot.lane.b32.xlu1 %v11873_v50, %s11310_s0 }
0x14ce   :  { %v2163_v62 = vsel %vm643_vm3, %v11875_v59, 0  ;;  %v11894_v49 = vpack.c.bf16 %v2031_v60, %v2031_v60 }
0x14cf   :  { %2085 = vrot.lane.b32.xlu0 %v11877_v61, %s11310_s0  ;;  %10000 = vmatpush3.bf16.msra.mxu0 %v2163_v62 }
0x14d0   :  { %10011 = vmatprep.subr.bf16.mxu0 %v11308_v31  ;;  %v2209_v6 = vsel %vm643_vm3, %v11894_v49, 0 }
0x153f   :  { %v2037_v63 = vpop.permute.xlu1 %2036 }
0x1540   :  { %v2042_v1 = vsel %vm517_vm2, %v2037_v63, 0 }
0x1541   :  { %9988 = vmatpush3.bf16.xpose.msra.mxu1 %v2042_v1  ;;  %v2086_v4 = vpop.permute.xlu0 %2085 }
0x1542   :  { %9993 = vmatprep.subr.bf16.mxu1 %v11308_v31  ;;  %v2091_v5 = vsel %vm517_vm2, %v2086_v4, 0 }
0x1548   :  { %9990 = vmatmul.mubr.msk.bf16.vlgmr.msra.gmra.mrb[52].mxu1 %vm517_vm2, %v11873_v50 }
0x1549   :  { %9994 = vmatpush3.bf16.xpose.msra.mxu1 %v2091_v5  ;;  %9995 = vmatprep.mubr.msk.bf16.mxu1 %vm11309_vm1, %v11308_v31 }
0x154a   :  { %10005 = vmatprep.subr.bf16.mxu1 %v11308_v31 }
0x1550   :  { %9996 = vmatmul.mubr.msk.bf16.vlgmr.msra.gmra.mrb[56].mxu1 %vm517_vm2, %v11877_v61 }
0x1551   :  { %10006 = vmatpush3.bf16.msra.mxu1 %v2209_v6  ;;  %10007 = vmatprep.mubr.msk.bf16.mxu1 %vm11309_vm1, %v11308_v31 }
0x1552   :  { %10017 = vmatprep.subr.bf16.mxu1 %v11308_v31 }
0x161b   :  { %v2078_v42 = vpop.f32.mrb[52].mxu1 }
0x161c   :  { %v2079_v7 = vadd.f32 %v2078_v42, %v11627_v57  ;;  %v9991_v8 = vpop.f32.mrb[53].mxu1 }
0x161d   :  { %v2081_v10 = vpop.f32.mrb[54].mxu1 }
0x161e   :  { %v9992_v9 = vpop.f32.mrb[55].mxu1  ;;  %v2133_v11 = vsel %vm613_vm5, %v2079_v7, -inf }
0x161f   :  { %2134 = vmax.xlane.f32.xlu1 %v2133_v11 }
0x1623   :  { %v2127_v12 = vpop.f32.mrb[56].mxu1 }
0x1624   :  { %v2128_v51 = vadd.f32 %v2127_v12, %v11627_v57  ;;  %v9997_v23 = vpop.f32.mrb[57].mxu1 }
0x1625   :  { %v2130_v13 = vpop.f32.mrb[58].mxu1 }
0x1626   :  { %v9998_v55 = vpop.f32.mrb[59].mxu1  ;;  %v2136_v45 = vsel %vm613_vm5, %v2128_v51, -inf }
0x1627   :  { %2137 = vmax.xlane.f32.xlu0 %v2136_v45 }
0x1630   :  { %2253 = vrot.lane.b32.xlu1 %v11873_v50, %s11312_s5 }
0x16ac   :  { %v2135_v34 = vpop.xlane.xlu1 %2134 }
0x16ad   :  { %v2139_v39 = vsub.f32 %v2079_v7, %v2135_v34 }
0x16af   :  { %v2141_v40 = vmul.f32 1.442695, %v2139_v39 }
0x16b0   :  { %v2254_v20 = vpop.permute.xlu1 %2253 }
0x16b1   :  { %10951 = vpow2.f32 %v2141_v40  ;;  %v2259_v26 = vsel %vm517_vm2, %v2254_v20, 0 }
0x16b4   :  { %v2138_v14 = vpop.xlane.xlu0 %2137 }
0x16b5   :  { %v2140_v15 = vsub.f32 %v2128_v51, %v2138_v14 }
0x16b7   :  { %v2143_v16 = vmul.f32 1.442695, %v2140_v15 }
0x16b9   :  { %10953 = vpow2.f32 %v2143_v16 }
0x16bb   :  { %v10952_v17 = vpop.eup %10951 }
0x16bc   :  { %v2145_v18 = vsel %vm613_vm5, %v10952_v17, 0.0 }
0x16bd   :  { %2146 = vadd.xlane.f32.xlu1 %v2145_v18 }
0x16c3   :  { %v10954_v19 = vpop.eup %10953 }
0x16c4   :  { %v2148_v52 = vsel %vm613_vm5, %v10954_v19, 0.0 }
0x16c5   :  { %2149 = vadd.xlane.f32.xlu0 %v2148_v52 }
0x16ce   :  { %2251 = vrot.lane.b32.xlu1 %v11873_v50, %s11313_s9 }
0x16d2   :  { %2301 = vrot.lane.b32.xlu1 %v11877_v61, %s11313_s9 }
0x16db   :  { %2303 = vrot.lane.b32.xlu0 %v11877_v61, %s11312_s5 }
0x174a   :  { %v2147_v21 = vpop.xlane.xlu1 %2146 }
0x174b   :  { %10955 = vrcp.f32 %v2147_v21 }
0x174e   :  { %v2252_v36 = vpop.permute.xlu1 %2251 }
0x1752   :  { %v2150_v22 = vpop.xlane.xlu0 %2149  ;;  %v2302_v38 = vpop.permute.xlu1 %2301 }
0x1753   :  { %10957 = vrcp.f32 %v2150_v22 }
0x1755   :  { %v10956_v24 = vpop.eup %10955 }
0x1756   :  { %v2153_v25 = vmul.f32 %v10956_v24, %v10952_v17  ;;  %v2304_v29 = vpop.permute.xlu0 %2303 }
0x1757   :  { %v2309_v37 = vsel %vm517_vm2, %v2304_v29, 0 }
0x1758   :  { %v2155_v41 = vpack.c.bf16 %v2153_v25, %v2153_v25 }
0x175a   :  { %10002 = vmatmul.mubr.msk.bf16.vlgmr.msra.gmra.mrb[36].mxu0 %vm613_vm5, %v2155_v41 }
0x175b   :  { %10012 = vmatpush3.bf16.xpose.msra.mxu0 %v2259_v26  ;;  %10013 = vmatprep.mubr.msk.bf16.mxu0 %vm11309_vm1, %v11308_v31 }
0x175c   :  { %10023 = vmatprep.subr.bf16.mxu0 %v11308_v31 }
0x175d   :  { %v10958_v27 = vpop.eup %10957 }
0x175e   :  { %v2154_v28 = vmul.f32 %v10958_v27, %v10954_v19 }
0x1760   :  { %v2156_v33 = vpack.c.bf16 %v2154_v28, %v2154_v28 }
0x1762   :  { %10008 = vmatmul.mubr.msk.bf16.vlgmr.msra.gmra.mrb[60].mxu1 %vm613_vm5, %v2156_v33  ;;  %10014 = vmatmul.mubr.msk.bf16.vlgmr.msra.gmra.mrb[40].mxu0 %vm517_vm2, %v2252_v36 }
0x1763   :  { %10018 = vmatpush3.bf16.xpose.msra.mxu1 %v2309_v37  ;;  %10019 = vmatprep.mubr.msk.bf16.mxu1 %vm11309_vm1, %v11308_v31 }
0x1764   :  { %10029 = vmatprep.subr.bf16.mxu1 %v11308_v31  ;;  %10025 = vmatprep.mubr.msk.bf16.mxu0 %vm11309_vm1, %v11308_v31 }
0x176a   :  { %10020 = vmatmul.mubr.msk.bf16.vlgmr.msra.gmra.mrb[64].mxu1 %vm517_vm2, %v2302_v38 }
0x176b   :  { %10031 = vmatprep.mubr.msk.bf16.mxu1 %vm11309_vm1, %v11308_v31 }
0x182d   :  { %v11933_v43 = vpop.f32.mrb[36].mxu0 }
0x182e   :  { %v10003_v44 = vpop.f32.mrb[37].mxu0 }
0x182f   :  { %v2202_v46 = vpop.f32.mrb[38].mxu0 }
0x1830   :  { %v10004_v47 = vpop.f32.mrb[39].mxu0 }
0x1835   :  { %v11935_v48 = vpop.f32.mrb[60].mxu1  ;;  %v2295_v53 = vpop.f32.mrb[40].mxu0 }
0x1836   :  { %v2296_v58 = vadd.f32 %v2295_v53, %v11627_v57  ;;  %v10009_v60 = vpop.f32.mrb[61].mxu1  ;;  %v10015_v62 = vpop.f32.mrb[41].mxu0 }
0x1837   :  { %v2248_v63 = vpop.f32.mrb[62].mxu1  ;;  %v2298_v1 = vpop.f32.mrb[42].mxu0 }
0x1838   :  { %v10010_v4 = vpop.f32.mrb[63].mxu1  ;;  %v10016_v5 = vpop.f32.mrb[43].mxu0  ;;  %v2351_v6 = vsel %vm613_vm5, %v2296_v58, -inf }
0x1839   :  { %2352 = vmax.xlane.f32.xlu1 %v2351_v6 }
0x183d   :  { %v2345_v42 = vpop.f32.mrb[64].mxu1 }
0x183e   :  { %v2346_v7 = vadd.f32 %v2345_v42, %v11627_v57  ;;  %v10021_v8 = vpop.f32.mrb[65].mxu1 }
0x183f   :  { %v2348_v10 = vpop.f32.mrb[66].mxu1 }
0x1840   :  { %v10022_v9 = vpop.f32.mrb[67].mxu1  ;;  %v2354_v11 = vsel %vm613_vm5, %v2346_v7, -inf }
0x1841   :  { %2355 = vmax.xlane.f32.xlu0 %v2354_v11 }
0x184a   :  { %2376 = vrot.lane.b32.xlu1 %v11875_v59, %s11313_s9 }
0x184e   :  { %2475 = vrot.lane.b32.xlu1 %v11873_v50, %s11314_s13 }
0x1852   :  { %2525 = vrot.lane.b32.xlu1 %v11877_v61, %s11314_s13 }
0x1856   :  { %2473 = vrot.lane.b32.xlu1 %v11873_v50, %s11315_s17 }
0x18c6   :  { %v2353_v12 = vpop.xlane.xlu1 %2352 }
0x18c7   :  { %v2357_v51 = vsub.f32 %v2296_v58, %v2353_v12 }
0x18c9   :  { %v2359_v23 = vmul.f32 1.442695, %v2357_v51 }
0x18ca   :  { %v2377_v13 = vpop.permute.xlu1 %2376 }
0x18cb   :  { %10959 = vpow2.f32 %v2359_v23  ;;  %v2382_v55 = vsel %vm643_vm3, %v2377_v13, 0 }
0x18cc   :  { %10024 = vmatpush3.bf16.msra.mxu0 %v2382_v55 }
0x18cd   :  { %10035 = vmatprep.subr.bf16.mxu0 %v11308_v31 }
0x18ce   :  { %v2356_v45 = vpop.xlane.xlu0 %2355  ;;  %v2476_v52 = vpop.permute.xlu1 %2475 }
0x18cf   :  { %v2358_v34 = vsub.f32 %v2346_v7, %v2356_v45  ;;  %v2481_v25 = vsel %vm517_vm2, %v2476_v52, 0 }
0x18d1   :  { %v2361_v39 = vmul.f32 1.442695, %v2358_v34 }
0x18d2   :  { %v2526_v41 = vpop.permute.xlu1 %2525 }
0x18d3   :  { %10961 = vpow2.f32 %v2361_v39  ;;  %v2531_v33 = vsel %vm517_vm2, %v2526_v41, 0 }
0x18d5   :  { %v10960_v40 = vpop.eup %10959 }
0x18d6   :  { %v2363_v14 = vsel %vm613_vm5, %v10960_v40, 0.0  ;;  %v2474_v29 = vpop.permute.xlu1 %2473 }
0x18d7   :  { %2364 = vadd.xlane.f32.xlu0 %v2363_v14 }
0x18dd   :  { %v10962_v15 = vpop.eup %10961 }
0x18de   :  { %v2366_v16 = vsel %vm613_vm5, %v10962_v15, 0.0 }
0x18df   :  { %2367 = vadd.xlane.f32.xlu0 %v2366_v16 }
0x18f5   :  { %2425 = vrot.lane.b32.xlu0 %v11894_v49, %s11313_s9 }
0x18f9   :  { %2523 = vrot.lane.b32.xlu0 %v11877_v61, %s11315_s17 }
0x1964   :  { %v2365_v17 = vpop.xlane.xlu0 %2364 }
0x1965   :  { %10963 = vrcp.f32 %v2365_v17 }
0x196c   :  { %v2368_v18 = vpop.xlane.xlu0 %2367 }
0x196d   :  { %10965 = vrcp.f32 %v2368_v18 }
0x196f   :  { %v10964_v19 = vpop.eup %10963 }
0x1970   :  { %v2426_v20 = vpop.permute.xlu0 %2425  ;;  %v2371_v21 = vmul.f32 %v10964_v19, %v10960_v40 }
0x1971   :  { %v2431_v22 = vsel %vm643_vm3, %v2426_v20, 0 }
0x1972   :  { %10030 = vmatpush3.bf16.msra.mxu1 %v2431_v22  ;;  %v2373_v24 = vpack.c.bf16 %v2371_v21, %v2371_v21 }
0x1973   :  { %10041 = vmatprep.subr.bf16.mxu1 %v11308_v31 }
0x1974   :  { %10026 = vmatmul.mubr.msk.bf16.vlgmr.msra.gmra.mrb[44].mxu0 %vm613_vm5, %v2373_v24  ;;  %v2524_v36 = vpop.permute.xlu0 %2523 }
0x1975   :  { %10036 = vmatpush3.bf16.xpose.msra.mxu0 %v2481_v25  ;;  %10037 = vmatprep.mubr.msk.bf16.mxu0 %vm11309_vm1, %v11308_v31 }
0x1976   :  { %10047 = vmatprep.subr.bf16.mxu0 %v11308_v31 }
0x1977   :  { %v10966_v26 = vpop.eup %10965 }
0x1978   :  { %v2372_v27 = vmul.f32 %v10966_v26, %v10962_v15 }
0x197a   :  { %v2374_v28 = vpack.c.bf16 %v2372_v27, %v2372_v27 }
0x197c   :  { %10032 = vmatmul.mubr.msk.bf16.vlgmr.msra.gmra.mrb[68].mxu1 %vm613_vm5, %v2374_v28  ;;  %10038 = vmatmul.mubr.msk.bf16.vlgmr.msra.gmra.mrb[48].mxu0 %vm517_vm2, %v2474_v29 }
0x197d   :  { %10042 = vmatpush3.bf16.xpose.msra.mxu1 %v2531_v33  ;;  %10043 = vmatprep.mubr.msk.bf16.mxu1 %vm11309_vm1, %v11308_v31 }
0x197e   :  { %10053 = vmatprep.subr.bf16.mxu1 %v11308_v31  ;;  %10049 = vmatprep.mubr.msk.bf16.mxu0 %vm11309_vm1, %v11308_v31 }
0x1984   :  { %10044 = vmatmul.mubr.msk.bf16.vlgmr.msra.gmra.mrb[72].mxu1 %vm517_vm2, %v2524_v36 }
0x1985   :  { %10055 = vmatprep.mubr.msk.bf16.mxu1 %vm11309_vm1, %v11308_v31 }
0x1a47   :  { %v11975_v37 = vpop.f32.mrb[44].mxu0 }
0x1a48   :  { %v10027_v38 = vpop.f32.mrb[45].mxu0 }
0x1a49   :  { %v2421_v44 = vpop.f32.mrb[46].mxu0 }
0x1a4a   :  { %v10028_v46 = vpop.f32.mrb[47].mxu0 }
0x1a4f   :  { %v11977_v47 = vpop.f32.mrb[68].mxu1  ;;  %v2517_v53 = vpop.f32.mrb[48].mxu0 }
0x1a50   :  { %v10615_v58 = vpack.i.bf16 %v11977_v47, %v11975_v37  ;;  %v2518_v60 = vadd.f32 %v2517_v53, %v11627_v57  ;;  %v10033_v62 = vpop.f32.mrb[69].mxu1  ;;  %v10039_v63 = vpop.f32.mrb[49].mxu0 }
0x1a51   :  { %v2470_v1 = vpop.f32.mrb[70].mxu1  ;;  %v2520_v4 = vpop.f32.mrb[50].mxu0 }
0x1a52   :  { %v10034_v5 = vpop.f32.mrb[71].mxu1  ;;  %v10040_v6 = vpop.f32.mrb[51].mxu0  ;;  %v2573_v42 = vsel %vm613_vm5, %v2518_v60, -inf }
0x1a53   :  { %2574 = vmax.xlane.f32.xlu1 %v2573_v42 }
0x1a57   :  { %v2567_v7 = vpop.f32.mrb[72].mxu1 }
0x1a58   :  { %v2568_v8 = vadd.f32 %v2567_v7, %v11627_v57  ;;  %v10045_v10 = vpop.f32.mrb[73].mxu1 }
0x1a59   :  { %v2570_v9 = vpop.f32.mrb[74].mxu1 }
0x1a5a   :  { %v10046_v11 = vpop.f32.mrb[75].mxu1  ;;  %v2576_v12 = vsel %vm613_vm5, %v2568_v8, -inf }
0x1a5b   :  { %2577 = vmax.xlane.f32.xlu0 %v2576_v12 }
0x1a64   :  { %2597 = vrot.lane.b32.xlu1 %v11875_v59, %s11315_s17 }
0x1a68   :  { %2695 = vrot.lane.b32.xlu1 %v11873_v50, %s11316_s21 }
0x1a6c   :  { %2745 = vrot.lane.b32.xlu1 %v11877_v61, %s11316_s21 }
0x1a70   :  { %2693 = vrot.lane.b32.xlu1 %v11873_v50, %s11317_s28 }
0x1ae0   :  { %v2575_v51 = vpop.xlane.xlu1 %2574 }
0x1ae1   :  { %v2579_v23 = vsub.f32 %v2518_v60, %v2575_v51 }
0x1ae3   :  { %v2581_v13 = vmul.f32 1.442695, %v2579_v23 }
0x1ae4   :  { %v2598_v55 = vpop.permute.xlu1 %2597 }
0x1ae5   :  { %10967 = vpow2.f32 %v2581_v13  ;;  %v2603_v45 = vsel %vm643_vm3, %v2598_v55, 0 }
0x1ae6   :  { %10048 = vmatpush3.bf16.msra.mxu0 %v2603_v45 }
0x1ae7   :  { %10059 = vmatprep.subr.bf16.mxu0 %v11308_v31 }
0x1ae8   :  { %v2578_v34 = vpop.xlane.xlu0 %2577  ;;  %v2696_v52 = vpop.permute.xlu1 %2695 }
0x1ae9   :  { %v2580_v39 = vsub.f32 %v2568_v8, %v2578_v34  ;;  %v2701_v25 = vsel %vm517_vm2, %v2696_v52, 0 }
0x1aeb   :  { %v2583_v40 = vmul.f32 1.442695, %v2580_v39 }
0x1aec   :  { %v2746_v41 = vpop.permute.xlu1 %2745 }
0x1aed   :  { %10969 = vpow2.f32 %v2583_v40  ;;  %v2751_v29 = vsel %vm517_vm2, %v2746_v41, 0  ;;  %v10762_v41 = vld [vmem:[%s11388_s30 + $0x38] sm:$0xff]  }
0x1aef   :  { %v10968_v14 = vpop.eup %10967 }
0x1af0   :  { %v2585_v15 = vsel %vm613_vm5, %v10968_v14, 0.0  ;;  %v2694_v28 = vpop.permute.xlu1 %2693 }
0x1af1   :  { %2586 = vadd.xlane.f32.xlu0 %v2585_v15 }
0x1af7   :  { %v10970_v16 = vpop.eup %10969 }
0x1af8   :  { %v2588_v50 = vsel %vm613_vm5, %v10970_v16, 0.0 }
0x1af9   :  { %2589 = vadd.xlane.f32.xlu0 %v2588_v50 }
0x1b0f   :  { %2645 = vrot.lane.b32.xlu0 %v11894_v49, %s11315_s17 }
0x1b13   :  { %2743 = vrot.lane.b32.xlu0 %v11877_v61, %s11317_s28 }
0x1b7e   :  { %v2587_v17 = vpop.xlane.xlu0 %2586 }
0x1b7f   :  { %10971 = vrcp.f32 %v2587_v17 }
0x1b86   :  { %v2590_v18 = vpop.xlane.xlu0 %2589 }
0x1b87   :  { %10973 = vrcp.f32 %v2590_v18 }
0x1b89   :  { %v10972_v19 = vpop.eup %10971 }
0x1b8a   :  { %v2646_v20 = vpop.permute.xlu0 %2645  ;;  %v2593_v21 = vmul.f32 %v10972_v19, %v10968_v14 }
0x1b8b   :  { %v2651_v22 = vsel %vm643_vm3, %v2646_v20, 0 }
0x1b8c   :  { %10054 = vmatpush3.bf16.msra.mxu1 %v2651_v22  ;;  %v2595_v24 = vpack.c.bf16 %v2593_v21, %v2593_v21  ;;  %v10759_v22 = vld [vmem:[%s11388_s30 + $0x20] sm:$0xff]  }
0x1b8d   :  { %10065 = vmatprep.subr.bf16.mxu1 %v11308_v31 }
0x1b8e   :  { %10050 = vmatmul.mubr.msk.bf16.vlgmr.msra.gmra.mrb[52].mxu0 %vm613_vm5, %v2595_v24  ;;  %v2744_v33 = vpop.permute.xlu0 %2743  ;;  %v10760_v24 = vld [vmem:[%s11388_s30 + $0x28] sm:$0xff]  }
0x1b8f   :  { %10060 = vmatpush3.bf16.xpose.msra.mxu0 %v2701_v25  ;;  %10061 = vmatprep.mubr.msk.bf16.mxu0 %vm11309_vm1, %v11308_v31  ;;  %v10761_v25 = vld [vmem:[%s11388_s30 + $0x30] sm:$0xff]   ;;  %s13223_s30 = sld [smem:[#allocation18_spill]] }
0x1b90   :  { %10071 = vmatprep.subr.bf16.mxu0 %v11308_v31 }
0x1b91   :  { %v10974_v61 = vpop.eup %10973 }
0x1b92   :  { %v2594_v26 = vmul.f32 %v10974_v61, %v10970_v16 }
0x1b94   :  { %v2596_v27 = vpack.c.bf16 %v2594_v26, %v2594_v26 }
0x1b96   :  { %10056 = vmatmul.mubr.msk.bf16.vlgmr.msra.gmra.mrb[76].mxu1 %vm613_vm5, %v2596_v27  ;;  %10062 = vmatmul.mubr.msk.bf16.vlgmr.msra.gmra.mrb[56].mxu0 %vm517_vm2, %v2694_v28 }
0x1b97   :  { %10066 = vmatpush3.bf16.xpose.msra.mxu1 %v2751_v29  ;;  %10067 = vmatprep.mubr.msk.bf16.mxu1 %vm11309_vm1, %v11308_v31 }
0x1b98   :  { %10077 = vmatprep.subr.bf16.mxu1 %v11308_v31  ;;  %10073 = vmatprep.mubr.msk.bf16.mxu0 %vm11309_vm1, %v11308_v31 }
0x1b9e   :  { %10068 = vmatmul.mubr.msk.bf16.vlgmr.msra.gmra.mrb[80].mxu1 %vm517_vm2, %v2744_v33 }
0x1b9f   :  { %10079 = vmatprep.mubr.msk.bf16.mxu1 %vm11309_vm1, %v11308_v31 }
0x1c61   :  { %v2639_v36 = vpop.f32.mrb[52].mxu0 }
0x1c62   :  { %v10051_v38 = vpop.f32.mrb[53].mxu0 }
0x1c63   :  { %v2642_v44 = vpop.f32.mrb[54].mxu0 }
0x1c64   :  { %v10052_v46 = vpop.f32.mrb[55].mxu0 }
0x1c69   :  { %v2687_v53 = vpop.f32.mrb[76].mxu1  ;;  %v2737_v60 = vpop.f32.mrb[56].mxu0 }
0x1c6a   :  { %v10620_v62 = vpack.i.bf16 %v2687_v53, %v2639_v36  ;;  %v2738_v63 = vadd.f32 %v2737_v60, %v11627_v57  ;;  %v10057_v1 = vpop.f32.mrb[77].mxu1  ;;  %v10063_v4 = vpop.f32.mrb[57].mxu0 }
0x1c6b   :  { %v2690_v5 = vpop.f32.mrb[78].mxu1  ;;  %v2740_v6 = vpop.f32.mrb[58].mxu0 }
0x1c6c   :  { %v10058_v42 = vpop.f32.mrb[79].mxu1  ;;  %v10064_v7 = vpop.f32.mrb[59].mxu0  ;;  %v2793_v8 = vsel %vm613_vm5, %v2738_v63, -inf }
0x1c6d   :  { %2794 = vmax.xlane.f32.xlu1 %v2793_v8 }
0x1c71   :  { %v2787_v10 = vpop.f32.mrb[80].mxu1 }
0x1c72   :  { %v2788_v9 = vadd.f32 %v2787_v10, %v11627_v57  ;;  %v10069_v11 = vpop.f32.mrb[81].mxu1 }
0x1c73   :  { %v2790_v12 = vpop.f32.mrb[82].mxu1 }
0x1c74   :  { %v10070_v51 = vpop.f32.mrb[83].mxu1  ;;  %v2796_v23 = vsel %vm613_vm5, %v2788_v9, -inf }
0x1c75   :  { %2797 = vmax.xlane.f32.xlu0 %v2796_v23  ;;  %v9213_v23 = vld [vmem:[%s11393_s6 + $0x1] ss:$0 sm:$0xff]  ;;  %s13224_s6 = sld [smem:[#allocation19_spill]] }
0x1c7e   :  { %2817 = vrot.lane.b32.xlu1 %v11875_v59, %s11317_s28 }
0x1c82   :  { %10616 = vrot.lane.b32.xlu1 %v10615_v58, %s11316_s21 }
0x1c86   :  { %10621 = vrot.lane.b32.xlu1 %v10620_v62, %s11314_s13 }
0x1cfa   :  { %v2795_v13 = vpop.xlane.xlu1 %2794 }
0x1cfb   :  { %v2799_v55 = vsub.f32 %v2738_v63, %v2795_v13 }
0x1cfd   :  { %v2801_v45 = vmul.f32 1.442695, %v2799_v55 }
0x1cfe   :  { %v2818_v57 = vpop.permute.xlu1 %2817 }
0x1cff   :  { %10975 = vpow2.f32 %v2801_v45  ;;  %v2823_v34 = vsel %vm643_vm3, %v2818_v57, 0 }
0x1d00   :  { %10072 = vmatpush3.bf16.msra.mxu0 %v2823_v34 }
0x1d01   :  { %10083 = vmatprep.subr.bf16.mxu0 %v11308_v31 }
0x1d02   :  { %v2798_v39 = vpop.xlane.xlu0 %2797  ;;  %v10617_v46 = vpop.permute.xlu1 %10616 }
0x1d03   :  { %v2800_v40 = vsub.f32 %v2788_v9, %v2798_v39  ;;  %v10619_v60 = vunpack.i.h.bf16 %v10617_v46  ;;  %v10618_v62 = vunpack.i.l.bf16 %v10617_v46  ;;  %v9217_v46 = vld [vmem:[%s13215_s4 + $0x1] ss:$0 sm:$0xff] }
0x1d05   :  { %v2803_v59 = vmul.f32 1.442695, %v2800_v40  ;;  %v2938_v5 = vsel %vm517_vm2, %v11935_v48, %v10619_v60  ;;  %v2937_v6 = vsel %vm517_vm2, %v11933_v43, %v10618_v62 }
0x1d06   :  { %v10622_v53 = vpop.permute.xlu1 %10621 }
0x1d07   :  { %10977 = vpow2.f32 %v2803_v59  ;;  %v10624_v63 = vunpack.i.h.bf16 %v10622_v53  ;;  %v10623_v1 = vunpack.i.l.bf16 %v10622_v53 }
0x1d09   :  { %v10976_v14 = vpop.eup %10975  ;;  %v2940_v8 = vsel %vm1421_vm6, %v2938_v5, %v10624_v63  ;;  %v2939_v10 = vsel %vm1421_vm6, %v2937_v6, %v10623_v1  ;;  %v10775_v1 = vld [vmem:[%s13216_s15 + $0xc0] sm:$0xff]   ;;  %v10777_v5 = vld [vmem:[%s13216_s15 + $0xc8] sm:$0xff]  }
0x1d0a   :  { %v2805_v37 = vsel %vm613_vm5, %v10976_v14, 0.0  ;;  %v10778_v6 = vld [vmem:[%s13216_s15 + $0x88] sm:$0xff]  }
0x1d0b   :  { %2806 = vadd.xlane.f32.xlu0 %v2805_v37 }
0x1d11   :  { %v10978_v47 = vpop.eup %10977 }
0x1d12   :  { %v2808_v58 = vsel %vm613_vm5, %v10978_v47, 0.0 }
0x1d13   :  { %2809 = vadd.xlane.f32.xlu0 %v2808_v58 }
0x1d29   :  { %2865 = vrot.lane.b32.xlu0 %v11894_v49, %s11317_s28 }
0x1d98   :  { %v2807_v15 = vpop.xlane.xlu0 %2806 }
0x1d99   :  { %10979 = vrcp.f32 %v2807_v15 }
0x1da0   :  { %v2810_v16 = vpop.xlane.xlu0 %2809 }
0x1da1   :  { %10981 = vrcp.f32 %v2810_v16 }
0x1da3   :  { %v10980_v50 = vpop.eup %10979 }
0x1da4   :  { %v2866_v17 = vpop.permute.xlu0 %2865  ;;  %v2813_v18 = vmul.f32 %v10980_v50, %v10976_v14 }
0x1da5   :  { %v2871_v19 = vsel %vm643_vm3, %v2866_v17, 0  ;;  %v10765_v17 = vld [vmem:[%s11408_s27 + $0x44] ss:$8 sps:$4 sm:$0xff]  }
0x1da6   :  { %10078 = vmatpush3.bf16.msra.mxu1 %v2871_v19  ;;  %v2815_v52 = vpack.c.bf16 %v2813_v18, %v2813_v18  ;;  %v10763_v18 = vld [vmem:[%s11408_s27 + $0x40] ss:$8 sps:$4 sm:$0xff]   ;;  %v10768_v19 = vld [vmem:[%s11408_s27 + $0x54] ss:$8 sps:$4 sm:$0xff]  }
0x1da7   :  { %3145 = vmatprep.subr.bf16.mxu1 %v10765_v17 }
0x1da8   :  { %10074 = vmatmul.mubr.msk.bf16.vlgmr.msra.gmra.mrb[60].mxu0 %vm613_vm5, %v2815_v52  ;;  %v10766_v52 = vld [vmem:[%s11408_s27 + $0x50] ss:$8 sps:$4 sm:$0xff]  }
0x1da9   :  { %10091 = vmatprep.mubr.msk.bf16.mxu0 %vm11309_vm1, %v11308_v31  ;;  %10084 = vmatpush3.bf16.msra.mxu0 %v10759_v22  ;;  %v10774_v22 = vld [vmem:[%s11408_s27 + $0x74] ss:$8 sps:$4 sm:$0xff]  }
0x1daa   :  { %10085 = vmatprep.subr.bf16.mxu0 %v11308_v31 }
0x1dab   :  { %v10982_v49 = vpop.eup %10981 }
0x1dac   :  { %v2814_v20 = vmul.f32 %v10982_v49, %v10978_v47  ;;  %v10771_v49 = vld [vmem:[%s11408_s27 + $0x64] ss:$8 sps:$4 sm:$0xff]  }
0x1dad   :  { %10086 = vmatpush3.bf16.msra.mxu0 %v10760_v24 }
0x1dae   :  { %v2816_v21 = vpack.c.bf16 %v2814_v20, %v2814_v20  ;;  %10087 = vmatprep.subr.bf16.mxu0 %v11308_v31  ;;  %v10769_v20 = vld [vmem:[%s11408_s27 + $0x60] ss:$8 sps:$4 sm:$0xff]  }
0x1db0   :  { %10080 = vmatmul.mubr.msk.bf16.vlgmr.msra.gmra.mrb[84].mxu1 %vm613_vm5, %v2816_v21  ;;  %v10772_v21 = vld [vmem:[%s11408_s27 + $0x70] ss:$8 sps:$4 sm:$0xff]   ;;  %s13226_s27 = sld [smem:[#allocation21_spill]] }
0x1db1   :  { %3177 = vmatprep.mubr.bf16.mxu1 %v11307_v2  ;;  %10088 = vmatpush3.bf16.msra.mxu0 %v10761_v25 }
0x1db2   :  { %10089 = vmatprep.subr.bf16.mxu0 %v11308_v31  ;;  %3146 = vmatpush1.bf16.msra.mxu1 %v10763_v18 }
0x1db3   :  { %3147 = vmatprep.subr.bf16.mxu1 %v10768_v19 }
0x1db5   :  { %10090 = vmatpush3.bf16.msra.mxu0 %v10762_v41 }
0x1db6   :  { %3148 = vmatpush1.bf16.msra.mxu1 %v10766_v52  ;;  %9644 = vmatprep.subr.bf16.mxu0 %v10775_v1 }
0x1db7   :  { %3149 = vmatprep.subr.bf16.mxu1 %v10771_v49 }
0x1dba   :  { %3150 = vmatpush1.bf16.msra.mxu1 %v10769_v20 }
0x1dbb   :  { %3151 = vmatprep.subr.bf16.mxu1 %v10774_v22 }
0x1dbe   :  { %3152 = vmatpush1.bf16.msra.mxu1 %v10772_v21 }
0x1dbf   :  { %10095 = vmatprep.subr.bf16.mxu1 %v11308_v31 }
0x1e7b   :  { %v2859_v61 = vpop.f32.mrb[60].mxu0 }
0x1e7c   :  { %v10075_v26 = vpop.f32.mrb[61].mxu0 }
0x1e7d   :  { %v2862_v27 = vpop.f32.mrb[62].mxu0 }
0x1e7e   :  { %v10076_v28 = vpop.f32.mrb[63].mxu0 }
0x1e83   :  { %v2907_v29 = vpop.f32.mrb[84].mxu1 }
0x1e84   :  { %v10625_v33 = vpack.i.bf16 %v2907_v29, %v2859_v61  ;;  %v10081_v36 = vpop.f32.mrb[85].mxu1 }
0x1e85   :  { %v2910_v38 = vpop.f32.mrb[86].mxu1 }
0x1e86   :  { %10626 = vrot.lane.b32.xlu1 %v10625_v33, %s11312_s5  ;;  %v10082_v44 = vpop.f32.mrb[87].mxu1  ;;  %v9216_v33 = vld [vmem:[%s11398_s12 + $0x1] ss:$0 sm:$0xff]  ;;  %s13225_s12 = sld [smem:[#allocation20_spill]] }
0x1ef8   :  { %v10627_v4 = vpop.permute.xlu1 %10626 }
0x1ef9   :  { %v10629_v42 = vunpack.i.h.bf16 %v10627_v4  ;;  %v10628_v7 = vunpack.i.l.bf16 %v10627_v4  ;;  %v10776_v4 = vld [vmem:[%s13216_s15 + $0x80] sm:$0xff]  }
0x1efb   :  { %v2942_v9 = vsel %vm1424_vm7, %v2940_v8, %v10629_v42  ;;  %v2941_v11 = vsel %vm1424_vm7, %v2939_v10, %v10628_v7  ;;  %v10779_v42 = vld [vmem:[%s13216_s15 + $0xd0] sm:$0xff]   ;;  %v10781_v8 = vld [vmem:[%s13216_s15 + $0xd8] sm:$0xff]  }
0x1efc   :  { %v2943_v12 = vpack.c.bf16 %v2942_v9, %v2941_v11  ;;  %v10780_v7 = vld [vmem:[%s13216_s15 + $0x90] sm:$0xff]   ;;  %v10782_v10 = vld [vmem:[%s13216_s15 + $0x98] sm:$0xff]   ;;  %v10783_v9 = vld [vmem:[%s13216_s15 + $0xe0] sm:$0xff]  }
0x1efd   :  { %v10784_v11 = vld [vmem:[%s13216_s15 + $0xa0] sm:$0xff]  }
0x1efe   :  { %10092 = vmatmul.mubr.msk.bf16.vlgmr.msra.gmra.mrb[64].mxu0 %vm264_vm0, %v2943_v12  ;;  %v10785_v12 = vld [vmem:[%s13216_s15 + $0xe8] sm:$0xff]  }
0x1eff   :  { %9645 = vmatpush3.bf16.msra.mxu0 %v10776_v4 }
0x1f00   :  { %9646 = vmatprep.subr.bf16.mxu0 %v10777_v5 }
0x1f03   :  { %9647 = vmatpush3.bf16.msra.mxu0 %v10778_v6 }
0x1f04   :  { %9648 = vmatprep.subr.bf16.mxu0 %v10779_v42 }
0x1f07   :  { %9649 = vmatpush3.bf16.msra.mxu0 %v10780_v7 }
0x1f08   :  { %9650 = vmatprep.subr.bf16.mxu0 %v10781_v8  ;;  %v9273_v8 = vld [vmem:[%s13218_s23 + $0x1] ss:$0 sm:$0xff] }
0x1f0b   :  { %9651 = vmatpush3.bf16.msra.mxu0 %v10782_v10 }
0x1f0c   :  { %9652 = vmatprep.subr.bf16.mxu0 %v10783_v9 }
0x1f0f   :  { %9653 = vmatpush3.bf16.msra.mxu0 %v10784_v11 }
0x1f10   :  { %9654 = vmatprep.subr.bf16.mxu0 %v10785_v12 }
0x1fd1   :  { %v3014_v51 = vpop.f32.mrb[64].mxu0 }
0x1fd2   :  { %v3021_v48 = vadd.f32 %v3014_v51, %v11843_v0  ;;  %v10093_v13 = vpop.f32.mrb[65].mxu0  ;;  %v10786_v51 = vld [vmem:[%s13216_s15 + $0xa8] sm:$0xff]  }
0x1fd3   :  { %v3017_v55 = vpop.f32.mrb[66].mxu0  ;;  %9655 = vmatpush3.bf16.msra.mxu0 %v10786_v51  ;;  %v10789_v13 = vld [vmem:[%s13216_s15 + $0xf8] sm:$0xff]  }
0x1fd4   :  { %v12061_v43 = vadd.f32 %v9213_v23, %v3021_v48  ;;  %v3022_v45 = vadd.f32 %v3017_v55, %v11846_v3  ;;  %v10094_v57 = vpop.f32.mrb[67].mxu0  ;;  %v10788_v48 = vld [vmem:[%s13216_s15 + $0xb0] sm:$0xff]   ;;  %v10790_v55 = vld [vmem:[%s13216_s15 + $0xb8] sm:$0xff]  }
0x1fd5   :  { %v12109_v57 = vld [vmem:[%s13219_s8 + $0x10] sm:$0xff] }
0x1fd6   :  { %v12064_v34 = vadd.f32 %v9213_v23, %v3022_v45  ;;  %v3037_v39 = vsel %vm264_vm0, %v12061_v43, 0.0  ;;  %v10787_v23 = vld [vmem:[%s13216_s15 + $0xf0] sm:$0xff]   ;;  %v12106_v45 = vld [vmem:[%s13219_s8] sm:$0xff] }
0x1fd7   :  { %3038 = vadd.xlane.f32.xlu0 %v3037_v39  ;;  %9656 = vmatprep.subr.bf16.mxu0 %v10787_v23  ;;  %v3550_v39 = vsel %vm264_vm0, %v12106_v45, 0.0 }
0x1fd8   :  { %v3040_v40 = vsel %vm264_vm0, %v12064_v34, 0.0  ;;  %9657 = vmatpush3.bf16.msra.mxu0 %v10788_v48 }
0x1fd9   :  { %3041 = vadd.xlane.f32.xlu1 %v3040_v40  ;;  %9658 = vmatprep.subr.bf16.mxu0 %v10789_v13  ;;  %v3556_v40 = vsel %vm264_vm0, %v12109_v57, 0.0 }
0x1fdc   :  { %9659 = vmatpush3.bf16.msra.mxu0 %v10790_v55 }
0x1fdd   :  { %10107 = vmatprep.subr.bf16.mxu0 %v11308_v31  ;;  %3551 = vadd.xlane.f32.xlu1 %v3550_v39 }
0x1fe1   :  { %3557 = vadd.xlane.f32.xlu1 %v3556_v40  ;;  %v3541_v40 = vld [vmem:[%s13219_s8 + $0x8] sm:$0xff] }
0x2064   :  { %v3039_v0 = vpop.xlane.xlu0 %3038 }
0x2065   :  { %v3043_v59 = vmul.f32 0.015625, %v3039_v0  ;;  %v9226_v0 = vld [vmem:[%s13217_s18 + $0x2] sm:$0x3] }
0x2066   :  { %v3042_v14 = vpop.xlane.xlu1 %3041 }
0x2067   :  { %v3045_v3 = vsub.f32 %v12061_v43, %v3043_v59  ;;  %v3044_v37 = vmul.f32 0.015625, %v3042_v14  ;;  %v3095_v59 = vrot.slane %v9226_v0, %v11584_v32  ;;  %v3099_v14 = vrot.slane %v9226_v0, %v11593_v35 }
0x2069   :  { %v3046_v47 = vsub.f32 %v12064_v34, %v3044_v37  ;;  %v3047_v58 = vmul.f32 %v3045_v3, %v3045_v3 }
0x206a   :  { %v3552_v23 = vpop.xlane.xlu1 %3551 }
0x206b   :  { %v3049_v15 = vsel %vm264_vm0, %v3047_v58, 0.0  ;;  %v3048_v16 = vmul.f32 %v3046_v47, %v3046_v47  ;;  %v3562_v55 = vmul.f32 0.015625, %v3552_v23 }
0x206c   :  { %3050 = vadd.xlane.f32.xlu0 %v3049_v15 }
0x206d   :  { %v3052_v50 = vsel %vm264_vm0, %v3048_v16, 0.0 }
0x206e   :  { %v3558_v0 = vpop.xlane.xlu1 %3557 }
0x2070   :  { %3053 = vadd.xlane.f32.xlu0 %v3052_v50 }
0x20f9   :  { %v3051_v24 = vpop.xlane.xlu0 %3050 }
0x20fa   :  { %v3055_v25 = vmul.f32 0.015625, %v3051_v24 }
0x20fc   :  { %v3057_v41 = vadd.f32 1e-05, %v3055_v25 }
0x20fd   :  { %v3054_v61 = vpop.xlane.xlu0 %3053 }
0x20fe   :  { %10983 = vrsqrt.f32 %v3057_v41  ;;  %v3056_v26 = vmul.f32 0.015625, %v3054_v61 }
0x2100   :  { %v3058_v27 = vadd.f32 1e-05, %v3056_v26 }
0x2102   :  { %10985 = vrsqrt.f32 %v3058_v27 }
0x2108   :  { %v10984_v28 = vpop.eup %10983 }
0x2109   :  { %v3061_v29 = vmul.f32 %v10984_v28, %v3045_v3 }
0x210b   :  { %v3069_v38 = vmul.f32 %v9216_v33, %v3061_v29 }
0x210c   :  { %v10986_v36 = vpop.eup %10985 }
0x210d   :  { %v3062_v44 = vmul.f32 %v10986_v36, %v3046_v47  ;;  %v3077_v60 = vadd.f32 %v9217_v46, %v3069_v38 }
0x210f   :  { %v3070_v53 = vmul.f32 %v9216_v33, %v3062_v44 }
0x2111   :  { %v3078_v62 = vadd.f32 %v9217_v46, %v3070_v53 }
0x2113   :  { %v3079_v63 = vpack.c.bf16 %v3078_v62, %v3077_v60 }
0x2115   :  { %9235 = vmatmul.mubr.msk.bf16.vlgmr.msra.gmra.mrb[88].mxu1 %vm264_vm0, %v3079_v63 }
0x2116   :  { %10103 = vmatprep.mubr.msk.bf16.mxu1 %vm11309_vm1, %v11308_v31 }
0x21e8   :  { %v3179_v3 = vpop.f32.mrb[88].mxu1 }
0x21e9   :  { %v3180_v37 = vadd.f32 %v3179_v3, %v3095_v59  ;;  %v3181_v47 = vpop.f32.mrb[89].mxu1  ;;  %v12128_v3 = vsub.f32 %v12106_v45, %v3562_v55 }
0x21ea   :  { %v3182_v58 = vadd.f32 %v3181_v47, %v3099_v14  ;;  %v3183_v15 = vpop.f32.mrb[90].mxu1 }
0x21eb   :  { %v9236_v16 = vmul.f32 -1.702, %v3180_v37  ;;  %v3184_v50 = vadd.f32 %v3183_v15, %v3095_v59  ;;  %v3185_v17 = vpop.f32.mrb[91].mxu1  ;;  %v3570_v47 = vmul.f32 %v12128_v3, %v12128_v3 }
0x21ec   :  { %v9237_v18 = vmul.f32 -1.702, %v3182_v58  ;;  %v3186_v19 = vadd.f32 %v3185_v17, %v3099_v14  ;;  %v3553_v14 = vsel %vm264_vm0, %v3541_v40, 0.0 }
0x21ed   :  { %v3196_v52 = vmul.f32 1.442695, %v9236_v16  ;;  %v9238_v49 = vmul.f32 -1.702, %v3184_v50  ;;  %v3574_v15 = vsel %vm264_vm0, %v3570_v47, 0.0 }
0x21ee   :  { %v3198_v20 = vmul.f32 1.442695, %v9237_v18  ;;  %v9239_v21 = vmul.f32 -1.702, %v3186_v19 }
0x21ef   :  { %10987 = vpow2.f32 %v3196_v52  ;;  %v3200_v22 = vmul.f32 1.442695, %v9238_v49 }
0x21f0   :  { %10989 = vpow2.f32 %v3198_v20  ;;  %v3202_v24 = vmul.f32 1.442695, %v9239_v21 }
0x21f1   :  { %10991 = vpow2.f32 %v3200_v22 }
0x21f2   :  { %10993 = vpow2.f32 %v3202_v24 }
0x21f9   :  { %v10988_v25 = vpop.eup %10987 }
0x21fa   :  { %v10990_v41 = vpop.eup %10989  ;;  %v3204_v61 = vadd.f32 1.0, %v10988_v25 }
0x21fb   :  { %v10992_v26 = vpop.eup %10991  ;;  %v3205_v27 = vadd.f32 1.0, %v10990_v41 }
0x21fc   :  { %v10994_v28 = vpop.eup %10993  ;;  %10995 = vrcp.f32 %v3204_v61  ;;  %v3206_v29 = vadd.f32 1.0, %v10992_v26 }
0x21fd   :  { %10997 = vrcp.f32 %v3205_v27  ;;  %v3207_v33 = vadd.f32 1.0, %v10994_v28 }
0x21fe   :  { %10999 = vrcp.f32 %v3206_v29 }
0x21ff   :  { %11001 = vrcp.f32 %v3207_v33 }
0x2206   :  { %v10996_v36 = vpop.eup %10995 }
0x2207   :  { %v10998_v38 = vpop.eup %10997  ;;  %v3216_v53 = vmul.f32 %v10996_v36, %v3180_v37  ;;  %v3543_v37 = vld [vmem:[%s13219_s8 + $0x18] sm:$0xff] }
0x2208   :  { %v11000_v44 = vpop.eup %10999  ;;  %v3217_v62 = vmul.f32 %v10998_v38, %v3182_v58  ;;  %v10791_v38 = vld [vmem:[%s13220_s14] sm:$0xff]  }
0x2209   :  { %v11002_v46 = vpop.eup %11001  ;;  %v3218_v60 = vmul.f32 %v11000_v44, %v3184_v50  ;;  %10096 = vmatpush3.bf16.msra.mxu1 %v10791_v38  ;;  %v10792_v44 = vld [vmem:[%s13220_s14 + $0x8] sm:$0xff]   ;;  %v9298_v38 = vld [vmem:[%s13224_s6] ss:$0 sm:$0xff] }
0x220a   :  { %v3219_v63 = vmul.f32 %v11002_v46, %v3186_v19  ;;  %10097 = vmatprep.subr.bf16.mxu1 %v11308_v31  ;;  %v10793_v46 = vld [vmem:[%s13220_s14 + $0x10] sm:$0xff]  }
0x220b   :  { %v3220_v1 = vpack.c.bf16 %v3218_v60, %v3216_v53  ;;  %v10794_v53 = vld [vmem:[%s13220_s14 + $0x18] sm:$0xff]   ;;  %v10797_v60 = vld [vmem:[%s11466_s3 + $0x4] ss:$8 sps:$4 sm:$0xff]  }
0x220c   :  { %v3221_v4 = vpack.c.bf16 %v3219_v63, %v3217_v62 }
0x220d   :  { %10098 = vmatpush3.bf16.msra.mxu1 %v10792_v44 }
0x220e   :  { %3391 = vmatprep.mubr.bf16.mxu0 %v3221_v4  ;;  %10099 = vmatprep.subr.bf16.mxu1 %v11308_v31 }
0x220f   :  { %3392 = vmatmul.mubr.bf16.vlgmr.msra.gmra.mrb[68].mxu0 %v3220_v1 }
0x2210   :  { %10109 = vmatprep.mubr.msk.bf16.mxu0 %vm11309_vm1, %v11308_v31 }
0x2211   :  { %10100 = vmatpush3.bf16.msra.mxu1 %v10793_v46 }
0x2212   :  { %10101 = vmatprep.subr.bf16.mxu1 %v11308_v31 }
0x2215   :  { %10102 = vmatpush3.bf16.msra.mxu1 %v10794_v53 }
0x2216   :  { %3690 = vmatprep.subr.bf16.mxu1 %v10797_v60 }
0x22e2   :  { %v9660_v5 = vpop.f32.mrb[68].mxu0 }
0x22e3   :  { %v9661_v6 = vpop.f32.mrb[69].mxu0 }
0x22e4   :  { %v9662_v42 = vadd.f32 %v9661_v6, %v9660_v5  ;;  %v9663_v7 = vpop.f32.mrb[70].mxu0 }
0x22e5   :  { %v9664_v10 = vpop.f32.mrb[71].mxu0 }
0x22e6   :  { %v9665_v9 = vadd.f32 %v9664_v10, %v9663_v7  ;;  %v3394_v11 = vadd.f32 %v9662_v42, %v9273_v8  ;;  %v9290_v7 = vld [vmem:[%s13221_s19] ss:$0 sm:$0xff] }
0x22e8   :  { %v3397_v12 = vadd.f32 %v9665_v9, %v9273_v8  ;;  %v3400_v48 = vadd.f32 %v3394_v11, %v12061_v43  ;;  %v3559_v43 = vsel %vm264_vm0, %v3543_v37, 0.0  ;;  %v9291_v11 = vld [vmem:[%s13222_s24] ss:$0 sm:$0xff] }
0x22ea   :  { %v3401_v51 = vadd.f32 %v3397_v12, %v12064_v34  ;;  %v3564_v34 = vmul.f32 0.015625, %v3558_v0 }
0x22ec   :  { %v3406_v13 = vrot.slane %v3401_v51, 7  ;;  %v12135_v58 = vsub.f32 %v12109_v57, %v3564_v34 }
0x22ee   :  { %v3408_v39 = vsel %vm3407_vm8, %v3406_v13, %v3400_v48  ;;  %v3572_v16 = vmul.f32 %v12135_v58, %v12135_v58 }
0x22ef   :  { %v3411_v59 = vsel %vm3410_vm9, %v3408_v39, 0.0 }
0x22f0   :  { %3412 = vadd.xlane.f32.xlu0 %v3411_v59  ;;  %v3580_v45 = vsel %vm264_vm0, %v3572_v16, 0.0 }
0x22f4   :  { %3554 = vadd.xlane.f32.xlu0 %v3553_v14 }
0x22f8   :  { %3560 = vadd.xlane.f32.xlu0 %v3559_v43 }
0x22fc   :  { %3575 = vadd.xlane.f32.xlu0 %v3574_v15 }
0x2300   :  { %3581 = vadd.xlane.f32.xlu0 %v3580_v45 }
0x237d   :  { %v3413_v50 = vpop.xlane.xlu0 %3412 }
0x237e   :  { %v3414_v17 = vmul.f32 0.015625, %v3413_v50  ;;  %v10795_v50 = vld [vmem:[%s11466_s3] ss:$8 sps:$4 sm:$0xff]  }
0x2380   :  { %v3416_v18 = vrot.slane %v3414_v17, 1  ;;  %v3419_v52 = vsub.f32 %v3400_v48, %v3414_v17 }
0x2381   :  { %v3555_v19 = vpop.xlane.xlu0 %3554 }
0x2382   :  { %v3420_v49 = vsub.f32 %v3401_v51, %v3416_v18  ;;  %v3563_v20 = vmul.f32 0.015625, %v3555_v19  ;;  %v3421_v24 = vmul.f32 %v3419_v52, %v3419_v52  ;;  %v10800_v19 = vld [vmem:[%s11466_s3 + $0x14] ss:$8 sps:$4 sm:$0xff]  }
0x2384   :  { %v12141_v21 = vsub.f32 %v3541_v40, %v3563_v20  ;;  %v3422_v57 = vmul.f32 %v3420_v49, %v3420_v49  ;;  %v10798_v20 = vld [vmem:[%s11466_s3 + $0x10] ss:$8 sps:$4 sm:$0xff]  }
0x2385   :  { %v3561_v22 = vpop.xlane.xlu0 %3560 }
0x2386   :  { %v3425_v25 = vrot.slane %v3422_v57, 7  ;;  %v3565_v41 = vmul.f32 0.015625, %v3561_v22  ;;  %v3571_v61 = vmul.f32 %v12141_v21, %v12141_v21  ;;  %v10803_v22 = vld [vmem:[%s11466_s3 + $0x24] ss:$8 sps:$4 sm:$0xff]  }
0x2388   :  { %v3426_v26 = vsel %vm3407_vm8, %v3425_v25, %v3421_v24  ;;  %v12146_v27 = vsub.f32 %v3543_v37, %v3565_v41  ;;  %v3577_v29 = vsel %vm264_vm0, %v3571_v61, 0.0  ;;  %v9297_v25 = vld [vmem:[%s13223_s30] ss:$0 sm:$0xff] }
0x2389   :  { %v3428_v28 = vsel %vm3410_vm9, %v3426_v26, 0.0  ;;  %v3576_v5 = vpop.xlane.xlu0 %3575  ;;  %v10801_v41 = vld [vmem:[%s11466_s3 + $0x20] ss:$8 sps:$4 sm:$0xff]   ;;  %v10806_v26 = vld [vmem:[%s11466_s3 + $0x34] ss:$8 sps:$4 sm:$0xff]  }
0x238a   :  { %3429 = vadd.xlane.f32.xlu1 %v3428_v28  ;;  %v3573_v33 = vmul.f32 %v12146_v27, %v12146_v27  ;;  %v3586_v8 = vmul.f32 0.015625, %v3576_v5 }
0x238c   :  { %v3583_v36 = vsel %vm264_vm0, %v3573_v33, 0.0  ;;  %v3590_v13 = vadd.f32 1e-05, %v3586_v8 }
0x238d   :  { %v3582_v40 = vpop.xlane.xlu0 %3581 }
0x238e   :  { %3578 = vadd.xlane.f32.xlu1 %v3577_v29  ;;  %v3588_v14 = vmul.f32 0.015625, %v3582_v40 }
0x2390   :  { %v3592_v15 = vadd.f32 1e-05, %v3588_v14 }
0x2392   :  { %3584 = vadd.xlane.f32.xlu1 %v3583_v36  ;;  %v10804_v36 = vld [vmem:[%s11466_s3 + $0x30] ss:$8 sps:$4 sm:$0xff]  }
0x2417   :  { %v3430_v62 = vpop.xlane.xlu1 %3429 }
0x2418   :  { %v3431_v63 = vmul.f32 0.015625, %v3430_v62 }
0x241a   :  { %v3432_v1 = vadd.f32 1e-05, %v3431_v63 }
0x241b   :  { %v3579_v4 = vpop.xlane.xlu1 %3578 }
0x241c   :  { %11003 = vrsqrt.f32 %v3432_v1  ;;  %v3587_v6 = vmul.f32 0.015625, %v3579_v4 }
0x241e   :  { %v3591_v23 = vadd.f32 1e-05, %v3587_v6 }
0x241f   :  { %v3585_v48 = vpop.xlane.xlu1 %3584 }
0x2420   :  { %11005 = vrsqrt.f32 %v3591_v23  ;;  %v3589_v0 = vmul.f32 0.015625, %v3585_v48 }
0x2421   :  { %11007 = vrsqrt.f32 %v3590_v13 }
0x2422   :  { %v3593_v43 = vadd.f32 1e-05, %v3589_v0 }
0x2424   :  { %11009 = vrsqrt.f32 %v3593_v43 }
0x2425   :  { %11011 = vrsqrt.f32 %v3592_v15 }
0x2426   :  { %v11004_v42 = vpop.eup %11003 }
0x2427   :  { %v3435_v10 = vrot.slane %v11004_v42, 1  ;;  %v3438_v9 = vmul.f32 %v11004_v42, %v3419_v52  ;;  %v3632_v42 = vld [vmem:[%s13225_s12] sm:$0x3] }
0x2428   :  { %v3641_v8 = vrot.slane %v3632_v42, %v11593_v35 }
0x2429   :  { %v3439_v12 = vmul.f32 %v3435_v10, %v3420_v49  ;;  %v3446_v51 = vmul.f32 %v9290_v7, %v3438_v9 }
0x242a   :  { %v11006_v52 = vpop.eup %11005 }
0x242b   :  { %v3447_v55 = vmul.f32 %v9290_v7, %v3439_v12  ;;  %v3454_v39 = vadd.f32 %v9291_v11, %v3446_v51  ;;  %v11008_v49 = vpop.eup %11007  ;;  %v3599_v57 = vmul.f32 %v11006_v52, %v12141_v21  ;;  %v3637_v7 = vrot.slane %v3632_v42, %v11584_v32 }
0x242c   :  { %v3598_v24 = vmul.f32 %v11008_v49, %v12128_v3 }
0x242d   :  { %v3455_v59 = vadd.f32 %v9291_v11, %v3447_v55  ;;  %v3456_v34 = vpack.c.bf16 %v3454_v39, %v3454_v39  ;;  %v3609_v61 = vmul.f32 %v9297_v25, %v3599_v57 }
0x242e   :  { %v11010_v28 = vpop.eup %11009  ;;  %v3608_v29 = vmul.f32 %v9297_v25, %v3598_v24 }
0x242f   :  { %v3457_v37 = vpack.c.bf16 %v3455_v59, %v3455_v59  ;;  %v3468_v16 = vunpack.c.l.b16 %v3456_v34  ;;  %v11012_v33 = vpop.eup %11011  ;;  %v3619_v44 = vadd.f32 %v9298_v38, %v3609_v61  ;;  %v3601_v21 = vmul.f32 %v11010_v28, %v12146_v27 }
0x2430   :  { %v3618_v46 = vadd.f32 %v9298_v38, %v3608_v29  ;;  %v3600_v53 = vmul.f32 %v11012_v33, %v12135_v58 }
0x2431   :  { %v3469_v47 = vunpack.c.l.b16 %v3457_v37  ;;  %v3611_v60 = vmul.f32 %v9297_v25, %v3601_v21 }
0x2432   :  { %v3622_v3 = vpack.c.bf16 %v3619_v44, %v3618_v46  ;;  %v3610_v62 = vmul.f32 %v9297_v25, %v3600_v53 }
0x2433   :  { %v3470_v45 = vrot.slane %v3469_v47, 7  ;;  %v3621_v63 = vadd.f32 %v9298_v38, %v3611_v60 }
0x2434   :  { %v3620_v1 = vadd.f32 %v9298_v38, %v3610_v62 }
0x2435   :  { %v3471_v17 = vsel %vm3407_vm8, %v3470_v45, %v3468_v16 }
0x2436   :  { %v3472_v18 = vpack.c.b16 %v3471_v17, %v3471_v17  ;;  %v3623_v4 = vpack.c.bf16 %v3621_v63, %v3620_v1 }
0x2438   :  { %10104 = vmatmul.mubr.msk.bf16.vlgmr.msra.gmra.mrb[92].mxu1 %vm264_vm0, %v3472_v18 }
0x2439   :  { %3691 = vmatpush1.bf16.msra.mxu1 %v10795_v50  ;;  %3722 = vmatprep.mubr.bf16.mxu1 %v11307_v2 }
0x243a   :  { %3692 = vmatprep.subr.bf16.mxu1 %v10800_v19 }
0x243d   :  { %3693 = vmatpush1.bf16.msra.mxu1 %v10798_v20 }
0x243e   :  { %3694 = vmatprep.subr.bf16.mxu1 %v10803_v22 }
0x2441   :  { %3695 = vmatpush1.bf16.msra.mxu1 %v10801_v41  ;;  %v12247_v41 = vsel %vm3546_vm10, 0.0, %v11311_v56 }
0x2442   :  { %3696 = vmatprep.subr.bf16.mxu1 %v10806_v26 }
0x2445   :  { %3697 = vmatpush1.bf16.msra.mxu1 %v10804_v36 }
0x2446   :  { %10119 = vmatprep.subr.bf16.mxu1 %v11308_v31 }
0x2448   :  { %9307 = vmatmul.mubr.msk.bf16.vlgmr.msra.gmra.mrb[96].mxu1 %vm264_vm0, %v3622_v3 }
0x2449   :  { %3732 = vmatprep.mubr.bf16.mxu1 %v11307_v2 }
0x2450   :  { %9308 = vmatmul.mubr.msk.bf16.gmra.mrb[100].mxu1 %vm264_vm0, %v3623_v4 }
0x2451   :  { %10121 = vmatprep.mubr.msk.bf16.mxu1 %vm11309_vm1, %v11308_v31 }
0x250b   :  { %v12185_v58 = vpop.f32.mrb[92].mxu1 }
0x250c   :  { %v10105_v27 = vpop.f32.mrb[93].mxu1 }
0x250d   :  { %v3537_v5 = vpop.f32.mrb[94].mxu1 }
0x250e   :  { %v10106_v6 = vpop.f32.mrb[95].mxu1 }
0x251b   :  { %v3724_v10 = vpop.f32.mrb[96].mxu1 }
0x251c   :  { %v3725_v9 = vadd.f32 %v3724_v10, %v3637_v7  ;;  %v3726_v11 = vpop.f32.mrb[97].mxu1 }
0x251d   :  { %v3727_v12 = vadd.f32 %v3726_v11, %v3641_v8  ;;  %v3728_v51 = vpop.f32.mrb[98].mxu1 }
0x251e   :  { %v12190_v23 = vpack.c.bf16 %v3725_v9, %v3725_v9  ;;  %v3729_v48 = vadd.f32 %v3728_v51, %v3637_v7  ;;  %v3730_v13 = vpop.f32.mrb[99].mxu1 }
0x251f   :  { %v3731_v55 = vadd.f32 %v3730_v13, %v3641_v8  ;;  %v12220_v49 = vpack.c.bf16 %v3727_v12, %v3727_v12 }
0x2520   :  { %v12192_v39 = vpack.c.bf16 %v3729_v48, %v3729_v48  ;;  %3748 = vrot.lane.b32.xlu0 %v12190_v23, %s11310_s0 }
0x2521   :  { %v3999_v22 = vsel %vm643_vm3, %v12220_v49, 0  ;;  %v12235_v24 = vpack.c.bf16 %v3731_v55, %v3731_v55 }
0x2522   :  { %3797 = vrot.lane.b32.xlu1 %v12192_v39, %s11310_s0 }
0x2523   :  { %v3734_v40 = vpop.f32.mrb[100].mxu1  ;;  %v4045_v25 = vsel %vm643_vm3, %v12235_v24, 0 }
0x2524   :  { %v3735_v0 = vadd.f32 %v3734_v40, %v3637_v7  ;;  %v3736_v59 = vpop.f32.mrb[101].mxu1 }
0x2525   :  { %v12198_v14 = vadd.f32 %v3736_v59, %v3641_v8  ;;  %v3738_v34 = vpop.f32.mrb[102].mxu1 }
0x2526   :  { %v12200_v37 = vpack.c.bf16 %v3735_v0, %v3735_v0  ;;  %v3739_v43 = vadd.f32 %v3738_v34, %v3637_v7  ;;  %v3740_v47 = vpop.f32.mrb[103].mxu1 }
0x2527   :  { %v12202_v15 = vadd.f32 %v3740_v47, %v3641_v8 }
0x2528   :  { %3846 = vrot.lane.b32.xlu1 %v12200_v37, %s11310_s0  ;;  %v12206_v16 = vpack.c.bf16 %v3739_v43, %v3739_v43 }
0x252c   :  { %3895 = vrot.lane.b32.xlu1 %v12206_v16, %s11310_s0 }
0x2592   :  { %v3749_v45 = vpop.permute.xlu0 %3748 }
0x2593   :  { %v3754_v50 = vsel %vm517_vm2, %v3749_v45, 0 }
0x2594   :  { %10108 = vmatpush3.bf16.xpose.msra.mxu0 %v3754_v50  ;;  %v3798_v17 = vpop.permute.xlu1 %3797 }
0x2595   :  { %10113 = vmatprep.subr.bf16.mxu0 %v11308_v31  ;;  %v3803_v19 = vsel %vm517_vm2, %v3798_v17, 0 }
0x259a   :  { %v3847_v18 = vpop.permute.xlu1 %3846 }
0x259b   :  { %v3852_v52 = vsel %vm517_vm2, %v3847_v18, 0  ;;  %10110 = vmatmul.mubr.msk.bf16.vlgmr.msra.gmra.mrb[72].mxu0 %vm517_vm2, %v12190_v23 }
0x259c   :  { %10114 = vmatpush3.bf16.xpose.msra.mxu0 %v3803_v19  ;;  %10120 = vmatpush3.bf16.xpose.msra.mxu1 %v3852_v52 }
0x259d   :  { %10115 = vmatprep.mubr.msk.bf16.mxu0 %vm11309_vm1, %v11308_v31  ;;  %10125 = vmatprep.subr.bf16.mxu0 %v11308_v31 }
0x259e   :  { %10131 = vmatprep.subr.bf16.mxu1 %v11308_v31  ;;  %v3896_v20 = vpop.permute.xlu1 %3895 }
0x259f   :  { %v3901_v57 = vsel %vm517_vm2, %v3896_v20, 0 }
0x25a3   :  { %10116 = vmatmul.mubr.msk.bf16.vlgmr.msra.gmra.mrb[76].mxu0 %vm517_vm2, %v12192_v39  ;;  %10122 = vmatmul.mubr.msk.bf16.vlgmr.msra.gmra.mrb[104].mxu1 %vm517_vm2, %v12200_v37 }
0x25a4   :  { %10126 = vmatpush3.bf16.xpose.msra.mxu0 %v3901_v57  ;;  %10132 = vmatpush3.bf16.msra.mxu1 %v3999_v22  ;;  %v12279_v22 = vpack.c.bf16 %v12198_v14, %v12198_v14  ;;  %v12289_v14 = vpack.c.bf16 %v12202_v15, %v12202_v15 }
0x25a5   :  { %10127 = vmatprep.mubr.msk.bf16.mxu0 %vm11309_vm1, %v11308_v31  ;;  %10137 = vmatprep.subr.bf16.mxu0 %v11308_v31 }
0x25a6   :  { %10133 = vmatprep.mubr.msk.bf16.mxu1 %vm11309_vm1, %v11308_v31  ;;  %10143 = vmatprep.subr.bf16.mxu1 %v11308_v31 }
0x25ab   :  { %10128 = vmatmul.mubr.msk.bf16.vlgmr.msra.gmra.mrb[80].mxu0 %vm517_vm2, %v12206_v16 }
0x25ac   :  { %10138 = vmatpush3.bf16.msra.mxu0 %v4045_v25  ;;  %10139 = vmatprep.mubr.msk.bf16.mxu0 %vm11309_vm1, %v11308_v31 }
0x25ad   :  { %10149 = vmatprep.subr.bf16.mxu0 %v11308_v31 }
0x266e   :  { %v3790_v61 = vpop.f32.mrb[72].mxu0 }
0x266f   :  { %v3791_v26 = vadd.f32 %v3790_v61, %v12247_v41  ;;  %v10111_v28 = vpop.f32.mrb[73].mxu0 }
0x2670   :  { %v3793_v29 = vpop.f32.mrb[74].mxu0 }
0x2671   :  { %v10112_v33 = vpop.f32.mrb[75].mxu0  ;;  %v3943_v36 = vsel %vm613_vm5, %v3791_v26, -inf }
0x2672   :  { %3944 = vmax.xlane.f32.xlu0 %v3943_v36 }
0x2676   :  { %v3839_v38 = vpop.f32.mrb[76].mxu0  ;;  %v3888_v44 = vpop.f32.mrb[104].mxu1 }
0x2677   :  { %v3840_v21 = vadd.f32 %v3839_v38, %v12247_v41  ;;  %v3889_v46 = vadd.f32 %v3888_v44, %v12247_v41  ;;  %v10117_v53 = vpop.f32.mrb[77].mxu0  ;;  %v10123_v30 = vpop.f32.mrb[105].mxu1 }
0x2678   :  { %v3842_v54 = vpop.f32.mrb[78].mxu0  ;;  %v3891_v56 = vpop.f32.mrb[106].mxu1  ;;  %v4137_v53 = vsel %vm643_vm3, %v12289_v14, 0 }
0x2679   :  { %v10118_v3 = vpop.f32.mrb[79].mxu0  ;;  %v10124_v60 = vpop.f32.mrb[107].mxu1  ;;  %v3949_v62 = vsel %vm613_vm5, %v3889_v46, -inf  ;;  %v3946_v63 = vsel %vm613_vm5, %v3840_v21, -inf }
0x267a   :  { %3950 = vmax.xlane.f32.xlu0 %v3949_v62  ;;  %3947 = vmax.xlane.f32.xlu1 %v3946_v63 }
0x267e   :  { %v3937_v1 = vpop.f32.mrb[80].mxu0 }
0x267f   :  { %v3938_v4 = vadd.f32 %v3937_v1, %v12247_v41  ;;  %v10129_v27 = vpop.f32.mrb[81].mxu0 }
0x2680   :  { %v3940_v5 = vpop.f32.mrb[82].mxu0 }
0x2681   :  { %v10130_v6 = vpop.f32.mrb[83].mxu0  ;;  %v3952_v42 = vsel %vm613_vm5, %v3938_v4, -inf }
0x2682   :  { %3953 = vmax.xlane.f32.xlu0 %v3952_v42 }
0x26ff   :  { %v3945_v7 = vpop.xlane.xlu0 %3944 }
0x2700   :  { %v3955_v8 = vsub.f32 %v3791_v26, %v3945_v7  ;;  %v4091_v26 = vsel %vm643_vm3, %v12279_v22, 0 }
0x2702   :  { %v3959_v10 = vmul.f32 1.442695, %v3955_v8 }
0x2704   :  { %11013 = vpow2.f32 %v3959_v10 }
0x2707   :  { %v3951_v9 = vpop.xlane.xlu0 %3950  ;;  %v3948_v11 = vpop.xlane.xlu1 %3947 }
0x2708   :  { %v3957_v12 = vsub.f32 %v3889_v46, %v3951_v9  ;;  %v3956_v51 = vsub.f32 %v3840_v21, %v3948_v11 }
0x270a   :  { %v3963_v48 = vmul.f32 1.442695, %v3957_v12  ;;  %v3961_v13 = vmul.f32 1.442695, %v3956_v51 }
0x270c   :  { %11015 = vpow2.f32 %v3963_v48 }
0x270d   :  { %11017 = vpow2.f32 %v3961_v13 }
0x270e   :  { %v11014_v55 = vpop.eup %11013 }
0x270f   :  { %v3967_v40 = vsel %vm613_vm5, %v11014_v55, 0.0  ;;  %v3954_v47 = vpop.xlane.xlu0 %3953 }
0x2710   :  { %3968 = vadd.xlane.f32.xlu0 %v3967_v40  ;;  %v3958_v45 = vsub.f32 %v3938_v4, %v3954_v47 }
0x2712   :  { %v3965_v50 = vmul.f32 1.442695, %v3958_v45 }
0x2714   :  { %11019 = vpow2.f32 %v3965_v50 }
0x2716   :  { %v11016_v0 = vpop.eup %11015 }
0x2717   :  { %v11018_v59 = vpop.eup %11017  ;;  %v3973_v34 = vsel %vm613_vm5, %v11016_v0, 0.0 }
0x2718   :  { %v3970_v43 = vsel %vm613_vm5, %v11018_v59, 0.0  ;;  %3974 = vadd.xlane.f32.xlu0 %v3973_v34 }
0x2719   :  { %3971 = vadd.xlane.f32.xlu1 %v3970_v43 }
0x271e   :  { %v11020_v17 = vpop.eup %11019 }
0x271f   :  { %v3976_v18 = vsel %vm613_vm5, %v11020_v17, 0.0 }
0x272a   :  { %4231 = vrot.lane.b32.xlu1 %v12192_v39, %s11312_s5 }
0x272e   :  { %4179 = vrot.lane.b32.xlu1 %v12190_v23, %s11313_s9  ;;  %4181 = vrot.lane.b32.xlu0 %v12190_v23, %s11312_s5 }
0x2732   :  { %4281 = vrot.lane.b32.xlu0 %v12200_v37, %s11312_s5 }
0x2736   :  { %4279 = vrot.lane.b32.xlu0 %v12200_v37, %s11313_s9 }
0x2752   :  { %3977 = vadd.xlane.f32.xlu1 %v3976_v18 }
0x2763   :  { %4229 = vrot.lane.b32.xlu1 %v12192_v39, %s11313_s9 }
0x2767   :  { %4331 = vrot.lane.b32.xlu1 %v12206_v16, %s11312_s5 }
0x276b   :  { %4329 = vrot.lane.b32.xlu1 %v12206_v16, %s11313_s9 }
0x279d   :  { %v3969_v19 = vpop.xlane.xlu0 %3968 }
0x279e   :  { %11021 = vrcp.f32 %v3969_v19 }
0x27a5   :  { %v3975_v52 = vpop.xlane.xlu0 %3974 }
0x27a6   :  { %v3972_v20 = vpop.xlane.xlu1 %3971  ;;  %11023 = vrcp.f32 %v3975_v52 }
0x27a7   :  { %11025 = vrcp.f32 %v3972_v20 }
0x27a8   :  { %v11022_v57 = vpop.eup %11021 }
0x27a9   :  { %v3983_v25 = vmul.f32 %v11022_v57, %v11014_v55  ;;  %v4182_v38 = vpop.permute.xlu0 %4181 }
0x27aa   :  { %v4187_v46 = vsel %vm517_vm2, %v4182_v38, 0  ;;  %v4232_v30 = vpop.permute.xlu1 %4231 }
0x27ab   :  { %v3987_v61 = vpack.c.bf16 %v3983_v25, %v3983_v25  ;;  %v4237_v27 = vsel %vm517_vm2, %v4232_v30, 0 }
0x27ad   :  { %10134 = vmatmul.mubr.msk.bf16.vlgmr.msra.gmra.mrb[108].mxu1 %vm613_vm5, %v3987_v61  ;;  %v4282_v15 = vpop.permute.xlu0 %4281 }
0x27ae   :  { %10144 = vmatpush3.bf16.msra.mxu1 %v4091_v26  ;;  %10145 = vmatprep.mubr.msk.bf16.mxu1 %vm11309_vm1, %v11308_v31  ;;  %v4180_v54 = vpop.permute.xlu1 %4179  ;;  %v4287_v56 = vsel %vm517_vm2, %v4282_v15, 0 }
0x27af   :  { %10155 = vmatprep.subr.bf16.mxu1 %v11308_v31 }
0x27b0   :  { %v11024_v28 = vpop.eup %11023 }
0x27b1   :  { %v11026_v29 = vpop.eup %11025  ;;  %v3985_v33 = vmul.f32 %v11024_v28, %v11016_v0  ;;  %v4280_v3 = vpop.permute.xlu0 %4279 }
0x27b2   :  { %v3984_v36 = vmul.f32 %v11026_v29, %v11018_v59 }
0x27b3   :  { %v3989_v44 = vpack.c.bf16 %v3985_v33, %v3985_v33 }
0x27b4   :  { %v3988_v21 = vpack.c.bf16 %v3984_v36, %v3984_v36 }
0x27b5   :  { %10146 = vmatmul.mubr.msk.bf16.vlgmr.msra.gmra.mrb[112].mxu1 %vm613_vm5, %v3989_v44 }
0x27b6   :  { %10140 = vmatmul.mubr.msk.bf16.vlgmr.msra.gmra.mrb[84].mxu0 %vm613_vm5, %v3988_v21  ;;  %10157 = vmatprep.mubr.msk.bf16.mxu1 %vm11309_vm1, %v11308_v31 }
0x27b7   :  { %10150 = vmatpush3.bf16.msra.mxu0 %v4137_v53  ;;  %10156 = vmatpush3.bf16.xpose.msra.mxu1 %v4187_v46 }
0x27b8   :  { %10167 = vmatprep.subr.bf16.mxu1 %v11308_v31  ;;  %10151 = vmatprep.mubr.msk.bf16.mxu0 %vm11309_vm1, %v11308_v31 }
0x27b9   :  { %10161 = vmatprep.subr.bf16.mxu0 %v11308_v31 }
0x27be   :  { %10158 = vmatmul.mubr.msk.bf16.vlgmr.msra.gmra.mrb[116].mxu1 %vm517_vm2, %v4180_v54 }
0x27bf   :  { %10168 = vmatpush3.bf16.xpose.msra.mxu1 %v4287_v56  ;;  %10169 = vmatprep.mubr.msk.bf16.mxu1 %vm11309_vm1, %v11308_v31 }
0x27c0   :  { %10179 = vmatprep.subr.bf16.mxu1 %v11308_v31 }
0x27c6   :  { %10170 = vmatmul.mubr.msk.bf16.vlgmr.msra.gmra.mrb[120].mxu1 %vm517_vm2, %v4280_v3 }
0x27c7   :  { %10181 = vmatprep.mubr.msk.bf16.mxu1 %vm11309_vm1, %v11308_v31 }
0x27df   :  { %v3978_v60 = vpop.xlane.xlu1 %3977 }
0x27e0   :  { %11027 = vrcp.f32 %v3978_v60 }
0x27e3   :  { %v4230_v4 = vpop.permute.xlu1 %4229 }
0x27e7   :  { %v4332_v5 = vpop.permute.xlu1 %4331 }
0x27e8   :  { %v4337_v6 = vsel %vm517_vm2, %v4332_v5, 0 }
0x27ea   :  { %v11028_v62 = vpop.eup %11027 }
0x27eb   :  { %v3986_v63 = vmul.f32 %v11028_v62, %v11020_v17  ;;  %v4330_v42 = vpop.permute.xlu1 %4329 }
0x27ed   :  { %v3990_v1 = vpack.c.bf16 %v3986_v63, %v3986_v63 }
0x27ef   :  { %10152 = vmatmul.mubr.msk.bf16.vlgmr.msra.gmra.mrb[88].mxu0 %vm613_vm5, %v3990_v1 }
0x27f0   :  { %10162 = vmatpush3.bf16.xpose.msra.mxu0 %v4237_v27  ;;  %10163 = vmatprep.mubr.msk.bf16.mxu0 %vm11309_vm1, %v11308_v31 }
0x27f1   :  { %10173 = vmatprep.subr.bf16.mxu0 %v11308_v31 }
0x27f7   :  { %10164 = vmatmul.mubr.msk.bf16.vlgmr.msra.gmra.mrb[92].mxu0 %vm517_vm2, %v4230_v4 }
0x27f8   :  { %10174 = vmatpush3.bf16.xpose.msra.mxu0 %v4337_v6  ;;  %10175 = vmatprep.mubr.msk.bf16.mxu0 %vm11309_vm1, %v11308_v31 }
0x27f9   :  { %10185 = vmatprep.subr.bf16.mxu0 %v11308_v31 }
0x27ff   :  { %10176 = vmatmul.mubr.msk.bf16.vlgmr.msra.gmra.mrb[96].mxu0 %vm517_vm2, %v4330_v42 }
0x2800   :  { %10187 = vmatprep.mubr.msk.bf16.mxu0 %vm11309_vm1, %v11308_v31 }
0x2880   :  { %v12323_v7 = vpop.f32.mrb[108].mxu1 }
0x2881   :  { %v10135_v8 = vpop.f32.mrb[109].mxu1 }
0x2882   :  { %v4038_v10 = vpop.f32.mrb[110].mxu1 }
0x2883   :  { %v10136_v9 = vpop.f32.mrb[111].mxu1 }
0x2888   :  { %v12325_v11 = vpop.f32.mrb[112].mxu1 }
0x2889   :  { %v12327_v12 = vpop.f32.mrb[84].mxu0  ;;  %v10147_v51 = vpop.f32.mrb[113].mxu1 }
0x288a   :  { %v10141_v48 = vpop.f32.mrb[85].mxu0  ;;  %v4130_v13 = vpop.f32.mrb[114].mxu1 }
0x288b   :  { %v4084_v55 = vpop.f32.mrb[86].mxu0  ;;  %v10148_v40 = vpop.f32.mrb[115].mxu1 }
0x288c   :  { %v10142_v0 = vpop.f32.mrb[87].mxu0 }
0x2891   :  { %v4223_v59 = vpop.f32.mrb[116].mxu1 }
0x2892   :  { %v4224_v34 = vadd.f32 %v4223_v59, %v12247_v41  ;;  %v10159_v43 = vpop.f32.mrb[117].mxu1 }
0x2893   :  { %v4226_v47 = vpop.f32.mrb[118].mxu1 }
0x2894   :  { %v10160_v45 = vpop.f32.mrb[119].mxu1  ;;  %v4379_v50 = vsel %vm613_vm5, %v4224_v34, -inf }
0x2895   :  { %4380 = vmax.xlane.f32.xlu0 %v4379_v50 }
0x2899   :  { %v4323_v17 = vpop.f32.mrb[120].mxu1 }
0x289a   :  { %v4324_v18 = vadd.f32 %v4323_v17, %v12247_v41  ;;  %v10171_v19 = vpop.f32.mrb[121].mxu1 }
0x289b   :  { %v4326_v52 = vpop.f32.mrb[122].mxu1 }
0x289c   :  { %v10172_v20 = vpop.f32.mrb[123].mxu1  ;;  %v4385_v57 = vsel %vm613_vm5, %v4324_v18, -inf }
0x289d   :  { %4386 = vmax.xlane.f32.xlu0 %v4385_v57 }
0x28c2   :  { %v12333_v25 = vpop.f32.mrb[88].mxu0 }
0x28c3   :  { %v10153_v61 = vpop.f32.mrb[89].mxu0 }
0x28c4   :  { %v4176_v26 = vpop.f32.mrb[90].mxu0 }
0x28c5   :  { %v10154_v28 = vpop.f32.mrb[91].mxu0 }
0x28ca   :  { %v4273_v29 = vpop.f32.mrb[92].mxu0 }
0x28cb   :  { %v4274_v33 = vadd.f32 %v4273_v29, %v12247_v41  ;;  %v10165_v36 = vpop.f32.mrb[93].mxu0 }
0x28cc   :  { %v4276_v38 = vpop.f32.mrb[94].mxu0 }
0x28cd   :  { %v10166_v44 = vpop.f32.mrb[95].mxu0  ;;  %v4382_v21 = vsel %vm613_vm5, %v4274_v33, -inf }
0x28ce   :  { %4383 = vmax.xlane.f32.xlu1 %v4382_v21 }
0x28d2   :  { %v4373_v46 = vpop.f32.mrb[96].mxu0 }
0x28d3   :  { %v4374_v53 = vadd.f32 %v4373_v46, %v12247_v41  ;;  %v10177_v30 = vpop.f32.mrb[97].mxu0 }
0x28d4   :  { %v4376_v15 = vpop.f32.mrb[98].mxu0 }
0x28d5   :  { %v10178_v54 = vpop.f32.mrb[99].mxu0  ;;  %v4388_v56 = vsel %vm613_vm5, %v4374_v53, -inf }
0x28d6   :  { %4389 = vmax.xlane.f32.xlu0 %v4388_v56 }
0x28df   :  { %4477 = vrot.lane.b32.xlu1 %v12235_v24, %s11313_s9 }
0x28e3   :  { %4526 = vrot.lane.b32.xlu1 %v12279_v22, %s11313_s9 }
0x28e7   :  { %4575 = vrot.lane.b32.xlu1 %v12289_v14, %s11313_s9 }
0x2922   :  { %v4381_v3 = vpop.xlane.xlu0 %4380 }
0x2923   :  { %v4391_v60 = vsub.f32 %v4224_v34, %v4381_v3 }
0x2925   :  { %v4395_v62 = vmul.f32 1.442695, %v4391_v60 }
0x2927   :  { %11029 = vpow2.f32 %v4395_v62 }
0x292a   :  { %v4387_v4 = vpop.xlane.xlu0 %4386 }
0x292b   :  { %v4393_v27 = vsub.f32 %v4324_v18, %v4387_v4 }
0x292d   :  { %v4399_v5 = vmul.f32 1.442695, %v4393_v27 }
0x292f   :  { %11031 = vpow2.f32 %v4399_v5 }
0x2931   :  { %v11030_v63 = vpop.eup %11029 }
0x2932   :  { %v4403_v1 = vsel %vm613_vm5, %v11030_v63, 0.0 }
0x2933   :  { %4404 = vadd.xlane.f32.xlu0 %v4403_v1 }
0x2939   :  { %v11032_v51 = vpop.eup %11031 }
0x293a   :  { %v4409_v48 = vsel %vm613_vm5, %v11032_v51, 0.0 }
0x2949   :  { %4428 = vrot.lane.b32.xlu0 %v12220_v49, %s11313_s9 }
0x295b   :  { %v4384_v6 = vpop.xlane.xlu1 %4383 }
0x295c   :  { %v4392_v42 = vsub.f32 %v4274_v33, %v4384_v6 }
0x295e   :  { %v4397_v8 = vmul.f32 1.442695, %v4392_v42 }
0x295f   :  { %v4478_v10 = vpop.permute.xlu1 %4477 }
0x2960   :  { %11033 = vpow2.f32 %v4397_v8  ;;  %v4483_v9 = vsel %vm643_vm3, %v4478_v10, 0 }
0x2961   :  { %10186 = vmatpush3.bf16.msra.mxu0 %v4483_v9 }
0x2962   :  { %10197 = vmatprep.subr.bf16.mxu0 %v11308_v31 }
0x2963   :  { %v4390_v40 = vpop.xlane.xlu0 %4389  ;;  %v4527_v19 = vpop.permute.xlu1 %4526 }
0x2964   :  { %v4394_v0 = vsub.f32 %v4374_v53, %v4390_v40  ;;  %v4532_v20 = vsel %vm643_vm3, %v4527_v19, 0 }
0x2966   :  { %v4401_v59 = vmul.f32 1.442695, %v4394_v0 }
0x2967   :  { %v4576_v57 = vpop.permute.xlu1 %4575 }
0x2968   :  { %4410 = vadd.xlane.f32.xlu0 %v4409_v48  ;;  %11035 = vpow2.f32 %v4401_v59  ;;  %v4581_v30 = vsel %vm643_vm3, %v4576_v57, 0 }
0x296a   :  { %v11034_v13 = vpop.eup %11033 }
0x296b   :  { %v4406_v55 = vsel %vm613_vm5, %v11034_v13, 0.0 }
0x296c   :  { %4407 = vadd.xlane.f32.xlu1 %v4406_v55 }
0x2972   :  { %v11036_v34 = vpop.eup %11035 }
0x2973   :  { %v4412_v43 = vsel %vm613_vm5, %v11036_v34, 0.0 }
0x297d   :  { %4675 = vrot.lane.b32.xlu1 %v12192_v39, %s11314_s13 }
0x297e   :  { %4625 = vrot.lane.b32.xlu0 %v12190_v23, %s11314_s13 }
0x2982   :  { %4623 = vrot.lane.b32.xlu0 %v12190_v23, %s11315_s17 }
0x2986   :  { %4725 = vrot.lane.b32.xlu0 %v12200_v37, %s11314_s13 }
0x298a   :  { %4723 = vrot.lane.b32.xlu0 %v12200_v37, %s11315_s17 }
0x29a1   :  { %4413 = vadd.xlane.f32.xlu1 %v4412_v43 }
0x29b2   :  { %4673 = vrot.lane.b32.xlu1 %v12192_v39, %s11315_s17 }
0x29b6   :  { %4775 = vrot.lane.b32.xlu1 %v12206_v16, %s11314_s13 }
0x29ba   :  { %4773 = vrot.lane.b32.xlu1 %v12206_v16, %s11315_s17 }
0x29c0   :  { %v4405_v47 = vpop.xlane.xlu0 %4404 }
0x29c1   :  { %11037 = vrcp.f32 %v4405_v47 }
0x29c4   :  { %v4429_v45 = vpop.permute.xlu0 %4428 }
0x29c5   :  { %v4434_v50 = vsel %vm643_vm3, %v4429_v45, 0 }
0x29c6   :  { %10180 = vmatpush3.bf16.msra.mxu1 %v4434_v50 }
0x29c7   :  { %10191 = vmatprep.subr.bf16.mxu1 %v11308_v31 }
0x29cb   :  { %v11038_v17 = vpop.eup %11037 }
0x29cc   :  { %v4419_v18 = vmul.f32 %v11038_v17, %v11030_v63 }
0x29ce   :  { %v4423_v52 = vpack.c.bf16 %v4419_v18, %v4419_v18 }
0x29d0   :  { %10182 = vmatmul.mubr.msk.bf16.vlgmr.msra.gmra.mrb[124].mxu1 %vm613_vm5, %v4423_v52 }
0x29d1   :  { %10192 = vmatpush3.bf16.msra.mxu1 %v4532_v20  ;;  %10193 = vmatprep.mubr.msk.bf16.mxu1 %vm11309_vm1, %v11308_v31 }
0x29d2   :  { %10203 = vmatprep.subr.bf16.mxu1 %v11308_v31 }
0x29f5   :  { %v4411_v61 = vpop.xlane.xlu0 %4410 }
0x29f6   :  { %11039 = vrcp.f32 %v4411_v61 }
0x29f9   :  { %v4408_v26 = vpop.xlane.xlu1 %4407  ;;  %v4626_v28 = vpop.permute.xlu0 %4625 }
0x29fa   :  { %11041 = vrcp.f32 %v4408_v26  ;;  %v4631_v21 = vsel %vm517_vm2, %v4626_v28, 0 }
0x29fd   :  { %v4624_v44 = vpop.permute.xlu0 %4623  ;;  %v4676_v3 = vpop.permute.xlu1 %4675 }
0x29fe   :  { %v4681_v27 = vsel %vm517_vm2, %v4676_v3, 0 }
0x2a00   :  { %v11040_v29 = vpop.eup %11039 }
0x2a01   :  { %v4421_v33 = vmul.f32 %v11040_v29, %v11032_v51  ;;  %v4726_v15 = vpop.permute.xlu0 %4725 }
0x2a02   :  { %v4731_v54 = vsel %vm517_vm2, %v4726_v15, 0 }
0x2a03   :  { %v4425_v36 = vpack.c.bf16 %v4421_v33, %v4421_v33 }
0x2a04   :  { %v11042_v38 = vpop.eup %11041 }
0x2a05   :  { %10194 = vmatmul.mubr.msk.bf16.vlgmr.msra.gmra.mrb[128].mxu1 %vm613_vm5, %v4425_v36  ;;  %v4420_v46 = vmul.f32 %v11042_v38, %v11034_v13  ;;  %v4724_v56 = vpop.permute.xlu0 %4723 }
0x2a06   :  { %10204 = vmatpush3.bf16.xpose.msra.mxu1 %v4631_v21  ;;  %10205 = vmatprep.mubr.msk.bf16.mxu1 %vm11309_vm1, %v11308_v31 }
0x2a07   :  { %v4424_v53 = vpack.c.bf16 %v4420_v46, %v4420_v46  ;;  %10215 = vmatprep.subr.bf16.mxu1 %v11308_v31 }
0x2a09   :  { %10188 = vmatmul.mubr.msk.bf16.vlgmr.msra.gmra.mrb[100].mxu0 %vm613_vm5, %v4424_v53 }
0x2a0a   :  { %10198 = vmatpush3.bf16.msra.mxu0 %v4581_v30  ;;  %10199 = vmatprep.mubr.msk.bf16.mxu0 %vm11309_vm1, %v11308_v31 }
0x2a0b   :  { %10209 = vmatprep.subr.bf16.mxu0 %v11308_v31 }
0x2a0d   :  { %10206 = vmatmul.mubr.msk.bf16.vlgmr.msra.gmra.mrb[132].mxu1 %vm517_vm2, %v4624_v44 }
0x2a0e   :  { %10216 = vmatpush3.bf16.xpose.msra.mxu1 %v4731_v54  ;;  %10217 = vmatprep.mubr.msk.bf16.mxu1 %vm11309_vm1, %v11308_v31 }
0x2a0f   :  { %10227 = vmatprep.subr.bf16.mxu1 %v11308_v31 }
0x2a15   :  { %10218 = vmatmul.mubr.msk.bf16.vlgmr.msra.gmra.mrb[136].mxu1 %vm517_vm2, %v4724_v56 }
0x2a16   :  { %10229 = vmatprep.mubr.msk.bf16.mxu1 %vm11309_vm1, %v11308_v31 }
0x2a2e   :  { %v4414_v60 = vpop.xlane.xlu1 %4413 }
0x2a2f   :  { %11043 = vrcp.f32 %v4414_v60 }
0x2a32   :  { %v4674_v4 = vpop.permute.xlu1 %4673 }
0x2a36   :  { %v4776_v5 = vpop.permute.xlu1 %4775 }
0x2a37   :  { %v4781_v6 = vsel %vm517_vm2, %v4776_v5, 0 }
0x2a39   :  { %v11044_v62 = vpop.eup %11043 }
0x2a3a   :  { %v4422_v63 = vmul.f32 %v11044_v62, %v11036_v34  ;;  %v4774_v42 = vpop.permute.xlu1 %4773 }
0x2a3c   :  { %v4426_v1 = vpack.c.bf16 %v4422_v63, %v4422_v63 }
0x2a3e   :  { %10200 = vmatmul.mubr.msk.bf16.vlgmr.msra.gmra.mrb[104].mxu0 %vm613_vm5, %v4426_v1 }
0x2a3f   :  { %10210 = vmatpush3.bf16.xpose.msra.mxu0 %v4681_v27  ;;  %10211 = vmatprep.mubr.msk.bf16.mxu0 %vm11309_vm1, %v11308_v31 }
0x2a40   :  { %10221 = vmatprep.subr.bf16.mxu0 %v11308_v31 }
0x2a46   :  { %10212 = vmatmul.mubr.msk.bf16.vlgmr.msra.gmra.mrb[108].mxu0 %vm517_vm2, %v4674_v4 }
0x2a47   :  { %10222 = vmatpush3.bf16.xpose.msra.mxu0 %v4781_v6  ;;  %10223 = vmatprep.mubr.msk.bf16.mxu0 %vm11309_vm1, %v11308_v31 }
0x2a48   :  { %10233 = vmatprep.subr.bf16.mxu0 %v11308_v31 }
0x2a4e   :  { %10224 = vmatmul.mubr.msk.bf16.vlgmr.msra.gmra.mrb[112].mxu0 %vm517_vm2, %v4774_v42 }
0x2a4f   :  { %10235 = vmatprep.mubr.msk.bf16.mxu0 %vm11309_vm1, %v11308_v31 }
0x2aa3   :  { %v12407_v8 = vpop.f32.mrb[124].mxu1 }
0x2aa4   :  { %v10183_v10 = vpop.f32.mrb[125].mxu1 }
0x2aa5   :  { %v4473_v9 = vpop.f32.mrb[126].mxu1 }
0x2aa6   :  { %v10184_v51 = vpop.f32.mrb[127].mxu1 }
0x2ad8   :  { %v12409_v48 = vpop.f32.mrb[128].mxu1 }
0x2ad9   :  { %v10195_v13 = vpop.f32.mrb[129].mxu1 }
0x2ada   :  { %v4571_v55 = vpop.f32.mrb[130].mxu1 }
0x2adb   :  { %v10196_v40 = vpop.f32.mrb[131].mxu1 }
0x2adc   :  { %v12411_v0 = vpop.f32.mrb[100].mxu0 }
0x2add   :  { %v10630_v59 = vpack.i.bf16 %v12411_v0, %v12407_v8  ;;  %v10189_v34 = vpop.f32.mrb[101].mxu0 }
0x2ade   :  { %v4522_v43 = vpop.f32.mrb[102].mxu0 }
0x2adf   :  { %v10190_v47 = vpop.f32.mrb[103].mxu0 }
0x2ae0   :  { %v4667_v45 = vpop.f32.mrb[132].mxu1 }
0x2ae1   :  { %v4668_v50 = vadd.f32 %v4667_v45, %v12247_v41  ;;  %v10207_v17 = vpop.f32.mrb[133].mxu1 }
0x2ae2   :  { %v4670_v18 = vpop.f32.mrb[134].mxu1 }
0x2ae3   :  { %v10208_v19 = vpop.f32.mrb[135].mxu1  ;;  %v4823_v52 = vsel %vm613_vm5, %v4668_v50, -inf }
0x2ae4   :  { %4824 = vmax.xlane.f32.xlu0 %v4823_v52 }
0x2ae8   :  { %v4767_v20 = vpop.f32.mrb[136].mxu1 }
0x2ae9   :  { %v4768_v57 = vadd.f32 %v4767_v20, %v12247_v41  ;;  %v10219_v61 = vpop.f32.mrb[137].mxu1 }
0x2aea   :  { %v4770_v26 = vpop.f32.mrb[138].mxu1 }
0x2aeb   :  { %v10220_v28 = vpop.f32.mrb[139].mxu1  ;;  %v4829_v29 = vsel %vm613_vm5, %v4768_v57, -inf }
0x2aec   :  { %4830 = vmax.xlane.f32.xlu0 %v4829_v29 }
0x2b11   :  { %v12419_v33 = vpop.f32.mrb[104].mxu0 }
0x2b12   :  { %v10635_v36 = vpack.i.bf16 %v12419_v33, %v12409_v48  ;;  %v10201_v38 = vpop.f32.mrb[105].mxu0 }
0x2b13   :  { %v4620_v44 = vpop.f32.mrb[106].mxu0 }
0x2b14   :  { %v10202_v21 = vpop.f32.mrb[107].mxu0 }
0x2b19   :  { %v4717_v46 = vpop.f32.mrb[108].mxu0 }
0x2b1a   :  { %v4718_v53 = vadd.f32 %v4717_v46, %v12247_v41  ;;  %v10213_v30 = vpop.f32.mrb[109].mxu0 }
0x2b1b   :  { %v4720_v15 = vpop.f32.mrb[110].mxu0 }
0x2b1c   :  { %v10214_v54 = vpop.f32.mrb[111].mxu0  ;;  %v4826_v56 = vsel %vm613_vm5, %v4718_v53, -inf }
0x2b1d   :  { %4827 = vmax.xlane.f32.xlu1 %v4826_v56 }
0x2b21   :  { %v4817_v3 = vpop.f32.mrb[112].mxu0 }
0x2b22   :  { %v4818_v60 = vadd.f32 %v4817_v3, %v12247_v41  ;;  %v10225_v62 = vpop.f32.mrb[113].mxu0 }
0x2b23   :  { %v4820_v63 = vpop.f32.mrb[114].mxu0 }
0x2b24   :  { %v10226_v1 = vpop.f32.mrb[115].mxu0  ;;  %v4832_v4 = vsel %vm613_vm5, %v4818_v60, -inf }
0x2b25   :  { %4833 = vmax.xlane.f32.xlu0 %v4832_v4 }
0x2b2e   :  { %4919 = vrot.lane.b32.xlu1 %v12235_v24, %s11315_s17 }
0x2b32   :  { %4967 = vrot.lane.b32.xlu1 %v12279_v22, %s11315_s17 }
0x2b36   :  { %5015 = vrot.lane.b32.xlu1 %v12289_v14, %s11315_s17 }
0x2b71   :  { %v4825_v27 = vpop.xlane.xlu0 %4824 }
0x2b72   :  { %v4835_v5 = vsub.f32 %v4668_v50, %v4825_v27 }
0x2b74   :  { %v4839_v6 = vmul.f32 1.442695, %v4835_v5 }
0x2b76   :  { %11045 = vpow2.f32 %v4839_v6 }
0x2b79   :  { %v4831_v9 = vpop.xlane.xlu0 %4830 }
0x2b7a   :  { %v4837_v51 = vsub.f32 %v4768_v57, %v4831_v9 }
0x2b7c   :  { %v4843_v13 = vmul.f32 1.442695, %v4837_v51 }
0x2b7e   :  { %11047 = vpow2.f32 %v4843_v13 }
0x2b80   :  { %v11046_v42 = vpop.eup %11045 }
0x2b81   :  { %v4847_v10 = vsel %vm613_vm5, %v11046_v42, 0.0 }
0x2b82   :  { %4848 = vadd.xlane.f32.xlu0 %v4847_v10 }
0x2b88   :  { %v11048_v45 = vpop.eup %11047 }
0x2b89   :  { %v4853_v50 = vsel %vm613_vm5, %v11048_v45, 0.0 }
0x2b98   :  { %4871 = vrot.lane.b32.xlu0 %v12220_v49, %s11315_s17 }
0x2baa   :  { %v4828_v55 = vpop.xlane.xlu1 %4827 }
0x2bab   :  { %v4836_v40 = vsub.f32 %v4718_v53, %v4828_v55 }
0x2bad   :  { %v4841_v34 = vmul.f32 1.442695, %v4836_v40 }
0x2bae   :  { %v4920_v43 = vpop.permute.xlu1 %4919 }
0x2baf   :  { %11049 = vpow2.f32 %v4841_v34  ;;  %v4925_v47 = vsel %vm643_vm3, %v4920_v43, 0 }
0x2bb0   :  { %10234 = vmatpush3.bf16.msra.mxu0 %v4925_v47 }
0x2bb1   :  { %10245 = vmatprep.subr.bf16.mxu0 %v11308_v31 }
0x2bb2   :  { %v4834_v19 = vpop.xlane.xlu0 %4833  ;;  %v4968_v38 = vpop.permute.xlu1 %4967 }
0x2bb3   :  { %v4838_v52 = vsub.f32 %v4818_v60, %v4834_v19 }
0x2bb5   :  { %v4845_v20 = vmul.f32 1.442695, %v4838_v52 }
0x2bb7   :  { %4854 = vadd.xlane.f32.xlu0 %v4853_v50  ;;  %11051 = vpow2.f32 %v4845_v20 }
0x2bb9   :  { %v11050_v17 = vpop.eup %11049 }
0x2bba   :  { %v4850_v18 = vsel %vm613_vm5, %v11050_v17, 0.0 }
0x2bbb   :  { %4851 = vadd.xlane.f32.xlu1 %v4850_v18 }
0x2bc1   :  { %v11052_v57 = vpop.eup %11051 }
0x2bc2   :  { %v4856_v61 = vsel %vm613_vm5, %v11052_v57, 0.0 }
0x2bcc   :  { %5115 = vrot.lane.b32.xlu1 %v12192_v39, %s11316_s21 }
0x2bcd   :  { %5065 = vrot.lane.b32.xlu0 %v12190_v23, %s11316_s21 }
0x2bd1   :  { %5063 = vrot.lane.b32.xlu0 %v12190_v23, %s11317_s28 }
0x2bd5   :  { %5165 = vrot.lane.b32.xlu0 %v12200_v37, %s11316_s21 }
0x2bd9   :  { %5163 = vrot.lane.b32.xlu0 %v12200_v37, %s11317_s28 }
0x2bf0   :  { %4857 = vadd.xlane.f32.xlu1 %v4856_v61 }
0x2c01   :  { %5113 = vrot.lane.b32.xlu1 %v12192_v39, %s11317_s28  ;;  %v4973_v39 = vsel %vm643_vm3, %v4968_v38, 0 }
0x2c05   :  { %5215 = vrot.lane.b32.xlu1 %v12206_v16, %s11316_s21 }
0x2c09   :  { %5213 = vrot.lane.b32.xlu1 %v12206_v16, %s11317_s28  ;;  %v5016_v16 = vpop.permute.xlu1 %5015 }
0x2c0a   :  { %v5021_v1 = vsel %vm643_vm3, %v5016_v16, 0 }
0x2c0f   :  { %v4849_v23 = vpop.xlane.xlu0 %4848 }
0x2c10   :  { %11053 = vrcp.f32 %v4849_v23 }
0x2c13   :  { %v4872_v26 = vpop.permute.xlu0 %4871 }
0x2c14   :  { %v4877_v37 = vsel %vm643_vm3, %v4872_v26, 0 }
0x2c15   :  { %10228 = vmatpush3.bf16.msra.mxu1 %v4877_v37 }
0x2c16   :  { %10239 = vmatprep.subr.bf16.mxu1 %v11308_v31 }
0x2c1a   :  { %v11054_v28 = vpop.eup %11053 }
0x2c1b   :  { %v4863_v29 = vmul.f32 %v11054_v28, %v11046_v42 }
0x2c1d   :  { %v4867_v44 = vpack.c.bf16 %v4863_v29, %v4863_v29 }
0x2c1f   :  { %10230 = vmatmul.mubr.msk.bf16.vlgmr.msra.gmra.mrb[140].mxu1 %vm613_vm5, %v4867_v44 }
0x2c20   :  { %10240 = vmatpush3.bf16.msra.mxu1 %v4973_v39  ;;  %10241 = vmatprep.mubr.msk.bf16.mxu1 %vm11309_vm1, %v11308_v31 }
0x2c21   :  { %10251 = vmatprep.subr.bf16.mxu1 %v11308_v31 }
0x2c44   :  { %v4855_v21 = vpop.xlane.xlu0 %4854 }
0x2c45   :  { %11055 = vrcp.f32 %v4855_v21 }
0x2c48   :  { %v4852_v46 = vpop.xlane.xlu1 %4851  ;;  %v5066_v53 = vpop.permute.xlu0 %5065 }
0x2c49   :  { %11057 = vrcp.f32 %v4852_v46  ;;  %v5071_v60 = vsel %vm517_vm2, %v5066_v53, 0 }
0x2c4c   :  { %v5064_v3 = vpop.permute.xlu0 %5063  ;;  %v5116_v6 = vpop.permute.xlu1 %5115 }
0x2c4d   :  { %v5121_v55 = vsel %vm517_vm2, %v5116_v6, 0 }
0x2c4f   :  { %v11056_v30 = vpop.eup %11055 }
0x2c50   :  { %v4865_v15 = vmul.f32 %v11056_v30, %v11048_v45  ;;  %v5166_v4 = vpop.permute.xlu0 %5165 }
0x2c51   :  { %v5171_v27 = vsel %vm517_vm2, %v5166_v4, 0 }
0x2c52   :  { %v4869_v54 = vpack.c.bf16 %v4865_v15, %v4865_v15 }
0x2c53   :  { %v11058_v56 = vpop.eup %11057 }
0x2c54   :  { %10242 = vmatmul.mubr.msk.bf16.vlgmr.msra.gmra.mrb[144].mxu1 %vm613_vm5, %v4869_v54  ;;  %v4864_v62 = vmul.f32 %v11058_v56, %v11050_v17  ;;  %v5164_v5 = vpop.permute.xlu0 %5163 }
0x2c55   :  { %10252 = vmatpush3.bf16.xpose.msra.mxu1 %v5071_v60  ;;  %10253 = vmatprep.mubr.msk.bf16.mxu1 %vm11309_vm1, %v11308_v31 }
0x2c56   :  { %v4868_v63 = vpack.c.bf16 %v4864_v62, %v4864_v62  ;;  %10263 = vmatprep.subr.bf16.mxu1 %v11308_v31 }
0x2c58   :  { %10236 = vmatmul.mubr.msk.bf16.vlgmr.msra.gmra.mrb[116].mxu0 %vm613_vm5, %v4868_v63 }
0x2c59   :  { %10246 = vmatpush3.bf16.msra.mxu0 %v5021_v1  ;;  %10247 = vmatprep.mubr.msk.bf16.mxu0 %vm11309_vm1, %v11308_v31 }
0x2c5a   :  { %10257 = vmatprep.subr.bf16.mxu0 %v11308_v31 }
0x2c5c   :  { %10254 = vmatmul.mubr.msk.bf16.vlgmr.msra.gmra.mrb[148].mxu1 %vm517_vm2, %v5064_v3 }
0x2c5d   :  { %10264 = vmatpush3.bf16.xpose.msra.mxu1 %v5171_v27  ;;  %10265 = vmatprep.mubr.msk.bf16.mxu1 %vm11309_vm1, %v11308_v31 }
0x2c5e   :  { %10275 = vmatprep.subr.bf16.mxu1 %v11308_v31 }
0x2c64   :  { %10266 = vmatmul.mubr.msk.bf16.vlgmr.msra.gmra.mrb[152].mxu1 %vm517_vm2, %v5164_v5 }
0x2c65   :  { %10277 = vmatprep.mubr.msk.bf16.mxu1 %vm11309_vm1, %v11308_v31 }
0x2c7d   :  { %v4858_v42 = vpop.xlane.xlu1 %4857 }
0x2c7e   :  { %11059 = vrcp.f32 %v4858_v42 }
0x2c81   :  { %v5114_v13 = vpop.permute.xlu1 %5113 }
0x2c85   :  { %v5216_v40 = vpop.permute.xlu1 %5215 }
0x2c86   :  { %v5221_v34 = vsel %vm517_vm2, %v5216_v40, 0 }
0x2c88   :  { %v11060_v10 = vpop.eup %11059 }
0x2c89   :  { %v4866_v9 = vmul.f32 %v11060_v10, %v11052_v57  ;;  %v5214_v43 = vpop.permute.xlu1 %5213 }
0x2c8b   :  { %v4870_v51 = vpack.c.bf16 %v4866_v9, %v4866_v9 }
0x2c8d   :  { %10248 = vmatmul.mubr.msk.bf16.vlgmr.msra.gmra.mrb[120].mxu0 %vm613_vm5, %v4870_v51 }
0x2c8e   :  { %10258 = vmatpush3.bf16.xpose.msra.mxu0 %v5121_v55  ;;  %10259 = vmatprep.mubr.msk.bf16.mxu0 %vm11309_vm1, %v11308_v31 }
0x2c8f   :  { %10269 = vmatprep.subr.bf16.mxu0 %v11308_v31 }
0x2c95   :  { %10260 = vmatmul.mubr.msk.bf16.vlgmr.msra.gmra.mrb[124].mxu0 %vm517_vm2, %v5114_v13 }
0x2c96   :  { %10270 = vmatpush3.bf16.xpose.msra.mxu0 %v5221_v34  ;;  %10271 = vmatprep.mubr.msk.bf16.mxu0 %vm11309_vm1, %v11308_v31 }
0x2c97   :  { %10281 = vmatprep.subr.bf16.mxu0 %v11308_v31 }
0x2c9d   :  { %10272 = vmatmul.mubr.msk.bf16.vlgmr.msra.gmra.mrb[128].mxu0 %vm517_vm2, %v5214_v43 }
0x2c9e   :  { %10283 = vmatprep.mubr.msk.bf16.mxu0 %vm11309_vm1, %v11308_v31 }
0x2cf2   :  { %v4913_v47 = vpop.f32.mrb[140].mxu1 }
0x2cf3   :  { %v10231_v45 = vpop.f32.mrb[141].mxu1 }
0x2cf4   :  { %v4916_v50 = vpop.f32.mrb[142].mxu1 }
0x2cf5   :  { %v10232_v17 = vpop.f32.mrb[143].mxu1 }
0x2d27   :  { %v12495_v18 = vpop.f32.mrb[144].mxu1 }
0x2d28   :  { %v10243_v19 = vpop.f32.mrb[145].mxu1 }
0x2d29   :  { %v5012_v52 = vpop.f32.mrb[146].mxu1 }
0x2d2a   :  { %v10244_v20 = vpop.f32.mrb[147].mxu1 }
0x2d2b   :  { %v4961_v57 = vpop.f32.mrb[116].mxu0 }
0x2d2c   :  { %v10640_v61 = vpack.i.bf16 %v4961_v57, %v4913_v47  ;;  %v10237_v23 = vpop.f32.mrb[117].mxu0 }
0x2d2d   :  { %v4964_v26 = vpop.f32.mrb[118].mxu0 }
0x2d2e   :  { %v10238_v37 = vpop.f32.mrb[119].mxu0 }
0x2d2f   :  { %v5107_v28 = vpop.f32.mrb[148].mxu1 }
0x2d30   :  { %v5108_v29 = vadd.f32 %v5107_v28, %v12247_v41  ;;  %v10255_v38 = vpop.f32.mrb[149].mxu1 }
0x2d31   :  { %v5110_v44 = vpop.f32.mrb[150].mxu1 }
0x2d32   :  { %v10256_v39 = vpop.f32.mrb[151].mxu1  ;;  %v5263_v16 = vsel %vm613_vm5, %v5108_v29, -inf }
0x2d33   :  { %5264 = vmax.xlane.f32.xlu0 %v5263_v16 }
0x2d37   :  { %v5207_v21 = vpop.f32.mrb[152].mxu1 }
0x2d38   :  { %v5208_v46 = vadd.f32 %v5207_v21, %v12247_v41  ;;  %v10267_v53 = vpop.f32.mrb[153].mxu1 }
0x2d39   :  { %v5210_v30 = vpop.f32.mrb[154].mxu1 }
0x2d3a   :  { %v10268_v15 = vpop.f32.mrb[155].mxu1  ;;  %v5269_v54 = vsel %vm613_vm5, %v5208_v46, -inf }
0x2d3b   :  { %5270 = vmax.xlane.f32.xlu0 %v5269_v54 }
0x2d60   :  { %v5057_v56 = vpop.f32.mrb[120].mxu0 }
0x2d61   :  { %v10645_v3 = vpack.i.bf16 %v5057_v56, %v12495_v18  ;;  %v10249_v60 = vpop.f32.mrb[121].mxu0 }
0x2d62   :  { %v5060_v62 = vpop.f32.mrb[122].mxu0 }
0x2d63   :  { %v10250_v63 = vpop.f32.mrb[123].mxu0 }
0x2d68   :  { %v5157_v1 = vpop.f32.mrb[124].mxu0 }
0x2d69   :  { %v5158_v4 = vadd.f32 %v5157_v1, %v12247_v41  ;;  %v10261_v27 = vpop.f32.mrb[125].mxu0 }
0x2d6a   :  { %v5160_v5 = vpop.f32.mrb[126].mxu0 }
0x2d6b   :  { %v10262_v6 = vpop.f32.mrb[127].mxu0  ;;  %v5266_v42 = vsel %vm613_vm5, %v5158_v4, -inf }
0x2d6c   :  { %5267 = vmax.xlane.f32.xlu1 %v5266_v42 }
0x2d70   :  { %v5257_v10 = vpop.f32.mrb[128].mxu0 }
0x2d71   :  { %v5258_v9 = vadd.f32 %v5257_v10, %v12247_v41  ;;  %v10273_v51 = vpop.f32.mrb[129].mxu0  ;;  %v10807_v10 = vld [vmem:[%s13226_s27] sm:$0xff]  }
0x2d72   :  { %v5260_v13 = vpop.f32.mrb[130].mxu0 }
0x2d73   :  { %v10274_v55 = vpop.f32.mrb[131].mxu0  ;;  %v5272_v40 = vsel %vm613_vm5, %v5258_v9, -inf }
0x2d74   :  { %5273 = vmax.xlane.f32.xlu0 %v5272_v40  ;;  %v10809_v40 = vld [vmem:[%s13226_s27 + $0x10] sm:$0xff]  }
0x2dc0   :  { %v5265_v34 = vpop.xlane.xlu0 %5264 }
0x2dc1   :  { %v5275_v43 = vsub.f32 %v5108_v29, %v5265_v34 }
0x2dc3   :  { %v5279_v47 = vmul.f32 1.442695, %v5275_v43 }
0x2dc5   :  { %11061 = vpow2.f32 %v5279_v47 }
0x2dc8   :  { %v5271_v45 = vpop.xlane.xlu0 %5270 }
0x2dc9   :  { %v5277_v50 = vsub.f32 %v5208_v46, %v5271_v45 }
0x2dcb   :  { %v5283_v17 = vmul.f32 1.442695, %v5277_v50 }
0x2dcd   :  { %11063 = vpow2.f32 %v5283_v17 }
0x2dcf   :  { %v11062_v18 = vpop.eup %11061 }
0x2dd0   :  { %v5287_v19 = vsel %vm613_vm5, %v11062_v18, 0.0 }
0x2dd1   :  { %5288 = vadd.xlane.f32.xlu0 %v5287_v19 }
0x2dd7   :  { %v11064_v52 = vpop.eup %11063 }
0x2dd8   :  { %v5293_v20 = vsel %vm613_vm5, %v11064_v52, 0.0 }
0x2dd9   :  { %5294 = vadd.xlane.f32.xlu0 %v5293_v20 }
0x2def   :  { %5311 = vrot.lane.b32.xlu0 %v12220_v49, %s11317_s28 }
0x2df3   :  { %10631 = vrot.lane.b32.xlu0 %v10630_v59, %s11316_s21 }
0x2df7   :  { %10641 = vrot.lane.b32.xlu0 %v10640_v61, %s11314_s13 }
0x2df9   :  { %v5268_v57 = vpop.xlane.xlu1 %5267 }
0x2dfa   :  { %v5276_v23 = vsub.f32 %v5158_v4, %v5268_v57 }
0x2dfc   :  { %v5281_v26 = vmul.f32 1.442695, %v5276_v23 }
0x2dfe   :  { %11065 = vpow2.f32 %v5281_v26 }
0x2e01   :  { %v5274_v49 = vpop.xlane.xlu0 %5273 }
0x2e02   :  { %v5278_v29 = vsub.f32 %v5258_v9, %v5274_v49  ;;  %v10808_v9 = vld [vmem:[%s13226_s27 + $0x8] sm:$0xff]  }
0x2e04   :  { %v5285_v8 = vmul.f32 1.442695, %v5278_v29 }
0x2e06   :  { %11067 = vpow2.f32 %v5285_v8 }
0x2e08   :  { %v11066_v37 = vpop.eup %11065 }
0x2e09   :  { %v5290_v28 = vsel %vm613_vm5, %v11066_v37, 0.0 }
0x2e0a   :  { %5291 = vadd.xlane.f32.xlu1 %v5290_v28 }
0x2e10   :  { %v11068_v0 = vpop.eup %11067 }
0x2e11   :  { %v5296_v59 = vsel %vm613_vm5, %v11068_v0, 0.0 }
0x2e1b   :  { %5359 = vrot.lane.b32.xlu1 %v12235_v24, %s11317_s28 }
0x2e1f   :  { %5407 = vrot.lane.b32.xlu1 %v12279_v22, %s11317_s28 }
0x2e43   :  { %5297 = vadd.xlane.f32.xlu1 %v5296_v59 }
0x2e54   :  { %5455 = vrot.lane.b32.xlu1 %v12289_v14, %s11317_s28 }
0x2e58   :  { %10636 = vrot.lane.b32.xlu1 %v10635_v36, %s11316_s21 }
0x2e5c   :  { %10646 = vrot.lane.b32.xlu1 %v10645_v3, %s11314_s13 }
0x2e5e   :  { %v5289_v24 = vpop.xlane.xlu0 %5288 }
0x2e5f   :  { %11069 = vrcp.f32 %v5289_v24 }
0x2e66   :  { %v5295_v22 = vpop.xlane.xlu0 %5294 }
0x2e67   :  { %11071 = vrcp.f32 %v5295_v22 }
0x2e69   :  { %v11070_v61 = vpop.eup %11069 }
0x2e6a   :  { %v5312_v38 = vpop.permute.xlu0 %5311  ;;  %v5303_v44 = vmul.f32 %v11070_v61, %v11062_v18  ;;  %v10810_v18 = vld [vmem:[%s13226_s27 + $0x18] sm:$0xff]  }
0x2e6b   :  { %v5317_v39 = vsel %vm643_vm3, %v5312_v38, 0 }
0x2e6c   :  { %10276 = vmatpush3.bf16.msra.mxu1 %v5317_v39  ;;  %v5307_v16 = vpack.c.bf16 %v5303_v44, %v5303_v44 }
0x2e6d   :  { %10287 = vmatprep.subr.bf16.mxu1 %v11308_v31 }
0x2e6e   :  { %v10632_v26 = vpop.permute.xlu0 %10631 }
0x2e6f   :  { %10278 = vmatmul.mubr.msk.bf16.vlgmr.msra.gmra.mrb[156].mxu1 %vm613_vm5, %v5307_v16  ;;  %v10634_v28 = vunpack.i.h.bf16 %v10632_v26  ;;  %v10633_v49 = vunpack.i.l.bf16 %v10632_v26 }
0x2e70   :  { %10289 = vmatprep.mubr.msk.bf16.mxu1 %vm11309_vm1, %v11308_v31 }
0x2e71   :  { %v11072_v48 = vpop.eup %11071  ;;  %v5552_v59 = vsel %vm517_vm2, %v12327_v12, %v10634_v28  ;;  %v5551_v24 = vsel %vm517_vm2, %v12323_v7, %v10633_v49 }
0x2e72   :  { %v5305_v21 = vmul.f32 %v11072_v48, %v11064_v52 }
0x2e74   :  { %v5309_v15 = vpack.c.bf16 %v5305_v21, %v5305_v21 }
0x2e97   :  { %v5292_v14 = vpop.xlane.xlu1 %5291 }
0x2e98   :  { %11073 = vrcp.f32 %v5292_v14 }
0x2e9b   :  { %v5360_v33 = vpop.permute.xlu1 %5359 }
0x2e9c   :  { %v5365_v36 = vsel %vm643_vm3, %v5360_v33, 0 }
0x2e9d   :  { %10282 = vmatpush3.bf16.msra.mxu0 %v5365_v36 }
0x2e9e   :  { %10293 = vmatprep.subr.bf16.mxu0 %v11308_v31 }
0x2e9f   :  { %v5408_v46 = vpop.permute.xlu1 %5407 }
0x2ea0   :  { %v5413_v53 = vsel %vm643_vm3, %v5408_v46, 0 }
0x2ea1   :  { %10288 = vmatpush3.bf16.msra.mxu1 %v5413_v53 }
0x2ea2   :  { %v11074_v30 = vpop.eup %11073  ;;  %10299 = vmatprep.subr.bf16.mxu1 %v10807_v10 }
0x2ea3   :  { %v5304_v54 = vmul.f32 %v11074_v30, %v11066_v37  ;;  %v10642_v37 = vpop.permute.xlu0 %10641 }
0x2ea4   :  { %10290 = vmatmul.mubr.msk.bf16.vlgmr.msra.gmra.mrb[160].mxu1 %vm613_vm5, %v5309_v15  ;;  %v10644_v29 = vunpack.i.h.bf16 %v10642_v37  ;;  %v10643_v8 = vunpack.i.l.bf16 %v10642_v37 }
0x2ea5   :  { %v5308_v56 = vpack.c.bf16 %v5304_v54, %v5304_v54  ;;  %10300 = vmatpush3.bf16.msra.mxu1 %v10807_v10 }
0x2ea6   :  { %10301 = vmatprep.subr.bf16.mxu1 %v10808_v9  ;;  %v5555_v38 = vsel %vm1421_vm6, %v5551_v24, %v10643_v8  ;;  %v5556_v44 = vsel %vm1421_vm6, %v5552_v59, %v10644_v29 }
0x2ea7   :  { %10284 = vmatmul.mubr.msk.bf16.vlgmr.msra.gmra.mrb[132].mxu0 %vm613_vm5, %v5308_v56 }
0x2ea8   :  { %10295 = vmatprep.mubr.msk.bf16.mxu0 %vm11309_vm1, %v11308_v31 }
0x2ea9   :  { %10302 = vmatpush3.bf16.msra.mxu1 %v10808_v9 }
0x2eaa   :  { %10303 = vmatprep.subr.bf16.mxu1 %v10809_v40 }
0x2ead   :  { %10304 = vmatpush3.bf16.msra.mxu1 %v10809_v40  ;;  %v11244_v40 = vld [vmem:[%s13219_s8 + $0x18] sm:$0xff] }
0x2eae   :  { %10305 = vmatprep.subr.bf16.mxu1 %v10810_v18 }
0x2eb1   :  { %10306 = vmatpush3.bf16.msra.mxu1 %v10810_v18 }
0x2ed0   :  { %v5298_v3 = vpop.xlane.xlu1 %5297 }
0x2ed1   :  { %11075 = vrcp.f32 %v5298_v3 }
0x2ed4   :  { %v5456_v60 = vpop.permute.xlu1 %5455 }
0x2ed5   :  { %v5461_v62 = vsel %vm643_vm3, %v5456_v60, 0 }
0x2ed6   :  { %10294 = vmatpush3.bf16.msra.mxu0 %v5461_v62 }
0x2ed8   :  { %v10637_v48 = vpop.permute.xlu1 %10636 }
0x2ed9   :  { %v10639_v36 = vunpack.i.h.bf16 %v10637_v48  ;;  %v10638_v12 = vunpack.i.l.bf16 %v10637_v48  ;;  %v10811_v48 = vld [vmem:[%s13228_s20] ss:$8 sps:$4 sm:$0xff]  }
0x2edb   :  { %v11076_v63 = vpop.eup %11075  ;;  %v5554_v53 = vsel %vm517_vm2, %v12333_v25, %v10639_v36  ;;  %v5553_v30 = vsel %vm517_vm2, %v12325_v11, %v10638_v12  ;;  %v9347_v25 = vld [vmem:[%s13227_s26] ss:$0 sm:$0xff]  ;;  %v10814_v36 = vld [vmem:[%s13228_s20 + $0x10] ss:$8 sps:$4 sm:$0xff]   ;;  %v10819_v12 = vld [vmem:[%s13228_s20 + $0x24] ss:$8 sps:$4 sm:$0xff]  }
0x2edc   :  { %v5306_v1 = vmul.f32 %v11076_v63, %v11068_v0  ;;  %v10647_v33 = vpop.permute.xlu1 %10646 }
0x2edd   :  { %v10649_v21 = vunpack.i.h.bf16 %v10647_v33  ;;  %v10648_v7 = vunpack.i.l.bf16 %v10647_v33  ;;  %v10816_v33 = vld [vmem:[%s13228_s20 + $0x14] ss:$8 sps:$4 sm:$0xff]  }
0x2ede   :  { %v5310_v4 = vpack.c.bf16 %v5306_v1, %v5306_v1 }
0x2edf   :  { %v5557_v56 = vsel %vm1421_vm6, %v5553_v30, %v10648_v7  ;;  %v5558_v3 = vsel %vm1421_vm6, %v5554_v53, %v10649_v21  ;;  %v10817_v21 = vld [vmem:[%s13228_s20 + $0x20] ss:$8 sps:$4 sm:$0xff]   ;;  %v10820_v7 = vld [vmem:[%s13228_s20 + $0x30] ss:$8 sps:$4 sm:$0xff]  }
0x2ee0   :  { %10296 = vmatmul.mubr.msk.bf16.vlgmr.msra.gmra.mrb[136].mxu0 %vm613_vm5, %v5310_v4 }
0x2ee1   :  { %5841 = vmatprep.mubr.bf16.mxu0 %v11307_v2 }
0x2f42   :  { %v5353_v27 = vpop.f32.mrb[156].mxu1 }
0x2f43   :  { %v10279_v5 = vpop.f32.mrb[157].mxu1 }
0x2f44   :  { %v5356_v6 = vpop.f32.mrb[158].mxu1  ;;  %v11242_v5 = vld [vmem:[%s13219_s8] sm:$0xff] }
0x2f45   :  { %v10280_v42 = vpop.f32.mrb[159].mxu1 }
0x2f77   :  { %v5449_v51 = vpop.f32.mrb[160].mxu1 }
0x2f78   :  { %v10291_v13 = vpop.f32.mrb[161].mxu1 }
0x2f79   :  { %v5452_v55 = vpop.f32.mrb[162].mxu1 }
0x2f7a   :  { %v5401_v34 = vpop.f32.mrb[132].mxu0  ;;  %v10292_v43 = vpop.f32.mrb[163].mxu1 }
0x2f7b   :  { %v10650_v47 = vpack.i.bf16 %v5401_v34, %v5353_v27  ;;  %v10285_v45 = vpop.f32.mrb[133].mxu0  ;;  %v11241_v27 = vld [vmem:[%s13219_s8 + $0x10] sm:$0xff] }
0x2f7c   :  { %v5404_v50 = vpop.f32.mrb[134].mxu0 }
0x2f7d   :  { %10651 = vrot.lane.b32.xlu0 %v10650_v47, %s11312_s5  ;;  %v10286_v17 = vpop.f32.mrb[135].mxu0 }
0x2fb3   :  { %v5497_v19 = vpop.f32.mrb[136].mxu0 }
0x2fb4   :  { %v10655_v52 = vpack.i.bf16 %v5497_v19, %v5449_v51  ;;  %v10297_v20 = vpop.f32.mrb[137].mxu0  ;;  %v11243_v51 = vld [vmem:[%s13219_s8 + $0x8] sm:$0xff] }
0x2fb5   :  { %v5500_v57 = vpop.f32.mrb[138].mxu0 }
0x2fb6   :  { %10656 = vrot.lane.b32.xlu1 %v10655_v52, %s11312_s5  ;;  %v10298_v23 = vpop.f32.mrb[139].mxu0 }
0x2fef   :  { %v10652_v0 = vpop.permute.xlu0 %10651 }
0x2ff0   :  { %v10654_v22 = vunpack.i.h.bf16 %v10652_v0  ;;  %v10653_v61 = vunpack.i.l.bf16 %v10652_v0 }
0x2ff2   :  { %v5560_v39 = vsel %vm1424_vm7, %v5556_v44, %v10654_v22  ;;  %v5559_v16 = vsel %vm1424_vm7, %v5555_v38, %v10653_v61 }
0x2ff3   :  { %v5563_v14 = vpack.c.bf16 %v5560_v39, %v5559_v16 }
0x2ff5   :  { %10307 = vmatprep.mubr.msk.bf16.mxu1 %vm264_vm0, %v5563_v14  ;;  %v10813_v14 = vld [vmem:[%s13228_s20 + $0x4] ss:$8 sps:$4 sm:$0xff]  }
0x2ff6   :  { %5809 = vmatprep.subr.bf16.mxu0 %v10813_v14  ;;  %v10837_v14 = vld [vmem:[%s11506_s25 + $0x78] sm:$0xff]  }
0x2ff7   :  { %5810 = vmatpush1.bf16.msra.mxu0 %v10811_v48  ;;  %v10838_v48 = vld [vmem:[%s11506_s25 + $0x38] sm:$0xff]  }
0x2ff8   :  { %5811 = vmatprep.subr.bf16.mxu0 %v10816_v33  ;;  %v5751_v33 = vld [vmem:[%s11501_s22] sm:$0x3] }
0x2ffb   :  { %5812 = vmatpush1.bf16.msra.mxu0 %v10814_v36  ;;  %v5756_v36 = vrot.slane %v5751_v33, %v11584_v32 }
0x2ffc   :  { %5813 = vmatprep.subr.bf16.mxu0 %v10819_v12  ;;  %v5760_v12 = vrot.slane %v5751_v33, %v11593_v35 }
0x2fff   :  { %5814 = vmatpush1.bf16.msra.mxu0 %v10817_v21 }
0x3028   :  { %v10657_v46 = vpop.permute.xlu1 %10656 }
0x3029   :  { %v10659_v15 = vunpack.i.h.bf16 %v10657_v46  ;;  %v10658_v54 = vunpack.i.l.bf16 %v10657_v46  ;;  %v10822_v46 = vld [vmem:[%s13228_s20 + $0x34] ss:$8 sps:$4 sm:$0xff]  }
0x302a   :  { %5815 = vmatprep.subr.bf16.mxu0 %v10822_v46 }
0x302b   :  { %v5562_v60 = vsel %vm1424_vm7, %v5558_v3, %v10659_v15  ;;  %v5561_v62 = vsel %vm1424_vm7, %v5557_v56, %v10658_v54  ;;  %5816 = vmatpush1.bf16.msra.mxu0 %v10820_v7 }
0x302c   :  { %v5564_v63 = vpack.c.bf16 %v5562_v60, %v5561_v62 }
0x302e   :  { %10308 = vmatmul.mubr.msk.bf16.vlgmr.msra.gmra.mrb[164].mxu1 %vm264_vm0, %v5564_v63 }
0x3101   :  { %v10309_v1 = vpop.f32.mrb[164].mxu1 }
0x3102   :  { %v5637_v4 = vpop.f32.mrb[165].mxu1  ;;  %v5654_v11 = vadd.f32 %v11241_v27, %v10309_v1 }
0x3103   :  { %v5652_v6 = vadd.f32 %v11242_v5, %v5637_v4  ;;  %v10310_v42 = vpop.f32.mrb[166].mxu1 }
0x3104   :  { %v5640_v10 = vpop.f32.mrb[167].mxu1  ;;  %v12573_v55 = vadd.f32 %v9347_v25, %v5654_v11  ;;  %v5655_v34 = vadd.f32 %v11244_v40, %v10310_v42  ;;  %v9348_v11 = vld [vmem:[%s13229_s1] ss:$0 sm:$0xff] }
0x3105   :  { %v12570_v9 = vadd.f32 %v9347_v25, %v5652_v6  ;;  %v5653_v13 = vadd.f32 %v11243_v51, %v5640_v10 }
0x3106   :  { %v12582_v50 = vadd.f32 %v9347_v25, %v5655_v34  ;;  %v5675_v17 = vsel %vm264_vm0, %v12573_v55, 0.0 }
0x3107   :  { %v12576_v43 = vadd.f32 %v9347_v25, %v5653_v13  ;;  %v5669_v47 = vsel %vm264_vm0, %v12570_v9, 0.0  ;;  %v9349_v13 = vld [vmem:[%s13230_s2] ss:$0 sm:$0xff] }
0x3108   :  { %5670 = vadd.xlane.f32.xlu0 %v5669_v47  ;;  %v5678_v18 = vsel %vm264_vm0, %v12582_v50, 0.0 }
0x3109   :  { %v5672_v45 = vsel %vm264_vm0, %v12576_v43, 0.0 }
0x310a   :  { %5673 = vadd.xlane.f32.xlu1 %v5672_v45 }
0x310c   :  { %5676 = vadd.xlane.f32.xlu0 %v5675_v17 }
0x3110   :  { %5679 = vadd.xlane.f32.xlu0 %v5678_v18 }
0x3195   :  { %v5671_v19 = vpop.xlane.xlu0 %5670 }
0x3196   :  { %v5681_v52 = vmul.f32 0.015625, %v5671_v19 }
0x3197   :  { %v5674_v20 = vpop.xlane.xlu1 %5673 }
0x3198   :  { %v5685_v57 = vsub.f32 %v12570_v9, %v5681_v52  ;;  %v5682_v23 = vmul.f32 0.015625, %v5674_v20 }
0x3199   :  { %v5677_v26 = vpop.xlane.xlu0 %5676 }
0x319a   :  { %v5686_v37 = vsub.f32 %v12576_v43, %v5682_v23  ;;  %v5683_v28 = vmul.f32 0.015625, %v5677_v26  ;;  %v5689_v49 = vmul.f32 %v5685_v57, %v5685_v57 }
0x319c   :  { %v5687_v29 = vsub.f32 %v12573_v55, %v5683_v28  ;;  %v5693_v8 = vsel %vm264_vm0, %v5689_v49, 0.0  ;;  %v5690_v0 = vmul.f32 %v5686_v37, %v5686_v37  ;;  %v10824_v28 = vld [vmem:[%s11506_s25] sm:$0xff]   ;;  %v10825_v49 = vld [vmem:[%s11506_s25 + $0x48] sm:$0xff]  }
0x319d   :  { %5694 = vadd.xlane.f32.xlu0 %v5693_v8  ;;  %v5680_v59 = vpop.xlane.xlu0 %5679  ;;  %v10827_v8 = vld [vmem:[%s11506_s25 + $0x50] sm:$0xff]  }
0x319e   :  { %v5684_v24 = vmul.f32 0.015625, %v5680_v59  ;;  %v5696_v22 = vsel %vm264_vm0, %v5690_v0, 0.0  ;;  %v5691_v61 = vmul.f32 %v5687_v29, %v5687_v29  ;;  %v10828_v0 = vld [vmem:[%s11506_s25 + $0x10] sm:$0xff]   ;;  %v10829_v59 = vld [vmem:[%s11506_s25 + $0x58] sm:$0xff]  }
0x319f   :  { %5697 = vadd.xlane.f32.xlu1 %v5696_v22  ;;  %v10831_v22 = vld [vmem:[%s11506_s25 + $0x60] sm:$0xff]  }
0x31a0   :  { %v5688_v38 = vsub.f32 %v12582_v50, %v5684_v24  ;;  %v5699_v44 = vsel %vm264_vm0, %v5691_v61, 0.0  ;;  %v10830_v24 = vld [vmem:[%s11506_s25 + $0x18] sm:$0xff]   ;;  %v10832_v61 = vld [vmem:[%s11506_s25 + $0x20] sm:$0xff]  }
0x31a1   :  { %5700 = vadd.xlane.f32.xlu0 %v5699_v44  ;;  %v10834_v44 = vld [vmem:[%s11506_s25 + $0x28] sm:$0xff]  }
0x31a2   :  { %v5692_v39 = vmul.f32 %v5688_v38, %v5688_v38 }
0x31a4   :  { %v5702_v16 = vsel %vm264_vm0, %v5692_v39, 0.0  ;;  %v10835_v39 = vld [vmem:[%s11506_s25 + $0x70] sm:$0xff]  }
0x31a5   :  { %5703 = vadd.xlane.f32.xlu1 %v5702_v16  ;;  %v10836_v16 = vld [vmem:[%s11506_s25 + $0x30] sm:$0xff]  }
0x322a   :  { %v5695_v53 = vpop.xlane.xlu0 %5694 }
0x322b   :  { %v5705_v30 = vmul.f32 0.015625, %v5695_v53 }
0x322c   :  { %v5698_v15 = vpop.xlane.xlu1 %5697 }
0x322d   :  { %v5709_v54 = vadd.f32 1e-05, %v5705_v30  ;;  %v5706_v56 = vmul.f32 0.015625, %v5698_v15 }
0x322e   :  { %v5701_v3 = vpop.xlane.xlu0 %5700 }
0x322f   :  { %11077 = vrsqrt.f32 %v5709_v54  ;;  %v5710_v60 = vadd.f32 1e-05, %v5706_v56  ;;  %v5707_v62 = vmul.f32 0.015625, %v5701_v3 }
0x3231   :  { %11079 = vrsqrt.f32 %v5710_v60  ;;  %v5711_v63 = vadd.f32 1e-05, %v5707_v62 }
0x3232   :  { %v5704_v1 = vpop.xlane.xlu1 %5703 }
0x3233   :  { %11081 = vrsqrt.f32 %v5711_v63  ;;  %v5708_v25 = vmul.f32 0.015625, %v5704_v1 }
0x3235   :  { %v5712_v4 = vadd.f32 1e-05, %v5708_v25 }
0x3237   :  { %11083 = vrsqrt.f32 %v5712_v4 }
0x3239   :  { %v11078_v27 = vpop.eup %11077 }
0x323a   :  { %v5717_v5 = vmul.f32 %v11078_v27, %v5685_v57 }
0x323b   :  { %v11080_v6 = vpop.eup %11079 }
0x323c   :  { %v5727_v42 = vmul.f32 %v9348_v11, %v5717_v5  ;;  %v5718_v10 = vmul.f32 %v11080_v6, %v5686_v37  ;;  %v10823_v37 = vld [vmem:[%s11506_s25 + $0x40] sm:$0xff]  }
0x323d   :  { %v11082_v51 = vpop.eup %11081  ;;  %9741 = vmatprep.subr.bf16.mxu1 %v10823_v37 }
0x323e   :  { %v5728_v40 = vmul.f32 %v9348_v11, %v5718_v10  ;;  %v5737_v34 = vadd.f32 %v9349_v13, %v5727_v42  ;;  %v5719_v45 = vmul.f32 %v11082_v51, %v5687_v29  ;;  %9742 = vmatpush3.bf16.msra.mxu1 %v10824_v28  ;;  %v10826_v29 = vld [vmem:[%s11506_s25 + $0x8] sm:$0xff]  }
0x323f   :  { %9743 = vmatprep.subr.bf16.mxu1 %v10825_v49 }
0x3240   :  { %v5738_v47 = vadd.f32 %v9349_v13, %v5728_v40  ;;  %v5729_v52 = vmul.f32 %v9348_v11, %v5719_v45 }
0x3241   :  { %v11084_v17 = vpop.eup %11083 }
0x3242   :  { %v5741_v18 = vpack.c.bf16 %v5738_v47, %v5737_v34  ;;  %v5720_v19 = vmul.f32 %v11084_v17, %v5688_v38  ;;  %v5739_v23 = vadd.f32 %v9349_v13, %v5729_v52  ;;  %9744 = vmatpush3.bf16.msra.mxu1 %v10826_v29  ;;  %v10833_v38 = vld [vmem:[%s11506_s25 + $0x68] sm:$0xff]  }
0x3243   :  { %9745 = vmatprep.subr.bf16.mxu1 %v10827_v8 }
0x3244   :  { %9358 = vmatmul.mubr.msk.bf16.vlgmr.msra.gmra.mrb[140].mxu0 %vm264_vm0, %v5741_v18  ;;  %v5730_v20 = vmul.f32 %v9348_v11, %v5720_v19 }
0x3245   :  { %5851 = vmatprep.mubr.bf16.mxu0 %v11307_v2 }
0x3246   :  { %v5740_v57 = vadd.f32 %v9349_v13, %v5730_v20  ;;  %9746 = vmatpush3.bf16.msra.mxu1 %v10828_v0 }
0x3247   :  { %9747 = vmatprep.subr.bf16.mxu1 %v10829_v59 }
0x3248   :  { %v5742_v26 = vpack.c.bf16 %v5740_v57, %v5739_v23 }
0x324a   :  { %9748 = vmatpush3.bf16.msra.mxu1 %v10830_v24 }
0x324b   :  { %9749 = vmatprep.subr.bf16.mxu1 %v10831_v22 }
0x324c   :  { %9359 = vmatmul.mubr.msk.bf16.gmra.mrb[144].mxu0 %vm264_vm0, %v5742_v26 }
0x324d   :  { %6296 = vmatprep.mubr.bf16.mxu0 %v11307_v2 }
0x324e   :  { %9750 = vmatpush3.bf16.msra.mxu1 %v10832_v61 }
0x324f   :  { %9751 = vmatprep.subr.bf16.mxu1 %v10833_v38 }
0x3252   :  { %9752 = vmatpush3.bf16.msra.mxu1 %v10834_v44 }
0x3253   :  { %9753 = vmatprep.subr.bf16.mxu1 %v10835_v39 }
0x3256   :  { %9754 = vmatpush3.bf16.msra.mxu1 %v10836_v16 }
0x3257   :  { %9755 = vmatprep.subr.bf16.mxu1 %v10837_v14 }
0x325a   :  { %9756 = vmatpush3.bf16.msra.mxu1 %v10838_v48 }
0x325b   :  { %10323 = vmatprep.subr.bf16.mxu1 %v11308_v31 }
0x3317   :  { %v5843_v21 = vpop.f32.mrb[140].mxu0 }
0x3318   :  { %v12630_v7 = vadd.f32 %v5843_v21, %v5756_v36  ;;  %v5845_v46 = vpop.f32.mrb[141].mxu0 }
0x3319   :  { %v12632_v53 = vadd.f32 %v5845_v46, %v5760_v12  ;;  %v5847_v30 = vpop.f32.mrb[142].mxu0 }
0x331a   :  { %v9360_v15 = vmul.f32 -1.702, %v12630_v7  ;;  %v12635_v54 = vadd.f32 %v5847_v30, %v5756_v36  ;;  %v5849_v56 = vpop.f32.mrb[143].mxu0 }
0x331b   :  { %v9361_v3 = vmul.f32 -1.702, %v12632_v53  ;;  %v5850_v60 = vadd.f32 %v5849_v56, %v5760_v12 }
0x331c   :  { %v5878_v62 = vmul.f32 1.442695, %v9360_v15  ;;  %v9362_v63 = vmul.f32 -1.702, %v12635_v54 }
0x331d   :  { %v5880_v1 = vmul.f32 1.442695, %v9361_v3  ;;  %v9363_v25 = vmul.f32 -1.702, %v5850_v60 }
0x331e   :  { %11085 = vpow2.f32 %v5878_v62  ;;  %v5882_v4 = vmul.f32 1.442695, %v9362_v63 }
0x331f   :  { %11087 = vpow2.f32 %v5880_v1  ;;  %v5884_v27 = vmul.f32 1.442695, %v9363_v25  ;;  %v5853_v11 = vpop.f32.mrb[144].mxu0 }
0x3320   :  { %11089 = vpow2.f32 %v5882_v4  ;;  %v5854_v5 = vadd.f32 %v5853_v11, %v5756_v36  ;;  %v5855_v6 = vpop.f32.mrb[145].mxu0 }
0x3321   :  { %11091 = vpow2.f32 %v5884_v27  ;;  %v5856_v42 = vadd.f32 %v5855_v6, %v5760_v12  ;;  %v5857_v10 = vpop.f32.mrb[146].mxu0 }
0x3322   :  { %v9364_v51 = vmul.f32 -1.702, %v5854_v5  ;;  %v5858_v13 = vadd.f32 %v5857_v10, %v5756_v36  ;;  %v5859_v40 = vpop.f32.mrb[147].mxu0 }
0x3323   :  { %v9365_v34 = vmul.f32 -1.702, %v5856_v42  ;;  %v5860_v47 = vadd.f32 %v5859_v40, %v5760_v12 }
0x3324   :  { %v5886_v45 = vmul.f32 1.442695, %v9364_v51  ;;  %v9366_v17 = vmul.f32 -1.702, %v5858_v13 }
0x3325   :  { %v5888_v18 = vmul.f32 1.442695, %v9365_v34  ;;  %v9367_v19 = vmul.f32 -1.702, %v5860_v47 }
0x3326   :  { %11093 = vpow2.f32 %v5886_v45  ;;  %v5890_v52 = vmul.f32 1.442695, %v9366_v17 }
0x3327   :  { %11095 = vpow2.f32 %v5888_v18  ;;  %v5892_v20 = vmul.f32 1.442695, %v9367_v19 }
0x3328   :  { %v11086_v57 = vpop.eup %11085  ;;  %11097 = vpow2.f32 %v5890_v52 }
0x3329   :  { %v11088_v23 = vpop.eup %11087  ;;  %v5894_v26 = vadd.f32 1.0, %v11086_v57  ;;  %11099 = vpow2.f32 %v5892_v20 }
0x332a   :  { %v11090_v37 = vpop.eup %11089  ;;  %v5895_v28 = vadd.f32 1.0, %v11088_v23 }
0x332b   :  { %v11092_v49 = vpop.eup %11091  ;;  %11101 = vrcp.f32 %v5894_v26  ;;  %v5896_v29 = vadd.f32 1.0, %v11090_v37 }
0x332c   :  { %11103 = vrcp.f32 %v5895_v28  ;;  %v5897_v8 = vadd.f32 1.0, %v11092_v49 }
0x332d   :  { %11105 = vrcp.f32 %v5896_v29 }
0x332e   :  { %11107 = vrcp.f32 %v5897_v8 }
0x3330   :  { %v11094_v0 = vpop.eup %11093 }
0x3331   :  { %v11096_v59 = vpop.eup %11095  ;;  %v5898_v24 = vadd.f32 1.0, %v11094_v0 }
0x3332   :  { %v11098_v22 = vpop.eup %11097  ;;  %v5899_v61 = vadd.f32 1.0, %v11096_v59 }
0x3333   :  { %v11100_v38 = vpop.eup %11099  ;;  %11109 = vrcp.f32 %v5898_v24  ;;  %v5900_v44 = vadd.f32 1.0, %v11098_v22 }
0x3334   :  { %11111 = vrcp.f32 %v5899_v61  ;;  %v5901_v39 = vadd.f32 1.0, %v11100_v38 }
0x3335   :  { %v11102_v16 = vpop.eup %11101  ;;  %11113 = vrcp.f32 %v5900_v44 }
0x3336   :  { %v11104_v14 = vpop.eup %11103  ;;  %11115 = vrcp.f32 %v5901_v39  ;;  %v5918_v36 = vmul.f32 %v11102_v16, %v12630_v7 }
0x3337   :  { %v11106_v48 = vpop.eup %11105  ;;  %v5919_v21 = vmul.f32 %v11104_v14, %v12632_v53 }
0x3338   :  { %v11108_v33 = vpop.eup %11107  ;;  %v5920_v12 = vmul.f32 %v11106_v48, %v12635_v54  ;;  %v9368_v54 = vld [vmem:[%s11511_s10] ss:$0 sm:$0xff] }
0x3339   :  { %v5921_v46 = vmul.f32 %v11108_v33, %v5850_v60 }
0x333a   :  { %v5926_v30 = vpack.c.bf16 %v5920_v12, %v5918_v36 }
0x333b   :  { %v5927_v15 = vpack.c.bf16 %v5921_v46, %v5919_v21  ;;  %v10841_v46 = vld [vmem:[%s11466_s3 + $0x44] ss:$8 sps:$4 sm:$0xff]  }
0x333c   :  { %6264 = vmatprep.subr.bf16.mxu0 %v10841_v46 }
0x333d   :  { %v11110_v56 = vpop.eup %11109  ;;  %6097 = vmatprep.mubr.bf16.mxu1 %v5927_v15  ;;  %v10844_v15 = vld [vmem:[%s11466_s3 + $0x54] ss:$8 sps:$4 sm:$0xff]  }
0x333e   :  { %v11112_v3 = vpop.eup %11111  ;;  %6098 = vmatmul.mubr.bf16.vlgmr.msra.gmra.mrb[168].mxu1 %v5926_v30  ;;  %v5922_v1 = vmul.f32 %v11110_v56, %v5854_v5  ;;  %v10839_v30 = vld [vmem:[%s11466_s3 + $0x40] ss:$8 sps:$4 sm:$0xff]   ;;  %v10842_v56 = vld [vmem:[%s11466_s3 + $0x50] ss:$8 sps:$4 sm:$0xff]  }
0x333f   :  { %v11114_v62 = vpop.eup %11113  ;;  %v5923_v4 = vmul.f32 %v11112_v3, %v5856_v42  ;;  %6265 = vmatpush1.bf16.msra.mxu0 %v10839_v30  ;;  %v10847_v3 = vld [vmem:[%s11466_s3 + $0x64] ss:$8 sps:$4 sm:$0xff]  }
0x3340   :  { %v11116_v63 = vpop.eup %11115  ;;  %v5924_v25 = vmul.f32 %v11114_v62, %v5858_v13  ;;  %6266 = vmatprep.subr.bf16.mxu0 %v10844_v15  ;;  %v10845_v62 = vld [vmem:[%s11466_s3 + $0x60] ss:$8 sps:$4 sm:$0xff]  }
0x3341   :  { %v5925_v27 = vmul.f32 %v11116_v63, %v5860_v47  ;;  %v10850_v63 = vld [vmem:[%s11466_s3 + $0x74] ss:$8 sps:$4 sm:$0xff]  }
0x3342   :  { %v5928_v11 = vpack.c.bf16 %v5924_v25, %v5922_v1  ;;  %v10848_v1 = vld [vmem:[%s11466_s3 + $0x70] ss:$8 sps:$4 sm:$0xff]   ;;  %s13232_s3 = sld [smem:[#allocation15_spill]] }
0x3343   :  { %v5929_v7 = vpack.c.bf16 %v5925_v27, %v5923_v4  ;;  %6267 = vmatpush1.bf16.msra.mxu0 %v10842_v56 }
0x3344   :  { %6268 = vmatprep.subr.bf16.mxu0 %v10847_v3 }
0x3345   :  { %6105 = vmatprep.mubr.bf16.mxu1 %v5929_v7 }
0x3346   :  { %6106 = vmatmul.mubr.bf16.gmra.mrb[172].mxu1 %v5928_v11 }
0x3347   :  { %10325 = vmatprep.mubr.msk.bf16.mxu1 %vm11309_vm1, %v11308_v31  ;;  %6269 = vmatpush1.bf16.msra.mxu0 %v10845_v62 }
0x3348   :  { %6270 = vmatprep.subr.bf16.mxu0 %v10850_v63 }
0x334b   :  { %6271 = vmatpush1.bf16.msra.mxu0 %v10848_v1 }
0x334c   :  { %10311 = vmatprep.subr.bf16.mxu0 %v11308_v31 }
0x3411   :  { %v9757_v53 = vpop.f32.mrb[168].mxu1 }
0x3412   :  { %v9758_v60 = vpop.f32.mrb[169].mxu1 }
0x3413   :  { %v9759_v6 = vadd.f32 %v9758_v60, %v9757_v53  ;;  %v9760_v10 = vpop.f32.mrb[170].mxu1 }
0x3414   :  { %v9761_v51 = vpop.f32.mrb[171].mxu1 }
0x3415   :  { %v6100_v40 = vadd.f32 %v9759_v6, %v9368_v54  ;;  %v9762_v34 = vadd.f32 %v9761_v51, %v9760_v10 }
0x3417   :  { %v12646_v5 = vadd.f32 %v6100_v40, %v12570_v9  ;;  %v6103_v42 = vadd.f32 %v9762_v34, %v9368_v54 }
0x3419   :  { %v12649_v13 = vadd.f32 %v6103_v42, %v12576_v43  ;;  %v9763_v47 = vpop.f32.mrb[172].mxu1  ;;  %v6122_v45 = vsel %vm264_vm0, %v12646_v5, 0.0  ;;  %v9387_v42 = vld [vmem:[%s13223_s30 + $0x1] ss:$0 sm:$0xff] }
0x341a   :  { %v9764_v17 = vpop.f32.mrb[173].mxu1  ;;  %6123 = vadd.xlane.f32.xlu0 %v6122_v45 }
0x341b   :  { %v9765_v18 = vadd.f32 %v9764_v17, %v9763_v47  ;;  %v9766_v19 = vpop.f32.mrb[174].mxu1  ;;  %v6125_v52 = vsel %vm264_vm0, %v12649_v13, 0.0 }
0x341c   :  { %v9767_v20 = vpop.f32.mrb[175].mxu1  ;;  %6126 = vadd.xlane.f32.xlu1 %v6125_v52 }
0x341d   :  { %v6108_v57 = vadd.f32 %v9765_v18, %v9368_v54  ;;  %v9768_v9 = vadd.f32 %v9767_v20, %v9766_v19  ;;  %v9388_v19 = vld [vmem:[%s13224_s6 + $0x1] ss:$0 sm:$0xff] }
0x341f   :  { %v12656_v23 = vadd.f32 %v6108_v57, %v12573_v55  ;;  %v6111_v43 = vadd.f32 %v9768_v9, %v9368_v54 }
0x3421   :  { %v12659_v26 = vadd.f32 %v6111_v43, %v12582_v50  ;;  %v6128_v37 = vsel %vm264_vm0, %v12656_v23, 0.0 }
0x3422   :  { %6129 = vadd.xlane.f32.xlu0 %v6128_v37 }
0x3423   :  { %v6131_v28 = vsel %vm264_vm0, %v12659_v26, 0.0 }
0x3424   :  { %6132 = vadd.xlane.f32.xlu1 %v6131_v28 }
0x34a7   :  { %v6124_v49 = vpop.xlane.xlu0 %6123 }
0x34a8   :  { %v6134_v29 = vmul.f32 0.015625, %v6124_v49 }
0x34a9   :  { %v6127_v8 = vpop.xlane.xlu1 %6126 }
0x34aa   :  { %v6138_v0 = vsub.f32 %v12646_v5, %v6134_v29  ;;  %v6135_v59 = vmul.f32 0.015625, %v6127_v8 }
0x34ac   :  { %v6139_v55 = vsub.f32 %v12649_v13, %v6135_v59  ;;  %v6142_v24 = vmul.f32 %v6138_v0, %v6138_v0 }
0x34ae   :  { %v6146_v50 = vsel %vm264_vm0, %v6142_v24, 0.0  ;;  %v6143_v22 = vmul.f32 %v6139_v55, %v6139_v55 }
0x34af   :  { %6147 = vadd.xlane.f32.xlu0 %v6146_v50  ;;  %v6130_v61 = vpop.xlane.xlu0 %6129 }
0x34b0   :  { %v6136_v38 = vmul.f32 0.015625, %v6130_v61  ;;  %v6149_v44 = vsel %vm264_vm0, %v6143_v22, 0.0 }
0x34b1   :  { %6150 = vadd.xlane.f32.xlu1 %v6149_v44  ;;  %v6133_v39 = vpop.xlane.xlu1 %6132 }
0x34b2   :  { %v6140_v16 = vsub.f32 %v12656_v23, %v6136_v38  ;;  %v6137_v14 = vmul.f32 0.015625, %v6133_v39 }
0x34b4   :  { %v6141_v48 = vsub.f32 %v12659_v26, %v6137_v14  ;;  %v6144_v33 = vmul.f32 %v6140_v16, %v6140_v16 }
0x34b6   :  { %v6152_v36 = vsel %vm264_vm0, %v6144_v33, 0.0  ;;  %v6145_v12 = vmul.f32 %v6141_v48, %v6141_v48 }
0x34b7   :  { %6153 = vadd.xlane.f32.xlu0 %v6152_v36 }
0x34b8   :  { %v6155_v21 = vsel %vm264_vm0, %v6145_v12, 0.0 }
0x34b9   :  { %6156 = vadd.xlane.f32.xlu1 %v6155_v21 }
0x353c   :  { %v6148_v25 = vpop.xlane.xlu0 %6147 }
0x353d   :  { %v6158_v4 = vmul.f32 0.015625, %v6148_v25 }
0x353e   :  { %v6151_v27 = vpop.xlane.xlu1 %6150 }
0x353f   :  { %v6162_v11 = vadd.f32 1e-05, %v6158_v4  ;;  %v6159_v7 = vmul.f32 0.015625, %v6151_v27 }
0x3541   :  { %11117 = vrsqrt.f32 %v6162_v11  ;;  %v6163_v53 = vadd.f32 1e-05, %v6159_v7 }
0x3543   :  { %11119 = vrsqrt.f32 %v6163_v53 }
0x3544   :  { %v6154_v54 = vpop.xlane.xlu0 %6153 }
0x3545   :  { %v6160_v60 = vmul.f32 0.015625, %v6154_v54 }
0x3546   :  { %v6157_v6 = vpop.xlane.xlu1 %6156 }
0x3547   :  { %v6164_v10 = vadd.f32 1e-05, %v6160_v60  ;;  %v6161_v51 = vmul.f32 0.015625, %v6157_v6 }
0x3549   :  { %11121 = vrsqrt.f32 %v6164_v10  ;;  %v6165_v40 = vadd.f32 1e-05, %v6161_v51 }
0x354b   :  { %v11118_v34 = vpop.eup %11117  ;;  %11123 = vrsqrt.f32 %v6165_v40 }
0x354c   :  { %v6170_v47 = vmul.f32 %v11118_v34, %v6138_v0 }
0x354d   :  { %v11120_v45 = vpop.eup %11119 }
0x354e   :  { %v6180_v17 = vmul.f32 %v9387_v42, %v6170_v47  ;;  %v6171_v18 = vmul.f32 %v11120_v45, %v6139_v55  ;;  %v9397_v55 = vld [vmem:[%s13225_s12 + $0x2] sm:$0x3] }
0x354f   :  { %v6211_v50 = vrot.slane %v9397_v55, %v11584_v32  ;;  %v6215_v33 = vrot.slane %v9397_v55, %v11593_v35 }
0x3550   :  { %v6181_v52 = vmul.f32 %v9387_v42, %v6171_v18  ;;  %v6190_v20 = vadd.f32 %v9388_v19, %v6180_v17 }
0x3552   :  { %v6191_v57 = vadd.f32 %v9388_v19, %v6181_v52 }
0x3553   :  { %v11122_v9 = vpop.eup %11121 }
0x3554   :  { %v6194_v43 = vpack.c.bf16 %v6191_v57, %v6190_v20  ;;  %v6172_v37 = vmul.f32 %v11122_v9, %v6140_v16 }
0x3555   :  { %v11124_v28 = vpop.eup %11123 }
0x3556   :  { %v6173_v49 = vmul.f32 %v11124_v28, %v6141_v48  ;;  %9406 = vmatmul.mubr.msk.bf16.vlgmr.msra.gmra.mrb[148].mxu0 %vm264_vm0, %v6194_v43  ;;  %v6182_v29 = vmul.f32 %v9387_v42, %v6172_v37 }
0x3557   :  { %6306 = vmatprep.mubr.bf16.mxu0 %v11307_v2 }
0x3558   :  { %v6183_v8 = vmul.f32 %v9387_v42, %v6173_v49  ;;  %v6192_v0 = vadd.f32 %v9388_v19, %v6182_v29 }
0x355a   :  { %v6193_v59 = vadd.f32 %v9388_v19, %v6183_v8 }
0x355c   :  { %v6195_v24 = vpack.c.bf16 %v6193_v59, %v6192_v0 }
0x355e   :  { %9407 = vmatmul.mubr.msk.bf16.gmra.mrb[152].mxu0 %vm264_vm0, %v6195_v24 }
0x355f   :  { %10313 = vmatprep.mubr.msk.bf16.mxu0 %vm11309_vm1, %v11308_v31 }
0x3629   :  { %v6298_v22 = vpop.f32.mrb[148].mxu0 }
0x362a   :  { %v6299_v61 = vadd.f32 %v6298_v22, %v6211_v50  ;;  %v6300_v38 = vpop.f32.mrb[149].mxu0 }
0x362b   :  { %v6302_v44 = vpop.f32.mrb[150].mxu0  ;;  %v6301_v11 = vadd.f32 %v6300_v38, %v6215_v33 }
0x362c   :  { %v12691_v39 = vpack.c.bf16 %v6299_v61, %v6299_v61  ;;  %v6303_v16 = vadd.f32 %v6302_v44, %v6211_v50  ;;  %v6304_v14 = vpop.f32.mrb[151].mxu0 }
0x362d   :  { %v12722_v54 = vpack.c.bf16 %v6301_v11, %v6301_v11  ;;  %v6305_v6 = vadd.f32 %v6304_v14, %v6215_v33 }
0x362e   :  { %v12693_v48 = vpack.c.bf16 %v6303_v16, %v6303_v16  ;;  %6322 = vrot.lane.b32.xlu0 %v12691_v39, %s11310_s0 }
0x362f   :  { %v6573_v51 = vsel %vm643_vm3, %v12722_v54, 0  ;;  %v12737_v40 = vpack.c.bf16 %v6305_v6, %v6305_v6 }
0x3630   :  { %6371 = vrot.lane.b32.xlu1 %v12693_v48, %s11310_s0 }
0x3631   :  { %v6308_v36 = vpop.f32.mrb[152].mxu0  ;;  %v6619_v34 = vsel %vm643_vm3, %v12737_v40, 0 }
0x3632   :  { %v6309_v12 = vadd.f32 %v6308_v36, %v6211_v50  ;;  %v6310_v21 = vpop.f32.mrb[153].mxu0 }
0x3633   :  { %v12700_v46 = vadd.f32 %v6310_v21, %v6215_v33  ;;  %v6312_v30 = vpop.f32.mrb[154].mxu0 }
0x3634   :  { %v12702_v15 = vpack.c.bf16 %v6309_v12, %v6309_v12  ;;  %v6313_v56 = vadd.f32 %v6312_v30, %v6211_v50  ;;  %v6314_v3 = vpop.f32.mrb[155].mxu0 }
0x3635   :  { %v12704_v62 = vadd.f32 %v6314_v3, %v6215_v33 }
0x3636   :  { %6420 = vrot.lane.b32.xlu1 %v12702_v15, %s11310_s0  ;;  %v12708_v63 = vpack.c.bf16 %v6313_v56, %v6313_v56 }
0x363a   :  { %6469 = vrot.lane.b32.xlu1 %v12708_v63, %s11310_s0 }
0x36a0   :  { %v6323_v1 = vpop.permute.xlu0 %6322 }
0x36a1   :  { %v6328_v25 = vsel %vm517_vm2, %v6323_v1, 0 }
0x36a2   :  { %10312 = vmatpush3.bf16.xpose.msra.mxu0 %v6328_v25  ;;  %v6372_v4 = vpop.permute.xlu1 %6371 }
0x36a3   :  { %10317 = vmatprep.subr.bf16.mxu0 %v11308_v31  ;;  %v6377_v7 = vsel %vm517_vm2, %v6372_v4, 0 }
0x36a8   :  { %v6421_v27 = vpop.permute.xlu1 %6420 }
0x36a9   :  { %v6426_v53 = vsel %vm517_vm2, %v6421_v27, 0  ;;  %10314 = vmatmul.mubr.msk.bf16.vlgmr.msra.gmra.mrb[156].mxu0 %vm517_vm2, %v12691_v39 }
0x36aa   :  { %10318 = vmatpush3.bf16.xpose.msra.mxu0 %v6377_v7  ;;  %10324 = vmatpush3.bf16.xpose.msra.mxu1 %v6426_v53 }
0x36ab   :  { %10319 = vmatprep.mubr.msk.bf16.mxu0 %vm11309_vm1, %v11308_v31  ;;  %10329 = vmatprep.subr.bf16.mxu0 %v11308_v31 }
0x36ac   :  { %10335 = vmatprep.subr.bf16.mxu1 %v11308_v31  ;;  %v6470_v60 = vpop.permute.xlu1 %6469 }
0x36ad   :  { %v6475_v10 = vsel %vm517_vm2, %v6470_v60, 0 }
0x36b1   :  { %10320 = vmatmul.mubr.msk.bf16.vlgmr.msra.gmra.mrb[160].mxu0 %vm517_vm2, %v12693_v48  ;;  %10326 = vmatmul.mubr.msk.bf16.vlgmr.msra.gmra.mrb[176].mxu1 %vm517_vm2, %v12702_v15 }
0x36b2   :  { %10330 = vmatpush3.bf16.xpose.msra.mxu0 %v6475_v10  ;;  %10336 = vmatpush3.bf16.msra.mxu1 %v6573_v51 }
0x36b3   :  { %10331 = vmatprep.mubr.msk.bf16.mxu0 %vm11309_vm1, %v11308_v31  ;;  %10341 = vmatprep.subr.bf16.mxu0 %v11308_v31 }
0x36b4   :  { %10337 = vmatprep.mubr.msk.bf16.mxu1 %vm11309_vm1, %v11308_v31  ;;  %10347 = vmatprep.subr.bf16.mxu1 %v11308_v31 }
0x36b9   :  { %10332 = vmatmul.mubr.msk.bf16.vlgmr.msra.gmra.mrb[164].mxu0 %vm517_vm2, %v12708_v63 }
0x36ba   :  { %10342 = vmatpush3.bf16.msra.mxu0 %v6619_v34  ;;  %10343 = vmatprep.mubr.msk.bf16.mxu0 %vm11309_vm1, %v11308_v31 }
0x36bb   :  { %10353 = vmatprep.subr.bf16.mxu0 %v11308_v31 }
0x377c   :  { %v6364_v42 = vpop.f32.mrb[156].mxu0 }
0x377d   :  { %v6365_v47 = vadd.f32 %v6364_v42, %v12247_v41  ;;  %v10315_v45 = vpop.f32.mrb[157].mxu0 }
0x377e   :  { %v6367_v17 = vpop.f32.mrb[158].mxu0  ;;  %v12776_v45 = vpack.c.bf16 %v12700_v46, %v12700_v46  ;;  %v12786_v46 = vpack.c.bf16 %v12704_v62, %v12704_v62 }
0x377f   :  { %v10316_v18 = vpop.f32.mrb[159].mxu0  ;;  %v6517_v19 = vsel %vm613_vm5, %v6365_v47, -inf }
0x3780   :  { %6518 = vmax.xlane.f32.xlu0 %v6517_v19  ;;  %v6665_v19 = vsel %vm643_vm3, %v12776_v45, 0 }
0x3784   :  { %v6413_v52 = vpop.f32.mrb[160].mxu0  ;;  %v6462_v20 = vpop.f32.mrb[176].mxu1 }
0x3785   :  { %v6414_v57 = vadd.f32 %v6413_v52, %v12247_v41  ;;  %v6463_v9 = vadd.f32 %v6462_v20, %v12247_v41  ;;  %v10321_v43 = vpop.f32.mrb[161].mxu0  ;;  %v10327_v37 = vpop.f32.mrb[177].mxu1 }
0x3786   :  { %v6416_v28 = vpop.f32.mrb[162].mxu0  ;;  %v6465_v49 = vpop.f32.mrb[178].mxu1 }
0x3787   :  { %v10322_v29 = vpop.f32.mrb[163].mxu0  ;;  %v10328_v8 = vpop.f32.mrb[179].mxu1  ;;  %v6523_v0 = vsel %vm613_vm5, %v6463_v9, -inf  ;;  %v6520_v59 = vsel %vm613_vm5, %v6414_v57, -inf }
0x3788   :  { %6524 = vmax.xlane.f32.xlu0 %v6523_v0  ;;  %6521 = vmax.xlane.f32.xlu1 %v6520_v59  ;;  %v6711_v29 = vsel %vm643_vm3, %v12786_v46, 0 }
0x378c   :  { %v6511_v24 = vpop.f32.mrb[164].mxu0 }
0x378d   :  { %v6512_v55 = vadd.f32 %v6511_v24, %v12247_v41  ;;  %v10333_v50 = vpop.f32.mrb[165].mxu0 }
0x378e   :  { %v6514_v22 = vpop.f32.mrb[166].mxu0 }
0x378f   :  { %v10334_v61 = vpop.f32.mrb[167].mxu0  ;;  %v6526_v38 = vsel %vm613_vm5, %v6512_v55, -inf }
0x3790   :  { %6527 = vmax.xlane.f32.xlu0 %v6526_v38 }
0x380d   :  { %v6519_v44 = vpop.xlane.xlu0 %6518 }
0x380e   :  { %v6529_v16 = vsub.f32 %v6365_v47, %v6519_v44 }
0x3810   :  { %v6533_v14 = vmul.f32 1.442695, %v6529_v16 }
0x3812   :  { %11125 = vpow2.f32 %v6533_v14 }
0x3815   :  { %v6525_v33 = vpop.xlane.xlu0 %6524  ;;  %v6522_v36 = vpop.xlane.xlu1 %6521 }
0x3816   :  { %v6531_v12 = vsub.f32 %v6463_v9, %v6525_v33  ;;  %v6530_v21 = vsub.f32 %v6414_v57, %v6522_v36 }
0x3818   :  { %v6537_v30 = vmul.f32 1.442695, %v6531_v12  ;;  %v6535_v56 = vmul.f32 1.442695, %v6530_v21 }
0x381a   :  { %11127 = vpow2.f32 %v6537_v30 }
0x381b   :  { %11129 = vpow2.f32 %v6535_v56 }
0x381c   :  { %v11126_v3 = vpop.eup %11125 }
0x381d   :  { %v6541_v1 = vsel %vm613_vm5, %v11126_v3, 0.0  ;;  %v6528_v7 = vpop.xlane.xlu0 %6527 }
0x381e   :  { %6542 = vadd.xlane.f32.xlu0 %v6541_v1  ;;  %v6532_v53 = vsub.f32 %v6512_v55, %v6528_v7 }
0x3820   :  { %v6539_v60 = vmul.f32 1.442695, %v6532_v53 }
0x3822   :  { %11131 = vpow2.f32 %v6539_v60 }
0x3824   :  { %v11128_v25 = vpop.eup %11127 }
0x3825   :  { %v11130_v4 = vpop.eup %11129  ;;  %v6547_v27 = vsel %vm613_vm5, %v11128_v25, 0.0 }
0x3826   :  { %v6544_v11 = vsel %vm613_vm5, %v11130_v4, 0.0  ;;  %6548 = vadd.xlane.f32.xlu0 %v6547_v27 }
0x3827   :  { %6545 = vadd.xlane.f32.xlu1 %v6544_v11 }
0x382c   :  { %v11132_v6 = vpop.eup %11131 }
0x382d   :  { %v6550_v10 = vsel %vm613_vm5, %v11132_v6, 0.0 }
0x3838   :  { %6805 = vrot.lane.b32.xlu1 %v12693_v48, %s11312_s5 }
0x383c   :  { %6753 = vrot.lane.b32.xlu1 %v12691_v39, %s11313_s9  ;;  %6755 = vrot.lane.b32.xlu0 %v12691_v39, %s11312_s5 }
0x3840   :  { %6855 = vrot.lane.b32.xlu0 %v12702_v15, %s11312_s5 }
0x3844   :  { %6853 = vrot.lane.b32.xlu0 %v12702_v15, %s11313_s9 }
0x3860   :  { %6551 = vadd.xlane.f32.xlu1 %v6550_v10 }
0x3871   :  { %6803 = vrot.lane.b32.xlu1 %v12693_v48, %s11313_s9 }
0x3875   :  { %6905 = vrot.lane.b32.xlu1 %v12708_v63, %s11312_s5 }
0x3879   :  { %6903 = vrot.lane.b32.xlu1 %v12708_v63, %s11313_s9 }
0x38ab   :  { %v6543_v51 = vpop.xlane.xlu0 %6542 }
0x38ac   :  { %11133 = vrcp.f32 %v6543_v51 }
0x38b3   :  { %v6549_v34 = vpop.xlane.xlu0 %6548 }
0x38b4   :  { %v6546_v42 = vpop.xlane.xlu1 %6545  ;;  %11135 = vrcp.f32 %v6549_v34 }
0x38b5   :  { %11137 = vrcp.f32 %v6546_v42 }
0x38b6   :  { %v11134_v47 = vpop.eup %11133 }
0x38b7   :  { %v6557_v17 = vmul.f32 %v11134_v47, %v11126_v3  ;;  %v6756_v43 = vpop.permute.xlu0 %6755 }
0x38b8   :  { %v6761_v49 = vsel %vm517_vm2, %v6756_v43, 0  ;;  %v6806_v8 = vpop.permute.xlu1 %6805 }
0x38b9   :  { %v6561_v18 = vpack.c.bf16 %v6557_v17, %v6557_v17  ;;  %v6811_v44 = vsel %vm517_vm2, %v6806_v8, 0 }
0x38bb   :  { %10338 = vmatmul.mubr.msk.bf16.vlgmr.msra.gmra.mrb[180].mxu1 %vm613_vm5, %v6561_v18  ;;  %v6856_v62 = vpop.permute.xlu0 %6855 }
0x38bc   :  { %10348 = vmatpush3.bf16.msra.mxu1 %v6665_v19  ;;  %10349 = vmatprep.mubr.msk.bf16.mxu1 %vm11309_vm1, %v11308_v31  ;;  %v6754_v0 = vpop.permute.xlu1 %6753  ;;  %v6861_v59 = vsel %vm517_vm2, %v6856_v62, 0 }
0x38bd   :  { %10359 = vmatprep.subr.bf16.mxu1 %v11308_v31 }
0x38be   :  { %v11136_v52 = vpop.eup %11135 }
0x38bf   :  { %v11138_v20 = vpop.eup %11137  ;;  %v6559_v57 = vmul.f32 %v11136_v52, %v11128_v25  ;;  %v6854_v24 = vpop.permute.xlu0 %6853 }
0x38c0   :  { %v6558_v9 = vmul.f32 %v11138_v20, %v11130_v4 }
0x38c1   :  { %v6563_v37 = vpack.c.bf16 %v6559_v57, %v6559_v57 }
0x38c2   :  { %v6562_v28 = vpack.c.bf16 %v6558_v9, %v6558_v9 }
0x38c3   :  { %10350 = vmatmul.mubr.msk.bf16.vlgmr.msra.gmra.mrb[184].mxu1 %vm613_vm5, %v6563_v37 }
0x38c4   :  { %10344 = vmatmul.mubr.msk.bf16.vlgmr.msra.gmra.mrb[168].mxu0 %vm613_vm5, %v6562_v28  ;;  %10361 = vmatprep.mubr.msk.bf16.mxu1 %vm11309_vm1, %v11308_v31 }
0x38c5   :  { %10354 = vmatpush3.bf16.msra.mxu0 %v6711_v29  ;;  %10360 = vmatpush3.bf16.xpose.msra.mxu1 %v6761_v49 }
0x38c6   :  { %10371 = vmatprep.subr.bf16.mxu1 %v11308_v31  ;;  %10355 = vmatprep.mubr.msk.bf16.mxu0 %vm11309_vm1, %v11308_v31 }
0x38c7   :  { %10365 = vmatprep.subr.bf16.mxu0 %v11308_v31 }
0x38cc   :  { %10362 = vmatmul.mubr.msk.bf16.vlgmr.msra.gmra.mrb[188].mxu1 %vm517_vm2, %v6754_v0 }
0x38cd   :  { %10372 = vmatpush3.bf16.xpose.msra.mxu1 %v6861_v59  ;;  %10373 = vmatprep.mubr.msk.bf16.mxu1 %vm11309_vm1, %v11308_v31 }
0x38ce   :  { %10383 = vmatprep.subr.bf16.mxu1 %v11308_v31 }
0x38d4   :  { %10374 = vmatmul.mubr.msk.bf16.vlgmr.msra.gmra.mrb[192].mxu1 %vm517_vm2, %v6854_v24 }
0x38d5   :  { %10385 = vmatprep.mubr.msk.bf16.mxu1 %vm11309_vm1, %v11308_v31 }
0x38ed   :  { %v6552_v55 = vpop.xlane.xlu1 %6551 }
0x38ee   :  { %11139 = vrcp.f32 %v6552_v55 }
0x38f1   :  { %v6804_v38 = vpop.permute.xlu1 %6803 }
0x38f5   :  { %v6906_v16 = vpop.permute.xlu1 %6905 }
0x38f6   :  { %v6911_v14 = vsel %vm517_vm2, %v6906_v16, 0 }
0x38f8   :  { %v11140_v50 = vpop.eup %11139 }
0x38f9   :  { %v6560_v22 = vmul.f32 %v11140_v50, %v11132_v6  ;;  %v6904_v33 = vpop.permute.xlu1 %6903 }
0x38fb   :  { %v6564_v61 = vpack.c.bf16 %v6560_v22, %v6560_v22 }
0x38fd   :  { %10356 = vmatmul.mubr.msk.bf16.vlgmr.msra.gmra.mrb[172].mxu0 %vm613_vm5, %v6564_v61 }
0x38fe   :  { %10366 = vmatpush3.bf16.xpose.msra.mxu0 %v6811_v44  ;;  %10367 = vmatprep.mubr.msk.bf16.mxu0 %vm11309_vm1, %v11308_v31 }
0x38ff   :  { %10377 = vmatprep.subr.bf16.mxu0 %v11308_v31 }
0x3905   :  { %10368 = vmatmul.mubr.msk.bf16.vlgmr.msra.gmra.mrb[176].mxu0 %vm517_vm2, %v6804_v38 }
0x3906   :  { %10378 = vmatpush3.bf16.xpose.msra.mxu0 %v6911_v14  ;;  %10379 = vmatprep.mubr.msk.bf16.mxu0 %vm11309_vm1, %v11308_v31 }
0x3907   :  { %10389 = vmatprep.subr.bf16.mxu0 %v11308_v31 }
0x390d   :  { %10380 = vmatmul.mubr.msk.bf16.vlgmr.msra.gmra.mrb[180].mxu0 %vm517_vm2, %v6904_v33 }
0x390e   :  { %10391 = vmatprep.mubr.msk.bf16.mxu0 %vm11309_vm1, %v11308_v31 }
0x398e   :  { %v12820_v36 = vpop.f32.mrb[180].mxu1 }
0x398f   :  { %v10339_v12 = vpop.f32.mrb[181].mxu1 }
0x3990   :  { %v6612_v21 = vpop.f32.mrb[182].mxu1 }
0x3991   :  { %v10340_v30 = vpop.f32.mrb[183].mxu1 }
0x3996   :  { %v12822_v56 = vpop.f32.mrb[184].mxu1 }
0x3997   :  { %v12824_v3 = vpop.f32.mrb[168].mxu0  ;;  %v10351_v1 = vpop.f32.mrb[185].mxu1 }
0x3998   :  { %v10345_v25 = vpop.f32.mrb[169].mxu0  ;;  %v6704_v4 = vpop.f32.mrb[186].mxu1 }
0x3999   :  { %v6658_v27 = vpop.f32.mrb[170].mxu0  ;;  %v10352_v11 = vpop.f32.mrb[187].mxu1 }
0x399a   :  { %v10346_v7 = vpop.f32.mrb[171].mxu0 }
0x399f   :  { %v6797_v53 = vpop.f32.mrb[188].mxu1 }
0x39a0   :  { %v6798_v60 = vadd.f32 %v6797_v53, %v12247_v41  ;;  %v10363_v6 = vpop.f32.mrb[189].mxu1 }
0x39a1   :  { %v6800_v10 = vpop.f32.mrb[190].mxu1 }
0x39a2   :  { %v10364_v51 = vpop.f32.mrb[191].mxu1  ;;  %v6953_v34 = vsel %vm613_vm5, %v6798_v60, -inf }
0x39a3   :  { %6954 = vmax.xlane.f32.xlu0 %v6953_v34 }
0x39a7   :  { %v6897_v42 = vpop.f32.mrb[192].mxu1 }
0x39a8   :  { %v6898_v47 = vadd.f32 %v6897_v42, %v12247_v41  ;;  %v10375_v17 = vpop.f32.mrb[193].mxu1 }
0x39a9   :  { %v6900_v18 = vpop.f32.mrb[194].mxu1 }
0x39aa   :  { %v10376_v19 = vpop.f32.mrb[195].mxu1  ;;  %v6959_v52 = vsel %vm613_vm5, %v6898_v47, -inf }
0x39ab   :  { %6960 = vmax.xlane.f32.xlu0 %v6959_v52 }
0x39d0   :  { %v12830_v20 = vpop.f32.mrb[172].mxu0 }
0x39d1   :  { %v10357_v57 = vpop.f32.mrb[173].mxu0 }
0x39d2   :  { %v6750_v9 = vpop.f32.mrb[174].mxu0 }
0x39d3   :  { %v10358_v43 = vpop.f32.mrb[175].mxu0 }
0x39d8   :  { %v6847_v37 = vpop.f32.mrb[176].mxu0 }
0x39d9   :  { %v6848_v28 = vadd.f32 %v6847_v37, %v12247_v41  ;;  %v10369_v49 = vpop.f32.mrb[177].mxu0 }
0x39da   :  { %v6850_v29 = vpop.f32.mrb[178].mxu0 }
0x39db   :  { %v10370_v8 = vpop.f32.mrb[179].mxu0  ;;  %v6956_v62 = vsel %vm613_vm5, %v6848_v28, -inf }
0x39dc   :  { %6957 = vmax.xlane.f32.xlu1 %v6956_v62 }
0x39e0   :  { %v6947_v0 = vpop.f32.mrb[180].mxu0 }
0x39e1   :  { %v6948_v59 = vadd.f32 %v6947_v0, %v12247_v41  ;;  %v10381_v24 = vpop.f32.mrb[181].mxu0 }
0x39e2   :  { %v6950_v55 = vpop.f32.mrb[182].mxu0 }
0x39e3   :  { %v10382_v50 = vpop.f32.mrb[183].mxu0  ;;  %v6962_v22 = vsel %vm613_vm5, %v6948_v59, -inf }
0x39e4   :  { %6963 = vmax.xlane.f32.xlu0 %v6962_v22 }
0x39ed   :  { %7051 = vrot.lane.b32.xlu1 %v12737_v40, %s11313_s9 }
0x39f1   :  { %7100 = vrot.lane.b32.xlu1 %v12776_v45, %s11313_s9 }
0x39f5   :  { %7149 = vrot.lane.b32.xlu1 %v12786_v46, %s11313_s9 }
0x3a30   :  { %v6955_v61 = vpop.xlane.xlu0 %6954 }
0x3a31   :  { %v6965_v38 = vsub.f32 %v6798_v60, %v6955_v61 }
0x3a33   :  { %v6969_v44 = vmul.f32 1.442695, %v6965_v38 }
0x3a35   :  { %11141 = vpow2.f32 %v6969_v44 }
0x3a38   :  { %v6961_v33 = vpop.xlane.xlu0 %6960 }
0x3a39   :  { %v6967_v12 = vsub.f32 %v6898_v47, %v6961_v33 }
0x3a3b   :  { %v6973_v21 = vmul.f32 1.442695, %v6967_v12 }
0x3a3d   :  { %11143 = vpow2.f32 %v6973_v21 }
0x3a3f   :  { %v11142_v16 = vpop.eup %11141 }
0x3a40   :  { %v6977_v14 = vsel %vm613_vm5, %v11142_v16, 0.0 }
0x3a41   :  { %6978 = vadd.xlane.f32.xlu0 %v6977_v14 }
0x3a47   :  { %v11144_v11 = vpop.eup %11143 }
0x3a48   :  { %v6983_v7 = vsel %vm613_vm5, %v11144_v11, 0.0 }
0x3a57   :  { %7002 = vrot.lane.b32.xlu0 %v12722_v54, %s11313_s9 }
0x3a69   :  { %v6958_v30 = vpop.xlane.xlu1 %6957 }
0x3a6a   :  { %v6966_v1 = vsub.f32 %v6848_v28, %v6958_v30 }
0x3a6c   :  { %v6971_v25 = vmul.f32 1.442695, %v6966_v1 }
0x3a6d   :  { %v7052_v4 = vpop.permute.xlu1 %7051 }
0x3a6e   :  { %11145 = vpow2.f32 %v6971_v25  ;;  %v7057_v27 = vsel %vm643_vm3, %v7052_v4, 0 }
0x3a6f   :  { %10390 = vmatpush3.bf16.msra.mxu0 %v7057_v27 }
0x3a70   :  { %10401 = vmatprep.subr.bf16.mxu0 %v11308_v31 }
0x3a71   :  { %v6964_v6 = vpop.xlane.xlu0 %6963  ;;  %v7101_v57 = vpop.permute.xlu1 %7100 }
0x3a72   :  { %v6968_v10 = vsub.f32 %v6948_v59, %v6964_v6  ;;  %v7106_v43 = vsel %vm643_vm3, %v7101_v57, 0 }
0x3a74   :  { %v6975_v51 = vmul.f32 1.442695, %v6968_v10 }
0x3a75   :  { %v7150_v37 = vpop.permute.xlu1 %7149 }
0x3a76   :  { %6984 = vadd.xlane.f32.xlu0 %v6983_v7  ;;  %11147 = vpow2.f32 %v6975_v51  ;;  %v7155_v61 = vsel %vm643_vm3, %v7150_v37, 0 }
0x3a78   :  { %v11146_v53 = vpop.eup %11145 }
0x3a79   :  { %v6980_v60 = vsel %vm613_vm5, %v11146_v53, 0.0 }
0x3a7a   :  { %6981 = vadd.xlane.f32.xlu1 %v6980_v60 }
0x3a80   :  { %v11148_v34 = vpop.eup %11147 }
0x3a81   :  { %v6986_v42 = vsel %vm613_vm5, %v11148_v34, 0.0 }
0x3a8b   :  { %7249 = vrot.lane.b32.xlu1 %v12693_v48, %s11314_s13 }
0x3a8c   :  { %7199 = vrot.lane.b32.xlu0 %v12691_v39, %s11314_s13 }
0x3a90   :  { %7197 = vrot.lane.b32.xlu0 %v12691_v39, %s11315_s17 }
0x3a94   :  { %7299 = vrot.lane.b32.xlu0 %v12702_v15, %s11314_s13 }
0x3a98   :  { %7297 = vrot.lane.b32.xlu0 %v12702_v15, %s11315_s17 }
0x3aaf   :  { %6987 = vadd.xlane.f32.xlu1 %v6986_v42 }
0x3ac0   :  { %7247 = vrot.lane.b32.xlu1 %v12693_v48, %s11315_s17 }
0x3ac4   :  { %7349 = vrot.lane.b32.xlu1 %v12708_v63, %s11314_s13 }
0x3ac8   :  { %7347 = vrot.lane.b32.xlu1 %v12708_v63, %s11315_s17 }
0x3ace   :  { %v6979_v47 = vpop.xlane.xlu0 %6978 }
0x3acf   :  { %11149 = vrcp.f32 %v6979_v47 }
0x3ad2   :  { %v7003_v17 = vpop.permute.xlu0 %7002 }
0x3ad3   :  { %v7008_v18 = vsel %vm643_vm3, %v7003_v17, 0 }
0x3ad4   :  { %10384 = vmatpush3.bf16.msra.mxu1 %v7008_v18 }
0x3ad5   :  { %10395 = vmatprep.subr.bf16.mxu1 %v11308_v31 }
0x3ad9   :  { %v11150_v19 = vpop.eup %11149 }
0x3ada   :  { %v6993_v52 = vmul.f32 %v11150_v19, %v11142_v16 }
0x3adc   :  { %v6997_v9 = vpack.c.bf16 %v6993_v52, %v6993_v52 }
0x3ade   :  { %10386 = vmatmul.mubr.msk.bf16.vlgmr.msra.gmra.mrb[196].mxu1 %vm613_vm5, %v6997_v9 }
0x3adf   :  { %10396 = vmatpush3.bf16.msra.mxu1 %v7106_v43  ;;  %10397 = vmatprep.mubr.msk.bf16.mxu1 %vm11309_vm1, %v11308_v31 }
0x3ae0   :  { %10407 = vmatprep.subr.bf16.mxu1 %v11308_v31 }
0x3b03   :  { %v6985_v28 = vpop.xlane.xlu0 %6984 }
0x3b04   :  { %11151 = vrcp.f32 %v6985_v28 }
0x3b07   :  { %v6982_v49 = vpop.xlane.xlu1 %6981  ;;  %v7200_v29 = vpop.permute.xlu0 %7199 }
0x3b08   :  { %11153 = vrcp.f32 %v6982_v49  ;;  %v7205_v50 = vsel %vm517_vm2, %v7200_v29, 0 }
0x3b0b   :  { %v7198_v24 = vpop.permute.xlu0 %7197  ;;  %v7250_v14 = vpop.permute.xlu1 %7249 }
0x3b0c   :  { %v7255_v25 = vsel %vm517_vm2, %v7250_v14, 0 }
0x3b0e   :  { %v11152_v8 = vpop.eup %11151 }
0x3b0f   :  { %v6995_v62 = vmul.f32 %v11152_v8, %v11144_v11  ;;  %v7300_v38 = vpop.permute.xlu0 %7299 }
0x3b10   :  { %v7305_v44 = vsel %vm517_vm2, %v7300_v38, 0 }
0x3b11   :  { %v6999_v0 = vpack.c.bf16 %v6995_v62, %v6995_v62 }
0x3b12   :  { %v11154_v59 = vpop.eup %11153 }
0x3b13   :  { %v6994_v55 = vmul.f32 %v11154_v59, %v11146_v53  ;;  %10398 = vmatmul.mubr.msk.bf16.vlgmr.msra.gmra.mrb[200].mxu1 %vm613_vm5, %v6999_v0  ;;  %v7298_v16 = vpop.permute.xlu0 %7297 }
0x3b14   :  { %10408 = vmatpush3.bf16.xpose.msra.mxu1 %v7205_v50  ;;  %10409 = vmatprep.mubr.msk.bf16.mxu1 %vm11309_vm1, %v11308_v31 }
0x3b15   :  { %v6998_v22 = vpack.c.bf16 %v6994_v55, %v6994_v55  ;;  %10419 = vmatprep.subr.bf16.mxu1 %v11308_v31 }
0x3b17   :  { %10392 = vmatmul.mubr.msk.bf16.vlgmr.msra.gmra.mrb[184].mxu0 %vm613_vm5, %v6998_v22 }
0x3b18   :  { %10402 = vmatpush3.bf16.msra.mxu0 %v7155_v61  ;;  %10403 = vmatprep.mubr.msk.bf16.mxu0 %vm11309_vm1, %v11308_v31 }
0x3b19   :  { %10413 = vmatprep.subr.bf16.mxu0 %v11308_v31 }
0x3b1b   :  { %10410 = vmatmul.mubr.msk.bf16.vlgmr.msra.gmra.mrb[204].mxu1 %vm517_vm2, %v7198_v24 }
0x3b1c   :  { %10420 = vmatpush3.bf16.xpose.msra.mxu1 %v7305_v44  ;;  %10421 = vmatprep.mubr.msk.bf16.mxu1 %vm11309_vm1, %v11308_v31 }
0x3b1d   :  { %10431 = vmatprep.subr.bf16.mxu1 %v11308_v31 }
0x3b23   :  { %10422 = vmatmul.mubr.msk.bf16.vlgmr.msra.gmra.mrb[208].mxu1 %vm517_vm2, %v7298_v16 }
0x3b24   :  { %10433 = vmatprep.mubr.msk.bf16.mxu1 %vm11309_vm1, %v11308_v31 }
0x3b3c   :  { %v6988_v33 = vpop.xlane.xlu1 %6987 }
0x3b3d   :  { %11155 = vrcp.f32 %v6988_v33 }
0x3b40   :  { %v7248_v1 = vpop.permute.xlu1 %7247 }
0x3b44   :  { %v7350_v4 = vpop.permute.xlu1 %7349 }
0x3b45   :  { %v7355_v27 = vsel %vm517_vm2, %v7350_v4, 0 }
0x3b47   :  { %v11156_v12 = vpop.eup %11155 }
0x3b48   :  { %v6996_v21 = vmul.f32 %v11156_v12, %v11148_v34  ;;  %v7348_v11 = vpop.permute.xlu1 %7347 }
0x3b4a   :  { %v7000_v30 = vpack.c.bf16 %v6996_v21, %v6996_v21 }
0x3b4c   :  { %10404 = vmatmul.mubr.msk.bf16.vlgmr.msra.gmra.mrb[188].mxu0 %vm613_vm5, %v7000_v30 }
0x3b4d   :  { %10414 = vmatpush3.bf16.xpose.msra.mxu0 %v7255_v25  ;;  %10415 = vmatprep.mubr.msk.bf16.mxu0 %vm11309_vm1, %v11308_v31 }
0x3b4e   :  { %10425 = vmatprep.subr.bf16.mxu0 %v11308_v31 }
0x3b54   :  { %10416 = vmatmul.mubr.msk.bf16.vlgmr.msra.gmra.mrb[192].mxu0 %vm517_vm2, %v7248_v1 }
0x3b55   :  { %10426 = vmatpush3.bf16.xpose.msra.mxu0 %v7355_v27  ;;  %10427 = vmatprep.mubr.msk.bf16.mxu0 %vm11309_vm1, %v11308_v31 }
0x3b56   :  { %10437 = vmatprep.subr.bf16.mxu0 %v11308_v31 }
0x3b5c   :  { %10428 = vmatmul.mubr.msk.bf16.vlgmr.msra.gmra.mrb[196].mxu0 %vm517_vm2, %v7348_v11 }
0x3b5d   :  { %10439 = vmatprep.mubr.msk.bf16.mxu0 %vm11309_vm1, %v11308_v31 }
0x3bb1   :  { %v12904_v7 = vpop.f32.mrb[196].mxu1 }
0x3bb2   :  { %v10387_v53 = vpop.f32.mrb[197].mxu1 }
0x3bb3   :  { %v7047_v60 = vpop.f32.mrb[198].mxu1 }
0x3bb4   :  { %v10388_v6 = vpop.f32.mrb[199].mxu1 }
0x3be6   :  { %v12906_v10 = vpop.f32.mrb[200].mxu1 }
0x3be7   :  { %v10399_v51 = vpop.f32.mrb[201].mxu1 }
0x3be8   :  { %v7145_v34 = vpop.f32.mrb[202].mxu1 }
0x3be9   :  { %v10400_v42 = vpop.f32.mrb[203].mxu1 }
0x3bea   :  { %v12908_v47 = vpop.f32.mrb[184].mxu0 }
0x3beb   :  { %v10660_v17 = vpack.i.bf16 %v12908_v47, %v12904_v7  ;;  %v10393_v18 = vpop.f32.mrb[185].mxu0 }
0x3bec   :  { %v7096_v19 = vpop.f32.mrb[186].mxu0 }
0x3bed   :  { %v10394_v52 = vpop.f32.mrb[187].mxu0 }
0x3bee   :  { %v7241_v57 = vpop.f32.mrb[204].mxu1 }
0x3bef   :  { %v7242_v9 = vadd.f32 %v7241_v57, %v12247_v41  ;;  %v10411_v43 = vpop.f32.mrb[205].mxu1 }
0x3bf0   :  { %v7244_v37 = vpop.f32.mrb[206].mxu1 }
0x3bf1   :  { %v10412_v28 = vpop.f32.mrb[207].mxu1  ;;  %v7397_v49 = vsel %vm613_vm5, %v7242_v9, -inf }
0x3bf2   :  { %7398 = vmax.xlane.f32.xlu0 %v7397_v49 }
0x3bf6   :  { %v7341_v29 = vpop.f32.mrb[208].mxu1 }
0x3bf7   :  { %v7342_v8 = vadd.f32 %v7341_v29, %v12247_v41  ;;  %v10423_v62 = vpop.f32.mrb[209].mxu1 }
0x3bf8   :  { %v7344_v0 = vpop.f32.mrb[210].mxu1 }
0x3bf9   :  { %v10424_v59 = vpop.f32.mrb[211].mxu1  ;;  %v7403_v24 = vsel %vm613_vm5, %v7342_v8, -inf }
0x3bfa   :  { %7404 = vmax.xlane.f32.xlu0 %v7403_v24 }
0x3c1f   :  { %v12916_v55 = vpop.f32.mrb[188].mxu0 }
0x3c20   :  { %v10665_v50 = vpack.i.bf16 %v12916_v55, %v12906_v10  ;;  %v10405_v22 = vpop.f32.mrb[189].mxu0 }
0x3c21   :  { %v7194_v61 = vpop.f32.mrb[190].mxu0 }
0x3c22   :  { %v10406_v38 = vpop.f32.mrb[191].mxu0 }
0x3c27   :  { %v7291_v44 = vpop.f32.mrb[192].mxu0 }
0x3c28   :  { %v7292_v16 = vadd.f32 %v7291_v44, %v12247_v41  ;;  %v10417_v14 = vpop.f32.mrb[193].mxu0 }
0x3c29   :  { %v7294_v33 = vpop.f32.mrb[194].mxu0 }
0x3c2a   :  { %v10418_v12 = vpop.f32.mrb[195].mxu0  ;;  %v7400_v21 = vsel %vm613_vm5, %v7292_v16, -inf }
0x3c2b   :  { %7401 = vmax.xlane.f32.xlu1 %v7400_v21 }
0x3c2f   :  { %v7391_v30 = vpop.f32.mrb[196].mxu0 }
0x3c30   :  { %v7392_v1 = vadd.f32 %v7391_v30, %v12247_v41  ;;  %v10429_v25 = vpop.f32.mrb[197].mxu0 }
0x3c31   :  { %v7394_v4 = vpop.f32.mrb[198].mxu0 }
0x3c32   :  { %v10430_v27 = vpop.f32.mrb[199].mxu0  ;;  %v7406_v11 = vsel %vm613_vm5, %v7392_v1, -inf }
0x3c33   :  { %7407 = vmax.xlane.f32.xlu0 %v7406_v11 }
0x3c3c   :  { %7493 = vrot.lane.b32.xlu1 %v12737_v40, %s11315_s17 }
0x3c40   :  { %7541 = vrot.lane.b32.xlu1 %v12776_v45, %s11315_s17 }
0x3c44   :  { %7589 = vrot.lane.b32.xlu1 %v12786_v46, %s11315_s17 }
0x3c7f   :  { %v7399_v53 = vpop.xlane.xlu0 %7398 }
0x3c80   :  { %v7409_v60 = vsub.f32 %v7242_v9, %v7399_v53 }
0x3c82   :  { %v7413_v6 = vmul.f32 1.442695, %v7409_v60 }
0x3c84   :  { %11157 = vpow2.f32 %v7413_v6 }
0x3c87   :  { %v7405_v42 = vpop.xlane.xlu0 %7404 }
0x3c88   :  { %v7411_v18 = vsub.f32 %v7342_v8, %v7405_v42 }
0x3c8a   :  { %v7417_v19 = vmul.f32 1.442695, %v7411_v18 }
0x3c8c   :  { %11159 = vpow2.f32 %v7417_v19 }
0x3c8e   :  { %v11158_v51 = vpop.eup %11157 }
0x3c8f   :  { %v7421_v34 = vsel %vm613_vm5, %v11158_v51, 0.0 }
0x3c90   :  { %7422 = vadd.xlane.f32.xlu0 %v7421_v34 }
0x3c96   :  { %v11160_v28 = vpop.eup %11159 }
0x3c97   :  { %v7427_v49 = vsel %vm613_vm5, %v11160_v28, 0.0 }
0x3ca6   :  { %7445 = vrot.lane.b32.xlu0 %v12722_v54, %s11315_s17 }
0x3cb8   :  { %v7402_v52 = vpop.xlane.xlu1 %7401 }
0x3cb9   :  { %v7410_v57 = vsub.f32 %v7292_v16, %v7402_v52 }
0x3cbb   :  { %v7415_v43 = vmul.f32 1.442695, %v7410_v57 }
0x3cbc   :  { %v7494_v37 = vpop.permute.xlu1 %7493 }
0x3cbd   :  { %11161 = vpow2.f32 %v7415_v43  ;;  %v7499_v9 = vsel %vm643_vm3, %v7494_v37, 0 }
0x3cbe   :  { %10438 = vmatpush3.bf16.msra.mxu0 %v7499_v9 }
0x3cbf   :  { %10449 = vmatprep.subr.bf16.mxu0 %v11308_v31 }
0x3cc0   :  { %v7408_v8 = vpop.xlane.xlu0 %7407  ;;  %v7542_v16 = vpop.permute.xlu1 %7541 }
0x3cc1   :  { %v7412_v0 = vsub.f32 %v7392_v1, %v7408_v8 }
0x3cc3   :  { %v7419_v59 = vmul.f32 1.442695, %v7412_v0 }
0x3cc5   :  { %7428 = vadd.xlane.f32.xlu0 %v7427_v49  ;;  %11163 = vpow2.f32 %v7419_v59 }
0x3cc7   :  { %v11162_v29 = vpop.eup %11161 }
0x3cc8   :  { %v7424_v62 = vsel %vm613_vm5, %v11162_v29, 0.0 }
0x3cc9   :  { %7425 = vadd.xlane.f32.xlu1 %v7424_v62 }
0x3ccf   :  { %v11164_v24 = vpop.eup %11163 }
0x3cd0   :  { %v7430_v22 = vsel %vm613_vm5, %v11164_v24, 0.0 }
0x3cda   :  { %7689 = vrot.lane.b32.xlu1 %v12693_v48, %s11316_s21 }
0x3cdb   :  { %7639 = vrot.lane.b32.xlu0 %v12691_v39, %s11316_s21 }
0x3cdf   :  { %7637 = vrot.lane.b32.xlu0 %v12691_v39, %s11317_s28 }
0x3ce3   :  { %7739 = vrot.lane.b32.xlu0 %v12702_v15, %s11316_s21 }
0x3ce7   :  { %7737 = vrot.lane.b32.xlu0 %v12702_v15, %s11317_s28 }
0x3cfe   :  { %7431 = vadd.xlane.f32.xlu1 %v7430_v22 }
0x3d0f   :  { %7687 = vrot.lane.b32.xlu1 %v12693_v48, %s11317_s28  ;;  %v7547_v48 = vsel %vm643_vm3, %v7542_v16, 0 }
0x3d13   :  { %7789 = vrot.lane.b32.xlu1 %v12708_v63, %s11316_s21 }
0x3d17   :  { %7787 = vrot.lane.b32.xlu1 %v12708_v63, %s11317_s28  ;;  %v7590_v63 = vpop.permute.xlu1 %7589 }
0x3d18   :  { %v7595_v6 = vsel %vm643_vm3, %v7590_v63, 0 }
0x3d1d   :  { %v7423_v39 = vpop.xlane.xlu0 %7422 }
0x3d1e   :  { %11165 = vrcp.f32 %v7423_v39 }
0x3d21   :  { %v7446_v61 = vpop.permute.xlu0 %7445 }
0x3d22   :  { %v7451_v15 = vsel %vm643_vm3, %v7446_v61, 0 }
0x3d23   :  { %10432 = vmatpush3.bf16.msra.mxu1 %v7451_v15 }
0x3d24   :  { %10443 = vmatprep.subr.bf16.mxu1 %v11308_v31 }
0x3d28   :  { %v11166_v38 = vpop.eup %11165 }
0x3d29   :  { %v7437_v44 = vmul.f32 %v11166_v38, %v11158_v51 }
0x3d2b   :  { %v7441_v14 = vpack.c.bf16 %v7437_v44, %v7437_v44 }
0x3d2d   :  { %10434 = vmatmul.mubr.msk.bf16.vlgmr.msra.gmra.mrb[212].mxu1 %vm613_vm5, %v7441_v14 }
0x3d2e   :  { %10444 = vmatpush3.bf16.msra.mxu1 %v7547_v48  ;;  %10445 = vmatprep.mubr.msk.bf16.mxu1 %vm11309_vm1, %v11308_v31 }
0x3d2f   :  { %10455 = vmatprep.subr.bf16.mxu1 %v11308_v31 }
0x3d52   :  { %v7429_v33 = vpop.xlane.xlu0 %7428 }
0x3d53   :  { %11167 = vrcp.f32 %v7429_v33 }
0x3d56   :  { %v7426_v12 = vpop.xlane.xlu1 %7425  ;;  %v7640_v21 = vpop.permute.xlu0 %7639 }
0x3d57   :  { %11169 = vrcp.f32 %v7426_v12  ;;  %v7645_v53 = vsel %vm517_vm2, %v7640_v21, 0 }
0x3d5a   :  { %v7638_v27 = vpop.permute.xlu0 %7637  ;;  %v7690_v18 = vpop.permute.xlu1 %7689 }
0x3d5b   :  { %v7695_v9 = vsel %vm517_vm2, %v7690_v18, 0 }
0x3d5d   :  { %v11168_v30 = vpop.eup %11167 }
0x3d5e   :  { %v7439_v1 = vmul.f32 %v11168_v30, %v11160_v28  ;;  %v7740_v51 = vpop.permute.xlu0 %7739 }
0x3d5f   :  { %v7745_v34 = vsel %vm517_vm2, %v7740_v51, 0 }
0x3d60   :  { %v7443_v25 = vpack.c.bf16 %v7439_v1, %v7439_v1 }
0x3d61   :  { %v11170_v4 = vpop.eup %11169 }
0x3d62   :  { %v7438_v11 = vmul.f32 %v11170_v4, %v11162_v29  ;;  %10446 = vmatmul.mubr.msk.bf16.vlgmr.msra.gmra.mrb[216].mxu1 %vm613_vm5, %v7443_v25  ;;  %v7738_v42 = vpop.permute.xlu0 %7737 }
0x3d63   :  { %10456 = vmatpush3.bf16.xpose.msra.mxu1 %v7645_v53  ;;  %10457 = vmatprep.mubr.msk.bf16.mxu1 %vm11309_vm1, %v11308_v31 }
0x3d64   :  { %v7442_v60 = vpack.c.bf16 %v7438_v11, %v7438_v11  ;;  %10467 = vmatprep.subr.bf16.mxu1 %v11308_v31 }
0x3d66   :  { %10440 = vmatmul.mubr.msk.bf16.vlgmr.msra.gmra.mrb[200].mxu0 %vm613_vm5, %v7442_v60 }
0x3d67   :  { %10450 = vmatpush3.bf16.msra.mxu0 %v7595_v6  ;;  %10451 = vmatprep.mubr.msk.bf16.mxu0 %vm11309_vm1, %v11308_v31 }
0x3d68   :  { %10461 = vmatprep.subr.bf16.mxu0 %v11308_v31 }
0x3d6a   :  { %10458 = vmatmul.mubr.msk.bf16.vlgmr.msra.gmra.mrb[220].mxu1 %vm517_vm2, %v7638_v27 }
0x3d6b   :  { %10468 = vmatpush3.bf16.xpose.msra.mxu1 %v7745_v34  ;;  %10469 = vmatprep.mubr.msk.bf16.mxu1 %vm11309_vm1, %v11308_v31 }
0x3d6c   :  { %10479 = vmatprep.subr.bf16.mxu1 %v11308_v31 }
0x3d72   :  { %10470 = vmatmul.mubr.msk.bf16.vlgmr.msra.gmra.mrb[224].mxu1 %vm517_vm2, %v7738_v42 }
0x3d73   :  { %10481 = vmatprep.mubr.msk.bf16.mxu1 %vm11309_vm1, %v11308_v31 }
0x3d8b   :  { %v7432_v19 = vpop.xlane.xlu1 %7431 }
0x3d8c   :  { %11171 = vrcp.f32 %v7432_v19 }
0x3d8f   :  { %v7688_v37 = vpop.permute.xlu1 %7687 }
0x3d93   :  { %v7790_v28 = vpop.permute.xlu1 %7789 }
0x3d94   :  { %v7795_v49 = vsel %vm517_vm2, %v7790_v28, 0 }
0x3d96   :  { %v11172_v52 = vpop.eup %11171 }
0x3d97   :  { %v7440_v57 = vmul.f32 %v11172_v52, %v11164_v24  ;;  %v7788_v29 = vpop.permute.xlu1 %7787 }
0x3d99   :  { %v7444_v43 = vpack.c.bf16 %v7440_v57, %v7440_v57 }
0x3d9b   :  { %10452 = vmatmul.mubr.msk.bf16.vlgmr.msra.gmra.mrb[204].mxu0 %vm613_vm5, %v7444_v43 }
0x3d9c   :  { %10462 = vmatpush3.bf16.xpose.msra.mxu0 %v7695_v9  ;;  %10463 = vmatprep.mubr.msk.bf16.mxu0 %vm11309_vm1, %v11308_v31 }
0x3d9d   :  { %10473 = vmatprep.subr.bf16.mxu0 %v11308_v31 }
0x3da3   :  { %10464 = vmatmul.mubr.msk.bf16.vlgmr.msra.gmra.mrb[208].mxu0 %vm517_vm2, %v7688_v37 }
0x3da4   :  { %10474 = vmatpush3.bf16.xpose.msra.mxu0 %v7795_v49  ;;  %10475 = vmatprep.mubr.msk.bf16.mxu0 %vm11309_vm1, %v11308_v31 }
0x3da5   :  { %10485 = vmatprep.subr.bf16.mxu0 %v11308_v31 }
0x3dab   :  { %10476 = vmatmul.mubr.msk.bf16.vlgmr.msra.gmra.mrb[212].mxu0 %vm517_vm2, %v7788_v29 }
0x3dac   :  { %10487 = vmatprep.mubr.msk.bf16.mxu0 %vm11309_vm1, %v11308_v31 }
0x3e00   :  { %v7487_v62 = vpop.f32.mrb[212].mxu1 }
0x3e01   :  { %v10435_v8 = vpop.f32.mrb[213].mxu1 }
0x3e02   :  { %v7490_v0 = vpop.f32.mrb[214].mxu1 }
0x3e03   :  { %v10436_v59 = vpop.f32.mrb[215].mxu1 }
0x3e35   :  { %v12992_v24 = vpop.f32.mrb[216].mxu1 }
0x3e36   :  { %v10447_v22 = vpop.f32.mrb[217].mxu1 }
0x3e37   :  { %v7586_v39 = vpop.f32.mrb[218].mxu1 }
0x3e38   :  { %v10448_v61 = vpop.f32.mrb[219].mxu1 }
0x3e39   :  { %v7535_v15 = vpop.f32.mrb[200].mxu0 }
0x3e3a   :  { %v10670_v38 = vpack.i.bf16 %v7535_v15, %v7487_v62  ;;  %v10441_v44 = vpop.f32.mrb[201].mxu0 }
0x3e3b   :  { %v7538_v16 = vpop.f32.mrb[202].mxu0 }
0x3e3c   :  { %v10442_v14 = vpop.f32.mrb[203].mxu0 }
0x3e3d   :  { %v7681_v48 = vpop.f32.mrb[220].mxu1 }
0x3e3e   :  { %v7682_v63 = vadd.f32 %v7681_v48, %v12247_v41  ;;  %v10459_v33 = vpop.f32.mrb[221].mxu1 }
0x3e3f   :  { %v7684_v12 = vpop.f32.mrb[222].mxu1 }
0x3e40   :  { %v10460_v21 = vpop.f32.mrb[223].mxu1  ;;  %v7837_v30 = vsel %vm613_vm5, %v7682_v63, -inf }
0x3e41   :  { %7838 = vmax.xlane.f32.xlu0 %v7837_v30 }
0x3e45   :  { %v7781_v1 = vpop.f32.mrb[224].mxu1 }
0x3e46   :  { %v7782_v25 = vadd.f32 %v7781_v1, %v12247_v41  ;;  %v10471_v4 = vpop.f32.mrb[225].mxu1 }
0x3e47   :  { %v7784_v27 = vpop.f32.mrb[226].mxu1 }
0x3e48   :  { %v10472_v11 = vpop.f32.mrb[227].mxu1  ;;  %v7843_v53 = vsel %vm613_vm5, %v7782_v25, -inf }
0x3e49   :  { %7844 = vmax.xlane.f32.xlu0 %v7843_v53 }
0x3e6e   :  { %v7631_v60 = vpop.f32.mrb[204].mxu0 }
0x3e6f   :  { %v10675_v6 = vpack.i.bf16 %v7631_v60, %v12992_v24  ;;  %v10453_v51 = vpop.f32.mrb[205].mxu0 }
0x3e70   :  { %v7634_v34 = vpop.f32.mrb[206].mxu0 }
0x3e71   :  { %v10454_v42 = vpop.f32.mrb[207].mxu0 }
0x3e76   :  { %v7731_v18 = vpop.f32.mrb[208].mxu0 }
0x3e77   :  { %v7732_v19 = vadd.f32 %v7731_v18, %v12247_v41  ;;  %v10465_v52 = vpop.f32.mrb[209].mxu0 }
0x3e78   :  { %v7734_v57 = vpop.f32.mrb[210].mxu0 }
0x3e79   :  { %v10466_v43 = vpop.f32.mrb[211].mxu0  ;;  %v7840_v37 = vsel %vm613_vm5, %v7732_v19, -inf }
0x3e7a   :  { %7841 = vmax.xlane.f32.xlu1 %v7840_v37 }
0x3e7e   :  { %v7831_v9 = vpop.f32.mrb[212].mxu0 }
0x3e7f   :  { %v7832_v28 = vadd.f32 %v7831_v9, %v12247_v41  ;;  %v10477_v49 = vpop.f32.mrb[213].mxu0 }
0x3e80   :  { %v7834_v29 = vpop.f32.mrb[214].mxu0 }
0x3e81   :  { %v10478_v62 = vpop.f32.mrb[215].mxu0  ;;  %v7846_v8 = vsel %vm613_vm5, %v7832_v28, -inf  ;;  %v10851_v29 = vld [vmem:[%s13226_s27 + $0x20] sm:$0xff]  }
0x3e82   :  { %7847 = vmax.xlane.f32.xlu0 %v7846_v8  ;;  %v10852_v62 = vld [vmem:[%s13226_s27 + $0x28] sm:$0xff]  }
0x3ece   :  { %v7839_v0 = vpop.xlane.xlu0 %7838 }
0x3ecf   :  { %v7849_v59 = vsub.f32 %v7682_v63, %v7839_v0 }
0x3ed1   :  { %v7853_v24 = vmul.f32 1.442695, %v7849_v59 }
0x3ed3   :  { %11173 = vpow2.f32 %v7853_v24  ;;  %v10853_v24 = vld [vmem:[%s13226_s27 + $0x30] sm:$0xff]  }
0x3ed6   :  { %v7845_v22 = vpop.xlane.xlu0 %7844 }
0x3ed7   :  { %v7851_v39 = vsub.f32 %v7782_v25, %v7845_v22 }
0x3ed9   :  { %v7857_v61 = vmul.f32 1.442695, %v7851_v39 }
0x3edb   :  { %11175 = vpow2.f32 %v7857_v61 }
0x3edd   :  { %v11174_v15 = vpop.eup %11173 }
0x3ede   :  { %v7861_v44 = vsel %vm613_vm5, %v11174_v15, 0.0 }
0x3edf   :  { %7862 = vadd.xlane.f32.xlu0 %v7861_v44 }
0x3ee5   :  { %v11176_v16 = vpop.eup %11175 }
0x3ee6   :  { %v7867_v41 = vsel %vm613_vm5, %v11176_v16, 0.0 }
0x3ee7   :  { %7868 = vadd.xlane.f32.xlu0 %v7867_v41  ;;  %v10854_v41 = vld [vmem:[%s13226_s27 + $0x38] sm:$0xff]  }
0x3efd   :  { %7885 = vrot.lane.b32.xlu0 %v12722_v54, %s11317_s28 }
0x3f01   :  { %10661 = vrot.lane.b32.xlu0 %v10660_v17, %s11316_s21 }
0x3f05   :  { %10671 = vrot.lane.b32.xlu0 %v10670_v38, %s11314_s13 }
0x3f07   :  { %v7842_v14 = vpop.xlane.xlu1 %7841 }
0x3f08   :  { %v7850_v48 = vsub.f32 %v7732_v19, %v7842_v14 }
0x3f0a   :  { %v7855_v63 = vmul.f32 1.442695, %v7850_v48 }
0x3f0c   :  { %11177 = vpow2.f32 %v7855_v63 }
0x3f0f   :  { %v7848_v54 = vpop.xlane.xlu0 %7847 }
0x3f10   :  { %v7852_v21 = vsub.f32 %v7832_v28, %v7848_v54 }
0x3f12   :  { %v7859_v7 = vmul.f32 1.442695, %v7852_v21 }
0x3f14   :  { %11179 = vpow2.f32 %v7859_v7 }
0x3f16   :  { %v11178_v33 = vpop.eup %11177 }
0x3f17   :  { %v7864_v12 = vsel %vm613_vm5, %v11178_v33, 0.0 }
0x3f18   :  { %7865 = vadd.xlane.f32.xlu1 %v7864_v12 }
0x3f1e   :  { %v11180_v47 = vpop.eup %11179 }
0x3f1f   :  { %v7870_v17 = vsel %vm613_vm5, %v11180_v47, 0.0 }
0x3f29   :  { %7933 = vrot.lane.b32.xlu1 %v12737_v40, %s11317_s28 }
0x3f2d   :  { %7981 = vrot.lane.b32.xlu1 %v12776_v45, %s11317_s28 }
0x3f51   :  { %7871 = vadd.xlane.f32.xlu1 %v7870_v17 }
0x3f62   :  { %8029 = vrot.lane.b32.xlu1 %v12786_v46, %s11317_s28 }
0x3f66   :  { %10666 = vrot.lane.b32.xlu1 %v10665_v50, %s11316_s21 }
0x3f6a   :  { %10676 = vrot.lane.b32.xlu1 %v10675_v6, %s11314_s13 }
0x3f6c   :  { %v7863_v40 = vpop.xlane.xlu0 %7862 }
0x3f6d   :  { %11181 = vrcp.f32 %v7863_v40 }
0x3f74   :  { %v7869_v45 = vpop.xlane.xlu0 %7868 }
0x3f75   :  { %11183 = vrcp.f32 %v7869_v45 }
0x3f77   :  { %v11182_v38 = vpop.eup %11181 }
0x3f78   :  { %v7877_v30 = vmul.f32 %v11182_v38, %v11174_v15  ;;  %v7886_v1 = vpop.permute.xlu0 %7885 }
0x3f79   :  { %v7891_v25 = vsel %vm643_vm3, %v7886_v1, 0 }
0x3f7a   :  { %10480 = vmatpush3.bf16.msra.mxu1 %v7891_v25  ;;  %v7881_v4 = vpack.c.bf16 %v7877_v30, %v7877_v30 }
0x3f7b   :  { %10491 = vmatprep.subr.bf16.mxu1 %v11308_v31 }
0x3f7c   :  { %v10662_v54 = vpop.permute.xlu0 %10661 }
0x3f7d   :  { %10482 = vmatmul.mubr.msk.bf16.vlgmr.msra.gmra.mrb[228].mxu1 %vm613_vm5, %v7881_v4  ;;  %v10664_v7 = vunpack.i.h.bf16 %v10662_v54 }
0x3f7e   :  { %10493 = vmatprep.mubr.msk.bf16.mxu1 %vm11309_vm1, %v11308_v31 }
0x3f7f   :  { %v11184_v10 = vpop.eup %11183  ;;  %v8126_v38 = vsel %vm517_vm2, %v12824_v3, %v10664_v7 }
0x3f80   :  { %v7879_v27 = vmul.f32 %v11184_v10, %v11176_v16  ;;  %v10672_v21 = vpop.permute.xlu0 %10671 }
0x3f81   :  { %v10674_v17 = vunpack.i.h.bf16 %v10672_v21  ;;  %v10673_v40 = vunpack.i.l.bf16 %v10672_v21 }
0x3f82   :  { %v7883_v6 = vpack.c.bf16 %v7879_v27, %v7879_v27 }
0x3fa5   :  { %v7866_v46 = vpop.xlane.xlu1 %7865 }
0x3fa6   :  { %11185 = vrcp.f32 %v7866_v46  ;;  %v8130_v46 = vsel %vm1421_vm6, %v8126_v38, %v10674_v17 }
0x3fa9   :  { %v7934_v55 = vpop.permute.xlu1 %7933 }
0x3faa   :  { %v7939_v50 = vsel %vm643_vm3, %v7934_v55, 0 }
0x3fab   :  { %10486 = vmatpush3.bf16.msra.mxu0 %v7939_v50 }
0x3fac   :  { %10497 = vmatprep.subr.bf16.mxu0 %v11308_v31 }
0x3fad   :  { %v7982_v11 = vpop.permute.xlu1 %7981 }
0x3fae   :  { %v7987_v53 = vsel %vm643_vm3, %v7982_v11, 0 }
0x3faf   :  { %10492 = vmatpush3.bf16.msra.mxu1 %v7987_v53 }
0x3fb0   :  { %v11186_v60 = vpop.eup %11185  ;;  %10503 = vmatprep.subr.bf16.mxu1 %v10851_v29 }
0x3fb1   :  { %v7878_v51 = vmul.f32 %v11186_v60, %v11178_v33 }
0x3fb2   :  { %10494 = vmatmul.mubr.msk.bf16.vlgmr.msra.gmra.mrb[232].mxu1 %vm613_vm5, %v7883_v6 }
0x3fb3   :  { %v7882_v34 = vpack.c.bf16 %v7878_v51, %v7878_v51  ;;  %10504 = vmatpush3.bf16.msra.mxu1 %v10851_v29 }
0x3fb4   :  { %10505 = vmatprep.subr.bf16.mxu1 %v10852_v62 }
0x3fb5   :  { %10488 = vmatmul.mubr.msk.bf16.vlgmr.msra.gmra.mrb[216].mxu0 %vm613_vm5, %v7882_v34 }
0x3fb6   :  { %10499 = vmatprep.mubr.msk.bf16.mxu0 %vm11309_vm1, %v11308_v31 }
0x3fb7   :  { %10506 = vmatpush3.bf16.msra.mxu1 %v10852_v62 }
0x3fb8   :  { %10507 = vmatprep.subr.bf16.mxu1 %v10853_v24 }
0x3fbb   :  { %10508 = vmatpush3.bf16.msra.mxu1 %v10853_v24 }
0x3fbc   :  { %10509 = vmatprep.subr.bf16.mxu1 %v10854_v41 }
0x3fbf   :  { %10510 = vmatpush3.bf16.msra.mxu1 %v10854_v41 }
0x3fde   :  { %v7872_v42 = vpop.xlane.xlu1 %7871 }
0x3fdf   :  { %11187 = vrcp.f32 %v7872_v42 }
0x3fe2   :  { %v8030_v18 = vpop.permute.xlu1 %8029 }
0x3fe3   :  { %v8035_v19 = vsel %vm643_vm3, %v8030_v18, 0 }
0x3fe4   :  { %10498 = vmatpush3.bf16.msra.mxu0 %v8035_v19 }
0x3fe6   :  { %v10667_v27 = vpop.permute.xlu1 %10666 }
0x3fe7   :  { %v10669_v53 = vunpack.i.h.bf16 %v10667_v27  ;;  %v10668_v3 = vunpack.i.l.bf16 %v10667_v27  ;;  %v10866_v27 = vld [vmem:[%s13228_s20 + $0x74] ss:$8 sps:$4 sm:$0xff]  }
0x3fe9   :  { %v11188_v52 = vpop.eup %11187  ;;  %v8128_v51 = vsel %vm517_vm2, %v12830_v20, %v10669_v53  ;;  %v8127_v34 = vsel %vm517_vm2, %v12822_v56, %v10668_v3 }
0x3fea   :  { %v7880_v57 = vmul.f32 %v11188_v52, %v11180_v47  ;;  %v10663_v47 = vunpack.i.l.bf16 %v10662_v54  ;;  %v10677_v11 = vpop.permute.xlu1 %10676 }
0x3feb   :  { %v10679_v60 = vunpack.i.h.bf16 %v10677_v11 }
0x3fec   :  { %v7884_v43 = vpack.c.bf16 %v7880_v57, %v7880_v57  ;;  %v8125_v30 = vsel %vm517_vm2, %v12820_v36, %v10663_v47  ;;  %v10678_v36 = vunpack.i.l.bf16 %v10677_v11  ;;  %v10864_v11 = vld [vmem:[%s13228_s20 + $0x70] ss:$8 sps:$4 sm:$0xff]  }
0x3fed   :  { %v8129_v4 = vsel %vm1421_vm6, %v8125_v30, %v10673_v40  ;;  %v8132_v52 = vsel %vm1421_vm6, %v8128_v51, %v10679_v60 }
0x3fee   :  { %10500 = vmatmul.mubr.msk.bf16.vlgmr.msra.gmra.mrb[220].mxu0 %vm613_vm5, %v7884_v43  ;;  %v8131_v19 = vsel %vm1421_vm6, %v8127_v34, %v10678_v36 }
0x3fef   :  { %8421 = vmatprep.mubr.bf16.mxu0 %v11307_v2 }
0x4050   :  { %v7927_v37 = vpop.f32.mrb[228].mxu1 }
0x4051   :  { %v10483_v9 = vpop.f32.mrb[229].mxu1 }
0x4052   :  { %v7930_v28 = vpop.f32.mrb[230].mxu1 }
0x4053   :  { %v10484_v49 = vpop.f32.mrb[231].mxu1  ;;  %v9455_v28 = vld [vmem:[%s13227_s26 + $0x1] ss:$0 sm:$0xff] }
0x4085   :  { %v8023_v8 = vpop.f32.mrb[232].mxu1 }
0x4086   :  { %v10495_v0 = vpop.f32.mrb[233].mxu1 }
0x4087   :  { %v8026_v59 = vpop.f32.mrb[234].mxu1 }
0x4088   :  { %v7975_v22 = vpop.f32.mrb[216].mxu0  ;;  %v10496_v39 = vpop.f32.mrb[235].mxu1 }
0x4089   :  { %v10680_v61 = vpack.i.bf16 %v7975_v22, %v7927_v37  ;;  %v10489_v15 = vpop.f32.mrb[217].mxu0 }
0x408a   :  { %v7978_v44 = vpop.f32.mrb[218].mxu0 }
0x408b   :  { %10681 = vrot.lane.b32.xlu0 %v10680_v61, %s11312_s5  ;;  %v10490_v16 = vpop.f32.mrb[219].mxu0 }
0x40c1   :  { %v8071_v14 = vpop.f32.mrb[220].mxu0 }
0x40c2   :  { %v10685_v48 = vpack.i.bf16 %v8071_v14, %v8023_v8  ;;  %v10501_v63 = vpop.f32.mrb[221].mxu0 }
0x40c3   :  { %v8074_v33 = vpop.f32.mrb[222].mxu0 }
0x40c4   :  { %10686 = vrot.lane.b32.xlu1 %v10685_v48, %s11312_s5  ;;  %v10502_v12 = vpop.f32.mrb[223].mxu0 }
0x40fd   :  { %v10682_v45 = vpop.permute.xlu0 %10681 }
0x40fe   :  { %v10684_v1 = vunpack.i.h.bf16 %v10682_v45  ;;  %v10683_v25 = vunpack.i.l.bf16 %v10682_v45 }
0x4100   :  { %v8134_v10 = vsel %vm1424_vm7, %v8130_v46, %v10684_v1  ;;  %v8133_v55 = vsel %vm1424_vm7, %v8129_v4, %v10683_v25  ;;  %v10857_v25 = vld [vmem:[%s13228_s20 + $0x44] ss:$8 sps:$4 sm:$0xff]   ;;  %v10855_v4 = vld [vmem:[%s13228_s20 + $0x40] ss:$8 sps:$4 sm:$0xff]   ;;  %v10860_v46 = vld [vmem:[%s13228_s20 + $0x54] ss:$8 sps:$4 sm:$0xff]  }
0x4101   :  { %v8137_v50 = vpack.c.bf16 %v8134_v10, %v8133_v55  ;;  %8389 = vmatprep.subr.bf16.mxu0 %v10857_v25  ;;  %v10858_v10 = vld [vmem:[%s13228_s20 + $0x50] ss:$8 sps:$4 sm:$0xff]   ;;  %v10863_v55 = vld [vmem:[%s13228_s20 + $0x64] ss:$8 sps:$4 sm:$0xff]   ;;  %v9468_v25 = vld [vmem:[%s11501_s22 + $0x2] sm:$0x3] }
0x4102   :  { %8390 = vmatpush1.bf16.msra.mxu0 %v10855_v4  ;;  %v8336_v4 = vrot.slane %v9468_v25, %v11584_v32  ;;  %s13234_s22 = sld [smem:[#allocation16_spill]] }
0x4103   :  { %10511 = vmatprep.mubr.msk.bf16.mxu1 %vm264_vm0, %v8137_v50  ;;  %8391 = vmatprep.subr.bf16.mxu0 %v10860_v46  ;;  %v10861_v50 = vld [vmem:[%s13228_s20 + $0x60] ss:$8 sps:$4 sm:$0xff]   ;;  %v8340_v46 = vrot.slane %v9468_v25, %v11593_v35 }
0x4106   :  { %8392 = vmatpush1.bf16.msra.mxu0 %v10858_v10 }
0x4107   :  { %8393 = vmatprep.subr.bf16.mxu0 %v10863_v55 }
0x410a   :  { %8394 = vmatpush1.bf16.msra.mxu0 %v10861_v50 }
0x410b   :  { %8395 = vmatprep.subr.bf16.mxu0 %v10866_v27 }
0x410e   :  { %8396 = vmatpush1.bf16.msra.mxu0 %v10864_v11 }
0x4136   :  { %v10687_v6 = vpop.permute.xlu1 %10686 }
0x4137   :  { %v10689_v42 = vunpack.i.h.bf16 %v10687_v6  ;;  %v10688_v18 = vunpack.i.l.bf16 %v10687_v6 }
0x4139   :  { %v8136_v57 = vsel %vm1424_vm7, %v8132_v52, %v10689_v42  ;;  %v8135_v43 = vsel %vm1424_vm7, %v8131_v19, %v10688_v18 }
0x413a   :  { %v8138_v37 = vpack.c.bf16 %v8136_v57, %v8135_v43 }
0x413c   :  { %10512 = vmatmul.mubr.msk.bf16.vlgmr.msra.gmra.mrb[236].mxu1 %vm264_vm0, %v8138_v37  ;;  %v9458_v37 = vld [vmem:[%s13229_s1 + $0x1] ss:$0 sm:$0xff] }
0x420f   :  { %v10513_v9 = vpop.f32.mrb[236].mxu1 }
0x4210   :  { %v8212_v49 = vpop.f32.mrb[237].mxu1  ;;  %v8229_v20 = vadd.f32 %v10513_v9, %v12656_v23 }
0x4211   :  { %v8227_v56 = vadd.f32 %v8212_v49, %v12646_v5  ;;  %v10514_v29 = vpop.f32.mrb[238].mxu1 }
0x4212   :  { %v8215_v62 = vpop.f32.mrb[239].mxu1  ;;  %v13070_v59 = vadd.f32 %v9455_v28, %v8229_v20  ;;  %v8230_v24 = vadd.f32 %v10514_v29, %v12659_v26  ;;  %v9459_v29 = vld [vmem:[%s13230_s2 + $0x1] ss:$0 sm:$0xff] }
0x4213   :  { %v13067_v8 = vadd.f32 %v9455_v28, %v8227_v56  ;;  %v8228_v0 = vadd.f32 %v8215_v62, %v12649_v13 }
0x4214   :  { %v13079_v5 = vadd.f32 %v9455_v28, %v8230_v24  ;;  %v8253_v61 = vsel %vm264_vm0, %v13070_v59, 0.0 }
0x4215   :  { %v13073_v22 = vadd.f32 %v9455_v28, %v8228_v0  ;;  %v8247_v39 = vsel %vm264_vm0, %v13067_v8, 0.0 }
0x4216   :  { %8248 = vadd.xlane.f32.xlu0 %v8247_v39  ;;  %v8256_v13 = vsel %vm264_vm0, %v13079_v5, 0.0 }
0x4217   :  { %v8250_v23 = vsel %vm264_vm0, %v13073_v22, 0.0 }
0x4218   :  { %8251 = vadd.xlane.f32.xlu1 %v8250_v23 }
0x421a   :  { %8254 = vadd.xlane.f32.xlu0 %v8253_v61 }
0x421e   :  { %8257 = vadd.xlane.f32.xlu0 %v8256_v13 }
0x42a3   :  { %v8249_v26 = vpop.xlane.xlu0 %8248 }
0x42a4   :  { %v8259_v15 = vmul.f32 0.015625, %v8249_v26 }
0x42a5   :  { %v8252_v44 = vpop.xlane.xlu1 %8251 }
0x42a6   :  { %v8263_v16 = vsub.f32 %v13067_v8, %v8259_v15  ;;  %v8260_v41 = vmul.f32 0.015625, %v8252_v44 }
0x42a7   :  { %v8255_v14 = vpop.xlane.xlu0 %8254 }
0x42a8   :  { %v8264_v48 = vsub.f32 %v13073_v22, %v8260_v41  ;;  %v8261_v63 = vmul.f32 0.015625, %v8255_v14  ;;  %v8267_v33 = vmul.f32 %v8263_v16, %v8263_v16  ;;  %v10867_v14 = vld [vmem:[%s11506_s25 + $0xc0] sm:$0xff]  }
0x42a9   :  { %9839 = vmatprep.subr.bf16.mxu1 %v10867_v14 }
0x42aa   :  { %v8265_v12 = vsub.f32 %v13070_v59, %v8261_v63  ;;  %v8271_v54 = vsel %vm264_vm0, %v8267_v33, 0.0  ;;  %v8268_v21 = vmul.f32 %v8264_v48, %v8264_v48  ;;  %v10869_v63 = vld [vmem:[%s11506_s25 + $0xc8] sm:$0xff]  }
0x42ab   :  { %8272 = vadd.xlane.f32.xlu0 %v8271_v54  ;;  %v8258_v7 = vpop.xlane.xlu0 %8257  ;;  %v10870_v33 = vld [vmem:[%s11506_s25 + $0x88] sm:$0xff]   ;;  %v10873_v54 = vld [vmem:[%s11506_s25 + $0xd8] sm:$0xff]  }
0x42ac   :  { %v8262_v47 = vmul.f32 0.015625, %v8258_v7  ;;  %v8274_v17 = vsel %vm264_vm0, %v8268_v21, 0.0  ;;  %v8269_v40 = vmul.f32 %v8265_v12, %v8265_v12  ;;  %v10874_v21 = vld [vmem:[%s11506_s25 + $0x98] sm:$0xff]   ;;  %v10875_v7 = vld [vmem:[%s11506_s25 + $0xe0] sm:$0xff]  }
0x42ad   :  { %8275 = vadd.xlane.f32.xlu1 %v8274_v17  ;;  %v10877_v17 = vld [vmem:[%s11506_s25 + $0xe8] sm:$0xff]  }
0x42ae   :  { %v8266_v45 = vsub.f32 %v13079_v5, %v8262_v47  ;;  %v8277_v38 = vsel %vm264_vm0, %v8269_v40, 0.0  ;;  %v10876_v47 = vld [vmem:[%s11506_s25 + $0xa0] sm:$0xff]   ;;  %v10878_v40 = vld [vmem:[%s11506_s25 + $0xa8] sm:$0xff]  }
0x42af   :  { %8278 = vadd.xlane.f32.xlu0 %v8277_v38  ;;  %v10880_v38 = vld [vmem:[%s11506_s25 + $0xb0] sm:$0xff]  }
0x42b0   :  { %v8270_v30 = vmul.f32 %v8266_v45, %v8266_v45 }
0x42b2   :  { %v8280_v1 = vsel %vm264_vm0, %v8270_v30, 0.0  ;;  %v10881_v30 = vld [vmem:[%s11506_s25 + $0xf8] sm:$0xff]  }
0x42b3   :  { %8281 = vadd.xlane.f32.xlu1 %v8280_v1  ;;  %v10882_v1 = vld [vmem:[%s11506_s25 + $0xb8] sm:$0xff]  }
0x4338   :  { %v8273_v53 = vpop.xlane.xlu0 %8272 }
0x4339   :  { %v8283_v3 = vmul.f32 0.015625, %v8273_v53 }
0x433a   :  { %v8276_v60 = vpop.xlane.xlu1 %8275 }
0x433b   :  { %v8287_v36 = vadd.f32 1e-05, %v8283_v3  ;;  %v8284_v6 = vmul.f32 0.015625, %v8276_v60 }
0x433c   :  { %v8279_v51 = vpop.xlane.xlu0 %8278 }
0x433d   :  { %11189 = vrsqrt.f32 %v8287_v36  ;;  %v8288_v34 = vadd.f32 1e-05, %v8284_v6  ;;  %v8285_v42 = vmul.f32 0.015625, %v8279_v51 }
0x433f   :  { %11191 = vrsqrt.f32 %v8288_v34  ;;  %v8289_v18 = vadd.f32 1e-05, %v8285_v42 }
0x4340   :  { %v8282_v19 = vpop.xlane.xlu1 %8281 }
0x4341   :  { %11193 = vrsqrt.f32 %v8289_v18  ;;  %v8286_v52 = vmul.f32 0.015625, %v8282_v19 }
0x4343   :  { %v8290_v57 = vadd.f32 1e-05, %v8286_v52 }
0x4345   :  { %11195 = vrsqrt.f32 %v8290_v57 }
0x4347   :  { %v11190_v43 = vpop.eup %11189 }
0x4348   :  { %v8295_v9 = vmul.f32 %v11190_v43, %v8263_v16 }
0x4349   :  { %v11192_v28 = vpop.eup %11191 }
0x434a   :  { %v8305_v49 = vmul.f32 %v9458_v37, %v8295_v9  ;;  %v8296_v20 = vmul.f32 %v11192_v28, %v8264_v48  ;;  %v10868_v48 = vld [vmem:[%s11506_s25 + $0x80] sm:$0xff]  }
0x434b   :  { %v11194_v56 = vpop.eup %11193  ;;  %9840 = vmatpush3.bf16.msra.mxu1 %v10868_v48 }
0x434c   :  { %v8306_v62 = vmul.f32 %v9458_v37, %v8296_v20  ;;  %v8297_v0 = vmul.f32 %v11194_v56, %v8265_v12  ;;  %v8315_v24 = vadd.f32 %v9459_v29, %v8305_v49  ;;  %9841 = vmatprep.subr.bf16.mxu1 %v10869_v63  ;;  %v10872_v12 = vld [vmem:[%s11506_s25 + $0x90] sm:$0xff]  }
0x434e   :  { %v8316_v39 = vadd.f32 %v9459_v29, %v8306_v62  ;;  %v8307_v26 = vmul.f32 %v9458_v37, %v8297_v0 }
0x434f   :  { %v11196_v23 = vpop.eup %11195  ;;  %9842 = vmatpush3.bf16.msra.mxu1 %v10870_v33 }
0x4350   :  { %v8298_v61 = vmul.f32 %v11196_v23, %v8266_v45  ;;  %v8319_v13 = vpack.c.bf16 %v8316_v39, %v8315_v24  ;;  %v8317_v16 = vadd.f32 %v9459_v29, %v8307_v26  ;;  %v10879_v45 = vld [vmem:[%s11506_s25 + $0xf0] sm:$0xff]  }
0x4352   :  { %9477 = vmatmul.mubr.msk.bf16.vlgmr.msra.gmra.mrb[224].mxu0 %vm264_vm0, %v8319_v13  ;;  %v8308_v15 = vmul.f32 %v9458_v37, %v8298_v61 }
0x4353   :  { %8431 = vmatprep.mubr.bf16.mxu0 %v11307_v2  ;;  %v10871_v2 = vld [vmem:[%s11506_s25 + $0xd0] sm:$0xff]   ;;  %s13231_s25 = sld [smem:[#allocation14_spill]] }
0x4354   :  { %v8318_v44 = vadd.f32 %v9459_v29, %v8308_v15  ;;  %9843 = vmatprep.subr.bf16.mxu1 %v10871_v2 }
0x4355   :  { %9844 = vmatpush3.bf16.msra.mxu1 %v10872_v12 }
0x4356   :  { %v8320_v41 = vpack.c.bf16 %v8318_v44, %v8317_v16  ;;  %9845 = vmatprep.subr.bf16.mxu1 %v10873_v54 }
0x4359   :  { %9846 = vmatpush3.bf16.msra.mxu1 %v10874_v21 }
0x435a   :  { %9478 = vmatmul.mubr.msk.bf16.gmra.mrb[228].mxu0 %vm264_vm0, %v8320_v41  ;;  %9847 = vmatprep.subr.bf16.mxu1 %v10875_v7 }
0x435b   :  { %10523 = vmatprep.mubr.msk.f32.mxu0 %vm11309_vm1, %v11308_v31 }
0x435d   :  { %9848 = vmatpush3.bf16.msra.mxu1 %v10876_v47 }
0x435e   :  { %9849 = vmatprep.subr.bf16.mxu1 %v10877_v17 }
0x4361   :  { %9850 = vmatpush3.bf16.msra.mxu1 %v10878_v40 }
0x4362   :  { %9851 = vmatprep.subr.bf16.mxu1 %v10879_v45 }
0x4365   :  { %9852 = vmatpush3.bf16.msra.mxu1 %v10880_v38 }
0x4366   :  { %9853 = vmatprep.subr.bf16.mxu1 %v10881_v30 }
0x4369   :  { %9854 = vmatpush3.bf16.msra.mxu1 %v10882_v1 }
0x4425   :  { %v8423_v10 = vpop.f32.mrb[224].mxu0 }
0x4426   :  { %v13127_v55 = vadd.f32 %v8423_v10, %v8336_v4  ;;  %v8425_v50 = vpop.f32.mrb[225].mxu0 }
0x4427   :  { %v13129_v27 = vadd.f32 %v8425_v50, %v8340_v46  ;;  %v8427_v11 = vpop.f32.mrb[226].mxu0 }
0x4428   :  { %v9479_v53 = vmul.f32 -1.702, %v13127_v55  ;;  %v13132_v3 = vadd.f32 %v8427_v11, %v8336_v4  ;;  %v8429_v60 = vpop.f32.mrb[227].mxu0 }
0x4429   :  { %v9480_v36 = vmul.f32 -1.702, %v13129_v27  ;;  %v8430_v6 = vadd.f32 %v8429_v60, %v8340_v46 }
0x442a   :  { %v8458_v51 = vmul.f32 1.442695, %v9479_v53  ;;  %v9481_v32 = vmul.f32 -1.702, %v13132_v3 }
0x442b   :  { %v8460_v34 = vmul.f32 1.442695, %v9480_v36  ;;  %v9482_v35 = vmul.f32 -1.702, %v8430_v6 }
0x442c   :  { %11197 = vpow2.f32 %v8458_v51  ;;  %v8462_v42 = vmul.f32 1.442695, %v9481_v32 }
0x442d   :  { %11199 = vpow2.f32 %v8460_v34  ;;  %v8464_v18 = vmul.f32 1.442695, %v9482_v35  ;;  %v8433_v19 = vpop.f32.mrb[228].mxu0 }
0x442e   :  { %11201 = vpow2.f32 %v8462_v42  ;;  %v8434_v52 = vadd.f32 %v8433_v19, %v8336_v4  ;;  %v8435_v57 = vpop.f32.mrb[229].mxu0 }
0x442f   :  { %11203 = vpow2.f32 %v8464_v18  ;;  %v8436_v43 = vadd.f32 %v8435_v57, %v8340_v46  ;;  %v8437_v37 = vpop.f32.mrb[230].mxu0 }
0x4430   :  { %v9483_v9 = vmul.f32 -1.702, %v8434_v52  ;;  %v8438_v28 = vadd.f32 %v8437_v37, %v8336_v4  ;;  %v8439_v49 = vpop.f32.mrb[231].mxu0 }
0x4431   :  { %v9484_v20 = vmul.f32 -1.702, %v8436_v43  ;;  %v8440_v56 = vadd.f32 %v8439_v49, %v8340_v46 }
0x4432   :  { %v8466_v29 = vmul.f32 1.442695, %v9483_v9  ;;  %v9485_v62 = vmul.f32 -1.702, %v8438_v28 }
0x4433   :  { %v8468_v0 = vmul.f32 1.442695, %v9484_v20  ;;  %v9486_v24 = vmul.f32 -1.702, %v8440_v56 }
0x4434   :  { %11205 = vpow2.f32 %v8466_v29  ;;  %v8470_v39 = vmul.f32 1.442695, %v9485_v62 }
0x4435   :  { %11207 = vpow2.f32 %v8468_v0  ;;  %v8472_v23 = vmul.f32 1.442695, %v9486_v24 }
0x4436   :  { %v11198_v61 = vpop.eup %11197  ;;  %11209 = vpow2.f32 %v8470_v39 }
0x4437   :  { %v11200_v13 = vpop.eup %11199  ;;  %v8474_v26 = vadd.f32 1.0, %v11198_v61  ;;  %11211 = vpow2.f32 %v8472_v23 }
0x4438   :  { %v11202_v15 = vpop.eup %11201  ;;  %v8475_v44 = vadd.f32 1.0, %v11200_v13 }
0x4439   :  { %v11204_v16 = vpop.eup %11203  ;;  %11213 = vrcp.f32 %v8474_v26  ;;  %v8476_v41 = vadd.f32 1.0, %v11202_v15 }
0x443a   :  { %11215 = vrcp.f32 %v8475_v44  ;;  %v8477_v14 = vadd.f32 1.0, %v11204_v16 }
0x443b   :  { %11217 = vrcp.f32 %v8476_v41 }
0x443c   :  { %11219 = vrcp.f32 %v8477_v14 }
0x443e   :  { %v11206_v48 = vpop.eup %11205 }
0x443f   :  { %v11208_v63 = vpop.eup %11207  ;;  %v8478_v33 = vadd.f32 1.0, %v11206_v48 }
0x4440   :  { %v11210_v2 = vpop.eup %11209  ;;  %v8479_v12 = vadd.f32 1.0, %v11208_v63 }
0x4441   :  { %v11212_v54 = vpop.eup %11211  ;;  %11221 = vrcp.f32 %v8478_v33  ;;  %v8480_v21 = vadd.f32 1.0, %v11210_v2 }
0x4442   :  { %11223 = vrcp.f32 %v8479_v12  ;;  %v8481_v7 = vadd.f32 1.0, %v11212_v54 }
0x4443   :  { %v11214_v47 = vpop.eup %11213  ;;  %11225 = vrcp.f32 %v8480_v21 }
0x4444   :  { %v11216_v17 = vpop.eup %11215  ;;  %11227 = vrcp.f32 %v8481_v7  ;;  %v8498_v38 = vmul.f32 %v11214_v47, %v13127_v55 }
0x4445   :  { %v11218_v40 = vpop.eup %11217  ;;  %v8499_v1 = vmul.f32 %v11216_v17, %v13129_v27  ;;  %v9520_v27 = vld [vmem:[%s11511_s10 + $0x1] ss:$0 sm:$0xff]  ;;  %s13233_s10 = sld [smem:[#allocation17_spill]] }
0x4446   :  { %v11220_v45 = vpop.eup %11219  ;;  %v8500_v30 = vmul.f32 %v11218_v40, %v13132_v3  ;;  %v8924_v40 = vmul.f32 %v12185_v58, %v12185_v58 }
0x4447   :  { %v8501_v25 = vmul.f32 %v11220_v45, %v8430_v6 }
0x4448   :  { %v8506_v4 = vpack.c.bf16 %v8500_v30, %v8498_v38  ;;  %v8926_v38 = vsel %vm8925_vm11, %v8924_v40, 0.0  ;;  %v11318_v30 = vmov 0.0|0.0  }
0x4449   :  { %v8507_v46 = vpack.c.bf16 %v8501_v25, %v8499_v1  ;;  %10543 = vmatprep.subr.bf16.mxu0 %v11318_v30 }
0x444b   :  { %v11222_v10 = vpop.eup %11221  ;;  %8679 = vmatprep.mubr.bf16.mxu1 %v8507_v46 }
0x444c   :  { %v11224_v50 = vpop.eup %11223  ;;  %8680 = vmatmul.mubr.bf16.vlgmr.msra.gmra.mrb[240].mxu1 %v8506_v4  ;;  %v8502_v60 = vmul.f32 %v11222_v10, %v8434_v52 }
0x444d   :  { %v11226_v11 = vpop.eup %11225  ;;  %v8503_v51 = vmul.f32 %v11224_v50, %v8436_v43 }
0x444e   :  { %v11228_v53 = vpop.eup %11227  ;;  %v8504_v36 = vmul.f32 %v11226_v11, %v8438_v28 }
0x444f   :  { %v8505_v32 = vmul.f32 %v11228_v53, %v8440_v56 }
0x4450   :  { %v8508_v34 = vpack.c.bf16 %v8504_v36, %v8502_v60 }
0x4451   :  { %v8509_v55 = vpack.c.bf16 %v8505_v32, %v8503_v51 }
0x4453   :  { %8687 = vmatprep.mubr.bf16.mxu1 %v8509_v55  ;;  %v9537_v55 = vld [vmem:[%s13231_s25] ss:$0 sm:$0xff] }
0x4454   :  { %8688 = vmatmul.mubr.bf16.gmra.mrb[244].mxu1 %v8508_v34 }
0x451f   :  { %v9855_v3 = vpop.f32.mrb[240].mxu1 }
0x4520   :  { %v9856_v6 = vpop.f32.mrb[241].mxu1 }
0x4521   :  { %v9857_v35 = vadd.f32 %v9856_v6, %v9855_v3  ;;  %v9858_v42 = vpop.f32.mrb[242].mxu1 }
0x4522   :  { %v9859_v18 = vpop.f32.mrb[243].mxu1 }
0x4523   :  { %v8682_v19 = vadd.f32 %v9857_v35, %v9520_v27  ;;  %v9860_v57 = vadd.f32 %v9859_v18, %v9858_v42  ;;  %v9538_v42 = vld [vmem:[%s13232_s3] ss:$0 sm:$0xff] }
0x4525   :  { %v8685_v37 = vadd.f32 %v9860_v57, %v9520_v27  ;;  %v8696_v9 = vadd.f32 %v8682_v19, %v13067_v8 }
0x4527   :  { %v9861_v49 = vpop.f32.mrb[244].mxu1  ;;  %v8702_v52 = vsel %vm264_vm0, %v8696_v9, 0.0  ;;  %v8697_v43 = vadd.f32 %v8685_v37, %v13073_v22 }
0x4528   :  { %v9862_v28 = vpop.f32.mrb[245].mxu1  ;;  %8703 = vadd.xlane.f32.xlu0 %v8702_v52 }
0x4529   :  { %v9863_v20 = vadd.f32 %v9862_v28, %v9861_v49  ;;  %v9864_v56 = vpop.f32.mrb[246].mxu1  ;;  %v8705_v29 = vsel %vm264_vm0, %v8697_v43, 0.0 }
0x452a   :  { %v9865_v62 = vpop.f32.mrb[247].mxu1  ;;  %8706 = vadd.xlane.f32.xlu1 %v8705_v29 }
0x452b   :  { %v8690_v0 = vadd.f32 %v9863_v20, %v9520_v27  ;;  %v9866_v24 = vadd.f32 %v9865_v62, %v9864_v56 }
0x452d   :  { %v8693_v39 = vadd.f32 %v9866_v24, %v9520_v27  ;;  %v8698_v23 = vadd.f32 %v8690_v0, %v13070_v59  ;;  %v8774_v0 = vld [vmem:[%s13233_s10] sm:$0xf] }
0x452e   :  { %v10883_v24 = vld [vmem:[%s13234_s22] sm:$0xff]  }
0x452f   :  { %v8708_v8 = vsel %vm264_vm0, %v8698_v23, 0.0  ;;  %v8699_v61 = vadd.f32 %v8693_v39, %v13079_v5  ;;  %v10884_v39 = vld [vmem:[%s13234_s22 + $0x8] sm:$0xff]  }
0x4530   :  { %8709 = vadd.xlane.f32.xlu0 %v8708_v8  ;;  %v10886_v8 = vld [vmem:[%s13234_s22 + $0x18] sm:$0xff]  }
0x4531   :  { %v8711_v22 = vsel %vm264_vm0, %v8699_v61, 0.0 }
0x4532   :  { %8712 = vadd.xlane.f32.xlu1 %v8711_v22 }
0x45b5   :  { %v8704_v13 = vpop.xlane.xlu0 %8703 }
0x45b6   :  { %v8714_v26 = vmul.f32 0.015625, %v8704_v13 }
0x45b7   :  { %v8707_v15 = vpop.xlane.xlu1 %8706 }
0x45b8   :  { %v8718_v44 = vsub.f32 %v8696_v9, %v8714_v26  ;;  %v8715_v16 = vmul.f32 0.015625, %v8707_v15 }
0x45ba   :  { %v8719_v41 = vsub.f32 %v8697_v43, %v8715_v16  ;;  %v8722_v14 = vmul.f32 %v8718_v44, %v8718_v44 }
0x45bc   :  { %v8726_v48 = vsel %vm264_vm0, %v8722_v14, 0.0  ;;  %v8723_v63 = vmul.f32 %v8719_v41, %v8719_v41 }
0x45bd   :  { %8727 = vadd.xlane.f32.xlu0 %v8726_v48  ;;  %v8710_v59 = vpop.xlane.xlu0 %8709  ;;  %v9547_v48 = vld [vmem:[#allocation2] ss:$0 sm:$0xff] }
0x45be   :  { %v8716_v33 = vmul.f32 0.015625, %v8710_v59  ;;  %v8729_v2 = vsel %vm264_vm0, %v8723_v63, 0.0 }
0x45bf   :  { %8730 = vadd.xlane.f32.xlu1 %v8729_v2  ;;  %v8713_v5 = vpop.xlane.xlu1 %8712 }
0x45c0   :  { %v8720_v12 = vsub.f32 %v8698_v23, %v8716_v33  ;;  %v8717_v54 = vmul.f32 0.015625, %v8713_v5  ;;  %v10885_v23 = vld [vmem:[%s13234_s22 + $0x10] sm:$0xff]  }
0x45c2   :  { %v8721_v21 = vsub.f32 %v8699_v61, %v8717_v54  ;;  %v8724_v7 = vmul.f32 %v8720_v12, %v8720_v12 }
0x45c4   :  { %v8732_v47 = vsel %vm264_vm0, %v8724_v7, 0.0  ;;  %v8725_v17 = vmul.f32 %v8721_v21, %v8721_v21 }
0x45c5   :  { %8733 = vadd.xlane.f32.xlu0 %v8732_v47 }
0x45c6   :  { %v8735_v45 = vsel %vm264_vm0, %v8725_v17, 0.0 }
0x45c7   :  { %8736 = vadd.xlane.f32.xlu1 %v8735_v45 }
0x45cb   :  { %8927 = vadd.xlane.f32.xlu1 %v8926_v38 }
0x464a   :  { %v8728_v1 = vpop.xlane.xlu0 %8727 }
0x464b   :  { %v8738_v25 = vmul.f32 0.015625, %v8728_v1 }
0x464c   :  { %v8731_v4 = vpop.xlane.xlu1 %8730 }
0x464d   :  { %v8742_v46 = vadd.f32 1e-05, %v8738_v25  ;;  %v8739_v10 = vmul.f32 0.015625, %v8731_v4 }
0x464f   :  { %11229 = vrsqrt.f32 %v8742_v46  ;;  %v8743_v50 = vadd.f32 1e-05, %v8739_v10 }
0x4651   :  { %11231 = vrsqrt.f32 %v8743_v50 }
0x4652   :  { %v8734_v11 = vpop.xlane.xlu0 %8733 }
0x4653   :  { %v8740_v53 = vmul.f32 0.015625, %v8734_v11 }
0x4654   :  { %v8737_v60 = vpop.xlane.xlu1 %8736 }
0x4655   :  { %v8744_v36 = vadd.f32 1e-05, %v8740_v53  ;;  %v8741_v51 = vmul.f32 0.015625, %v8737_v60 }
0x4657   :  { %11233 = vrsqrt.f32 %v8744_v36  ;;  %v8745_v32 = vadd.f32 1e-05, %v8741_v51 }
0x4658   :  { %v8928_v63 = vpop.xlane.xlu1 %8927 }
0x4659   :  { %v11230_v34 = vpop.eup %11229  ;;  %11235 = vrsqrt.f32 %v8745_v32  ;;  %v8929_v59 = vadd.f32 1e-12, %v8928_v63 }
0x465a   :  { %v8750_v3 = vmul.f32 %v11230_v34, %v8718_v44 }
0x465b   :  { %v11232_v27 = vpop.eup %11231 }
0x465c   :  { %v8751_v6 = vmul.f32 %v11232_v27, %v8719_v41  ;;  %v8760_v35 = vmul.f32 %v9537_v55, %v8750_v3 }
0x465e   :  { %v8761_v18 = vmul.f32 %v9537_v55, %v8751_v6  ;;  %v8770_v19 = vadd.f32 %v9538_v42, %v8760_v35 }
0x4660   :  { %v8771_v57 = vadd.f32 %v9538_v42, %v8761_v18 }
0x4661   :  { %v11234_v37 = vpop.eup %11233 }
0x4662   :  { %v8752_v9 = vmul.f32 %v11234_v37, %v8720_v12  ;;  %v10544_v49 = vpack.c.bf16 %v8771_v57, %v8770_v19 }
0x4663   :  { %v11236_v52 = vpop.eup %11235 }
0x4664   :  { %v8753_v43 = vmul.f32 %v11236_v52, %v8721_v21  ;;  %10545 = vmatpush3.bf16.msra.mxu0 %v10544_v49  ;;  %v8762_v28 = vmul.f32 %v9537_v55, %v8752_v9 }
0x4665   :  { %10546 = vmatprep.subr.bf16.mxu0 %v11318_v30 }
0x4666   :  { %v8763_v20 = vmul.f32 %v9537_v55, %v8753_v43  ;;  %v8772_v56 = vadd.f32 %v9538_v42, %v8762_v28 }
0x4668   :  { %v8773_v29 = vadd.f32 %v9538_v42, %v8763_v20 }
0x466a   :  { %v10547_v62 = vpack.c.bf16 %v8773_v29, %v8772_v56 }
0x466c   :  { %10548 = vmatpush3.bf16.msra.mxu0 %v10547_v62 }
0x466d   :  { %10526 = vmatprep.subr.bf16.mxu0 %v11308_v31 }
0x466f   :  { %10524 = vmatmul.mubr.msk.f32.vlgmr.msra.gmra.mrb[232].mxu0 %vm1421_vm6, %v8774_v0 }
0x4670   :  { %10527 = vmatpush3.bf16.msra.mxu0 %v10883_v24  ;;  %10534 = vmatprep.mubr.msk.bf16.mxu0 %vm11309_vm1, %v11308_v31 }
0x4671   :  { %10528 = vmatprep.subr.bf16.mxu0 %v11308_v31 }
0x4674   :  { %10529 = vmatpush3.bf16.msra.mxu0 %v10884_v39 }
0x4675   :  { %10530 = vmatprep.subr.bf16.mxu0 %v11308_v31 }
0x4678   :  { %10531 = vmatpush3.bf16.msra.mxu0 %v10885_v23 }
0x4679   :  { %10532 = vmatprep.subr.bf16.mxu0 %v11308_v31 }
0x467c   :  { %10533 = vmatpush3.bf16.msra.mxu0 %v10886_v8 }
0x467d   :  { %10538 = vmatprep.subr.mxu0 %v11308_v31 }
0x4742   :  { %v8844_v61 = vpop.f32.mrb[232].mxu0 }
0x4743   :  { %v8848_v22 = vpack.c.bf16 %v8844_v61, %v8844_v61  ;;  %v10525_v13 = vpop.f32.mrb[233].mxu0 }
0x4745   :  { %10535 = vmatmul.mubr.msk.bf16.vlgmr.msra.gmra.mrb[236].mxu0 %vm264_vm0, %v8848_v22 }
0x4746   :  { %10540 = vmatprep.mubr.msk.f32.mxu0 %vm11309_vm1, %v11308_v31 }
0x4818   :  { %v8918_v26 = vpop.f32.mrb[236].mxu0 }
0x4819   :  { %v8932_v15 = vmul.f32 %v8918_v26, %v8918_v26  ;;  %v10536_v44 = vpop.f32.mrb[237].mxu0 }
0x481a   :  { %v8921_v16 = vpop.f32.mrb[238].mxu0 }
0x481b   :  { %v8934_v41 = vsel %vm8933_vm12, %v8932_v15, 0.0  ;;  %v10537_v14 = vpop.f32.mrb[239].mxu0 }
0x481c   :  { %8935 = vadd.xlane.f32.xlu0 %v8934_v41 }
0x4832   :  { %9023 = vperm.xlu0 %10690, %v9547_v48  }
0x48a9   :  { %v8936_v33 = vpop.xlane.xlu0 %8935 }
0x48aa   :  { %v8937_v2 = vadd.f32 1e-12, %v8936_v33 }
0x48ac   :  { %11237 = vrsqrt.f32 %v8937_v2 }
0x48ad   :  { %11239 = vrsqrt.f32 %v8929_v59 }
0x48b1   :  { %v9024_v21 = vpop.permute.xlu0 %9023 }
0x48b6   :  { %v11238_v5 = vpop.eup %11237 }
0x48b7   :  { %v11240_v12 = vpop.eup %11239  ;;  %v8939_v54 = vmul.f32 %v11238_v5, %v8918_v26 }
0x48b8   :  { %v8931_v31 = vmul.f32 %v11240_v12, %v12185_v58 }
0x48b9   :  { %10539 = vmatpush3.xpose.msk.msra.mxu0 %vm1421_vm6, %v8939_v54 }
0x48bc   :  { %10541 = vmatmul.mubr.msk.f32.vlgmr.msra.gmra.mrb[234].mxu0 %vm1421_vm6, %v8931_v31 }
0x498f   :  { %v9012_v7 = vpop.f32.mrb[234].mxu0 }
0x4990   :  { %v9026_v47 = vmul.f32 %v9024_v21, %v9012_v7  ;;  %v10542_v17 = vpop.f32.mrb[235].mxu0 }
0x4992   :  { %9028 = vst.msk [vmem:[#allocation3] sm:$0x3] %vm9027_vm13, %v9026_v47 }
0x4993   :  { %11256 = shalt.err (!%p11253_p4)
}
0x4994   :  { %s11257_s0 = scalar_lea.hbm %s11516_s16, 32 }
0x4995   :  { %p11258_p5 = scmp.ne.s32.totalorder %s11516_s16, %s11257_s0  ;;  %p11261_p6 = scmp.lt.u32.totalorder %s11257_s0, %s11516_s16 }
0x4997   :  { %p11263_p7 = pnand %p11261_p6, %p11258_p5 }
0x4999   :  { %11266 = shalt.err (!%p11263_p7)
}
0x499a   :  { %9038 = dma.vmem_to_hbm [thread:$0]  %s9036_s7, 32, %s11516_s16, [#allocation4]  }
0x499b   :  { %11267 = dma.done.wait [#allocation4], 32  }
0x499c   :  { %11268 = vsyncadd [#allocation4], 4294967264 }
0x499d   :  { %9042 = vsyncpa [#allocation4], 1 }

</bundles_post_ra>
